<compile_context>
chip_gen: v6e
topology: v6e:2x2x1
jax: 0.10.0
libtpu: 0.0.40
codegen_flags: <defaults>
</compile_context>

<pallas_src>
import jax
import jax.numpy as jnp
from jax import lax
from jax.experimental import pallas as pl
from jax.experimental.pallas import tpu as pltpu


BP = 8       # batch padded to native sublane count
HP = 128     # hidden / feature width padded to native lane count
G3 = 3 * HP  # 3 gates, each in its own 128-lane slab

_VMEM = pl.BlockSpec(memory_space=pltpu.MemorySpace.VMEM)


# ----------------------------------------------------------------------------
# Fused kernel: 4 GRU layers + MLP head
# ----------------------------------------------------------------------------
def fused_rnn_fnn_kernel(x_ref, wih_ref, whh_ref, gib_ref, bhn_ref,
                         w1_ref, b1_ref, w2_ref, b2_ref,
                         out_ref, act_scr, gi_scr, h_scr):
    """
    x_ref:   (T*BP, HP)      padded input sequence (zeros in pad rows/lanes)
    wih_ref: (L, HP, 3*HP)   per-layer padded W_ih^T (gate g in lanes [g*HP, g*HP+H))
    whh_ref: (L, HP, 3*HP)   per-layer padded W_hh^T
    gib_ref: (L, 1, 3*HP)    b_ih + [b_hr, b_hz, 0]  (padded)
    bhn_ref: (L, 1, HP)      b_hn                    (padded)
    w1_ref:  (HP, HP)        padded fc1^T ;  b1_ref: (1, HP)
    w2_ref:  (HP, HP)        padded fc2^T ;  b2_ref: (1, HP)
    out_ref: (T*BP, HP)      padded model output (valid cols = 3)
    act_scr: (T*BP, HP)      resident layer activations
    gi_scr:  (T*BP, 3*HP)    hoisted input-projection for all timesteps
    h_scr:   (BP, HP)        recurrent hidden state
    """
    Bp, H = h_scr.shape
    T = act_scr.shape[0] // Bp
    n_layers = wih_ref.shape[0]

    # Stage the input sequence into the resident activation buffer.
    act_scr[...] = x_ref[...]

    for l in range(n_layers):  # static Python loop over the 4 GRU layers
        # Zero-cost per-layer ref views.
        whh_l = whh_ref.at[l]

        # Hoisted input projection for all T steps at once (one MXU call,
        # M = T*Bp), with b_ih + b_hr/b_hz folded in.
        gi_scr[...] = (
            jnp.dot(act_scr[...], wih_ref[l],
                    preferred_element_type=jnp.float32)
            + gib_ref[l]
        )
        # Hoisted broadcast of the n-gate hidden bias (must stay inside r*(.)).
        bhn = jnp.broadcast_to(bhn_ref[l], (Bp, H))
        h_scr[...] = jnp.zeros_like(h_scr)

        def step(t, carry, whh_l=whh_l, bhn=bhn):
            row = pl.multiple_of(t * Bp, Bp)
            gi_t = gi_scr[pl.ds(row, Bp), :]              # (Bp, 3H), lane-aligned
            h_prev = h_scr[...]
            gh = jnp.dot(h_prev, whh_l[...],
                         preferred_element_type=jnp.float32)
            r = jax.nn.sigmoid(gi_t[:, 0:H] + gh[:, 0:H])
            z = jax.nn.sigmoid(gi_t[:, H:2 * H] + gh[:, H:2 * H])
            n = jnp.tanh(gi_t[:, 2 * H:3 * H] + r * (gh[:, 2 * H:3 * H] + bhn))
            # (1-z)*n + z*h_prev, rewritten with one fewer VPU op.
            h_new = n + z * (h_prev - n)
            h_scr[...] = h_new
            act_scr[pl.ds(row, Bp), :] = h_new
            return carry

        lax.fori_loop(0, T, step, 0, unroll=True)

    # Fused MLP head on the padded, lane-dense activations.
    h1 = jnp.dot(act_scr[...], w1_ref[...],
                 preferred_element_type=jnp.float32) + b1_ref[...]
    h1 = jnp.maximum(h1, 0.0)
    out_ref[...] = (
        jnp.dot(h1, w2_ref[...], preferred_element_type=jnp.float32) + b2_ref[...]
    ).astype(out_ref.dtype)


# ----------------------------------------------------------------------------
# One-time parameter packing (transpose + pad) — done outside the jitted forward
# ----------------------------------------------------------------------------
def _pad_gru_layer(w_ih, w_hh, b_ih, b_hh):
    """PyTorch-layout GRU params -> padded/transposed slabs."""
    H = w_hh.shape[1]
    D = w_ih.shape[1]
    wih_t = w_ih.T  # (D, 3H), gate order [r, z, n]
    whh_t = w_hh.T  # (H, 3H)
    gi_b = b_ih + jnp.concatenate(
        [b_hh[:H], b_hh[H:2 * H], jnp.zeros((H,), jnp.float32)])
    bhn = b_hh[2 * H:3 * H]

    wih_p = jnp.zeros((HP, G3), jnp.float32)
    whh_p = jnp.zeros((HP, G3), jnp.float32)
    gib_p = jnp.zeros((G3,), jnp.float32)
    bhn_p = jnp.zeros((HP,), jnp.float32).at[:H].set(bhn)
    for g in range(3):
        wih_p = wih_p.at[:D, g * HP:g * HP + H].set(wih_t[:, g * H:(g + 1) * H])
        whh_p = whh_p.at[:H, g * HP:g * HP + H].set(whh_t[:, g * H:(g + 1) * H])
        gib_p = gib_p.at[g * HP:g * HP + H].set(gi_b[g * H:(g + 1) * H])
    return wih_p, whh_p, gib_p.reshape(1, G3), bhn_p.reshape(1, HP)


def prepare_params(params):
    layers = list(params["gru1"]) + [params["gru2"]]
    wih_l, whh_l, gib_l, bhn_l = [], [], [], []
    for (w_ih, w_hh, b_ih, b_hh) in layers:
        a, b, c, d = _pad_gru_layer(w_ih, w_hh, b_ih, b_hh)
        wih_l.append(a); whh_l.append(b); gib_l.append(c); bhn_l.append(d)

    w1, b1, w2, b2 = params["fc"]
    w1p = jnp.zeros((HP, HP), jnp.float32).at[:w1.shape[1], :w1.shape[0]].set(w1.T)
    b1p = jnp.zeros((1, HP), jnp.float32).at[0, :b1.shape[0]].set(b1)
    w2p = jnp.zeros((HP, HP), jnp.float32).at[:w2.shape[1], :w2.shape[0]].set(w2.T)
    b2p = jnp.zeros((1, HP), jnp.float32).at[0, :b2.shape[0]].set(b2)

    return {
        "wih": jnp.stack(wih_l),   # (4, 128, 384)
        "whh": jnp.stack(whh_l),   # (4, 128, 384)
        "gib": jnp.stack(gib_l),   # (4, 1, 384)
        "bhn": jnp.stack(bhn_l),   # (4, 1, 128)
        "w1": w1p, "b1": b1p, "w2": w2p, "b2": b2p,
        "out_dim": int(w2.shape[0]),
    }


# ----------------------------------------------------------------------------
# Forward pass (single pallas_call, jitted)
# ----------------------------------------------------------------------------
@jax.jit
def my_model_forward(x, packed):
    T, B, D = x.shape
    # Pad batch to 8 sublanes and features to 128 lanes (zeros).
    xp = jnp.zeros((T, BP, HP), jnp.float32).at[:, :B, :D].set(x)
    xp = xp.reshape(T * BP, HP)

    out = pl.pallas_call(
        fused_rnn_fnn_kernel,
        out_shape=jax.ShapeDtypeStruct((T * BP, HP), jnp.float32),
        in_specs=[_VMEM] * 9,
        out_specs=_VMEM,
        scratch_shapes=[
            pltpu.VMEM((T * BP, HP), jnp.float32),   # resident activations
            pltpu.VMEM((T * BP, G3), jnp.float32),   # hoisted input projection
            pltpu.VMEM((BP, HP), jnp.float32),       # recurrent hidden state
        ],
    )(xp, packed["wih"], packed["whh"], packed["gib"], packed["bhn"],
      packed["w1"], packed["b1"], packed["w2"], packed["b2"])

    return out.reshape(T, BP, HP)[:, :B, :3]


# ----------------------------------------------------------------------------
# Deterministic PyTorch-style parameter init (uniform(-1/sqrt(H), 1/sqrt(H)))
# ----------------------------------------------------------------------------
def _uniform(key, shape, bound):
    return jax.random.uniform(key, shape, jnp.float32, minval=-bound, maxval=bound)


def init_params(key):
    params = {}
    H1 = 128
    gru1_layers = []
    in_dim = 2
    for _ in range(3):
        key, k1, k2, k3, k4 = jax.random.split(key, 5)
        b = 1.0 / jnp.sqrt(H1)
        gru1_layers.append((
            _uniform(k1, (3 * H1, in_dim), b),
            _uniform(k2, (3 * H1, H1), b),
            _uniform(k3, (3 * H1,), b),
            _uniform(k4, (3 * H1,), b),
        ))
        in_dim = H1
    params["gru1"] = gru1_layers

    H2 = 64
    key, k1, k2, k3, k4 = jax.random.split(key, 5)
    b = 1.0 / jnp.sqrt(H2)
    params["gru2"] = (
        _uniform(k1, (3 * H2, H1), b),
        _uniform(k2, (3 * H2, H2), b),
        _uniform(k3, (3 * H2,), b),
        _uniform(k4, (3 * H2,), b),
    )

    key, k1, k2, k3, k4 = jax.random.split(key, 5)
    b1 = 1.0 / jnp.sqrt(64.0)
    b2 = 1.0 / jnp.sqrt(32.0)
    params["fc"] = (
        _uniform(k1, (32, 64), b1),
        _uniform(k2, (32,), b1),
        _uniform(k3, (3, 32), b2),
        _uniform(k4, (3,), b2),
    )
    return params


# ----------------------------------------------------------------------------
# Pure-JAX reference (for a correctness sanity check)
# ----------------------------------------------------------------------------
def _gru_ref(x, w_ih, w_hh, b_ih, b_hh):
    H = w_hh.shape[1]

    def step(h, x_t):
        gi = x_t @ w_ih.T + b_ih
        gh = h @ w_hh.T + b_hh
        i_r, i_z, i_n = jnp.split(gi, 3, axis=-1)
        h_r, h_z, h_n = jnp.split(gh, 3, axis=-1)
        r = jax.nn.sigmoid(i_r + h_r)
        z = jax.nn.sigmoid(i_z + h_z)
        n = jnp.tanh(i_n + r * h_n)
        h_new = (1.0 - z) * n + z * h
        return h_new, h_new

    h0 = jnp.zeros((x.shape[1], H), jnp.float32)
    _, ys = lax.scan(step, h0, x)
    return ys


def _model_ref(x, params):
    h = x
    for lp in params["gru1"]:
        h = _gru_ref(h, *lp)
    h = _gru_ref(h, *params["gru2"])
    w1, b1, w2, b2 = params["fc"]
    h = jnp.maximum(h @ w1.T + b1, 0.0)
    return h @ w2.T + b2


if __name__ == "__main__":
    key = jax.random.PRNGKey(0)
    pkey, xkey = jax.random.split(key)
    params = init_params(pkey)
    packed = prepare_params(params)

    # (seq=8, batch=2, features=2) — time-major like nn.GRU(batch_first=False)
    x = jax.random.normal(xkey, (8, 2, 2), dtype=jnp.float32)

    out = my_model_forward(x, packed)
    out = jax.block_until_ready(out)
    assert out.shape == (8, 2, 3), out.shape

    ref = jax.block_until_ready(_model_ref(x, params))
    err = float(jnp.max(jnp.abs(out - ref)))
    assert err < 5e-3, f"kernel/reference mismatch, max abs err = {err}"

    print("KERNEL_OK")
</pallas_src>

<mosaic_0001>
module attributes {stable_mosaic.version = 11 : i64} {
  func.func @fused_rnn_fnn_kernel(%arg0: memref<64x128xf32, #tpu.memory_space<vmem>>, %arg1: memref<4x128x384xf32, #tpu.memory_space<vmem>>, %arg2: memref<4x128x384xf32, #tpu.memory_space<vmem>>, %arg3: memref<4x1x384xf32, #tpu.memory_space<vmem>>, %arg4: memref<4x1x128xf32, #tpu.memory_space<vmem>>, %arg5: memref<128x128xf32, #tpu.memory_space<vmem>>, %arg6: memref<1x128xf32, #tpu.memory_space<vmem>>, %arg7: memref<128x128xf32, #tpu.memory_space<vmem>>, %arg8: memref<1x128xf32, #tpu.memory_space<vmem>>, %arg9: memref<64x128xf32, #tpu.memory_space<vmem>>, %arg10: memref<64x128xf32, #tpu.memory_space<vmem>>, %arg11: memref<64x384xf32, #tpu.memory_space<vmem>>, %arg12: memref<8x128xf32, #tpu.memory_space<vmem>>) attributes {dimension_semantics = [], scalar_prefetch = 0 : i64, scratch_operands = 3 : i64, tpu.core_type = #tpu.core_type<tc>} {
    %c0 = arith.constant 0 : index
    %c0_0 = arith.constant 0 : index
    %0 = vector.load %arg0[%c0, %c0_0] : memref<64x128xf32, #tpu.memory_space<vmem>>, vector<64x128xf32>
    %c0_1 = arith.constant 0 : index
    %c0_2 = arith.constant 0 : index
    %1 = vector.load %arg10[%c0_1, %c0_2] : memref<64x128xf32, #tpu.memory_space<vmem>>, vector<64x128xf32>
    tpu.vector_store %arg10[%c0_1, %c0_2], %0 {strides = array<i32>} : memref<64x128xf32, #tpu.memory_space<vmem>>, vector<64x128xf32>,
    %c0_3 = arith.constant 0 : index
    %c0_4 = arith.constant 0 : index
    %2 = vector.load %arg10[%c0_3, %c0_4] : memref<64x128xf32, #tpu.memory_space<vmem>>, vector<64x128xf32>
    %c0_5 = arith.constant 0 : index
    %c0_6 = arith.constant 0 : index
    %c0_7 = arith.constant 0 : index
    %3 = vector.load %arg1[%c0_5, %c0_6, %c0_7] : memref<4x128x384xf32, #tpu.memory_space<vmem>>, vector<1x128x384xf32>
    %4 = vector.shape_cast %3 : vector<1x128x384xf32> to vector<128x384xf32>
    %cst = arith.constant dense<0.000000e+00> : vector<64x384xf32>
    %5 = tpu.matmul %2, %4, %cst {dimension_numbers = #tpu.dot_dimension_numbers<[1], [0], [0], [1], [0, 0, 1, 1], [], []>} : vector<64x128xf32>, vector<128x384xf32>, vector<64x384xf32> -> vector<64x384xf32>
    %c0_8 = arith.constant 0 : index
    %c0_9 = arith.constant 0 : index
    %c0_10 = arith.constant 0 : index
    %6 = vector.load %arg3[%c0_8, %c0_9, %c0_10] : memref<4x1x384xf32, #tpu.memory_space<vmem>>, vector<1x1x384xf32>
    %7 = vector.shape_cast %6 : vector<1x1x384xf32> to vector<1x384xf32>
    %8 = vector.broadcast %7 : vector<1x384xf32> to vector<64x384xf32>
    %9 = arith.addf %5, %8 : vector<64x384xf32>
    %c0_11 = arith.constant 0 : index
    %c0_12 = arith.constant 0 : index
    %10 = vector.load %arg11[%c0_11, %c0_12] : memref<64x384xf32, #tpu.memory_space<vmem>>, vector<64x384xf32>
    tpu.vector_store %arg11[%c0_11, %c0_12], %9 {strides = array<i32>} : memref<64x384xf32, #tpu.memory_space<vmem>>, vector<64x384xf32>,
    %c0_13 = arith.constant 0 : index
    %c0_14 = arith.constant 0 : index
    %c0_15 = arith.constant 0 : index
    %11 = vector.load %arg4[%c0_13, %c0_14, %c0_15] : memref<4x1x128xf32, #tpu.memory_space<vmem>>, vector<1x1x128xf32>
    %12 = vector.shape_cast %11 : vector<1x1x128xf32> to vector<1x128xf32>
    %13 = vector.shape_cast %12 : vector<1x128xf32> to vector<1x128xf32>
    %14 = vector.broadcast %13 : vector<1x128xf32> to vector<8x128xf32>
    %cst_16 = arith.constant 0.000000e+00 : f32
    %15 = vector.broadcast %cst_16 : f32 to vector<8x128xf32>
    %c0_17 = arith.constant 0 : index
    %c0_18 = arith.constant 0 : index
    %16 = vector.load %arg12[%c0_17, %c0_18] : memref<8x128xf32, #tpu.memory_space<vmem>>, vector<8x128xf32>
    tpu.vector_store %arg12[%c0_17, %c0_18], %15 {strides = array<i32>} : memref<8x128xf32, #tpu.memory_space<vmem>>, vector<8x128xf32>,
    %c0_i32 = arith.constant 0 : i32
    %c0_i32_19 = arith.constant 0 : i32
    %c8_i32 = arith.constant 8 : i32
    %17 = arith.muli %c0_i32_19, %c8_i32 : i32
    %18 = tpu.assume_multiple %17, 8 : i32
    %19 = arith.index_cast %18 : i32 to index
    %c0_20 = arith.constant 0 : index
    %20 = vector.load %arg11[%19, %c0_20] : memref<64x384xf32, #tpu.memory_space<vmem>>, vector<8x384xf32>
    %c0_21 = arith.constant 0 : index
    %c0_22 = arith.constant 0 : index
    %21 = vector.load %arg12[%c0_21, %c0_22] : memref<8x128xf32, #tpu.memory_space<vmem>>, vector<8x128xf32>
    %22 = arith.index_cast %c0_i32 : i32 to index
    %c0_23 = arith.constant 0 : index
    %c0_24 = arith.constant 0 : index
    %23 = vector.load %arg2[%22, %c0_23, %c0_24] : memref<4x128x384xf32, #tpu.memory_space<vmem>>, vector<1x128x384xf32>
    %24 = vector.shape_cast %23 : vector<1x128x384xf32> to vector<128x384xf32>
    %cst_25 = arith.constant dense<0.000000e+00> : vector<8x384xf32>
    %25 = tpu.matmul %21, %24, %cst_25 {dimension_numbers = #tpu.dot_dimension_numbers<[1], [0], [0], [1], [0, 0, 1, 1], [], []>} : vector<8x128xf32>, vector<128x384xf32>, vector<8x384xf32> -> vector<8x384xf32>
    %26 = vector.extract_strided_slice %20 {offsets = [0, 0], sizes = [8, 128], strides = [1, 1]} : vector<8x384xf32> to vector<8x128xf32>
    %27 = vector.extract_strided_slice %25 {offsets = [0, 0], sizes = [8, 128], strides = [1, 1]} : vector<8x384xf32> to vector<8x128xf32>
    %28 = arith.addf %26, %27 : vector<8x128xf32>
    %29 = arith.negf %28 : vector<8x128xf32>
    %30 = math.exp %29 : vector<8x128xf32>
    %cst_26 = arith.constant 1.000000e+00 : f32
    %31 = vector.broadcast %cst_26 : f32 to vector<8x128xf32>
    %32 = arith.addf %31, %30 : vector<8x128xf32>
    %33 = arith.divf %31, %32 : vector<8x128xf32>
    %34 = vector.extract_strided_slice %20 {offsets = [0, 128], sizes = [8, 128], strides = [1, 1]} : vector<8x384xf32> to vector<8x128xf32>
    %35 = vector.extract_strided_slice %25 {offsets = [0, 128], sizes = [8, 128], strides = [1, 1]} : vector<8x384xf32> to vector<8x128xf32>
    %36 = arith.addf %34, %35 : vector<8x128xf32>
    %37 = arith.negf %36 : vector<8x128xf32>
    %38 = math.exp %37 : vector<8x128xf32>
    %cst_27 = arith.constant 1.000000e+00 : f32
    %39 = vector.broadcast %cst_27 : f32 to vector<8x128xf32>
    %40 = arith.addf %39, %38 : vector<8x128xf32>
    %41 = arith.divf %39, %40 : vector<8x128xf32>
    %42 = vector.extract_strided_slice %20 {offsets = [0, 256], sizes = [8, 128], strides = [1, 1]} : vector<8x384xf32> to vector<8x128xf32>
    %43 = vector.extract_strided_slice %25 {offsets = [0, 256], sizes = [8, 128], strides = [1, 1]} : vector<8x384xf32> to vector<8x128xf32>
    %44 = arith.addf %43, %14 : vector<8x128xf32>
    %45 = arith.mulf %33, %44 : vector<8x128xf32>
    %46 = arith.addf %42, %45 : vector<8x128xf32>
    %47 = math.tanh %46 : vector<8x128xf32>
    %48 = arith.subf %21, %47 : vector<8x128xf32>
    %49 = arith.mulf %41, %48 : vector<8x128xf32>
    %50 = arith.addf %47, %49 : vector<8x128xf32>
    %c0_28 = arith.constant 0 : index
    %c0_29 = arith.constant 0 : index
    %51 = vector.load %arg12[%c0_28, %c0_29] : memref<8x128xf32, #tpu.memory_space<vmem>>, vector<8x128xf32>
    tpu.vector_store %arg12[%c0_28, %c0_29], %50 {strides = array<i32>} : memref<8x128xf32, #tpu.memory_space<vmem>>, vector<8x128xf32>,
    %52 = arith.index_cast %18 : i32 to index
    %c0_30 = arith.constant 0 : index
    %53 = vector.load %arg10[%52, %c0_30] : memref<64x128xf32, #tpu.memory_space<vmem>>, vector<8x128xf32>
    tpu.vector_store %arg10[%52, %c0_30], %50 {strides = array<i32>} : memref<64x128xf32, #tpu.memory_space<vmem>>, vector<8x128xf32>,
    %c1_i32 = arith.constant 1 : i32
    %c8_i32_31 = arith.constant 8 : i32
    %54 = arith.muli %c1_i32, %c8_i32_31 : i32
    %55 = tpu.assume_multiple %54, 8 : i32
    %56 = arith.index_cast %55 : i32 to index
    %c0_32 = arith.constant 0 : index
    %57 = vector.load %arg11[%56, %c0_32] : memref<64x384xf32, #tpu.memory_space<vmem>>, vector<8x384xf32>
    %c0_33 = arith.constant 0 : index
    %c0_34 = arith.constant 0 : index
    %58 = vector.load %arg12[%c0_33, %c0_34] : memref<8x128xf32, #tpu.memory_space<vmem>>, vector<8x128xf32>
    %59 = arith.index_cast %c0_i32 : i32 to index
    %c0_35 = arith.constant 0 : index
    %c0_36 = arith.constant 0 : index
    %60 = vector.load %arg2[%59, %c0_35, %c0_36] : memref<4x128x384xf32, #tpu.memory_space<vmem>>, vector<1x128x384xf32>
    %61 = vector.shape_cast %60 : vector<1x128x384xf32> to vector<128x384xf32>
    %cst_37 = arith.constant dense<0.000000e+00> : vector<8x384xf32>
    %62 = tpu.matmul %58, %61, %cst_37 {dimension_numbers = #tpu.dot_dimension_numbers<[1], [0], [0], [1], [0, 0, 1, 1], [], []>} : vector<8x128xf32>, vector<128x384xf32>, vector<8x384xf32> -> vector<8x384xf32>
    %63 = vector.extract_strided_slice %57 {offsets = [0, 0], sizes = [8, 128], strides = [1, 1]} : vector<8x384xf32> to vector<8x128xf32>
    %64 = vector.extract_strided_slice %62 {offsets = [0, 0], sizes = [8, 128], strides = [1, 1]} : vector<8x384xf32> to vector<8x128xf32>
    %65 = arith.addf %63, %64 : vector<8x128xf32>
    %66 = arith.negf %65 : vector<8x128xf32>
    %67 = math.exp %66 : vector<8x128xf32>
    %cst_38 = arith.constant 1.000000e+00 : f32
    %68 = vector.broadcast %cst_38 : f32 to vector<8x128xf32>
    %69 = arith.addf %68, %67 : vector<8x128xf32>
    %70 = arith.divf %68, %69 : vector<8x128xf32>
    %71 = vector.extract_strided_slice %57 {offsets = [0, 128], sizes = [8, 128], strides = [1, 1]} : vector<8x384xf32> to vector<8x128xf32>
    %72 = vector.extract_strided_slice %62 {offsets = [0, 128], sizes = [8, 128], strides = [1, 1]} : vector<8x384xf32> to vector<8x128xf32>
    %73 = arith.addf %71, %72 : vector<8x128xf32>
    %74 = arith.negf %73 : vector<8x128xf32>
    %75 = math.exp %74 : vector<8x128xf32>
    %cst_39 = arith.constant 1.000000e+00 : f32
    %76 = vector.broadcast %cst_39 : f32 to vector<8x128xf32>
    %77 = arith.addf %76, %75 : vector<8x128xf32>
    %78 = arith.divf %76, %77 : vector<8x128xf32>
    %79 = vector.extract_strided_slice %57 {offsets = [0, 256], sizes = [8, 128], strides = [1, 1]} : vector<8x384xf32> to vector<8x128xf32>
    %80 = vector.extract_strided_slice %62 {offsets = [0, 256], sizes = [8, 128], strides = [1, 1]} : vector<8x384xf32> to vector<8x128xf32>
    %81 = arith.addf %80, %14 : vector<8x128xf32>
    %82 = arith.mulf %70, %81 : vector<8x128xf32>
    %83 = arith.addf %79, %82 : vector<8x128xf32>
    %84 = math.tanh %83 : vector<8x128xf32>
    %85 = arith.subf %58, %84 : vector<8x128xf32>
    %86 = arith.mulf %78, %85 : vector<8x128xf32>
    %87 = arith.addf %84, %86 : vector<8x128xf32>
    %c0_40 = arith.constant 0 : index
    %c0_41 = arith.constant 0 : index
    %88 = vector.load %arg12[%c0_40, %c0_41] : memref<8x128xf32, #tpu.memory_space<vmem>>, vector<8x128xf32>
    tpu.vector_store %arg12[%c0_40, %c0_41], %87 {strides = array<i32>} : memref<8x128xf32, #tpu.memory_space<vmem>>, vector<8x128xf32>,
    %89 = arith.index_cast %55 : i32 to index
    %c0_42 = arith.constant 0 : index
    %90 = vector.load %arg10[%89, %c0_42] : memref<64x128xf32, #tpu.memory_space<vmem>>, vector<8x128xf32>
    tpu.vector_store %arg10[%89, %c0_42], %87 {strides = array<i32>} : memref<64x128xf32, #tpu.memory_space<vmem>>, vector<8x128xf32>,
    %c2_i32 = arith.constant 2 : i32
    %c8_i32_43 = arith.constant 8 : i32
    %91 = arith.muli %c2_i32, %c8_i32_43 : i32
    %92 = tpu.assume_multiple %91, 8 : i32
    %93 = arith.index_cast %92 : i32 to index
    %c0_44 = arith.constant 0 : index
    %94 = vector.load %arg11[%93, %c0_44] : memref<64x384xf32, #tpu.memory_space<vmem>>, vector<8x384xf32>
    %c0_45 = arith.constant 0 : index
    %c0_46 = arith.constant 0 : index
    %95 = vector.load %arg12[%c0_45, %c0_46] : memref<8x128xf32, #tpu.memory_space<vmem>>, vector<8x128xf32>
    %96 = arith.index_cast %c0_i32 : i32 to index
    %c0_47 = arith.constant 0 : index
    %c0_48 = arith.constant 0 : index
    %97 = vector.load %arg2[%96, %c0_47, %c0_48] : memref<4x128x384xf32, #tpu.memory_space<vmem>>, vector<1x128x384xf32>
    %98 = vector.shape_cast %97 : vector<1x128x384xf32> to vector<128x384xf32>
    %cst_49 = arith.constant dense<0.000000e+00> : vector<8x384xf32>
    %99 = tpu.matmul %95, %98, %cst_49 {dimension_numbers = #tpu.dot_dimension_numbers<[1], [0], [0], [1], [0, 0, 1, 1], [], []>} : vector<8x128xf32>, vector<128x384xf32>, vector<8x384xf32> -> vector<8x384xf32>
    %100 = vector.extract_strided_slice %94 {offsets = [0, 0], sizes = [8, 128], strides = [1, 1]} : vector<8x384xf32> to vector<8x128xf32>
    %101 = vector.extract_strided_slice %99 {offsets = [0, 0], sizes = [8, 128], strides = [1, 1]} : vector<8x384xf32> to vector<8x128xf32>
    %102 = arith.addf %100, %101 : vector<8x128xf32>
    %103 = arith.negf %102 : vector<8x128xf32>
    %104 = math.exp %103 : vector<8x128xf32>
    %cst_50 = arith.constant 1.000000e+00 : f32
    %105 = vector.broadcast %cst_50 : f32 to vector<8x128xf32>
    %106 = arith.addf %105, %104 : vector<8x128xf32>
    %107 = arith.divf %105, %106 : vector<8x128xf32>
    %108 = vector.extract_strided_slice %94 {offsets = [0, 128], sizes = [8, 128], strides = [1, 1]} : vector<8x384xf32> to vector<8x128xf32>
    %109 = vector.extract_strided_slice %99 {offsets = [0, 128], sizes = [8, 128], strides = [1, 1]} : vector<8x384xf32> to vector<8x128xf32>
    %110 = arith.addf %108, %109 : vector<8x128xf32>
    %111 = arith.negf %110 : vector<8x128xf32>
    %112 = math.exp %111 : vector<8x128xf32>
    %cst_51 = arith.constant 1.000000e+00 : f32
    %113 = vector.broadcast %cst_51 : f32 to vector<8x128xf32>
    %114 = arith.addf %113, %112 : vector<8x128xf32>
    %115 = arith.divf %113, %114 : vector<8x128xf32>
    %116 = vector.extract_strided_slice %94 {offsets = [0, 256], sizes = [8, 128], strides = [1, 1]} : vector<8x384xf32> to vector<8x128xf32>
    %117 = vector.extract_strided_slice %99 {offsets = [0, 256], sizes = [8, 128], strides = [1, 1]} : vector<8x384xf32> to vector<8x128xf32>
    %118 = arith.addf %117, %14 : vector<8x128xf32>
    %119 = arith.mulf %107, %118 : vector<8x128xf32>
    %120 = arith.addf %116, %119 : vector<8x128xf32>
    %121 = math.tanh %120 : vector<8x128xf32>
    %122 = arith.subf %95, %121 : vector<8x128xf32>
    %123 = arith.mulf %115, %122 : vector<8x128xf32>
    %124 = arith.addf %121, %123 : vector<8x128xf32>
    %c0_52 = arith.constant 0 : index
    %c0_53 = arith.constant 0 : index
    %125 = vector.load %arg12[%c0_52, %c0_53] : memref<8x128xf32, #tpu.memory_space<vmem>>, vector<8x128xf32>
    tpu.vector_store %arg12[%c0_52, %c0_53], %124 {strides = array<i32>} : memref<8x128xf32, #tpu.memory_space<vmem>>, vector<8x128xf32>,
    %126 = arith.index_cast %92 : i32 to index
    %c0_54 = arith.constant 0 : index
    %127 = vector.load %arg10[%126, %c0_54] : memref<64x128xf32, #tpu.memory_space<vmem>>, vector<8x128xf32>
    tpu.vector_store %arg10[%126, %c0_54], %124 {strides = array<i32>} : memref<64x128xf32, #tpu.memory_space<vmem>>, vector<8x128xf32>,
    %c3_i32 = arith.constant 3 : i32
    %c8_i32_55 = arith.constant 8 : i32
    %128 = arith.muli %c3_i32, %c8_i32_55 : i32
    %129 = tpu.assume_multiple %128, 8 : i32
    %130 = arith.index_cast %129 : i32 to index
    %c0_56 = arith.constant 0 : index
    %131 = vector.load %arg11[%130, %c0_56] : memref<64x384xf32, #tpu.memory_space<vmem>>, vector<8x384xf32>
    %c0_57 = arith.constant 0 : index
    %c0_58 = arith.constant 0 : index
    %132 = vector.load %arg12[%c0_57, %c0_58] : memref<8x128xf32, #tpu.memory_space<vmem>>, vector<8x128xf32>
    %133 = arith.index_cast %c0_i32 : i32 to index
    %c0_59 = arith.constant 0 : index
    %c0_60 = arith.constant 0 : index
    %134 = vector.load %arg2[%133, %c0_59, %c0_60] : memref<4x128x384xf32, #tpu.memory_space<vmem>>, vector<1x128x384xf32>
    %135 = vector.shape_cast %134 : vector<1x128x384xf32> to vector<128x384xf32>
    %cst_61 = arith.constant dense<0.000000e+00> : vector<8x384xf32>
    %136 = tpu.matmul %132, %135, %cst_61 {dimension_numbers = #tpu.dot_dimension_numbers<[1], [0], [0], [1], [0, 0, 1, 1], [], []>} : vector<8x128xf32>, vector<128x384xf32>, vector<8x384xf32> -> vector<8x384xf32>
    %137 = vector.extract_strided_slice %131 {offsets = [0, 0], sizes = [8, 128], strides = [1, 1]} : vector<8x384xf32> to vector<8x128xf32>
    %138 = vector.extract_strided_slice %136 {offsets = [0, 0], sizes = [8, 128], strides = [1, 1]} : vector<8x384xf32> to vector<8x128xf32>
    %139 = arith.addf %137, %138 : vector<8x128xf32>
    %140 = arith.negf %139 : vector<8x128xf32>
    %141 = math.exp %140 : vector<8x128xf32>
    %cst_62 = arith.constant 1.000000e+00 : f32
    %142 = vector.broadcast %cst_62 : f32 to vector<8x128xf32>
    %143 = arith.addf %142, %141 : vector<8x128xf32>
    %144 = arith.divf %142, %143 : vector<8x128xf32>
    %145 = vector.extract_strided_slice %131 {offsets = [0, 128], sizes = [8, 128], strides = [1, 1]} : vector<8x384xf32> to vector<8x128xf32>
    %146 = vector.extract_strided_slice %136 {offsets = [0, 128], sizes = [8, 128], strides = [1, 1]} : vector<8x384xf32> to vector<8x128xf32>
    %147 = arith.addf %145, %146 : vector<8x128xf32>
    %148 = arith.negf %147 : vector<8x128xf32>
    %149 = math.exp %148 : vector<8x128xf32>
    %cst_63 = arith.constant 1.000000e+00 : f32
    %150 = vector.broadcast %cst_63 : f32 to vector<8x128xf32>
    %151 = arith.addf %150, %149 : vector<8x128xf32>
    %152 = arith.divf %150, %151 : vector<8x128xf32>
    %153 = vector.extract_strided_slice %131 {offsets = [0, 256], sizes = [8, 128], strides = [1, 1]} : vector<8x384xf32> to vector<8x128xf32>
    %154 = vector.extract_strided_slice %136 {offsets = [0, 256], sizes = [8, 128], strides = [1, 1]} : vector<8x384xf32> to vector<8x128xf32>
    %155 = arith.addf %154, %14 : vector<8x128xf32>
    %156 = arith.mulf %144, %155 : vector<8x128xf32>
    %157 = arith.addf %153, %156 : vector<8x128xf32>
    %158 = math.tanh %157 : vector<8x128xf32>
    %159 = arith.subf %132, %158 : vector<8x128xf32>
    %160 = arith.mulf %152, %159 : vector<8x128xf32>
    %161 = arith.addf %158, %160 : vector<8x128xf32>
    %c0_64 = arith.constant 0 : index
    %c0_65 = arith.constant 0 : index
    %162 = vector.load %arg12[%c0_64, %c0_65] : memref<8x128xf32, #tpu.memory_space<vmem>>, vector<8x128xf32>
    tpu.vector_store %arg12[%c0_64, %c0_65], %161 {strides = array<i32>} : memref<8x128xf32, #tpu.memory_space<vmem>>, vector<8x128xf32>,
    %163 = arith.index_cast %129 : i32 to index
    %c0_66 = arith.constant 0 : index
    %164 = vector.load %arg10[%163, %c0_66] : memref<64x128xf32, #tpu.memory_space<vmem>>, vector<8x128xf32>
    tpu.vector_store %arg10[%163, %c0_66], %161 {strides = array<i32>} : memref<64x128xf32, #tpu.memory_space<vmem>>, vector<8x128xf32>,
    %c4_i32 = arith.constant 4 : i32
    %c8_i32_67 = arith.constant 8 : i32
    %165 = arith.muli %c4_i32, %c8_i32_67 : i32
    %166 = tpu.assume_multiple %165, 8 : i32
    %167 = arith.index_cast %166 : i32 to index
    %c0_68 = arith.constant 0 : index
    %168 = vector.load %arg11[%167, %c0_68] : memref<64x384xf32, #tpu.memory_space<vmem>>, vector<8x384xf32>
    %c0_69 = arith.constant 0 : index
    %c0_70 = arith.constant 0 : index
    %169 = vector.load %arg12[%c0_69, %c0_70] : memref<8x128xf32, #tpu.memory_space<vmem>>, vector<8x128xf32>
    %170 = arith.index_cast %c0_i32 : i32 to index
    %c0_71 = arith.constant 0 : index
    %c0_72 = arith.constant 0 : index
    %171 = vector.load %arg2[%170, %c0_71, %c0_72] : memref<4x128x384xf32, #tpu.memory_space<vmem>>, vector<1x128x384xf32>
    %172 = vector.shape_cast %171 : vector<1x128x384xf32> to vector<128x384xf32>
    %cst_73 = arith.constant dense<0.000000e+00> : vector<8x384xf32>
    %173 = tpu.matmul %169, %172, %cst_73 {dimension_numbers = #tpu.dot_dimension_numbers<[1], [0], [0], [1], [0, 0, 1, 1], [], []>} : vector<8x128xf32>, vector<128x384xf32>, vector<8x384xf32> -> vector<8x384xf32>
    %174 = vector.extract_strided_slice %168 {offsets = [0, 0], sizes = [8, 128], strides = [1, 1]} : vector<8x384xf32> to vector<8x128xf32>
    %175 = vector.extract_strided_slice %173 {offsets = [0, 0], sizes = [8, 128], strides = [1, 1]} : vector<8x384xf32> to vector<8x128xf32>
    %176 = arith.addf %174, %175 : vector<8x128xf32>
    %177 = arith.negf %176 : vector<8x128xf32>
    %178 = math.exp %177 : vector<8x128xf32>
    %cst_74 = arith.constant 1.000000e+00 : f32
    %179 = vector.broadcast %cst_74 : f32 to vector<8x128xf32>
    %180 = arith.addf %179, %178 : vector<8x128xf32>
    %181 = arith.divf %179, %180 : vector<8x128xf32>
    %182 = vector.extract_strided_slice %168 {offsets = [0, 128], sizes = [8, 128], strides = [1, 1]} : vector<8x384xf32> to vector<8x128xf32>
    %183 = vector.extract_strided_slice %173 {offsets = [0, 128], sizes = [8, 128], strides = [1, 1]} : vector<8x384xf32> to vector<8x128xf32>
    %184 = arith.addf %182, %183 : vector<8x128xf32>
    %185 = arith.negf %184 : vector<8x128xf32>
    %186 = math.exp %185 : vector<8x128xf32>
    %cst_75 = arith.constant 1.000000e+00 : f32
    %187 = vector.broadcast %cst_75 : f32 to vector<8x128xf32>
    %188 = arith.addf %187, %186 : vector<8x128xf32>
    %189 = arith.divf %187, %188 : vector<8x128xf32>
    %190 = vector.extract_strided_slice %168 {offsets = [0, 256], sizes = [8, 128], strides = [1, 1]} : vector<8x384xf32> to vector<8x128xf32>
    %191 = vector.extract_strided_slice %173 {offsets = [0, 256], sizes = [8, 128], strides = [1, 1]} : vector<8x384xf32> to vector<8x128xf32>
    %192 = arith.addf %191, %14 : vector<8x128xf32>
    %193 = arith.mulf %181, %192 : vector<8x128xf32>
    %194 = arith.addf %190, %193 : vector<8x128xf32>
    %195 = math.tanh %194 : vector<8x128xf32>
    %196 = arith.subf %169, %195 : vector<8x128xf32>
    %197 = arith.mulf %189, %196 : vector<8x128xf32>
    %198 = arith.addf %195, %197 : vector<8x128xf32>
    %c0_76 = arith.constant 0 : index
    %c0_77 = arith.constant 0 : index
    %199 = vector.load %arg12[%c0_76, %c0_77] : memref<8x128xf32, #tpu.memory_space<vmem>>, vector<8x128xf32>
    tpu.vector_store %arg12[%c0_76, %c0_77], %198 {strides = array<i32>} : memref<8x128xf32, #tpu.memory_space<vmem>>, vector<8x128xf32>,
    %200 = arith.index_cast %166 : i32 to index
    %c0_78 = arith.constant 0 : index
    %201 = vector.load %arg10[%200, %c0_78] : memref<64x128xf32, #tpu.memory_space<vmem>>, vector<8x128xf32>
    tpu.vector_store %arg10[%200, %c0_78], %198 {strides = array<i32>} : memref<64x128xf32, #tpu.memory_space<vmem>>, vector<8x128xf32>,
    %c5_i32 = arith.constant 5 : i32
    %c8_i32_79 = arith.constant 8 : i32
    %202 = arith.muli %c5_i32, %c8_i32_79 : i32
    %203 = tpu.assume_multiple %202, 8 : i32
    %204 = arith.index_cast %203 : i32 to index
    %c0_80 = arith.constant 0 : index
    %205 = vector.load %arg11[%204, %c0_80] : memref<64x384xf32, #tpu.memory_space<vmem>>, vector<8x384xf32>
    %c0_81 = arith.constant 0 : index
    %c0_82 = arith.constant 0 : index
    %206 = vector.load %arg12[%c0_81, %c0_82] : memref<8x128xf32, #tpu.memory_space<vmem>>, vector<8x128xf32>
    %207 = arith.index_cast %c0_i32 : i32 to index
    %c0_83 = arith.constant 0 : index
    %c0_84 = arith.constant 0 : index
    %208 = vector.load %arg2[%207, %c0_83, %c0_84] : memref<4x128x384xf32, #tpu.memory_space<vmem>>, vector<1x128x384xf32>
    %209 = vector.shape_cast %208 : vector<1x128x384xf32> to vector<128x384xf32>
    %cst_85 = arith.constant dense<0.000000e+00> : vector<8x384xf32>
    %210 = tpu.matmul %206, %209, %cst_85 {dimension_numbers = #tpu.dot_dimension_numbers<[1], [0], [0], [1], [0, 0, 1, 1], [], []>} : vector<8x128xf32>, vector<128x384xf32>, vector<8x384xf32> -> vector<8x384xf32>
    %211 = vector.extract_strided_slice %205 {offsets = [0, 0], sizes = [8, 128], strides = [1, 1]} : vector<8x384xf32> to vector<8x128xf32>
    %212 = vector.extract_strided_slice %210 {offsets = [0, 0], sizes = [8, 128], strides = [1, 1]} : vector<8x384xf32> to vector<8x128xf32>
    %213 = arith.addf %211, %212 : vector<8x128xf32>
    %214 = arith.negf %213 : vector<8x128xf32>
    %215 = math.exp %214 : vector<8x128xf32>
    %cst_86 = arith.constant 1.000000e+00 : f32
    %216 = vector.broadcast %cst_86 : f32 to vector<8x128xf32>
    %217 = arith.addf %216, %215 : vector<8x128xf32>
    %218 = arith.divf %216, %217 : vector<8x128xf32>
    %219 = vector.extract_strided_slice %205 {offsets = [0, 128], sizes = [8, 128], strides = [1, 1]} : vector<8x384xf32> to vector<8x128xf32>
    %220 = vector.extract_strided_slice %210 {offsets = [0, 128], sizes = [8, 128], strides = [1, 1]} : vector<8x384xf32> to vector<8x128xf32>
    %221 = arith.addf %219, %220 : vector<8x128xf32>
    %222 = arith.negf %221 : vector<8x128xf32>
    %223 = math.exp %222 : vector<8x128xf32>
    %cst_87 = arith.constant 1.000000e+00 : f32
    %224 = vector.broadcast %cst_87 : f32 to vector<8x128xf32>
    %225 = arith.addf %224, %223 : vector<8x128xf32>
    %226 = arith.divf %224, %225 : vector<8x128xf32>
    %227 = vector.extract_strided_slice %205 {offsets = [0, 256], sizes = [8, 128], strides = [1, 1]} : vector<8x384xf32> to vector<8x128xf32>
    %228 = vector.extract_strided_slice %210 {offsets = [0, 256], sizes = [8, 128], strides = [1, 1]} : vector<8x384xf32> to vector<8x128xf32>
    %229 = arith.addf %228, %14 : vector<8x128xf32>
    %230 = arith.mulf %218, %229 : vector<8x128xf32>
    %231 = arith.addf %227, %230 : vector<8x128xf32>
    %232 = math.tanh %231 : vector<8x128xf32>
    %233 = arith.subf %206, %232 : vector<8x128xf32>
    %234 = arith.mulf %226, %233 : vector<8x128xf32>
    %235 = arith.addf %232, %234 : vector<8x128xf32>
    %c0_88 = arith.constant 0 : index
    %c0_89 = arith.constant 0 : index
    %236 = vector.load %arg12[%c0_88, %c0_89] : memref<8x128xf32, #tpu.memory_space<vmem>>, vector<8x128xf32>
    tpu.vector_store %arg12[%c0_88, %c0_89], %235 {strides = array<i32>} : memref<8x128xf32, #tpu.memory_space<vmem>>, vector<8x128xf32>,
    %237 = arith.index_cast %203 : i32 to index
    %c0_90 = arith.constant 0 : index
    %238 = vector.load %arg10[%237, %c0_90] : memref<64x128xf32, #tpu.memory_space<vmem>>, vector<8x128xf32>
    tpu.vector_store %arg10[%237, %c0_90], %235 {strides = array<i32>} : memref<64x128xf32, #tpu.memory_space<vmem>>, vector<8x128xf32>,
    %c6_i32 = arith.constant 6 : i32
    %c8_i32_91 = arith.constant 8 : i32
    %239 = arith.muli %c6_i32, %c8_i32_91 : i32
    %240 = tpu.assume_multiple %239, 8 : i32
    %241 = arith.index_cast %240 : i32 to index
    %c0_92 = arith.constant 0 : index
    %242 = vector.load %arg11[%241, %c0_92] : memref<64x384xf32, #tpu.memory_space<vmem>>, vector<8x384xf32>
    %c0_93 = arith.constant 0 : index
    %c0_94 = arith.constant 0 : index
    %243 = vector.load %arg12[%c0_93, %c0_94] : memref<8x128xf32, #tpu.memory_space<vmem>>, vector<8x128xf32>
    %244 = arith.index_cast %c0_i32 : i32 to index
    %c0_95 = arith.constant 0 : index
    %c0_96 = arith.constant 0 : index
    %245 = vector.load %arg2[%244, %c0_95, %c0_96] : memref<4x128x384xf32, #tpu.memory_space<vmem>>, vector<1x128x384xf32>
    %246 = vector.shape_cast %245 : vector<1x128x384xf32> to vector<128x384xf32>
    %cst_97 = arith.constant dense<0.000000e+00> : vector<8x384xf32>
    %247 = tpu.matmul %243, %246, %cst_97 {dimension_numbers = #tpu.dot_dimension_numbers<[1], [0], [0], [1], [0, 0, 1, 1], [], []>} : vector<8x128xf32>, vector<128x384xf32>, vector<8x384xf32> -> vector<8x384xf32>
    %248 = vector.extract_strided_slice %242 {offsets = [0, 0], sizes = [8, 128], strides = [1, 1]} : vector<8x384xf32> to vector<8x128xf32>
    %249 = vector.extract_strided_slice %247 {offsets = [0, 0], sizes = [8, 128], strides = [1, 1]} : vector<8x384xf32> to vector<8x128xf32>
    %250 = arith.addf %248, %249 : vector<8x128xf32>
    %251 = arith.negf %250 : vector<8x128xf32>
    %252 = math.exp %251 : vector<8x128xf32>
    %cst_98 = arith.constant 1.000000e+00 : f32
    %253 = vector.broadcast %cst_98 : f32 to vector<8x128xf32>
    %254 = arith.addf %253, %252 : vector<8x128xf32>
    %255 = arith.divf %253, %254 : vector<8x128xf32>
    %256 = vector.extract_strided_slice %242 {offsets = [0, 128], sizes = [8, 128], strides = [1, 1]} : vector<8x384xf32> to vector<8x128xf32>
    %257 = vector.extract_strided_slice %247 {offsets = [0, 128], sizes = [8, 128], strides = [1, 1]} : vector<8x384xf32> to vector<8x128xf32>
    %258 = arith.addf %256, %257 : vector<8x128xf32>
    %259 = arith.negf %258 : vector<8x128xf32>
    %260 = math.exp %259 : vector<8x128xf32>
    %cst_99 = arith.constant 1.000000e+00 : f32
    %261 = vector.broadcast %cst_99 : f32 to vector<8x128xf32>
    %262 = arith.addf %261, %260 : vector<8x128xf32>
    %263 = arith.divf %261, %262 : vector<8x128xf32>
    %264 = vector.extract_strided_slice %242 {offsets = [0, 256], sizes = [8, 128], strides = [1, 1]} : vector<8x384xf32> to vector<8x128xf32>
    %265 = vector.extract_strided_slice %247 {offsets = [0, 256], sizes = [8, 128], strides = [1, 1]} : vector<8x384xf32> to vector<8x128xf32>
    %266 = arith.addf %265, %14 : vector<8x128xf32>
    %267 = arith.mulf %255, %266 : vector<8x128xf32>
    %268 = arith.addf %264, %267 : vector<8x128xf32>
    %269 = math.tanh %268 : vector<8x128xf32>
    %270 = arith.subf %243, %269 : vector<8x128xf32>
    %271 = arith.mulf %263, %270 : vector<8x128xf32>
    %272 = arith.addf %269, %271 : vector<8x128xf32>
    %c0_100 = arith.constant 0 : index
    %c0_101 = arith.constant 0 : index
    %273 = vector.load %arg12[%c0_100, %c0_101] : memref<8x128xf32, #tpu.memory_space<vmem>>, vector<8x128xf32>
    tpu.vector_store %arg12[%c0_100, %c0_101], %272 {strides = array<i32>} : memref<8x128xf32, #tpu.memory_space<vmem>>, vector<8x128xf32>,
    %274 = arith.index_cast %240 : i32 to index
    %c0_102 = arith.constant 0 : index
    %275 = vector.load %arg10[%274, %c0_102] : memref<64x128xf32, #tpu.memory_space<vmem>>, vector<8x128xf32>
    tpu.vector_store %arg10[%274, %c0_102], %272 {strides = array<i32>} : memref<64x128xf32, #tpu.memory_space<vmem>>, vector<8x128xf32>,
    %c7_i32 = arith.constant 7 : i32
    %c8_i32_103 = arith.constant 8 : i32
    %276 = arith.muli %c7_i32, %c8_i32_103 : i32
    %277 = tpu.assume_multiple %276, 8 : i32
    %278 = arith.index_cast %277 : i32 to index
    %c0_104 = arith.constant 0 : index
    %279 = vector.load %arg11[%278, %c0_104] : memref<64x384xf32, #tpu.memory_space<vmem>>, vector<8x384xf32>
    %c0_105 = arith.constant 0 : index
    %c0_106 = arith.constant 0 : index
    %280 = vector.load %arg12[%c0_105, %c0_106] : memref<8x128xf32, #tpu.memory_space<vmem>>, vector<8x128xf32>
    %281 = arith.index_cast %c0_i32 : i32 to index
    %c0_107 = arith.constant 0 : index
    %c0_108 = arith.constant 0 : index
    %282 = vector.load %arg2[%281, %c0_107, %c0_108] : memref<4x128x384xf32, #tpu.memory_space<vmem>>, vector<1x128x384xf32>
    %283 = vector.shape_cast %282 : vector<1x128x384xf32> to vector<128x384xf32>
    %cst_109 = arith.constant dense<0.000000e+00> : vector<8x384xf32>
    %284 = tpu.matmul %280, %283, %cst_109 {dimension_numbers = #tpu.dot_dimension_numbers<[1], [0], [0], [1], [0, 0, 1, 1], [], []>} : vector<8x128xf32>, vector<128x384xf32>, vector<8x384xf32> -> vector<8x384xf32>
    %285 = vector.extract_strided_slice %279 {offsets = [0, 0], sizes = [8, 128], strides = [1, 1]} : vector<8x384xf32> to vector<8x128xf32>
    %286 = vector.extract_strided_slice %284 {offsets = [0, 0], sizes = [8, 128], strides = [1, 1]} : vector<8x384xf32> to vector<8x128xf32>
    %287 = arith.addf %285, %286 : vector<8x128xf32>
    %288 = arith.negf %287 : vector<8x128xf32>
    %289 = math.exp %288 : vector<8x128xf32>
    %cst_110 = arith.constant 1.000000e+00 : f32
    %290 = vector.broadcast %cst_110 : f32 to vector<8x128xf32>
    %291 = arith.addf %290, %289 : vector<8x128xf32>
    %292 = arith.divf %290, %291 : vector<8x128xf32>
    %293 = vector.extract_strided_slice %279 {offsets = [0, 128], sizes = [8, 128], strides = [1, 1]} : vector<8x384xf32> to vector<8x128xf32>
    %294 = vector.extract_strided_slice %284 {offsets = [0, 128], sizes = [8, 128], strides = [1, 1]} : vector<8x384xf32> to vector<8x128xf32>
    %295 = arith.addf %293, %294 : vector<8x128xf32>
    %296 = arith.negf %295 : vector<8x128xf32>
    %297 = math.exp %296 : vector<8x128xf32>
    %cst_111 = arith.constant 1.000000e+00 : f32
    %298 = vector.broadcast %cst_111 : f32 to vector<8x128xf32>
    %299 = arith.addf %298, %297 : vector<8x128xf32>
    %300 = arith.divf %298, %299 : vector<8x128xf32>
    %301 = vector.extract_strided_slice %279 {offsets = [0, 256], sizes = [8, 128], strides = [1, 1]} : vector<8x384xf32> to vector<8x128xf32>
    %302 = vector.extract_strided_slice %284 {offsets = [0, 256], sizes = [8, 128], strides = [1, 1]} : vector<8x384xf32> to vector<8x128xf32>
    %303 = arith.addf %302, %14 : vector<8x128xf32>
    %304 = arith.mulf %292, %303 : vector<8x128xf32>
    %305 = arith.addf %301, %304 : vector<8x128xf32>
    %306 = math.tanh %305 : vector<8x128xf32>
    %307 = arith.subf %280, %306 : vector<8x128xf32>
    %308 = arith.mulf %300, %307 : vector<8x128xf32>
    %309 = arith.addf %306, %308 : vector<8x128xf32>
    %c0_112 = arith.constant 0 : index
    %c0_113 = arith.constant 0 : index
    %310 = vector.load %arg12[%c0_112, %c0_113] : memref<8x128xf32, #tpu.memory_space<vmem>>, vector<8x128xf32>
    tpu.vector_store %arg12[%c0_112, %c0_113], %309 {strides = array<i32>} : memref<8x128xf32, #tpu.memory_space<vmem>>, vector<8x128xf32>,
    %311 = arith.index_cast %277 : i32 to index
    %c0_114 = arith.constant 0 : index
    %312 = vector.load %arg10[%311, %c0_114] : memref<64x128xf32, #tpu.memory_space<vmem>>, vector<8x128xf32>
    tpu.vector_store %arg10[%311, %c0_114], %309 {strides = array<i32>} : memref<64x128xf32, #tpu.memory_space<vmem>>, vector<8x128xf32>,
    %c8_i32_115 = arith.constant 8 : i32
    %c0_116 = arith.constant 0 : index
    %c0_117 = arith.constant 0 : index
    %313 = vector.load %arg10[%c0_116, %c0_117] : memref<64x128xf32, #tpu.memory_space<vmem>>, vector<64x128xf32>
    %c1 = arith.constant 1 : index
    %c0_118 = arith.constant 0 : index
    %c0_119 = arith.constant 0 : index
    %314 = vector.load %arg1[%c1, %c0_118, %c0_119] : memref<4x128x384xf32, #tpu.memory_space<vmem>>, vector<1x128x384xf32>
    %315 = vector.shape_cast %314 : vector<1x128x384xf32> to vector<128x384xf32>
    %cst_120 = arith.constant dense<0.000000e+00> : vector<64x384xf32>
    %316 = tpu.matmul %313, %315, %cst_120 {dimension_numbers = #tpu.dot_dimension_numbers<[1], [0], [0], [1], [0, 0, 1, 1], [], []>} : vector<64x128xf32>, vector<128x384xf32>, vector<64x384xf32> -> vector<64x384xf32>
    %c1_121 = arith.constant 1 : index
    %c0_122 = arith.constant 0 : index
    %c0_123 = arith.constant 0 : index
    %317 = vector.load %arg3[%c1_121, %c0_122, %c0_123] : memref<4x1x384xf32, #tpu.memory_space<vmem>>, vector<1x1x384xf32>
    %318 = vector.shape_cast %317 : vector<1x1x384xf32> to vector<1x384xf32>
    %319 = vector.broadcast %318 : vector<1x384xf32> to vector<64x384xf32>
    %320 = arith.addf %316, %319 : vector<64x384xf32>
    %c0_124 = arith.constant 0 : index
    %c0_125 = arith.constant 0 : index
    %321 = vector.load %arg11[%c0_124, %c0_125] : memref<64x384xf32, #tpu.memory_space<vmem>>, vector<64x384xf32>
    tpu.vector_store %arg11[%c0_124, %c0_125], %320 {strides = array<i32>} : memref<64x384xf32, #tpu.memory_space<vmem>>, vector<64x384xf32>,
    %c1_126 = arith.constant 1 : index
    %c0_127 = arith.constant 0 : index
    %c0_128 = arith.constant 0 : index
    %322 = vector.load %arg4[%c1_126, %c0_127, %c0_128] : memref<4x1x128xf32, #tpu.memory_space<vmem>>, vector<1x1x128xf32>
    %323 = vector.shape_cast %322 : vector<1x1x128xf32> to vector<1x128xf32>
    %324 = vector.shape_cast %323 : vector<1x128xf32> to vector<1x128xf32>
    %325 = vector.broadcast %324 : vector<1x128xf32> to vector<8x128xf32>
    %cst_129 = arith.constant 0.000000e+00 : f32
    %326 = vector.broadcast %cst_129 : f32 to vector<8x128xf32>
    %c0_130 = arith.constant 0 : index
    %c0_131 = arith.constant 0 : index
    %327 = vector.load %arg12[%c0_130, %c0_131] : memref<8x128xf32, #tpu.memory_space<vmem>>, vector<8x128xf32>
    tpu.vector_store %arg12[%c0_130, %c0_131], %326 {strides = array<i32>} : memref<8x128xf32, #tpu.memory_space<vmem>>, vector<8x128xf32>,
    %c1_i32_132 = arith.constant 1 : i32
    %c0_i32_133 = arith.constant 0 : i32
    %c8_i32_134 = arith.constant 8 : i32
    %328 = arith.muli %c0_i32_133, %c8_i32_134 : i32
    %329 = tpu.assume_multiple %328, 8 : i32
    %330 = arith.index_cast %329 : i32 to index
    %c0_135 = arith.constant 0 : index
    %331 = vector.load %arg11[%330, %c0_135] : memref<64x384xf32, #tpu.memory_space<vmem>>, vector<8x384xf32>
    %c0_136 = arith.constant 0 : index
    %c0_137 = arith.constant 0 : index
    %332 = vector.load %arg12[%c0_136, %c0_137] : memref<8x128xf32, #tpu.memory_space<vmem>>, vector<8x128xf32>
    %333 = arith.index_cast %c1_i32_132 : i32 to index
    %c0_138 = arith.constant 0 : index
    %c0_139 = arith.constant 0 : index
    %334 = vector.load %arg2[%333, %c0_138, %c0_139] : memref<4x128x384xf32, #tpu.memory_space<vmem>>, vector<1x128x384xf32>
    %335 = vector.shape_cast %334 : vector<1x128x384xf32> to vector<128x384xf32>
    %cst_140 = arith.constant dense<0.000000e+00> : vector<8x384xf32>
    %336 = tpu.matmul %332, %335, %cst_140 {dimension_numbers = #tpu.dot_dimension_numbers<[1], [0], [0], [1], [0, 0, 1, 1], [], []>} : vector<8x128xf32>, vector<128x384xf32>, vector<8x384xf32> -> vector<8x384xf32>
    %337 = vector.extract_strided_slice %331 {offsets = [0, 0], sizes = [8, 128], strides = [1, 1]} : vector<8x384xf32> to vector<8x128xf32>
    %338 = vector.extract_strided_slice %336 {offsets = [0, 0], sizes = [8, 128], strides = [1, 1]} : vector<8x384xf32> to vector<8x128xf32>
    %339 = arith.addf %337, %338 : vector<8x128xf32>
    %340 = arith.negf %339 : vector<8x128xf32>
    %341 = math.exp %340 : vector<8x128xf32>
    %cst_141 = arith.constant 1.000000e+00 : f32
    %342 = vector.broadcast %cst_141 : f32 to vector<8x128xf32>
    %343 = arith.addf %342, %341 : vector<8x128xf32>
    %344 = arith.divf %342, %343 : vector<8x128xf32>
    %345 = vector.extract_strided_slice %331 {offsets = [0, 128], sizes = [8, 128], strides = [1, 1]} : vector<8x384xf32> to vector<8x128xf32>
    %346 = vector.extract_strided_slice %336 {offsets = [0, 128], sizes = [8, 128], strides = [1, 1]} : vector<8x384xf32> to vector<8x128xf32>
    %347 = arith.addf %345, %346 : vector<8x128xf32>
    %348 = arith.negf %347 : vector<8x128xf32>
    %349 = math.exp %348 : vector<8x128xf32>
    %cst_142 = arith.constant 1.000000e+00 : f32
    %350 = vector.broadcast %cst_142 : f32 to vector<8x128xf32>
    %351 = arith.addf %350, %349 : vector<8x128xf32>
    %352 = arith.divf %350, %351 : vector<8x128xf32>
    %353 = vector.extract_strided_slice %331 {offsets = [0, 256], sizes = [8, 128], strides = [1, 1]} : vector<8x384xf32> to vector<8x128xf32>
    %354 = vector.extract_strided_slice %336 {offsets = [0, 256], sizes = [8, 128], strides = [1, 1]} : vector<8x384xf32> to vector<8x128xf32>
    %355 = arith.addf %354, %325 : vector<8x128xf32>
    %356 = arith.mulf %344, %355 : vector<8x128xf32>
    %357 = arith.addf %353, %356 : vector<8x128xf32>
    %358 = math.tanh %357 : vector<8x128xf32>
    %359 = arith.subf %332, %358 : vector<8x128xf32>
    %360 = arith.mulf %352, %359 : vector<8x128xf32>
    %361 = arith.addf %358, %360 : vector<8x128xf32>
    %c0_143 = arith.constant 0 : index
    %c0_144 = arith.constant 0 : index
    %362 = vector.load %arg12[%c0_143, %c0_144] : memref<8x128xf32, #tpu.memory_space<vmem>>, vector<8x128xf32>
    tpu.vector_store %arg12[%c0_143, %c0_144], %361 {strides = array<i32>} : memref<8x128xf32, #tpu.memory_space<vmem>>, vector<8x128xf32>,
    %363 = arith.index_cast %329 : i32 to index
    %c0_145 = arith.constant 0 : index
    %364 = vector.load %arg10[%363, %c0_145] : memref<64x128xf32, #tpu.memory_space<vmem>>, vector<8x128xf32>
    tpu.vector_store %arg10[%363, %c0_145], %361 {strides = array<i32>} : memref<64x128xf32, #tpu.memory_space<vmem>>, vector<8x128xf32>,
    %c1_i32_146 = arith.constant 1 : i32
    %c8_i32_147 = arith.constant 8 : i32
    %365 = arith.muli %c1_i32_146, %c8_i32_147 : i32
    %366 = tpu.assume_multiple %365, 8 : i32
    %367 = arith.index_cast %366 : i32 to index
    %c0_148 = arith.constant 0 : index
    %368 = vector.load %arg11[%367, %c0_148] : memref<64x384xf32, #tpu.memory_space<vmem>>, vector<8x384xf32>
    %c0_149 = arith.constant 0 : index
    %c0_150 = arith.constant 0 : index
    %369 = vector.load %arg12[%c0_149, %c0_150] : memref<8x128xf32, #tpu.memory_space<vmem>>, vector<8x128xf32>
    %370 = arith.index_cast %c1_i32_132 : i32 to index
    %c0_151 = arith.constant 0 : index
    %c0_152 = arith.constant 0 : index
    %371 = vector.load %arg2[%370, %c0_151, %c0_152] : memref<4x128x384xf32, #tpu.memory_space<vmem>>, vector<1x128x384xf32>
    %372 = vector.shape_cast %371 : vector<1x128x384xf32> to vector<128x384xf32>
    %cst_153 = arith.constant dense<0.000000e+00> : vector<8x384xf32>
    %373 = tpu.matmul %369, %372, %cst_153 {dimension_numbers = #tpu.dot_dimension_numbers<[1], [0], [0], [1], [0, 0, 1, 1], [], []>} : vector<8x128xf32>, vector<128x384xf32>, vector<8x384xf32> -> vector<8x384xf32>
    %374 = vector.extract_strided_slice %368 {offsets = [0, 0], sizes = [8, 128], strides = [1, 1]} : vector<8x384xf32> to vector<8x128xf32>
    %375 = vector.extract_strided_slice %373 {offsets = [0, 0], sizes = [8, 128], strides = [1, 1]} : vector<8x384xf32> to vector<8x128xf32>
    %376 = arith.addf %374, %375 : vector<8x128xf32>
    %377 = arith.negf %376 : vector<8x128xf32>
    %378 = math.exp %377 : vector<8x128xf32>
    %cst_154 = arith.constant 1.000000e+00 : f32
    %379 = vector.broadcast %cst_154 : f32 to vector<8x128xf32>
    %380 = arith.addf %379, %378 : vector<8x128xf32>
    %381 = arith.divf %379, %380 : vector<8x128xf32>
    %382 = vector.extract_strided_slice %368 {offsets = [0, 128], sizes = [8, 128], strides = [1, 1]} : vector<8x384xf32> to vector<8x128xf32>
    %383 = vector.extract_strided_slice %373 {offsets = [0, 128], sizes = [8, 128], strides = [1, 1]} : vector<8x384xf32> to vector<8x128xf32>
    %384 = arith.addf %382, %383 : vector<8x128xf32>
    %385 = arith.negf %384 : vector<8x128xf32>
    %386 = math.exp %385 : vector<8x128xf32>
    %cst_155 = arith.constant 1.000000e+00 : f32
    %387 = vector.broadcast %cst_155 : f32 to vector<8x128xf32>
    %388 = arith.addf %387, %386 : vector<8x128xf32>
    %389 = arith.divf %387, %388 : vector<8x128xf32>
    %390 = vector.extract_strided_slice %368 {offsets = [0, 256], sizes = [8, 128], strides = [1, 1]} : vector<8x384xf32> to vector<8x128xf32>
    %391 = vector.extract_strided_slice %373 {offsets = [0, 256], sizes = [8, 128], strides = [1, 1]} : vector<8x384xf32> to vector<8x128xf32>
    %392 = arith.addf %391, %325 : vector<8x128xf32>
    %393 = arith.mulf %381, %392 : vector<8x128xf32>
    %394 = arith.addf %390, %393 : vector<8x128xf32>
    %395 = math.tanh %394 : vector<8x128xf32>
    %396 = arith.subf %369, %395 : vector<8x128xf32>
    %397 = arith.mulf %389, %396 : vector<8x128xf32>
    %398 = arith.addf %395, %397 : vector<8x128xf32>
    %c0_156 = arith.constant 0 : index
    %c0_157 = arith.constant 0 : index
    %399 = vector.load %arg12[%c0_156, %c0_157] : memref<8x128xf32, #tpu.memory_space<vmem>>, vector<8x128xf32>
    tpu.vector_store %arg12[%c0_156, %c0_157], %398 {strides = array<i32>} : memref<8x128xf32, #tpu.memory_space<vmem>>, vector<8x128xf32>,
    %400 = arith.index_cast %366 : i32 to index
    %c0_158 = arith.constant 0 : index
    %401 = vector.load %arg10[%400, %c0_158] : memref<64x128xf32, #tpu.memory_space<vmem>>, vector<8x128xf32>
    tpu.vector_store %arg10[%400, %c0_158], %398 {strides = array<i32>} : memref<64x128xf32, #tpu.memory_space<vmem>>, vector<8x128xf32>,
    %c2_i32_159 = arith.constant 2 : i32
    %c8_i32_160 = arith.constant 8 : i32
    %402 = arith.muli %c2_i32_159, %c8_i32_160 : i32
    %403 = tpu.assume_multiple %402, 8 : i32
    %404 = arith.index_cast %403 : i32 to index
    %c0_161 = arith.constant 0 : index
    %405 = vector.load %arg11[%404, %c0_161] : memref<64x384xf32, #tpu.memory_space<vmem>>, vector<8x384xf32>
    %c0_162 = arith.constant 0 : index
    %c0_163 = arith.constant 0 : index
    %406 = vector.load %arg12[%c0_162, %c0_163] : memref<8x128xf32, #tpu.memory_space<vmem>>, vector<8x128xf32>
    %407 = arith.index_cast %c1_i32_132 : i32 to index
    %c0_164 = arith.constant 0 : index
    %c0_165 = arith.constant 0 : index
    %408 = vector.load %arg2[%407, %c0_164, %c0_165] : memref<4x128x384xf32, #tpu.memory_space<vmem>>, vector<1x128x384xf32>
    %409 = vector.shape_cast %408 : vector<1x128x384xf32> to vector<128x384xf32>
    %cst_166 = arith.constant dense<0.000000e+00> : vector<8x384xf32>
    %410 = tpu.matmul %406, %409, %cst_166 {dimension_numbers = #tpu.dot_dimension_numbers<[1], [0], [0], [1], [0, 0, 1, 1], [], []>} : vector<8x128xf32>, vector<128x384xf32>, vector<8x384xf32> -> vector<8x384xf32>
    %411 = vector.extract_strided_slice %405 {offsets = [0, 0], sizes = [8, 128], strides = [1, 1]} : vector<8x384xf32> to vector<8x128xf32>
    %412 = vector.extract_strided_slice %410 {offsets = [0, 0], sizes = [8, 128], strides = [1, 1]} : vector<8x384xf32> to vector<8x128xf32>
    %413 = arith.addf %411, %412 : vector<8x128xf32>
    %414 = arith.negf %413 : vector<8x128xf32>
    %415 = math.exp %414 : vector<8x128xf32>
    %cst_167 = arith.constant 1.000000e+00 : f32
    %416 = vector.broadcast %cst_167 : f32 to vector<8x128xf32>
    %417 = arith.addf %416, %415 : vector<8x128xf32>
    %418 = arith.divf %416, %417 : vector<8x128xf32>
    %419 = vector.extract_strided_slice %405 {offsets = [0, 128], sizes = [8, 128], strides = [1, 1]} : vector<8x384xf32> to vector<8x128xf32>
    %420 = vector.extract_strided_slice %410 {offsets = [0, 128], sizes = [8, 128], strides = [1, 1]} : vector<8x384xf32> to vector<8x128xf32>
    %421 = arith.addf %419, %420 : vector<8x128xf32>
    %422 = arith.negf %421 : vector<8x128xf32>
    %423 = math.exp %422 : vector<8x128xf32>
    %cst_168 = arith.constant 1.000000e+00 : f32
    %424 = vector.broadcast %cst_168 : f32 to vector<8x128xf32>
    %425 = arith.addf %424, %423 : vector<8x128xf32>
    %426 = arith.divf %424, %425 : vector<8x128xf32>
    %427 = vector.extract_strided_slice %405 {offsets = [0, 256], sizes = [8, 128], strides = [1, 1]} : vector<8x384xf32> to vector<8x128xf32>
    %428 = vector.extract_strided_slice %410 {offsets = [0, 256], sizes = [8, 128], strides = [1, 1]} : vector<8x384xf32> to vector<8x128xf32>
    %429 = arith.addf %428, %325 : vector<8x128xf32>
    %430 = arith.mulf %418, %429 : vector<8x128xf32>
    %431 = arith.addf %427, %430 : vector<8x128xf32>
    %432 = math.tanh %431 : vector<8x128xf32>
    %433 = arith.subf %406, %432 : vector<8x128xf32>
    %434 = arith.mulf %426, %433 : vector<8x128xf32>
    %435 = arith.addf %432, %434 : vector<8x128xf32>
    %c0_169 = arith.constant 0 : index
    %c0_170 = arith.constant 0 : index
    %436 = vector.load %arg12[%c0_169, %c0_170] : memref<8x128xf32, #tpu.memory_space<vmem>>, vector<8x128xf32>
    tpu.vector_store %arg12[%c0_169, %c0_170], %435 {strides = array<i32>} : memref<8x128xf32, #tpu.memory_space<vmem>>, vector<8x128xf32>,
    %437 = arith.index_cast %403 : i32 to index
    %c0_171 = arith.constant 0 : index
    %438 = vector.load %arg10[%437, %c0_171] : memref<64x128xf32, #tpu.memory_space<vmem>>, vector<8x128xf32>
    tpu.vector_store %arg10[%437, %c0_171], %435 {strides = array<i32>} : memref<64x128xf32, #tpu.memory_space<vmem>>, vector<8x128xf32>,
    %c3_i32_172 = arith.constant 3 : i32
    %c8_i32_173 = arith.constant 8 : i32
    %439 = arith.muli %c3_i32_172, %c8_i32_173 : i32
    %440 = tpu.assume_multiple %439, 8 : i32
    %441 = arith.index_cast %440 : i32 to index
    %c0_174 = arith.constant 0 : index
    %442 = vector.load %arg11[%441, %c0_174] : memref<64x384xf32, #tpu.memory_space<vmem>>, vector<8x384xf32>
    %c0_175 = arith.constant 0 : index
    %c0_176 = arith.constant 0 : index
    %443 = vector.load %arg12[%c0_175, %c0_176] : memref<8x128xf32, #tpu.memory_space<vmem>>, vector<8x128xf32>
    %444 = arith.index_cast %c1_i32_132 : i32 to index
    %c0_177 = arith.constant 0 : index
    %c0_178 = arith.constant 0 : index
    %445 = vector.load %arg2[%444, %c0_177, %c0_178] : memref<4x128x384xf32, #tpu.memory_space<vmem>>, vector<1x128x384xf32>
    %446 = vector.shape_cast %445 : vector<1x128x384xf32> to vector<128x384xf32>
    %cst_179 = arith.constant dense<0.000000e+00> : vector<8x384xf32>
    %447 = tpu.matmul %443, %446, %cst_179 {dimension_numbers = #tpu.dot_dimension_numbers<[1], [0], [0], [1], [0, 0, 1, 1], [], []>} : vector<8x128xf32>, vector<128x384xf32>, vector<8x384xf32> -> vector<8x384xf32>
    %448 = vector.extract_strided_slice %442 {offsets = [0, 0], sizes = [8, 128], strides = [1, 1]} : vector<8x384xf32> to vector<8x128xf32>
    %449 = vector.extract_strided_slice %447 {offsets = [0, 0], sizes = [8, 128], strides = [1, 1]} : vector<8x384xf32> to vector<8x128xf32>
    %450 = arith.addf %448, %449 : vector<8x128xf32>
    %451 = arith.negf %450 : vector<8x128xf32>
    %452 = math.exp %451 : vector<8x128xf32>
    %cst_180 = arith.constant 1.000000e+00 : f32
    %453 = vector.broadcast %cst_180 : f32 to vector<8x128xf32>
    %454 = arith.addf %453, %452 : vector<8x128xf32>
    %455 = arith.divf %453, %454 : vector<8x128xf32>
    %456 = vector.extract_strided_slice %442 {offsets = [0, 128], sizes = [8, 128], strides = [1, 1]} : vector<8x384xf32> to vector<8x128xf32>
    %457 = vector.extract_strided_slice %447 {offsets = [0, 128], sizes = [8, 128], strides = [1, 1]} : vector<8x384xf32> to vector<8x128xf32>
    %458 = arith.addf %456, %457 : vector<8x128xf32>
    %459 = arith.negf %458 : vector<8x128xf32>
    %460 = math.exp %459 : vector<8x128xf32>
    %cst_181 = arith.constant 1.000000e+00 : f32
    %461 = vector.broadcast %cst_181 : f32 to vector<8x128xf32>
    %462 = arith.addf %461, %460 : vector<8x128xf32>
    %463 = arith.divf %461, %462 : vector<8x128xf32>
    %464 = vector.extract_strided_slice %442 {offsets = [0, 256], sizes = [8, 128], strides = [1, 1]} : vector<8x384xf32> to vector<8x128xf32>
    %465 = vector.extract_strided_slice %447 {offsets = [0, 256], sizes = [8, 128], strides = [1, 1]} : vector<8x384xf32> to vector<8x128xf32>
    %466 = arith.addf %465, %325 : vector<8x128xf32>
    %467 = arith.mulf %455, %466 : vector<8x128xf32>
    %468 = arith.addf %464, %467 : vector<8x128xf32>
    %469 = math.tanh %468 : vector<8x128xf32>
    %470 = arith.subf %443, %469 : vector<8x128xf32>
    %471 = arith.mulf %463, %470 : vector<8x128xf32>
    %472 = arith.addf %469, %471 : vector<8x128xf32>
    %c0_182 = arith.constant 0 : index
    %c0_183 = arith.constant 0 : index
    %473 = vector.load %arg12[%c0_182, %c0_183] : memref<8x128xf32, #tpu.memory_space<vmem>>, vector<8x128xf32>
    tpu.vector_store %arg12[%c0_182, %c0_183], %472 {strides = array<i32>} : memref<8x128xf32, #tpu.memory_space<vmem>>, vector<8x128xf32>,
    %474 = arith.index_cast %440 : i32 to index
    %c0_184 = arith.constant 0 : index
    %475 = vector.load %arg10[%474, %c0_184] : memref<64x128xf32, #tpu.memory_space<vmem>>, vector<8x128xf32>
    tpu.vector_store %arg10[%474, %c0_184], %472 {strides = array<i32>} : memref<64x128xf32, #tpu.memory_space<vmem>>, vector<8x128xf32>,
    %c4_i32_185 = arith.constant 4 : i32
    %c8_i32_186 = arith.constant 8 : i32
    %476 = arith.muli %c4_i32_185, %c8_i32_186 : i32
    %477 = tpu.assume_multiple %476, 8 : i32
    %478 = arith.index_cast %477 : i32 to index
    %c0_187 = arith.constant 0 : index
    %479 = vector.load %arg11[%478, %c0_187] : memref<64x384xf32, #tpu.memory_space<vmem>>, vector<8x384xf32>
    %c0_188 = arith.constant 0 : index
    %c0_189 = arith.constant 0 : index
    %480 = vector.load %arg12[%c0_188, %c0_189] : memref<8x128xf32, #tpu.memory_space<vmem>>, vector<8x128xf32>
    %481 = arith.index_cast %c1_i32_132 : i32 to index
    %c0_190 = arith.constant 0 : index
    %c0_191 = arith.constant 0 : index
    %482 = vector.load %arg2[%481, %c0_190, %c0_191] : memref<4x128x384xf32, #tpu.memory_space<vmem>>, vector<1x128x384xf32>
    %483 = vector.shape_cast %482 : vector<1x128x384xf32> to vector<128x384xf32>
    %cst_192 = arith.constant dense<0.000000e+00> : vector<8x384xf32>
    %484 = tpu.matmul %480, %483, %cst_192 {dimension_numbers = #tpu.dot_dimension_numbers<[1], [0], [0], [1], [0, 0, 1, 1], [], []>} : vector<8x128xf32>, vector<128x384xf32>, vector<8x384xf32> -> vector<8x384xf32>
    %485 = vector.extract_strided_slice %479 {offsets = [0, 0], sizes = [8, 128], strides = [1, 1]} : vector<8x384xf32> to vector<8x128xf32>
    %486 = vector.extract_strided_slice %484 {offsets = [0, 0], sizes = [8, 128], strides = [1, 1]} : vector<8x384xf32> to vector<8x128xf32>
    %487 = arith.addf %485, %486 : vector<8x128xf32>
    %488 = arith.negf %487 : vector<8x128xf32>
    %489 = math.exp %488 : vector<8x128xf32>
    %cst_193 = arith.constant 1.000000e+00 : f32
    %490 = vector.broadcast %cst_193 : f32 to vector<8x128xf32>
    %491 = arith.addf %490, %489 : vector<8x128xf32>
    %492 = arith.divf %490, %491 : vector<8x128xf32>
    %493 = vector.extract_strided_slice %479 {offsets = [0, 128], sizes = [8, 128], strides = [1, 1]} : vector<8x384xf32> to vector<8x128xf32>
    %494 = vector.extract_strided_slice %484 {offsets = [0, 128], sizes = [8, 128], strides = [1, 1]} : vector<8x384xf32> to vector<8x128xf32>
    %495 = arith.addf %493, %494 : vector<8x128xf32>
    %496 = arith.negf %495 : vector<8x128xf32>
    %497 = math.exp %496 : vector<8x128xf32>
    %cst_194 = arith.constant 1.000000e+00 : f32
    %498 = vector.broadcast %cst_194 : f32 to vector<8x128xf32>
    %499 = arith.addf %498, %497 : vector<8x128xf32>
    %500 = arith.divf %498, %499 : vector<8x128xf32>
    %501 = vector.extract_strided_slice %479 {offsets = [0, 256], sizes = [8, 128], strides = [1, 1]} : vector<8x384xf32> to vector<8x128xf32>
    %502 = vector.extract_strided_slice %484 {offsets = [0, 256], sizes = [8, 128], strides = [1, 1]} : vector<8x384xf32> to vector<8x128xf32>
    %503 = arith.addf %502, %325 : vector<8x128xf32>
    %504 = arith.mulf %492, %503 : vector<8x128xf32>
    %505 = arith.addf %501, %504 : vector<8x128xf32>
    %506 = math.tanh %505 : vector<8x128xf32>
    %507 = arith.subf %480, %506 : vector<8x128xf32>
    %508 = arith.mulf %500, %507 : vector<8x128xf32>
    %509 = arith.addf %506, %508 : vector<8x128xf32>
    %c0_195 = arith.constant 0 : index
    %c0_196 = arith.constant 0 : index
    %510 = vector.load %arg12[%c0_195, %c0_196] : memref<8x128xf32, #tpu.memory_space<vmem>>, vector<8x128xf32>
    tpu.vector_store %arg12[%c0_195, %c0_196], %509 {strides = array<i32>} : memref<8x128xf32, #tpu.memory_space<vmem>>, vector<8x128xf32>,
    %511 = arith.index_cast %477 : i32 to index
    %c0_197 = arith.constant 0 : index
    %512 = vector.load %arg10[%511, %c0_197] : memref<64x128xf32, #tpu.memory_space<vmem>>, vector<8x128xf32>
    tpu.vector_store %arg10[%511, %c0_197], %509 {strides = array<i32>} : memref<64x128xf32, #tpu.memory_space<vmem>>, vector<8x128xf32>,
    %c5_i32_198 = arith.constant 5 : i32
    %c8_i32_199 = arith.constant 8 : i32
    %513 = arith.muli %c5_i32_198, %c8_i32_199 : i32
    %514 = tpu.assume_multiple %513, 8 : i32
    %515 = arith.index_cast %514 : i32 to index
    %c0_200 = arith.constant 0 : index
    %516 = vector.load %arg11[%515, %c0_200] : memref<64x384xf32, #tpu.memory_space<vmem>>, vector<8x384xf32>
    %c0_201 = arith.constant 0 : index
    %c0_202 = arith.constant 0 : index
    %517 = vector.load %arg12[%c0_201, %c0_202] : memref<8x128xf32, #tpu.memory_space<vmem>>, vector<8x128xf32>
    %518 = arith.index_cast %c1_i32_132 : i32 to index
    %c0_203 = arith.constant 0 : index
    %c0_204 = arith.constant 0 : index
    %519 = vector.load %arg2[%518, %c0_203, %c0_204] : memref<4x128x384xf32, #tpu.memory_space<vmem>>, vector<1x128x384xf32>
    %520 = vector.shape_cast %519 : vector<1x128x384xf32> to vector<128x384xf32>
    %cst_205 = arith.constant dense<0.000000e+00> : vector<8x384xf32>
    %521 = tpu.matmul %517, %520, %cst_205 {dimension_numbers = #tpu.dot_dimension_numbers<[1], [0], [0], [1], [0, 0, 1, 1], [], []>} : vector<8x128xf32>, vector<128x384xf32>, vector<8x384xf32> -> vector<8x384xf32>
    %522 = vector.extract_strided_slice %516 {offsets = [0, 0], sizes = [8, 128], strides = [1, 1]} : vector<8x384xf32> to vector<8x128xf32>
    %523 = vector.extract_strided_slice %521 {offsets = [0, 0], sizes = [8, 128], strides = [1, 1]} : vector<8x384xf32> to vector<8x128xf32>
    %524 = arith.addf %522, %523 : vector<8x128xf32>
    %525 = arith.negf %524 : vector<8x128xf32>
    %526 = math.exp %525 : vector<8x128xf32>
    %cst_206 = arith.constant 1.000000e+00 : f32
    %527 = vector.broadcast %cst_206 : f32 to vector<8x128xf32>
    %528 = arith.addf %527, %526 : vector<8x128xf32>
    %529 = arith.divf %527, %528 : vector<8x128xf32>
    %530 = vector.extract_strided_slice %516 {offsets = [0, 128], sizes = [8, 128], strides = [1, 1]} : vector<8x384xf32> to vector<8x128xf32>
    %531 = vector.extract_strided_slice %521 {offsets = [0, 128], sizes = [8, 128], strides = [1, 1]} : vector<8x384xf32> to vector<8x128xf32>
    %532 = arith.addf %530, %531 : vector<8x128xf32>
    %533 = arith.negf %532 : vector<8x128xf32>
    %534 = math.exp %533 : vector<8x128xf32>
    %cst_207 = arith.constant 1.000000e+00 : f32
    %535 = vector.broadcast %cst_207 : f32 to vector<8x128xf32>
    %536 = arith.addf %535, %534 : vector<8x128xf32>
    %537 = arith.divf %535, %536 : vector<8x128xf32>
    %538 = vector.extract_strided_slice %516 {offsets = [0, 256], sizes = [8, 128], strides = [1, 1]} : vector<8x384xf32> to vector<8x128xf32>
    %539 = vector.extract_strided_slice %521 {offsets = [0, 256], sizes = [8, 128], strides = [1, 1]} : vector<8x384xf32> to vector<8x128xf32>
    %540 = arith.addf %539, %325 : vector<8x128xf32>
    %541 = arith.mulf %529, %540 : vector<8x128xf32>
    %542 = arith.addf %538, %541 : vector<8x128xf32>
    %543 = math.tanh %542 : vector<8x128xf32>
    %544 = arith.subf %517, %543 : vector<8x128xf32>
    %545 = arith.mulf %537, %544 : vector<8x128xf32>
    %546 = arith.addf %543, %545 : vector<8x128xf32>
    %c0_208 = arith.constant 0 : index
    %c0_209 = arith.constant 0 : index
    %547 = vector.load %arg12[%c0_208, %c0_209] : memref<8x128xf32, #tpu.memory_space<vmem>>, vector<8x128xf32>
    tpu.vector_store %arg12[%c0_208, %c0_209], %546 {strides = array<i32>} : memref<8x128xf32, #tpu.memory_space<vmem>>, vector<8x128xf32>,
    %548 = arith.index_cast %514 : i32 to index
    %c0_210 = arith.constant 0 : index
    %549 = vector.load %arg10[%548, %c0_210] : memref<64x128xf32, #tpu.memory_space<vmem>>, vector<8x128xf32>
    tpu.vector_store %arg10[%548, %c0_210], %546 {strides = array<i32>} : memref<64x128xf32, #tpu.memory_space<vmem>>, vector<8x128xf32>,
    %c6_i32_211 = arith.constant 6 : i32
    %c8_i32_212 = arith.constant 8 : i32
    %550 = arith.muli %c6_i32_211, %c8_i32_212 : i32
    %551 = tpu.assume_multiple %550, 8 : i32
    %552 = arith.index_cast %551 : i32 to index
    %c0_213 = arith.constant 0 : index
    %553 = vector.load %arg11[%552, %c0_213] : memref<64x384xf32, #tpu.memory_space<vmem>>, vector<8x384xf32>
    %c0_214 = arith.constant 0 : index
    %c0_215 = arith.constant 0 : index
    %554 = vector.load %arg12[%c0_214, %c0_215] : memref<8x128xf32, #tpu.memory_space<vmem>>, vector<8x128xf32>
    %555 = arith.index_cast %c1_i32_132 : i32 to index
    %c0_216 = arith.constant 0 : index
    %c0_217 = arith.constant 0 : index
    %556 = vector.load %arg2[%555, %c0_216, %c0_217] : memref<4x128x384xf32, #tpu.memory_space<vmem>>, vector<1x128x384xf32>
    %557 = vector.shape_cast %556 : vector<1x128x384xf32> to vector<128x384xf32>
    %cst_218 = arith.constant dense<0.000000e+00> : vector<8x384xf32>
    %558 = tpu.matmul %554, %557, %cst_218 {dimension_numbers = #tpu.dot_dimension_numbers<[1], [0], [0], [1], [0, 0, 1, 1], [], []>} : vector<8x128xf32>, vector<128x384xf32>, vector<8x384xf32> -> vector<8x384xf32>
    %559 = vector.extract_strided_slice %553 {offsets = [0, 0], sizes = [8, 128], strides = [1, 1]} : vector<8x384xf32> to vector<8x128xf32>
    %560 = vector.extract_strided_slice %558 {offsets = [0, 0], sizes = [8, 128], strides = [1, 1]} : vector<8x384xf32> to vector<8x128xf32>
    %561 = arith.addf %559, %560 : vector<8x128xf32>
    %562 = arith.negf %561 : vector<8x128xf32>
    %563 = math.exp %562 : vector<8x128xf32>
    %cst_219 = arith.constant 1.000000e+00 : f32
    %564 = vector.broadcast %cst_219 : f32 to vector<8x128xf32>
    %565 = arith.addf %564, %563 : vector<8x128xf32>
    %566 = arith.divf %564, %565 : vector<8x128xf32>
    %567 = vector.extract_strided_slice %553 {offsets = [0, 128], sizes = [8, 128], strides = [1, 1]} : vector<8x384xf32> to vector<8x128xf32>
    %568 = vector.extract_strided_slice %558 {offsets = [0, 128], sizes = [8, 128], strides = [1, 1]} : vector<8x384xf32> to vector<8x128xf32>
    %569 = arith.addf %567, %568 : vector<8x128xf32>
    %570 = arith.negf %569 : vector<8x128xf32>
    %571 = math.exp %570 : vector<8x128xf32>
    %cst_220 = arith.constant 1.000000e+00 : f32
    %572 = vector.broadcast %cst_220 : f32 to vector<8x128xf32>
    %573 = arith.addf %572, %571 : vector<8x128xf32>
    %574 = arith.divf %572, %573 : vector<8x128xf32>
    %575 = vector.extract_strided_slice %553 {offsets = [0, 256], sizes = [8, 128], strides = [1, 1]} : vector<8x384xf32> to vector<8x128xf32>
    %576 = vector.extract_strided_slice %558 {offsets = [0, 256], sizes = [8, 128], strides = [1, 1]} : vector<8x384xf32> to vector<8x128xf32>
    %577 = arith.addf %576, %325 : vector<8x128xf32>
    %578 = arith.mulf %566, %577 : vector<8x128xf32>
    %579 = arith.addf %575, %578 : vector<8x128xf32>
    %580 = math.tanh %579 : vector<8x128xf32>
    %581 = arith.subf %554, %580 : vector<8x128xf32>
    %582 = arith.mulf %574, %581 : vector<8x128xf32>
    %583 = arith.addf %580, %582 : vector<8x128xf32>
    %c0_221 = arith.constant 0 : index
    %c0_222 = arith.constant 0 : index
    %584 = vector.load %arg12[%c0_221, %c0_222] : memref<8x128xf32, #tpu.memory_space<vmem>>, vector<8x128xf32>
    tpu.vector_store %arg12[%c0_221, %c0_222], %583 {strides = array<i32>} : memref<8x128xf32, #tpu.memory_space<vmem>>, vector<8x128xf32>,
    %585 = arith.index_cast %551 : i32 to index
    %c0_223 = arith.constant 0 : index
    %586 = vector.load %arg10[%585, %c0_223] : memref<64x128xf32, #tpu.memory_space<vmem>>, vector<8x128xf32>
    tpu.vector_store %arg10[%585, %c0_223], %583 {strides = array<i32>} : memref<64x128xf32, #tpu.memory_space<vmem>>, vector<8x128xf32>,
    %c7_i32_224 = arith.constant 7 : i32
    %c8_i32_225 = arith.constant 8 : i32
    %587 = arith.muli %c7_i32_224, %c8_i32_225 : i32
    %588 = tpu.assume_multiple %587, 8 : i32
    %589 = arith.index_cast %588 : i32 to index
    %c0_226 = arith.constant 0 : index
    %590 = vector.load %arg11[%589, %c0_226] : memref<64x384xf32, #tpu.memory_space<vmem>>, vector<8x384xf32>
    %c0_227 = arith.constant 0 : index
    %c0_228 = arith.constant 0 : index
    %591 = vector.load %arg12[%c0_227, %c0_228] : memref<8x128xf32, #tpu.memory_space<vmem>>, vector<8x128xf32>
    %592 = arith.index_cast %c1_i32_132 : i32 to index
    %c0_229 = arith.constant 0 : index
    %c0_230 = arith.constant 0 : index
    %593 = vector.load %arg2[%592, %c0_229, %c0_230] : memref<4x128x384xf32, #tpu.memory_space<vmem>>, vector<1x128x384xf32>
    %594 = vector.shape_cast %593 : vector<1x128x384xf32> to vector<128x384xf32>
    %cst_231 = arith.constant dense<0.000000e+00> : vector<8x384xf32>
    %595 = tpu.matmul %591, %594, %cst_231 {dimension_numbers = #tpu.dot_dimension_numbers<[1], [0], [0], [1], [0, 0, 1, 1], [], []>} : vector<8x128xf32>, vector<128x384xf32>, vector<8x384xf32> -> vector<8x384xf32>
    %596 = vector.extract_strided_slice %590 {offsets = [0, 0], sizes = [8, 128], strides = [1, 1]} : vector<8x384xf32> to vector<8x128xf32>
    %597 = vector.extract_strided_slice %595 {offsets = [0, 0], sizes = [8, 128], strides = [1, 1]} : vector<8x384xf32> to vector<8x128xf32>
    %598 = arith.addf %596, %597 : vector<8x128xf32>
    %599 = arith.negf %598 : vector<8x128xf32>
    %600 = math.exp %599 : vector<8x128xf32>
    %cst_232 = arith.constant 1.000000e+00 : f32
    %601 = vector.broadcast %cst_232 : f32 to vector<8x128xf32>
    %602 = arith.addf %601, %600 : vector<8x128xf32>
    %603 = arith.divf %601, %602 : vector<8x128xf32>
    %604 = vector.extract_strided_slice %590 {offsets = [0, 128], sizes = [8, 128], strides = [1, 1]} : vector<8x384xf32> to vector<8x128xf32>
    %605 = vector.extract_strided_slice %595 {offsets = [0, 128], sizes = [8, 128], strides = [1, 1]} : vector<8x384xf32> to vector<8x128xf32>
    %606 = arith.addf %604, %605 : vector<8x128xf32>
    %607 = arith.negf %606 : vector<8x128xf32>
    %608 = math.exp %607 : vector<8x128xf32>
    %cst_233 = arith.constant 1.000000e+00 : f32
    %609 = vector.broadcast %cst_233 : f32 to vector<8x128xf32>
    %610 = arith.addf %609, %608 : vector<8x128xf32>
    %611 = arith.divf %609, %610 : vector<8x128xf32>
    %612 = vector.extract_strided_slice %590 {offsets = [0, 256], sizes = [8, 128], strides = [1, 1]} : vector<8x384xf32> to vector<8x128xf32>
    %613 = vector.extract_strided_slice %595 {offsets = [0, 256], sizes = [8, 128], strides = [1, 1]} : vector<8x384xf32> to vector<8x128xf32>
    %614 = arith.addf %613, %325 : vector<8x128xf32>
    %615 = arith.mulf %603, %614 : vector<8x128xf32>
    %616 = arith.addf %612, %615 : vector<8x128xf32>
    %617 = math.tanh %616 : vector<8x128xf32>
    %618 = arith.subf %591, %617 : vector<8x128xf32>
    %619 = arith.mulf %611, %618 : vector<8x128xf32>
    %620 = arith.addf %617, %619 : vector<8x128xf32>
    %c0_234 = arith.constant 0 : index
    %c0_235 = arith.constant 0 : index
    %621 = vector.load %arg12[%c0_234, %c0_235] : memref<8x128xf32, #tpu.memory_space<vmem>>, vector<8x128xf32>
    tpu.vector_store %arg12[%c0_234, %c0_235], %620 {strides = array<i32>} : memref<8x128xf32, #tpu.memory_space<vmem>>, vector<8x128xf32>,
    %622 = arith.index_cast %588 : i32 to index
    %c0_236 = arith.constant 0 : index
    %623 = vector.load %arg10[%622, %c0_236] : memref<64x128xf32, #tpu.memory_space<vmem>>, vector<8x128xf32>
    tpu.vector_store %arg10[%622, %c0_236], %620 {strides = array<i32>} : memref<64x128xf32, #tpu.memory_space<vmem>>, vector<8x128xf32>,
    %c8_i32_237 = arith.constant 8 : i32
    %c0_238 = arith.constant 0 : index
    %c0_239 = arith.constant 0 : index
    %624 = vector.load %arg10[%c0_238, %c0_239] : memref<64x128xf32, #tpu.memory_space<vmem>>, vector<64x128xf32>
    %c2 = arith.constant 2 : index
    %c0_240 = arith.constant 0 : index
    %c0_241 = arith.constant 0 : index
    %625 = vector.load %arg1[%c2, %c0_240, %c0_241] : memref<4x128x384xf32, #tpu.memory_space<vmem>>, vector<1x128x384xf32>
    %626 = vector.shape_cast %625 : vector<1x128x384xf32> to vector<128x384xf32>
    %cst_242 = arith.constant dense<0.000000e+00> : vector<64x384xf32>
    %627 = tpu.matmul %624, %626, %cst_242 {dimension_numbers = #tpu.dot_dimension_numbers<[1], [0], [0], [1], [0, 0, 1, 1], [], []>} : vector<64x128xf32>, vector<128x384xf32>, vector<64x384xf32> -> vector<64x384xf32>
    %c2_243 = arith.constant 2 : index
    %c0_244 = arith.constant 0 : index
    %c0_245 = arith.constant 0 : index
    %628 = vector.load %arg3[%c2_243, %c0_244, %c0_245] : memref<4x1x384xf32, #tpu.memory_space<vmem>>, vector<1x1x384xf32>
    %629 = vector.shape_cast %628 : vector<1x1x384xf32> to vector<1x384xf32>
    %630 = vector.broadcast %629 : vector<1x384xf32> to vector<64x384xf32>
    %631 = arith.addf %627, %630 : vector<64x384xf32>
    %c0_246 = arith.constant 0 : index
    %c0_247 = arith.constant 0 : index
    %632 = vector.load %arg11[%c0_246, %c0_247] : memref<64x384xf32, #tpu.memory_space<vmem>>, vector<64x384xf32>
    tpu.vector_store %arg11[%c0_246, %c0_247], %631 {strides = array<i32>} : memref<64x384xf32, #tpu.memory_space<vmem>>, vector<64x384xf32>,
    %c2_248 = arith.constant 2 : index
    %c0_249 = arith.constant 0 : index
    %c0_250 = arith.constant 0 : index
    %633 = vector.load %arg4[%c2_248, %c0_249, %c0_250] : memref<4x1x128xf32, #tpu.memory_space<vmem>>, vector<1x1x128xf32>
    %634 = vector.shape_cast %633 : vector<1x1x128xf32> to vector<1x128xf32>
    %635 = vector.shape_cast %634 : vector<1x128xf32> to vector<1x128xf32>
    %636 = vector.broadcast %635 : vector<1x128xf32> to vector<8x128xf32>
    %cst_251 = arith.constant 0.000000e+00 : f32
    %637 = vector.broadcast %cst_251 : f32 to vector<8x128xf32>
    %c0_252 = arith.constant 0 : index
    %c0_253 = arith.constant 0 : index
    %638 = vector.load %arg12[%c0_252, %c0_253] : memref<8x128xf32, #tpu.memory_space<vmem>>, vector<8x128xf32>
    tpu.vector_store %arg12[%c0_252, %c0_253], %637 {strides = array<i32>} : memref<8x128xf32, #tpu.memory_space<vmem>>, vector<8x128xf32>,
    %c2_i32_254 = arith.constant 2 : i32
    %c0_i32_255 = arith.constant 0 : i32
    %c8_i32_256 = arith.constant 8 : i32
    %639 = arith.muli %c0_i32_255, %c8_i32_256 : i32
    %640 = tpu.assume_multiple %639, 8 : i32
    %641 = arith.index_cast %640 : i32 to index
    %c0_257 = arith.constant 0 : index
    %642 = vector.load %arg11[%641, %c0_257] : memref<64x384xf32, #tpu.memory_space<vmem>>, vector<8x384xf32>
    %c0_258 = arith.constant 0 : index
    %c0_259 = arith.constant 0 : index
    %643 = vector.load %arg12[%c0_258, %c0_259] : memref<8x128xf32, #tpu.memory_space<vmem>>, vector<8x128xf32>
    %644 = arith.index_cast %c2_i32_254 : i32 to index
    %c0_260 = arith.constant 0 : index
    %c0_261 = arith.constant 0 : index
    %645 = vector.load %arg2[%644, %c0_260, %c0_261] : memref<4x128x384xf32, #tpu.memory_space<vmem>>, vector<1x128x384xf32>
    %646 = vector.shape_cast %645 : vector<1x128x384xf32> to vector<128x384xf32>
    %cst_262 = arith.constant dense<0.000000e+00> : vector<8x384xf32>
    %647 = tpu.matmul %643, %646, %cst_262 {dimension_numbers = #tpu.dot_dimension_numbers<[1], [0], [0], [1], [0, 0, 1, 1], [], []>} : vector<8x128xf32>, vector<128x384xf32>, vector<8x384xf32> -> vector<8x384xf32>
    %648 = vector.extract_strided_slice %642 {offsets = [0, 0], sizes = [8, 128], strides = [1, 1]} : vector<8x384xf32> to vector<8x128xf32>
    %649 = vector.extract_strided_slice %647 {offsets = [0, 0], sizes = [8, 128], strides = [1, 1]} : vector<8x384xf32> to vector<8x128xf32>
    %650 = arith.addf %648, %649 : vector<8x128xf32>
    %651 = arith.negf %650 : vector<8x128xf32>
    %652 = math.exp %651 : vector<8x128xf32>
    %cst_263 = arith.constant 1.000000e+00 : f32
    %653 = vector.broadcast %cst_263 : f32 to vector<8x128xf32>
    %654 = arith.addf %653, %652 : vector<8x128xf32>
    %655 = arith.divf %653, %654 : vector<8x128xf32>
    %656 = vector.extract_strided_slice %642 {offsets = [0, 128], sizes = [8, 128], strides = [1, 1]} : vector<8x384xf32> to vector<8x128xf32>
    %657 = vector.extract_strided_slice %647 {offsets = [0, 128], sizes = [8, 128], strides = [1, 1]} : vector<8x384xf32> to vector<8x128xf32>
    %658 = arith.addf %656, %657 : vector<8x128xf32>
    %659 = arith.negf %658 : vector<8x128xf32>
    %660 = math.exp %659 : vector<8x128xf32>
    %cst_264 = arith.constant 1.000000e+00 : f32
    %661 = vector.broadcast %cst_264 : f32 to vector<8x128xf32>
    %662 = arith.addf %661, %660 : vector<8x128xf32>
    %663 = arith.divf %661, %662 : vector<8x128xf32>
    %664 = vector.extract_strided_slice %642 {offsets = [0, 256], sizes = [8, 128], strides = [1, 1]} : vector<8x384xf32> to vector<8x128xf32>
    %665 = vector.extract_strided_slice %647 {offsets = [0, 256], sizes = [8, 128], strides = [1, 1]} : vector<8x384xf32> to vector<8x128xf32>
    %666 = arith.addf %665, %636 : vector<8x128xf32>
    %667 = arith.mulf %655, %666 : vector<8x128xf32>
    %668 = arith.addf %664, %667 : vector<8x128xf32>
    %669 = math.tanh %668 : vector<8x128xf32>
    %670 = arith.subf %643, %669 : vector<8x128xf32>
    %671 = arith.mulf %663, %670 : vector<8x128xf32>
    %672 = arith.addf %669, %671 : vector<8x128xf32>
    %c0_265 = arith.constant 0 : index
    %c0_266 = arith.constant 0 : index
    %673 = vector.load %arg12[%c0_265, %c0_266] : memref<8x128xf32, #tpu.memory_space<vmem>>, vector<8x128xf32>
    tpu.vector_store %arg12[%c0_265, %c0_266], %672 {strides = array<i32>} : memref<8x128xf32, #tpu.memory_space<vmem>>, vector<8x128xf32>,
    %674 = arith.index_cast %640 : i32 to index
    %c0_267 = arith.constant 0 : index
    %675 = vector.load %arg10[%674, %c0_267] : memref<64x128xf32, #tpu.memory_space<vmem>>, vector<8x128xf32>
    tpu.vector_store %arg10[%674, %c0_267], %672 {strides = array<i32>} : memref<64x128xf32, #tpu.memory_space<vmem>>, vector<8x128xf32>,
    %c1_i32_268 = arith.constant 1 : i32
    %c8_i32_269 = arith.constant 8 : i32
    %676 = arith.muli %c1_i32_268, %c8_i32_269 : i32
    %677 = tpu.assume_multiple %676, 8 : i32
    %678 = arith.index_cast %677 : i32 to index
    %c0_270 = arith.constant 0 : index
    %679 = vector.load %arg11[%678, %c0_270] : memref<64x384xf32, #tpu.memory_space<vmem>>, vector<8x384xf32>
    %c0_271 = arith.constant 0 : index
    %c0_272 = arith.constant 0 : index
    %680 = vector.load %arg12[%c0_271, %c0_272] : memref<8x128xf32, #tpu.memory_space<vmem>>, vector<8x128xf32>
    %681 = arith.index_cast %c2_i32_254 : i32 to index
    %c0_273 = arith.constant 0 : index
    %c0_274 = arith.constant 0 : index
    %682 = vector.load %arg2[%681, %c0_273, %c0_274] : memref<4x128x384xf32, #tpu.memory_space<vmem>>, vector<1x128x384xf32>
    %683 = vector.shape_cast %682 : vector<1x128x384xf32> to vector<128x384xf32>
    %cst_275 = arith.constant dense<0.000000e+00> : vector<8x384xf32>
    %684 = tpu.matmul %680, %683, %cst_275 {dimension_numbers = #tpu.dot_dimension_numbers<[1], [0], [0], [1], [0, 0, 1, 1], [], []>} : vector<8x128xf32>, vector<128x384xf32>, vector<8x384xf32> -> vector<8x384xf32>
    %685 = vector.extract_strided_slice %679 {offsets = [0, 0], sizes = [8, 128], strides = [1, 1]} : vector<8x384xf32> to vector<8x128xf32>
    %686 = vector.extract_strided_slice %684 {offsets = [0, 0], sizes = [8, 128], strides = [1, 1]} : vector<8x384xf32> to vector<8x128xf32>
    %687 = arith.addf %685, %686 : vector<8x128xf32>
    %688 = arith.negf %687 : vector<8x128xf32>
    %689 = math.exp %688 : vector<8x128xf32>
    %cst_276 = arith.constant 1.000000e+00 : f32
    %690 = vector.broadcast %cst_276 : f32 to vector<8x128xf32>
    %691 = arith.addf %690, %689 : vector<8x128xf32>
    %692 = arith.divf %690, %691 : vector<8x128xf32>
    %693 = vector.extract_strided_slice %679 {offsets = [0, 128], sizes = [8, 128], strides = [1, 1]} : vector<8x384xf32> to vector<8x128xf32>
    %694 = vector.extract_strided_slice %684 {offsets = [0, 128], sizes = [8, 128], strides = [1, 1]} : vector<8x384xf32> to vector<8x128xf32>
    %695 = arith.addf %693, %694 : vector<8x128xf32>
    %696 = arith.negf %695 : vector<8x128xf32>
    %697 = math.exp %696 : vector<8x128xf32>
    %cst_277 = arith.constant 1.000000e+00 : f32
    %698 = vector.broadcast %cst_277 : f32 to vector<8x128xf32>
    %699 = arith.addf %698, %697 : vector<8x128xf32>
    %700 = arith.divf %698, %699 : vector<8x128xf32>
    %701 = vector.extract_strided_slice %679 {offsets = [0, 256], sizes = [8, 128], strides = [1, 1]} : vector<8x384xf32> to vector<8x128xf32>
    %702 = vector.extract_strided_slice %684 {offsets = [0, 256], sizes = [8, 128], strides = [1, 1]} : vector<8x384xf32> to vector<8x128xf32>
    %703 = arith.addf %702, %636 : vector<8x128xf32>
    %704 = arith.mulf %692, %703 : vector<8x128xf32>
    %705 = arith.addf %701, %704 : vector<8x128xf32>
    %706 = math.tanh %705 : vector<8x128xf32>
    %707 = arith.subf %680, %706 : vector<8x128xf32>
    %708 = arith.mulf %700, %707 : vector<8x128xf32>
    %709 = arith.addf %706, %708 : vector<8x128xf32>
    %c0_278 = arith.constant 0 : index
    %c0_279 = arith.constant 0 : index
    %710 = vector.load %arg12[%c0_278, %c0_279] : memref<8x128xf32, #tpu.memory_space<vmem>>, vector<8x128xf32>
    tpu.vector_store %arg12[%c0_278, %c0_279], %709 {strides = array<i32>} : memref<8x128xf32, #tpu.memory_space<vmem>>, vector<8x128xf32>,
    %711 = arith.index_cast %677 : i32 to index
    %c0_280 = arith.constant 0 : index
    %712 = vector.load %arg10[%711, %c0_280] : memref<64x128xf32, #tpu.memory_space<vmem>>, vector<8x128xf32>
    tpu.vector_store %arg10[%711, %c0_280], %709 {strides = array<i32>} : memref<64x128xf32, #tpu.memory_space<vmem>>, vector<8x128xf32>,
    %c2_i32_281 = arith.constant 2 : i32
    %c8_i32_282 = arith.constant 8 : i32
    %713 = arith.muli %c2_i32_281, %c8_i32_282 : i32
    %714 = tpu.assume_multiple %713, 8 : i32
    %715 = arith.index_cast %714 : i32 to index
    %c0_283 = arith.constant 0 : index
    %716 = vector.load %arg11[%715, %c0_283] : memref<64x384xf32, #tpu.memory_space<vmem>>, vector<8x384xf32>
    %c0_284 = arith.constant 0 : index
    %c0_285 = arith.constant 0 : index
    %717 = vector.load %arg12[%c0_284, %c0_285] : memref<8x128xf32, #tpu.memory_space<vmem>>, vector<8x128xf32>
    %718 = arith.index_cast %c2_i32_254 : i32 to index
    %c0_286 = arith.constant 0 : index
    %c0_287 = arith.constant 0 : index
    %719 = vector.load %arg2[%718, %c0_286, %c0_287] : memref<4x128x384xf32, #tpu.memory_space<vmem>>, vector<1x128x384xf32>
    %720 = vector.shape_cast %719 : vector<1x128x384xf32> to vector<128x384xf32>
    %cst_288 = arith.constant dense<0.000000e+00> : vector<8x384xf32>
    %721 = tpu.matmul %717, %720, %cst_288 {dimension_numbers = #tpu.dot_dimension_numbers<[1], [0], [0], [1], [0, 0, 1, 1], [], []>} : vector<8x128xf32>, vector<128x384xf32>, vector<8x384xf32> -> vector<8x384xf32>
    %722 = vector.extract_strided_slice %716 {offsets = [0, 0], sizes = [8, 128], strides = [1, 1]} : vector<8x384xf32> to vector<8x128xf32>
    %723 = vector.extract_strided_slice %721 {offsets = [0, 0], sizes = [8, 128], strides = [1, 1]} : vector<8x384xf32> to vector<8x128xf32>
    %724 = arith.addf %722, %723 : vector<8x128xf32>
    %725 = arith.negf %724 : vector<8x128xf32>
    %726 = math.exp %725 : vector<8x128xf32>
    %cst_289 = arith.constant 1.000000e+00 : f32
    %727 = vector.broadcast %cst_289 : f32 to vector<8x128xf32>
    %728 = arith.addf %727, %726 : vector<8x128xf32>
    %729 = arith.divf %727, %728 : vector<8x128xf32>
    %730 = vector.extract_strided_slice %716 {offsets = [0, 128], sizes = [8, 128], strides = [1, 1]} : vector<8x384xf32> to vector<8x128xf32>
    %731 = vector.extract_strided_slice %721 {offsets = [0, 128], sizes = [8, 128], strides = [1, 1]} : vector<8x384xf32> to vector<8x128xf32>
    %732 = arith.addf %730, %731 : vector<8x128xf32>
    %733 = arith.negf %732 : vector<8x128xf32>
    %734 = math.exp %733 : vector<8x128xf32>
    %cst_290 = arith.constant 1.000000e+00 : f32
    %735 = vector.broadcast %cst_290 : f32 to vector<8x128xf32>
    %736 = arith.addf %735, %734 : vector<8x128xf32>
    %737 = arith.divf %735, %736 : vector<8x128xf32>
    %738 = vector.extract_strided_slice %716 {offsets = [0, 256], sizes = [8, 128], strides = [1, 1]} : vector<8x384xf32> to vector<8x128xf32>
    %739 = vector.extract_strided_slice %721 {offsets = [0, 256], sizes = [8, 128], strides = [1, 1]} : vector<8x384xf32> to vector<8x128xf32>
    %740 = arith.addf %739, %636 : vector<8x128xf32>
    %741 = arith.mulf %729, %740 : vector<8x128xf32>
    %742 = arith.addf %738, %741 : vector<8x128xf32>
    %743 = math.tanh %742 : vector<8x128xf32>
    %744 = arith.subf %717, %743 : vector<8x128xf32>
    %745 = arith.mulf %737, %744 : vector<8x128xf32>
    %746 = arith.addf %743, %745 : vector<8x128xf32>
    %c0_291 = arith.constant 0 : index
    %c0_292 = arith.constant 0 : index
    %747 = vector.load %arg12[%c0_291, %c0_292] : memref<8x128xf32, #tpu.memory_space<vmem>>, vector<8x128xf32>
    tpu.vector_store %arg12[%c0_291, %c0_292], %746 {strides = array<i32>} : memref<8x128xf32, #tpu.memory_space<vmem>>, vector<8x128xf32>,
    %748 = arith.index_cast %714 : i32 to index
    %c0_293 = arith.constant 0 : index
    %749 = vector.load %arg10[%748, %c0_293] : memref<64x128xf32, #tpu.memory_space<vmem>>, vector<8x128xf32>
    tpu.vector_store %arg10[%748, %c0_293], %746 {strides = array<i32>} : memref<64x128xf32, #tpu.memory_space<vmem>>, vector<8x128xf32>,
    %c3_i32_294 = arith.constant 3 : i32
    %c8_i32_295 = arith.constant 8 : i32
    %750 = arith.muli %c3_i32_294, %c8_i32_295 : i32
    %751 = tpu.assume_multiple %750, 8 : i32
    %752 = arith.index_cast %751 : i32 to index
    %c0_296 = arith.constant 0 : index
    %753 = vector.load %arg11[%752, %c0_296] : memref<64x384xf32, #tpu.memory_space<vmem>>, vector<8x384xf32>
    %c0_297 = arith.constant 0 : index
    %c0_298 = arith.constant 0 : index
    %754 = vector.load %arg12[%c0_297, %c0_298] : memref<8x128xf32, #tpu.memory_space<vmem>>, vector<8x128xf32>
    %755 = arith.index_cast %c2_i32_254 : i32 to index
    %c0_299 = arith.constant 0 : index
    %c0_300 = arith.constant 0 : index
    %756 = vector.load %arg2[%755, %c0_299, %c0_300] : memref<4x128x384xf32, #tpu.memory_space<vmem>>, vector<1x128x384xf32>
    %757 = vector.shape_cast %756 : vector<1x128x384xf32> to vector<128x384xf32>
    %cst_301 = arith.constant dense<0.000000e+00> : vector<8x384xf32>
    %758 = tpu.matmul %754, %757, %cst_301 {dimension_numbers = #tpu.dot_dimension_numbers<[1], [0], [0], [1], [0, 0, 1, 1], [], []>} : vector<8x128xf32>, vector<128x384xf32>, vector<8x384xf32> -> vector<8x384xf32>
    %759 = vector.extract_strided_slice %753 {offsets = [0, 0], sizes = [8, 128], strides = [1, 1]} : vector<8x384xf32> to vector<8x128xf32>
    %760 = vector.extract_strided_slice %758 {offsets = [0, 0], sizes = [8, 128], strides = [1, 1]} : vector<8x384xf32> to vector<8x128xf32>
    %761 = arith.addf %759, %760 : vector<8x128xf32>
    %762 = arith.negf %761 : vector<8x128xf32>
    %763 = math.exp %762 : vector<8x128xf32>
    %cst_302 = arith.constant 1.000000e+00 : f32
    %764 = vector.broadcast %cst_302 : f32 to vector<8x128xf32>
    %765 = arith.addf %764, %763 : vector<8x128xf32>
    %766 = arith.divf %764, %765 : vector<8x128xf32>
    %767 = vector.extract_strided_slice %753 {offsets = [0, 128], sizes = [8, 128], strides = [1, 1]} : vector<8x384xf32> to vector<8x128xf32>
    %768 = vector.extract_strided_slice %758 {offsets = [0, 128], sizes = [8, 128], strides = [1, 1]} : vector<8x384xf32> to vector<8x128xf32>
    %769 = arith.addf %767, %768 : vector<8x128xf32>
    %770 = arith.negf %769 : vector<8x128xf32>
    %771 = math.exp %770 : vector<8x128xf32>
    %cst_303 = arith.constant 1.000000e+00 : f32
    %772 = vector.broadcast %cst_303 : f32 to vector<8x128xf32>
    %773 = arith.addf %772, %771 : vector<8x128xf32>
    %774 = arith.divf %772, %773 : vector<8x128xf32>
    %775 = vector.extract_strided_slice %753 {offsets = [0, 256], sizes = [8, 128], strides = [1, 1]} : vector<8x384xf32> to vector<8x128xf32>
    %776 = vector.extract_strided_slice %758 {offsets = [0, 256], sizes = [8, 128], strides = [1, 1]} : vector<8x384xf32> to vector<8x128xf32>
    %777 = arith.addf %776, %636 : vector<8x128xf32>
    %778 = arith.mulf %766, %777 : vector<8x128xf32>
    %779 = arith.addf %775, %778 : vector<8x128xf32>
    %780 = math.tanh %779 : vector<8x128xf32>
    %781 = arith.subf %754, %780 : vector<8x128xf32>
    %782 = arith.mulf %774, %781 : vector<8x128xf32>
    %783 = arith.addf %780, %782 : vector<8x128xf32>
    %c0_304 = arith.constant 0 : index
    %c0_305 = arith.constant 0 : index
    %784 = vector.load %arg12[%c0_304, %c0_305] : memref<8x128xf32, #tpu.memory_space<vmem>>, vector<8x128xf32>
    tpu.vector_store %arg12[%c0_304, %c0_305], %783 {strides = array<i32>} : memref<8x128xf32, #tpu.memory_space<vmem>>, vector<8x128xf32>,
    %785 = arith.index_cast %751 : i32 to index
    %c0_306 = arith.constant 0 : index
    %786 = vector.load %arg10[%785, %c0_306] : memref<64x128xf32, #tpu.memory_space<vmem>>, vector<8x128xf32>
    tpu.vector_store %arg10[%785, %c0_306], %783 {strides = array<i32>} : memref<64x128xf32, #tpu.memory_space<vmem>>, vector<8x128xf32>,
    %c4_i32_307 = arith.constant 4 : i32
    %c8_i32_308 = arith.constant 8 : i32
    %787 = arith.muli %c4_i32_307, %c8_i32_308 : i32
    %788 = tpu.assume_multiple %787, 8 : i32
    %789 = arith.index_cast %788 : i32 to index
    %c0_309 = arith.constant 0 : index
    %790 = vector.load %arg11[%789, %c0_309] : memref<64x384xf32, #tpu.memory_space<vmem>>, vector<8x384xf32>
    %c0_310 = arith.constant 0 : index
    %c0_311 = arith.constant 0 : index
    %791 = vector.load %arg12[%c0_310, %c0_311] : memref<8x128xf32, #tpu.memory_space<vmem>>, vector<8x128xf32>
    %792 = arith.index_cast %c2_i32_254 : i32 to index
    %c0_312 = arith.constant 0 : index
    %c0_313 = arith.constant 0 : index
    %793 = vector.load %arg2[%792, %c0_312, %c0_313] : memref<4x128x384xf32, #tpu.memory_space<vmem>>, vector<1x128x384xf32>
    %794 = vector.shape_cast %793 : vector<1x128x384xf32> to vector<128x384xf32>
    %cst_314 = arith.constant dense<0.000000e+00> : vector<8x384xf32>
    %795 = tpu.matmul %791, %794, %cst_314 {dimension_numbers = #tpu.dot_dimension_numbers<[1], [0], [0], [1], [0, 0, 1, 1], [], []>} : vector<8x128xf32>, vector<128x384xf32>, vector<8x384xf32> -> vector<8x384xf32>
    %796 = vector.extract_strided_slice %790 {offsets = [0, 0], sizes = [8, 128], strides = [1, 1]} : vector<8x384xf32> to vector<8x128xf32>
    %797 = vector.extract_strided_slice %795 {offsets = [0, 0], sizes = [8, 128], strides = [1, 1]} : vector<8x384xf32> to vector<8x128xf32>
    %798 = arith.addf %796, %797 : vector<8x128xf32>
    %799 = arith.negf %798 : vector<8x128xf32>
    %800 = math.exp %799 : vector<8x128xf32>
    %cst_315 = arith.constant 1.000000e+00 : f32
    %801 = vector.broadcast %cst_315 : f32 to vector<8x128xf32>
    %802 = arith.addf %801, %800 : vector<8x128xf32>
    %803 = arith.divf %801, %802 : vector<8x128xf32>
    %804 = vector.extract_strided_slice %790 {offsets = [0, 128], sizes = [8, 128], strides = [1, 1]} : vector<8x384xf32> to vector<8x128xf32>
    %805 = vector.extract_strided_slice %795 {offsets = [0, 128], sizes = [8, 128], strides = [1, 1]} : vector<8x384xf32> to vector<8x128xf32>
    %806 = arith.addf %804, %805 : vector<8x128xf32>
    %807 = arith.negf %806 : vector<8x128xf32>
    %808 = math.exp %807 : vector<8x128xf32>
    %cst_316 = arith.constant 1.000000e+00 : f32
    %809 = vector.broadcast %cst_316 : f32 to vector<8x128xf32>
    %810 = arith.addf %809, %808 : vector<8x128xf32>
    %811 = arith.divf %809, %810 : vector<8x128xf32>
    %812 = vector.extract_strided_slice %790 {offsets = [0, 256], sizes = [8, 128], strides = [1, 1]} : vector<8x384xf32> to vector<8x128xf32>
    %813 = vector.extract_strided_slice %795 {offsets = [0, 256], sizes = [8, 128], strides = [1, 1]} : vector<8x384xf32> to vector<8x128xf32>
    %814 = arith.addf %813, %636 : vector<8x128xf32>
    %815 = arith.mulf %803, %814 : vector<8x128xf32>
    %816 = arith.addf %812, %815 : vector<8x128xf32>
    %817 = math.tanh %816 : vector<8x128xf32>
    %818 = arith.subf %791, %817 : vector<8x128xf32>
    %819 = arith.mulf %811, %818 : vector<8x128xf32>
    %820 = arith.addf %817, %819 : vector<8x128xf32>
    %c0_317 = arith.constant 0 : index
    %c0_318 = arith.constant 0 : index
    %821 = vector.load %arg12[%c0_317, %c0_318] : memref<8x128xf32, #tpu.memory_space<vmem>>, vector<8x128xf32>
    tpu.vector_store %arg12[%c0_317, %c0_318], %820 {strides = array<i32>} : memref<8x128xf32, #tpu.memory_space<vmem>>, vector<8x128xf32>,
    %822 = arith.index_cast %788 : i32 to index
    %c0_319 = arith.constant 0 : index
    %823 = vector.load %arg10[%822, %c0_319] : memref<64x128xf32, #tpu.memory_space<vmem>>, vector<8x128xf32>
    tpu.vector_store %arg10[%822, %c0_319], %820 {strides = array<i32>} : memref<64x128xf32, #tpu.memory_space<vmem>>, vector<8x128xf32>,
    %c5_i32_320 = arith.constant 5 : i32
    %c8_i32_321 = arith.constant 8 : i32
    %824 = arith.muli %c5_i32_320, %c8_i32_321 : i32
    %825 = tpu.assume_multiple %824, 8 : i32
    %826 = arith.index_cast %825 : i32 to index
    %c0_322 = arith.constant 0 : index
    %827 = vector.load %arg11[%826, %c0_322] : memref<64x384xf32, #tpu.memory_space<vmem>>, vector<8x384xf32>
    %c0_323 = arith.constant 0 : index
    %c0_324 = arith.constant 0 : index
    %828 = vector.load %arg12[%c0_323, %c0_324] : memref<8x128xf32, #tpu.memory_space<vmem>>, vector<8x128xf32>
    %829 = arith.index_cast %c2_i32_254 : i32 to index
    %c0_325 = arith.constant 0 : index
    %c0_326 = arith.constant 0 : index
    %830 = vector.load %arg2[%829, %c0_325, %c0_326] : memref<4x128x384xf32, #tpu.memory_space<vmem>>, vector<1x128x384xf32>
    %831 = vector.shape_cast %830 : vector<1x128x384xf32> to vector<128x384xf32>
    %cst_327 = arith.constant dense<0.000000e+00> : vector<8x384xf32>
    %832 = tpu.matmul %828, %831, %cst_327 {dimension_numbers = #tpu.dot_dimension_numbers<[1], [0], [0], [1], [0, 0, 1, 1], [], []>} : vector<8x128xf32>, vector<128x384xf32>, vector<8x384xf32> -> vector<8x384xf32>
    %833 = vector.extract_strided_slice %827 {offsets = [0, 0], sizes = [8, 128], strides = [1, 1]} : vector<8x384xf32> to vector<8x128xf32>
    %834 = vector.extract_strided_slice %832 {offsets = [0, 0], sizes = [8, 128], strides = [1, 1]} : vector<8x384xf32> to vector<8x128xf32>
    %835 = arith.addf %833, %834 : vector<8x128xf32>
    %836 = arith.negf %835 : vector<8x128xf32>
    %837 = math.exp %836 : vector<8x128xf32>
    %cst_328 = arith.constant 1.000000e+00 : f32
    %838 = vector.broadcast %cst_328 : f32 to vector<8x128xf32>
    %839 = arith.addf %838, %837 : vector<8x128xf32>
    %840 = arith.divf %838, %839 : vector<8x128xf32>
    %841 = vector.extract_strided_slice %827 {offsets = [0, 128], sizes = [8, 128], strides = [1, 1]} : vector<8x384xf32> to vector<8x128xf32>
    %842 = vector.extract_strided_slice %832 {offsets = [0, 128], sizes = [8, 128], strides = [1, 1]} : vector<8x384xf32> to vector<8x128xf32>
    %843 = arith.addf %841, %842 : vector<8x128xf32>
    %844 = arith.negf %843 : vector<8x128xf32>
    %845 = math.exp %844 : vector<8x128xf32>
    %cst_329 = arith.constant 1.000000e+00 : f32
    %846 = vector.broadcast %cst_329 : f32 to vector<8x128xf32>
    %847 = arith.addf %846, %845 : vector<8x128xf32>
    %848 = arith.divf %846, %847 : vector<8x128xf32>
    %849 = vector.extract_strided_slice %827 {offsets = [0, 256], sizes = [8, 128], strides = [1, 1]} : vector<8x384xf32> to vector<8x128xf32>
    %850 = vector.extract_strided_slice %832 {offsets = [0, 256], sizes = [8, 128], strides = [1, 1]} : vector<8x384xf32> to vector<8x128xf32>
    %851 = arith.addf %850, %636 : vector<8x128xf32>
    %852 = arith.mulf %840, %851 : vector<8x128xf32>
    %853 = arith.addf %849, %852 : vector<8x128xf32>
    %854 = math.tanh %853 : vector<8x128xf32>
    %855 = arith.subf %828, %854 : vector<8x128xf32>
    %856 = arith.mulf %848, %855 : vector<8x128xf32>
    %857 = arith.addf %854, %856 : vector<8x128xf32>
    %c0_330 = arith.constant 0 : index
    %c0_331 = arith.constant 0 : index
    %858 = vector.load %arg12[%c0_330, %c0_331] : memref<8x128xf32, #tpu.memory_space<vmem>>, vector<8x128xf32>
    tpu.vector_store %arg12[%c0_330, %c0_331], %857 {strides = array<i32>} : memref<8x128xf32, #tpu.memory_space<vmem>>, vector<8x128xf32>,
    %859 = arith.index_cast %825 : i32 to index
    %c0_332 = arith.constant 0 : index
    %860 = vector.load %arg10[%859, %c0_332] : memref<64x128xf32, #tpu.memory_space<vmem>>, vector<8x128xf32>
    tpu.vector_store %arg10[%859, %c0_332], %857 {strides = array<i32>} : memref<64x128xf32, #tpu.memory_space<vmem>>, vector<8x128xf32>,
    %c6_i32_333 = arith.constant 6 : i32
    %c8_i32_334 = arith.constant 8 : i32
    %861 = arith.muli %c6_i32_333, %c8_i32_334 : i32
    %862 = tpu.assume_multiple %861, 8 : i32
    %863 = arith.index_cast %862 : i32 to index
    %c0_335 = arith.constant 0 : index
    %864 = vector.load %arg11[%863, %c0_335] : memref<64x384xf32, #tpu.memory_space<vmem>>, vector<8x384xf32>
    %c0_336 = arith.constant 0 : index
    %c0_337 = arith.constant 0 : index
    %865 = vector.load %arg12[%c0_336, %c0_337] : memref<8x128xf32, #tpu.memory_space<vmem>>, vector<8x128xf32>
    %866 = arith.index_cast %c2_i32_254 : i32 to index
    %c0_338 = arith.constant 0 : index
    %c0_339 = arith.constant 0 : index
    %867 = vector.load %arg2[%866, %c0_338, %c0_339] : memref<4x128x384xf32, #tpu.memory_space<vmem>>, vector<1x128x384xf32>
    %868 = vector.shape_cast %867 : vector<1x128x384xf32> to vector<128x384xf32>
    %cst_340 = arith.constant dense<0.000000e+00> : vector<8x384xf32>
    %869 = tpu.matmul %865, %868, %cst_340 {dimension_numbers = #tpu.dot_dimension_numbers<[1], [0], [0], [1], [0, 0, 1, 1], [], []>} : vector<8x128xf32>, vector<128x384xf32>, vector<8x384xf32> -> vector<8x384xf32>
    %870 = vector.extract_strided_slice %864 {offsets = [0, 0], sizes = [8, 128], strides = [1, 1]} : vector<8x384xf32> to vector<8x128xf32>
    %871 = vector.extract_strided_slice %869 {offsets = [0, 0], sizes = [8, 128], strides = [1, 1]} : vector<8x384xf32> to vector<8x128xf32>
    %872 = arith.addf %870, %871 : vector<8x128xf32>
    %873 = arith.negf %872 : vector<8x128xf32>
    %874 = math.exp %873 : vector<8x128xf32>
    %cst_341 = arith.constant 1.000000e+00 : f32
    %875 = vector.broadcast %cst_341 : f32 to vector<8x128xf32>
    %876 = arith.addf %875, %874 : vector<8x128xf32>
    %877 = arith.divf %875, %876 : vector<8x128xf32>
    %878 = vector.extract_strided_slice %864 {offsets = [0, 128], sizes = [8, 128], strides = [1, 1]} : vector<8x384xf32> to vector<8x128xf32>
    %879 = vector.extract_strided_slice %869 {offsets = [0, 128], sizes = [8, 128], strides = [1, 1]} : vector<8x384xf32> to vector<8x128xf32>
    %880 = arith.addf %878, %879 : vector<8x128xf32>
    %881 = arith.negf %880 : vector<8x128xf32>
    %882 = math.exp %881 : vector<8x128xf32>
    %cst_342 = arith.constant 1.000000e+00 : f32
    %883 = vector.broadcast %cst_342 : f32 to vector<8x128xf32>
    %884 = arith.addf %883, %882 : vector<8x128xf32>
    %885 = arith.divf %883, %884 : vector<8x128xf32>
    %886 = vector.extract_strided_slice %864 {offsets = [0, 256], sizes = [8, 128], strides = [1, 1]} : vector<8x384xf32> to vector<8x128xf32>
    %887 = vector.extract_strided_slice %869 {offsets = [0, 256], sizes = [8, 128], strides = [1, 1]} : vector<8x384xf32> to vector<8x128xf32>
    %888 = arith.addf %887, %636 : vector<8x128xf32>
    %889 = arith.mulf %877, %888 : vector<8x128xf32>
    %890 = arith.addf %886, %889 : vector<8x128xf32>
    %891 = math.tanh %890 : vector<8x128xf32>
    %892 = arith.subf %865, %891 : vector<8x128xf32>
    %893 = arith.mulf %885, %892 : vector<8x128xf32>
    %894 = arith.addf %891, %893 : vector<8x128xf32>
    %c0_343 = arith.constant 0 : index
    %c0_344 = arith.constant 0 : index
    %895 = vector.load %arg12[%c0_343, %c0_344] : memref<8x128xf32, #tpu.memory_space<vmem>>, vector<8x128xf32>
    tpu.vector_store %arg12[%c0_343, %c0_344], %894 {strides = array<i32>} : memref<8x128xf32, #tpu.memory_space<vmem>>, vector<8x128xf32>,
    %896 = arith.index_cast %862 : i32 to index
    %c0_345 = arith.constant 0 : index
    %897 = vector.load %arg10[%896, %c0_345] : memref<64x128xf32, #tpu.memory_space<vmem>>, vector<8x128xf32>
    tpu.vector_store %arg10[%896, %c0_345], %894 {strides = array<i32>} : memref<64x128xf32, #tpu.memory_space<vmem>>, vector<8x128xf32>,
    %c7_i32_346 = arith.constant 7 : i32
    %c8_i32_347 = arith.constant 8 : i32
    %898 = arith.muli %c7_i32_346, %c8_i32_347 : i32
    %899 = tpu.assume_multiple %898, 8 : i32
    %900 = arith.index_cast %899 : i32 to index
    %c0_348 = arith.constant 0 : index
    %901 = vector.load %arg11[%900, %c0_348] : memref<64x384xf32, #tpu.memory_space<vmem>>, vector<8x384xf32>
    %c0_349 = arith.constant 0 : index
    %c0_350 = arith.constant 0 : index
    %902 = vector.load %arg12[%c0_349, %c0_350] : memref<8x128xf32, #tpu.memory_space<vmem>>, vector<8x128xf32>
    %903 = arith.index_cast %c2_i32_254 : i32 to index
    %c0_351 = arith.constant 0 : index
    %c0_352 = arith.constant 0 : index
    %904 = vector.load %arg2[%903, %c0_351, %c0_352] : memref<4x128x384xf32, #tpu.memory_space<vmem>>, vector<1x128x384xf32>
    %905 = vector.shape_cast %904 : vector<1x128x384xf32> to vector<128x384xf32>
    %cst_353 = arith.constant dense<0.000000e+00> : vector<8x384xf32>
    %906 = tpu.matmul %902, %905, %cst_353 {dimension_numbers = #tpu.dot_dimension_numbers<[1], [0], [0], [1], [0, 0, 1, 1], [], []>} : vector<8x128xf32>, vector<128x384xf32>, vector<8x384xf32> -> vector<8x384xf32>
    %907 = vector.extract_strided_slice %901 {offsets = [0, 0], sizes = [8, 128], strides = [1, 1]} : vector<8x384xf32> to vector<8x128xf32>
    %908 = vector.extract_strided_slice %906 {offsets = [0, 0], sizes = [8, 128], strides = [1, 1]} : vector<8x384xf32> to vector<8x128xf32>
    %909 = arith.addf %907, %908 : vector<8x128xf32>
    %910 = arith.negf %909 : vector<8x128xf32>
    %911 = math.exp %910 : vector<8x128xf32>
    %cst_354 = arith.constant 1.000000e+00 : f32
    %912 = vector.broadcast %cst_354 : f32 to vector<8x128xf32>
    %913 = arith.addf %912, %911 : vector<8x128xf32>
    %914 = arith.divf %912, %913 : vector<8x128xf32>
    %915 = vector.extract_strided_slice %901 {offsets = [0, 128], sizes = [8, 128], strides = [1, 1]} : vector<8x384xf32> to vector<8x128xf32>
    %916 = vector.extract_strided_slice %906 {offsets = [0, 128], sizes = [8, 128], strides = [1, 1]} : vector<8x384xf32> to vector<8x128xf32>
    %917 = arith.addf %915, %916 : vector<8x128xf32>
    %918 = arith.negf %917 : vector<8x128xf32>
    %919 = math.exp %918 : vector<8x128xf32>
    %cst_355 = arith.constant 1.000000e+00 : f32
    %920 = vector.broadcast %cst_355 : f32 to vector<8x128xf32>
    %921 = arith.addf %920, %919 : vector<8x128xf32>
    %922 = arith.divf %920, %921 : vector<8x128xf32>
    %923 = vector.extract_strided_slice %901 {offsets = [0, 256], sizes = [8, 128], strides = [1, 1]} : vector<8x384xf32> to vector<8x128xf32>
    %924 = vector.extract_strided_slice %906 {offsets = [0, 256], sizes = [8, 128], strides = [1, 1]} : vector<8x384xf32> to vector<8x128xf32>
    %925 = arith.addf %924, %636 : vector<8x128xf32>
    %926 = arith.mulf %914, %925 : vector<8x128xf32>
    %927 = arith.addf %923, %926 : vector<8x128xf32>
    %928 = math.tanh %927 : vector<8x128xf32>
    %929 = arith.subf %902, %928 : vector<8x128xf32>
    %930 = arith.mulf %922, %929 : vector<8x128xf32>
    %931 = arith.addf %928, %930 : vector<8x128xf32>
    %c0_356 = arith.constant 0 : index
    %c0_357 = arith.constant 0 : index
    %932 = vector.load %arg12[%c0_356, %c0_357] : memref<8x128xf32, #tpu.memory_space<vmem>>, vector<8x128xf32>
    tpu.vector_store %arg12[%c0_356, %c0_357], %931 {strides = array<i32>} : memref<8x128xf32, #tpu.memory_space<vmem>>, vector<8x128xf32>,
    %933 = arith.index_cast %899 : i32 to index
    %c0_358 = arith.constant 0 : index
    %934 = vector.load %arg10[%933, %c0_358] : memref<64x128xf32, #tpu.memory_space<vmem>>, vector<8x128xf32>
    tpu.vector_store %arg10[%933, %c0_358], %931 {strides = array<i32>} : memref<64x128xf32, #tpu.memory_space<vmem>>, vector<8x128xf32>,
    %c8_i32_359 = arith.constant 8 : i32
    %c0_360 = arith.constant 0 : index
    %c0_361 = arith.constant 0 : index
    %935 = vector.load %arg10[%c0_360, %c0_361] : memref<64x128xf32, #tpu.memory_space<vmem>>, vector<64x128xf32>
    %c3 = arith.constant 3 : index
    %c0_362 = arith.constant 0 : index
    %c0_363 = arith.constant 0 : index
    %936 = vector.load %arg1[%c3, %c0_362, %c0_363] : memref<4x128x384xf32, #tpu.memory_space<vmem>>, vector<1x128x384xf32>
    %937 = vector.shape_cast %936 : vector<1x128x384xf32> to vector<128x384xf32>
    %cst_364 = arith.constant dense<0.000000e+00> : vector<64x384xf32>
    %938 = tpu.matmul %935, %937, %cst_364 {dimension_numbers = #tpu.dot_dimension_numbers<[1], [0], [0], [1], [0, 0, 1, 1], [], []>} : vector<64x128xf32>, vector<128x384xf32>, vector<64x384xf32> -> vector<64x384xf32>
    %c3_365 = arith.constant 3 : index
    %c0_366 = arith.constant 0 : index
    %c0_367 = arith.constant 0 : index
    %939 = vector.load %arg3[%c3_365, %c0_366, %c0_367] : memref<4x1x384xf32, #tpu.memory_space<vmem>>, vector<1x1x384xf32>
    %940 = vector.shape_cast %939 : vector<1x1x384xf32> to vector<1x384xf32>
    %941 = vector.broadcast %940 : vector<1x384xf32> to vector<64x384xf32>
    %942 = arith.addf %938, %941 : vector<64x384xf32>
    %c0_368 = arith.constant 0 : index
    %c0_369 = arith.constant 0 : index
    %943 = vector.load %arg11[%c0_368, %c0_369] : memref<64x384xf32, #tpu.memory_space<vmem>>, vector<64x384xf32>
    tpu.vector_store %arg11[%c0_368, %c0_369], %942 {strides = array<i32>} : memref<64x384xf32, #tpu.memory_space<vmem>>, vector<64x384xf32>,
    %c3_370 = arith.constant 3 : index
    %c0_371 = arith.constant 0 : index
    %c0_372 = arith.constant 0 : index
    %944 = vector.load %arg4[%c3_370, %c0_371, %c0_372] : memref<4x1x128xf32, #tpu.memory_space<vmem>>, vector<1x1x128xf32>
    %945 = vector.shape_cast %944 : vector<1x1x128xf32> to vector<1x128xf32>
    %946 = vector.shape_cast %945 : vector<1x128xf32> to vector<1x128xf32>
    %947 = vector.broadcast %946 : vector<1x128xf32> to vector<8x128xf32>
    %cst_373 = arith.constant 0.000000e+00 : f32
    %948 = vector.broadcast %cst_373 : f32 to vector<8x128xf32>
    %c0_374 = arith.constant 0 : index
    %c0_375 = arith.constant 0 : index
    %949 = vector.load %arg12[%c0_374, %c0_375] : memref<8x128xf32, #tpu.memory_space<vmem>>, vector<8x128xf32>
    tpu.vector_store %arg12[%c0_374, %c0_375], %948 {strides = array<i32>} : memref<8x128xf32, #tpu.memory_space<vmem>>, vector<8x128xf32>,
    %c3_i32_376 = arith.constant 3 : i32
    %c0_i32_377 = arith.constant 0 : i32
    %c8_i32_378 = arith.constant 8 : i32
    %950 = arith.muli %c0_i32_377, %c8_i32_378 : i32
    %951 = tpu.assume_multiple %950, 8 : i32
    %952 = arith.index_cast %951 : i32 to index
    %c0_379 = arith.constant 0 : index
    %953 = vector.load %arg11[%952, %c0_379] : memref<64x384xf32, #tpu.memory_space<vmem>>, vector<8x384xf32>
    %c0_380 = arith.constant 0 : index
    %c0_381 = arith.constant 0 : index
    %954 = vector.load %arg12[%c0_380, %c0_381] : memref<8x128xf32, #tpu.memory_space<vmem>>, vector<8x128xf32>
    %955 = arith.index_cast %c3_i32_376 : i32 to index
    %c0_382 = arith.constant 0 : index
    %c0_383 = arith.constant 0 : index
    %956 = vector.load %arg2[%955, %c0_382, %c0_383] : memref<4x128x384xf32, #tpu.memory_space<vmem>>, vector<1x128x384xf32>
    %957 = vector.shape_cast %956 : vector<1x128x384xf32> to vector<128x384xf32>
    %cst_384 = arith.constant dense<0.000000e+00> : vector<8x384xf32>
    %958 = tpu.matmul %954, %957, %cst_384 {dimension_numbers = #tpu.dot_dimension_numbers<[1], [0], [0], [1], [0, 0, 1, 1], [], []>} : vector<8x128xf32>, vector<128x384xf32>, vector<8x384xf32> -> vector<8x384xf32>
    %959 = vector.extract_strided_slice %953 {offsets = [0, 0], sizes = [8, 128], strides = [1, 1]} : vector<8x384xf32> to vector<8x128xf32>
    %960 = vector.extract_strided_slice %958 {offsets = [0, 0], sizes = [8, 128], strides = [1, 1]} : vector<8x384xf32> to vector<8x128xf32>
    %961 = arith.addf %959, %960 : vector<8x128xf32>
    %962 = arith.negf %961 : vector<8x128xf32>
    %963 = math.exp %962 : vector<8x128xf32>
    %cst_385 = arith.constant 1.000000e+00 : f32
    %964 = vector.broadcast %cst_385 : f32 to vector<8x128xf32>
    %965 = arith.addf %964, %963 : vector<8x128xf32>
    %966 = arith.divf %964, %965 : vector<8x128xf32>
    %967 = vector.extract_strided_slice %953 {offsets = [0, 128], sizes = [8, 128], strides = [1, 1]} : vector<8x384xf32> to vector<8x128xf32>
    %968 = vector.extract_strided_slice %958 {offsets = [0, 128], sizes = [8, 128], strides = [1, 1]} : vector<8x384xf32> to vector<8x128xf32>
    %969 = arith.addf %967, %968 : vector<8x128xf32>
    %970 = arith.negf %969 : vector<8x128xf32>
    %971 = math.exp %970 : vector<8x128xf32>
    %cst_386 = arith.constant 1.000000e+00 : f32
    %972 = vector.broadcast %cst_386 : f32 to vector<8x128xf32>
    %973 = arith.addf %972, %971 : vector<8x128xf32>
    %974 = arith.divf %972, %973 : vector<8x128xf32>
    %975 = vector.extract_strided_slice %953 {offsets = [0, 256], sizes = [8, 128], strides = [1, 1]} : vector<8x384xf32> to vector<8x128xf32>
    %976 = vector.extract_strided_slice %958 {offsets = [0, 256], sizes = [8, 128], strides = [1, 1]} : vector<8x384xf32> to vector<8x128xf32>
    %977 = arith.addf %976, %947 : vector<8x128xf32>
    %978 = arith.mulf %966, %977 : vector<8x128xf32>
    %979 = arith.addf %975, %978 : vector<8x128xf32>
    %980 = math.tanh %979 : vector<8x128xf32>
    %981 = arith.subf %954, %980 : vector<8x128xf32>
    %982 = arith.mulf %974, %981 : vector<8x128xf32>
    %983 = arith.addf %980, %982 : vector<8x128xf32>
    %c0_387 = arith.constant 0 : index
    %c0_388 = arith.constant 0 : index
    %984 = vector.load %arg12[%c0_387, %c0_388] : memref<8x128xf32, #tpu.memory_space<vmem>>, vector<8x128xf32>
    tpu.vector_store %arg12[%c0_387, %c0_388], %983 {strides = array<i32>} : memref<8x128xf32, #tpu.memory_space<vmem>>, vector<8x128xf32>,
    %985 = arith.index_cast %951 : i32 to index
    %c0_389 = arith.constant 0 : index
    %986 = vector.load %arg10[%985, %c0_389] : memref<64x128xf32, #tpu.memory_space<vmem>>, vector<8x128xf32>
    tpu.vector_store %arg10[%985, %c0_389], %983 {strides = array<i32>} : memref<64x128xf32, #tpu.memory_space<vmem>>, vector<8x128xf32>,
    %c1_i32_390 = arith.constant 1 : i32
    %c8_i32_391 = arith.constant 8 : i32
    %987 = arith.muli %c1_i32_390, %c8_i32_391 : i32
    %988 = tpu.assume_multiple %987, 8 : i32
    %989 = arith.index_cast %988 : i32 to index
    %c0_392 = arith.constant 0 : index
    %990 = vector.load %arg11[%989, %c0_392] : memref<64x384xf32, #tpu.memory_space<vmem>>, vector<8x384xf32>
    %c0_393 = arith.constant 0 : index
    %c0_394 = arith.constant 0 : index
    %991 = vector.load %arg12[%c0_393, %c0_394] : memref<8x128xf32, #tpu.memory_space<vmem>>, vector<8x128xf32>
    %992 = arith.index_cast %c3_i32_376 : i32 to index
    %c0_395 = arith.constant 0 : index
    %c0_396 = arith.constant 0 : index
    %993 = vector.load %arg2[%992, %c0_395, %c0_396] : memref<4x128x384xf32, #tpu.memory_space<vmem>>, vector<1x128x384xf32>
    %994 = vector.shape_cast %993 : vector<1x128x384xf32> to vector<128x384xf32>
    %cst_397 = arith.constant dense<0.000000e+00> : vector<8x384xf32>
    %995 = tpu.matmul %991, %994, %cst_397 {dimension_numbers = #tpu.dot_dimension_numbers<[1], [0], [0], [1], [0, 0, 1, 1], [], []>} : vector<8x128xf32>, vector<128x384xf32>, vector<8x384xf32> -> vector<8x384xf32>
    %996 = vector.extract_strided_slice %990 {offsets = [0, 0], sizes = [8, 128], strides = [1, 1]} : vector<8x384xf32> to vector<8x128xf32>
    %997 = vector.extract_strided_slice %995 {offsets = [0, 0], sizes = [8, 128], strides = [1, 1]} : vector<8x384xf32> to vector<8x128xf32>
    %998 = arith.addf %996, %997 : vector<8x128xf32>
    %999 = arith.negf %998 : vector<8x128xf32>
    %1000 = math.exp %999 : vector<8x128xf32>
    %cst_398 = arith.constant 1.000000e+00 : f32
    %1001 = vector.broadcast %cst_398 : f32 to vector<8x128xf32>
    %1002 = arith.addf %1001, %1000 : vector<8x128xf32>
    %1003 = arith.divf %1001, %1002 : vector<8x128xf32>
    %1004 = vector.extract_strided_slice %990 {offsets = [0, 128], sizes = [8, 128], strides = [1, 1]} : vector<8x384xf32> to vector<8x128xf32>
    %1005 = vector.extract_strided_slice %995 {offsets = [0, 128], sizes = [8, 128], strides = [1, 1]} : vector<8x384xf32> to vector<8x128xf32>
    %1006 = arith.addf %1004, %1005 : vector<8x128xf32>
    %1007 = arith.negf %1006 : vector<8x128xf32>
    %1008 = math.exp %1007 : vector<8x128xf32>
    %cst_399 = arith.constant 1.000000e+00 : f32
    %1009 = vector.broadcast %cst_399 : f32 to vector<8x128xf32>
    %1010 = arith.addf %1009, %1008 : vector<8x128xf32>
    %1011 = arith.divf %1009, %1010 : vector<8x128xf32>
    %1012 = vector.extract_strided_slice %990 {offsets = [0, 256], sizes = [8, 128], strides = [1, 1]} : vector<8x384xf32> to vector<8x128xf32>
    %1013 = vector.extract_strided_slice %995 {offsets = [0, 256], sizes = [8, 128], strides = [1, 1]} : vector<8x384xf32> to vector<8x128xf32>
    %1014 = arith.addf %1013, %947 : vector<8x128xf32>
    %1015 = arith.mulf %1003, %1014 : vector<8x128xf32>
    %1016 = arith.addf %1012, %1015 : vector<8x128xf32>
    %1017 = math.tanh %1016 : vector<8x128xf32>
    %1018 = arith.subf %991, %1017 : vector<8x128xf32>
    %1019 = arith.mulf %1011, %1018 : vector<8x128xf32>
    %1020 = arith.addf %1017, %1019 : vector<8x128xf32>
    %c0_400 = arith.constant 0 : index
    %c0_401 = arith.constant 0 : index
    %1021 = vector.load %arg12[%c0_400, %c0_401] : memref<8x128xf32, #tpu.memory_space<vmem>>, vector<8x128xf32>
    tpu.vector_store %arg12[%c0_400, %c0_401], %1020 {strides = array<i32>} : memref<8x128xf32, #tpu.memory_space<vmem>>, vector<8x128xf32>,
    %1022 = arith.index_cast %988 : i32 to index
    %c0_402 = arith.constant 0 : index
    %1023 = vector.load %arg10[%1022, %c0_402] : memref<64x128xf32, #tpu.memory_space<vmem>>, vector<8x128xf32>
    tpu.vector_store %arg10[%1022, %c0_402], %1020 {strides = array<i32>} : memref<64x128xf32, #tpu.memory_space<vmem>>, vector<8x128xf32>,
    %c2_i32_403 = arith.constant 2 : i32
    %c8_i32_404 = arith.constant 8 : i32
    %1024 = arith.muli %c2_i32_403, %c8_i32_404 : i32
    %1025 = tpu.assume_multiple %1024, 8 : i32
    %1026 = arith.index_cast %1025 : i32 to index
    %c0_405 = arith.constant 0 : index
    %1027 = vector.load %arg11[%1026, %c0_405] : memref<64x384xf32, #tpu.memory_space<vmem>>, vector<8x384xf32>
    %c0_406 = arith.constant 0 : index
    %c0_407 = arith.constant 0 : index
    %1028 = vector.load %arg12[%c0_406, %c0_407] : memref<8x128xf32, #tpu.memory_space<vmem>>, vector<8x128xf32>
    %1029 = arith.index_cast %c3_i32_376 : i32 to index
    %c0_408 = arith.constant 0 : index
    %c0_409 = arith.constant 0 : index
    %1030 = vector.load %arg2[%1029, %c0_408, %c0_409] : memref<4x128x384xf32, #tpu.memory_space<vmem>>, vector<1x128x384xf32>
    %1031 = vector.shape_cast %1030 : vector<1x128x384xf32> to vector<128x384xf32>
    %cst_410 = arith.constant dense<0.000000e+00> : vector<8x384xf32>
    %1032 = tpu.matmul %1028, %1031, %cst_410 {dimension_numbers = #tpu.dot_dimension_numbers<[1], [0], [0], [1], [0, 0, 1, 1], [], []>} : vector<8x128xf32>, vector<128x384xf32>, vector<8x384xf32> -> vector<8x384xf32>
    %1033 = vector.extract_strided_slice %1027 {offsets = [0, 0], sizes = [8, 128], strides = [1, 1]} : vector<8x384xf32> to vector<8x128xf32>
    %1034 = vector.extract_strided_slice %1032 {offsets = [0, 0], sizes = [8, 128], strides = [1, 1]} : vector<8x384xf32> to vector<8x128xf32>
    %1035 = arith.addf %1033, %1034 : vector<8x128xf32>
    %1036 = arith.negf %1035 : vector<8x128xf32>
    %1037 = math.exp %1036 : vector<8x128xf32>
    %cst_411 = arith.constant 1.000000e+00 : f32
    %1038 = vector.broadcast %cst_411 : f32 to vector<8x128xf32>
    %1039 = arith.addf %1038, %1037 : vector<8x128xf32>
    %1040 = arith.divf %1038, %1039 : vector<8x128xf32>
    %1041 = vector.extract_strided_slice %1027 {offsets = [0, 128], sizes = [8, 128], strides = [1, 1]} : vector<8x384xf32> to vector<8x128xf32>
    %1042 = vector.extract_strided_slice %1032 {offsets = [0, 128], sizes = [8, 128], strides = [1, 1]} : vector<8x384xf32> to vector<8x128xf32>
    %1043 = arith.addf %1041, %1042 : vector<8x128xf32>
    %1044 = arith.negf %1043 : vector<8x128xf32>
    %1045 = math.exp %1044 : vector<8x128xf32>
    %cst_412 = arith.constant 1.000000e+00 : f32
    %1046 = vector.broadcast %cst_412 : f32 to vector<8x128xf32>
    %1047 = arith.addf %1046, %1045 : vector<8x128xf32>
    %1048 = arith.divf %1046, %1047 : vector<8x128xf32>
    %1049 = vector.extract_strided_slice %1027 {offsets = [0, 256], sizes = [8, 128], strides = [1, 1]} : vector<8x384xf32> to vector<8x128xf32>
    %1050 = vector.extract_strided_slice %1032 {offsets = [0, 256], sizes = [8, 128], strides = [1, 1]} : vector<8x384xf32> to vector<8x128xf32>
    %1051 = arith.addf %1050, %947 : vector<8x128xf32>
    %1052 = arith.mulf %1040, %1051 : vector<8x128xf32>
    %1053 = arith.addf %1049, %1052 : vector<8x128xf32>
    %1054 = math.tanh %1053 : vector<8x128xf32>
    %1055 = arith.subf %1028, %1054 : vector<8x128xf32>
    %1056 = arith.mulf %1048, %1055 : vector<8x128xf32>
    %1057 = arith.addf %1054, %1056 : vector<8x128xf32>
    %c0_413 = arith.constant 0 : index
    %c0_414 = arith.constant 0 : index
    %1058 = vector.load %arg12[%c0_413, %c0_414] : memref<8x128xf32, #tpu.memory_space<vmem>>, vector<8x128xf32>
    tpu.vector_store %arg12[%c0_413, %c0_414], %1057 {strides = array<i32>} : memref<8x128xf32, #tpu.memory_space<vmem>>, vector<8x128xf32>,
    %1059 = arith.index_cast %1025 : i32 to index
    %c0_415 = arith.constant 0 : index
    %1060 = vector.load %arg10[%1059, %c0_415] : memref<64x128xf32, #tpu.memory_space<vmem>>, vector<8x128xf32>
    tpu.vector_store %arg10[%1059, %c0_415], %1057 {strides = array<i32>} : memref<64x128xf32, #tpu.memory_space<vmem>>, vector<8x128xf32>,
    %c3_i32_416 = arith.constant 3 : i32
    %c8_i32_417 = arith.constant 8 : i32
    %1061 = arith.muli %c3_i32_416, %c8_i32_417 : i32
    %1062 = tpu.assume_multiple %1061, 8 : i32
    %1063 = arith.index_cast %1062 : i32 to index
    %c0_418 = arith.constant 0 : index
    %1064 = vector.load %arg11[%1063, %c0_418] : memref<64x384xf32, #tpu.memory_space<vmem>>, vector<8x384xf32>
    %c0_419 = arith.constant 0 : index
    %c0_420 = arith.constant 0 : index
    %1065 = vector.load %arg12[%c0_419, %c0_420] : memref<8x128xf32, #tpu.memory_space<vmem>>, vector<8x128xf32>
    %1066 = arith.index_cast %c3_i32_376 : i32 to index
    %c0_421 = arith.constant 0 : index
    %c0_422 = arith.constant 0 : index
    %1067 = vector.load %arg2[%1066, %c0_421, %c0_422] : memref<4x128x384xf32, #tpu.memory_space<vmem>>, vector<1x128x384xf32>
    %1068 = vector.shape_cast %1067 : vector<1x128x384xf32> to vector<128x384xf32>
    %cst_423 = arith.constant dense<0.000000e+00> : vector<8x384xf32>
    %1069 = tpu.matmul %1065, %1068, %cst_423 {dimension_numbers = #tpu.dot_dimension_numbers<[1], [0], [0], [1], [0, 0, 1, 1], [], []>} : vector<8x128xf32>, vector<128x384xf32>, vector<8x384xf32> -> vector<8x384xf32>
    %1070 = vector.extract_strided_slice %1064 {offsets = [0, 0], sizes = [8, 128], strides = [1, 1]} : vector<8x384xf32> to vector<8x128xf32>
    %1071 = vector.extract_strided_slice %1069 {offsets = [0, 0], sizes = [8, 128], strides = [1, 1]} : vector<8x384xf32> to vector<8x128xf32>
    %1072 = arith.addf %1070, %1071 : vector<8x128xf32>
    %1073 = arith.negf %1072 : vector<8x128xf32>
    %1074 = math.exp %1073 : vector<8x128xf32>
    %cst_424 = arith.constant 1.000000e+00 : f32
    %1075 = vector.broadcast %cst_424 : f32 to vector<8x128xf32>
    %1076 = arith.addf %1075, %1074 : vector<8x128xf32>
    %1077 = arith.divf %1075, %1076 : vector<8x128xf32>
    %1078 = vector.extract_strided_slice %1064 {offsets = [0, 128], sizes = [8, 128], strides = [1, 1]} : vector<8x384xf32> to vector<8x128xf32>
    %1079 = vector.extract_strided_slice %1069 {offsets = [0, 128], sizes = [8, 128], strides = [1, 1]} : vector<8x384xf32> to vector<8x128xf32>
    %1080 = arith.addf %1078, %1079 : vector<8x128xf32>
    %1081 = arith.negf %1080 : vector<8x128xf32>
    %1082 = math.exp %1081 : vector<8x128xf32>
    %cst_425 = arith.constant 1.000000e+00 : f32
    %1083 = vector.broadcast %cst_425 : f32 to vector<8x128xf32>
    %1084 = arith.addf %1083, %1082 : vector<8x128xf32>
    %1085 = arith.divf %1083, %1084 : vector<8x128xf32>
    %1086 = vector.extract_strided_slice %1064 {offsets = [0, 256], sizes = [8, 128], strides = [1, 1]} : vector<8x384xf32> to vector<8x128xf32>
    %1087 = vector.extract_strided_slice %1069 {offsets = [0, 256], sizes = [8, 128], strides = [1, 1]} : vector<8x384xf32> to vector<8x128xf32>
    %1088 = arith.addf %1087, %947 : vector<8x128xf32>
    %1089 = arith.mulf %1077, %1088 : vector<8x128xf32>
    %1090 = arith.addf %1086, %1089 : vector<8x128xf32>
    %1091 = math.tanh %1090 : vector<8x128xf32>
    %1092 = arith.subf %1065, %1091 : vector<8x128xf32>
    %1093 = arith.mulf %1085, %1092 : vector<8x128xf32>
    %1094 = arith.addf %1091, %1093 : vector<8x128xf32>
    %c0_426 = arith.constant 0 : index
    %c0_427 = arith.constant 0 : index
    %1095 = vector.load %arg12[%c0_426, %c0_427] : memref<8x128xf32, #tpu.memory_space<vmem>>, vector<8x128xf32>
    tpu.vector_store %arg12[%c0_426, %c0_427], %1094 {strides = array<i32>} : memref<8x128xf32, #tpu.memory_space<vmem>>, vector<8x128xf32>,
    %1096 = arith.index_cast %1062 : i32 to index
    %c0_428 = arith.constant 0 : index
    %1097 = vector.load %arg10[%1096, %c0_428] : memref<64x128xf32, #tpu.memory_space<vmem>>, vector<8x128xf32>
    tpu.vector_store %arg10[%1096, %c0_428], %1094 {strides = array<i32>} : memref<64x128xf32, #tpu.memory_space<vmem>>, vector<8x128xf32>,
    %c4_i32_429 = arith.constant 4 : i32
    %c8_i32_430 = arith.constant 8 : i32
    %1098 = arith.muli %c4_i32_429, %c8_i32_430 : i32
    %1099 = tpu.assume_multiple %1098, 8 : i32
    %1100 = arith.index_cast %1099 : i32 to index
    %c0_431 = arith.constant 0 : index
    %1101 = vector.load %arg11[%1100, %c0_431] : memref<64x384xf32, #tpu.memory_space<vmem>>, vector<8x384xf32>
    %c0_432 = arith.constant 0 : index
    %c0_433 = arith.constant 0 : index
    %1102 = vector.load %arg12[%c0_432, %c0_433] : memref<8x128xf32, #tpu.memory_space<vmem>>, vector<8x128xf32>
    %1103 = arith.index_cast %c3_i32_376 : i32 to index
    %c0_434 = arith.constant 0 : index
    %c0_435 = arith.constant 0 : index
    %1104 = vector.load %arg2[%1103, %c0_434, %c0_435] : memref<4x128x384xf32, #tpu.memory_space<vmem>>, vector<1x128x384xf32>
    %1105 = vector.shape_cast %1104 : vector<1x128x384xf32> to vector<128x384xf32>
    %cst_436 = arith.constant dense<0.000000e+00> : vector<8x384xf32>
    %1106 = tpu.matmul %1102, %1105, %cst_436 {dimension_numbers = #tpu.dot_dimension_numbers<[1], [0], [0], [1], [0, 0, 1, 1], [], []>} : vector<8x128xf32>, vector<128x384xf32>, vector<8x384xf32> -> vector<8x384xf32>
    %1107 = vector.extract_strided_slice %1101 {offsets = [0, 0], sizes = [8, 128], strides = [1, 1]} : vector<8x384xf32> to vector<8x128xf32>
    %1108 = vector.extract_strided_slice %1106 {offsets = [0, 0], sizes = [8, 128], strides = [1, 1]} : vector<8x384xf32> to vector<8x128xf32>
    %1109 = arith.addf %1107, %1108 : vector<8x128xf32>
    %1110 = arith.negf %1109 : vector<8x128xf32>
    %1111 = math.exp %1110 : vector<8x128xf32>
    %cst_437 = arith.constant 1.000000e+00 : f32
    %1112 = vector.broadcast %cst_437 : f32 to vector<8x128xf32>
    %1113 = arith.addf %1112, %1111 : vector<8x128xf32>
    %1114 = arith.divf %1112, %1113 : vector<8x128xf32>
    %1115 = vector.extract_strided_slice %1101 {offsets = [0, 128], sizes = [8, 128], strides = [1, 1]} : vector<8x384xf32> to vector<8x128xf32>
    %1116 = vector.extract_strided_slice %1106 {offsets = [0, 128], sizes = [8, 128], strides = [1, 1]} : vector<8x384xf32> to vector<8x128xf32>
    %1117 = arith.addf %1115, %1116 : vector<8x128xf32>
    %1118 = arith.negf %1117 : vector<8x128xf32>
    %1119 = math.exp %1118 : vector<8x128xf32>
    %cst_438 = arith.constant 1.000000e+00 : f32
    %1120 = vector.broadcast %cst_438 : f32 to vector<8x128xf32>
    %1121 = arith.addf %1120, %1119 : vector<8x128xf32>
    %1122 = arith.divf %1120, %1121 : vector<8x128xf32>
    %1123 = vector.extract_strided_slice %1101 {offsets = [0, 256], sizes = [8, 128], strides = [1, 1]} : vector<8x384xf32> to vector<8x128xf32>
    %1124 = vector.extract_strided_slice %1106 {offsets = [0, 256], sizes = [8, 128], strides = [1, 1]} : vector<8x384xf32> to vector<8x128xf32>
    %1125 = arith.addf %1124, %947 : vector<8x128xf32>
    %1126 = arith.mulf %1114, %1125 : vector<8x128xf32>
    %1127 = arith.addf %1123, %1126 : vector<8x128xf32>
    %1128 = math.tanh %1127 : vector<8x128xf32>
    %1129 = arith.subf %1102, %1128 : vector<8x128xf32>
    %1130 = arith.mulf %1122, %1129 : vector<8x128xf32>
    %1131 = arith.addf %1128, %1130 : vector<8x128xf32>
    %c0_439 = arith.constant 0 : index
    %c0_440 = arith.constant 0 : index
    %1132 = vector.load %arg12[%c0_439, %c0_440] : memref<8x128xf32, #tpu.memory_space<vmem>>, vector<8x128xf32>
    tpu.vector_store %arg12[%c0_439, %c0_440], %1131 {strides = array<i32>} : memref<8x128xf32, #tpu.memory_space<vmem>>, vector<8x128xf32>,
    %1133 = arith.index_cast %1099 : i32 to index
    %c0_441 = arith.constant 0 : index
    %1134 = vector.load %arg10[%1133, %c0_441] : memref<64x128xf32, #tpu.memory_space<vmem>>, vector<8x128xf32>
    tpu.vector_store %arg10[%1133, %c0_441], %1131 {strides = array<i32>} : memref<64x128xf32, #tpu.memory_space<vmem>>, vector<8x128xf32>,
    %c5_i32_442 = arith.constant 5 : i32
    %c8_i32_443 = arith.constant 8 : i32
    %1135 = arith.muli %c5_i32_442, %c8_i32_443 : i32
    %1136 = tpu.assume_multiple %1135, 8 : i32
    %1137 = arith.index_cast %1136 : i32 to index
    %c0_444 = arith.constant 0 : index
    %1138 = vector.load %arg11[%1137, %c0_444] : memref<64x384xf32, #tpu.memory_space<vmem>>, vector<8x384xf32>
    %c0_445 = arith.constant 0 : index
    %c0_446 = arith.constant 0 : index
    %1139 = vector.load %arg12[%c0_445, %c0_446] : memref<8x128xf32, #tpu.memory_space<vmem>>, vector<8x128xf32>
    %1140 = arith.index_cast %c3_i32_376 : i32 to index
    %c0_447 = arith.constant 0 : index
    %c0_448 = arith.constant 0 : index
    %1141 = vector.load %arg2[%1140, %c0_447, %c0_448] : memref<4x128x384xf32, #tpu.memory_space<vmem>>, vector<1x128x384xf32>
    %1142 = vector.shape_cast %1141 : vector<1x128x384xf32> to vector<128x384xf32>
    %cst_449 = arith.constant dense<0.000000e+00> : vector<8x384xf32>
    %1143 = tpu.matmul %1139, %1142, %cst_449 {dimension_numbers = #tpu.dot_dimension_numbers<[1], [0], [0], [1], [0, 0, 1, 1], [], []>} : vector<8x128xf32>, vector<128x384xf32>, vector<8x384xf32> -> vector<8x384xf32>
    %1144 = vector.extract_strided_slice %1138 {offsets = [0, 0], sizes = [8, 128], strides = [1, 1]} : vector<8x384xf32> to vector<8x128xf32>
    %1145 = vector.extract_strided_slice %1143 {offsets = [0, 0], sizes = [8, 128], strides = [1, 1]} : vector<8x384xf32> to vector<8x128xf32>
    %1146 = arith.addf %1144, %1145 : vector<8x128xf32>
    %1147 = arith.negf %1146 : vector<8x128xf32>
    %1148 = math.exp %1147 : vector<8x128xf32>
    %cst_450 = arith.constant 1.000000e+00 : f32
    %1149 = vector.broadcast %cst_450 : f32 to vector<8x128xf32>
    %1150 = arith.addf %1149, %1148 : vector<8x128xf32>
    %1151 = arith.divf %1149, %1150 : vector<8x128xf32>
    %1152 = vector.extract_strided_slice %1138 {offsets = [0, 128], sizes = [8, 128], strides = [1, 1]} : vector<8x384xf32> to vector<8x128xf32>
    %1153 = vector.extract_strided_slice %1143 {offsets = [0, 128], sizes = [8, 128], strides = [1, 1]} : vector<8x384xf32> to vector<8x128xf32>
    %1154 = arith.addf %1152, %1153 : vector<8x128xf32>
    %1155 = arith.negf %1154 : vector<8x128xf32>
    %1156 = math.exp %1155 : vector<8x128xf32>
    %cst_451 = arith.constant 1.000000e+00 : f32
    %1157 = vector.broadcast %cst_451 : f32 to vector<8x128xf32>
    %1158 = arith.addf %1157, %1156 : vector<8x128xf32>
    %1159 = arith.divf %1157, %1158 : vector<8x128xf32>
    %1160 = vector.extract_strided_slice %1138 {offsets = [0, 256], sizes = [8, 128], strides = [1, 1]} : vector<8x384xf32> to vector<8x128xf32>
    %1161 = vector.extract_strided_slice %1143 {offsets = [0, 256], sizes = [8, 128], strides = [1, 1]} : vector<8x384xf32> to vector<8x128xf32>
    %1162 = arith.addf %1161, %947 : vector<8x128xf32>
    %1163 = arith.mulf %1151, %1162 : vector<8x128xf32>
    %1164 = arith.addf %1160, %1163 : vector<8x128xf32>
    %1165 = math.tanh %1164 : vector<8x128xf32>
    %1166 = arith.subf %1139, %1165 : vector<8x128xf32>
    %1167 = arith.mulf %1159, %1166 : vector<8x128xf32>
    %1168 = arith.addf %1165, %1167 : vector<8x128xf32>
    %c0_452 = arith.constant 0 : index
    %c0_453 = arith.constant 0 : index
    %1169 = vector.load %arg12[%c0_452, %c0_453] : memref<8x128xf32, #tpu.memory_space<vmem>>, vector<8x128xf32>
    tpu.vector_store %arg12[%c0_452, %c0_453], %1168 {strides = array<i32>} : memref<8x128xf32, #tpu.memory_space<vmem>>, vector<8x128xf32>,
    %1170 = arith.index_cast %1136 : i32 to index
    %c0_454 = arith.constant 0 : index
    %1171 = vector.load %arg10[%1170, %c0_454] : memref<64x128xf32, #tpu.memory_space<vmem>>, vector<8x128xf32>
    tpu.vector_store %arg10[%1170, %c0_454], %1168 {strides = array<i32>} : memref<64x128xf32, #tpu.memory_space<vmem>>, vector<8x128xf32>,
    %c6_i32_455 = arith.constant 6 : i32
    %c8_i32_456 = arith.constant 8 : i32
    %1172 = arith.muli %c6_i32_455, %c8_i32_456 : i32
    %1173 = tpu.assume_multiple %1172, 8 : i32
    %1174 = arith.index_cast %1173 : i32 to index
    %c0_457 = arith.constant 0 : index
    %1175 = vector.load %arg11[%1174, %c0_457] : memref<64x384xf32, #tpu.memory_space<vmem>>, vector<8x384xf32>
    %c0_458 = arith.constant 0 : index
    %c0_459 = arith.constant 0 : index
    %1176 = vector.load %arg12[%c0_458, %c0_459] : memref<8x128xf32, #tpu.memory_space<vmem>>, vector<8x128xf32>
    %1177 = arith.index_cast %c3_i32_376 : i32 to index
    %c0_460 = arith.constant 0 : index
    %c0_461 = arith.constant 0 : index
    %1178 = vector.load %arg2[%1177, %c0_460, %c0_461] : memref<4x128x384xf32, #tpu.memory_space<vmem>>, vector<1x128x384xf32>
    %1179 = vector.shape_cast %1178 : vector<1x128x384xf32> to vector<128x384xf32>
    %cst_462 = arith.constant dense<0.000000e+00> : vector<8x384xf32>
    %1180 = tpu.matmul %1176, %1179, %cst_462 {dimension_numbers = #tpu.dot_dimension_numbers<[1], [0], [0], [1], [0, 0, 1, 1], [], []>} : vector<8x128xf32>, vector<128x384xf32>, vector<8x384xf32> -> vector<8x384xf32>
    %1181 = vector.extract_strided_slice %1175 {offsets = [0, 0], sizes = [8, 128], strides = [1, 1]} : vector<8x384xf32> to vector<8x128xf32>
    %1182 = vector.extract_strided_slice %1180 {offsets = [0, 0], sizes = [8, 128], strides = [1, 1]} : vector<8x384xf32> to vector<8x128xf32>
    %1183 = arith.addf %1181, %1182 : vector<8x128xf32>
    %1184 = arith.negf %1183 : vector<8x128xf32>
    %1185 = math.exp %1184 : vector<8x128xf32>
    %cst_463 = arith.constant 1.000000e+00 : f32
    %1186 = vector.broadcast %cst_463 : f32 to vector<8x128xf32>
    %1187 = arith.addf %1186, %1185 : vector<8x128xf32>
    %1188 = arith.divf %1186, %1187 : vector<8x128xf32>
    %1189 = vector.extract_strided_slice %1175 {offsets = [0, 128], sizes = [8, 128], strides = [1, 1]} : vector<8x384xf32> to vector<8x128xf32>
    %1190 = vector.extract_strided_slice %1180 {offsets = [0, 128], sizes = [8, 128], strides = [1, 1]} : vector<8x384xf32> to vector<8x128xf32>
    %1191 = arith.addf %1189, %1190 : vector<8x128xf32>
    %1192 = arith.negf %1191 : vector<8x128xf32>
    %1193 = math.exp %1192 : vector<8x128xf32>
    %cst_464 = arith.constant 1.000000e+00 : f32
    %1194 = vector.broadcast %cst_464 : f32 to vector<8x128xf32>
    %1195 = arith.addf %1194, %1193 : vector<8x128xf32>
    %1196 = arith.divf %1194, %1195 : vector<8x128xf32>
    %1197 = vector.extract_strided_slice %1175 {offsets = [0, 256], sizes = [8, 128], strides = [1, 1]} : vector<8x384xf32> to vector<8x128xf32>
    %1198 = vector.extract_strided_slice %1180 {offsets = [0, 256], sizes = [8, 128], strides = [1, 1]} : vector<8x384xf32> to vector<8x128xf32>
    %1199 = arith.addf %1198, %947 : vector<8x128xf32>
    %1200 = arith.mulf %1188, %1199 : vector<8x128xf32>
    %1201 = arith.addf %1197, %1200 : vector<8x128xf32>
    %1202 = math.tanh %1201 : vector<8x128xf32>
    %1203 = arith.subf %1176, %1202 : vector<8x128xf32>
    %1204 = arith.mulf %1196, %1203 : vector<8x128xf32>
    %1205 = arith.addf %1202, %1204 : vector<8x128xf32>
    %c0_465 = arith.constant 0 : index
    %c0_466 = arith.constant 0 : index
    %1206 = vector.load %arg12[%c0_465, %c0_466] : memref<8x128xf32, #tpu.memory_space<vmem>>, vector<8x128xf32>
    tpu.vector_store %arg12[%c0_465, %c0_466], %1205 {strides = array<i32>} : memref<8x128xf32, #tpu.memory_space<vmem>>, vector<8x128xf32>,
    %1207 = arith.index_cast %1173 : i32 to index
    %c0_467 = arith.constant 0 : index
    %1208 = vector.load %arg10[%1207, %c0_467] : memref<64x128xf32, #tpu.memory_space<vmem>>, vector<8x128xf32>
    tpu.vector_store %arg10[%1207, %c0_467], %1205 {strides = array<i32>} : memref<64x128xf32, #tpu.memory_space<vmem>>, vector<8x128xf32>,
    %c7_i32_468 = arith.constant 7 : i32
    %c8_i32_469 = arith.constant 8 : i32
    %1209 = arith.muli %c7_i32_468, %c8_i32_469 : i32
    %1210 = tpu.assume_multiple %1209, 8 : i32
    %1211 = arith.index_cast %1210 : i32 to index
    %c0_470 = arith.constant 0 : index
    %1212 = vector.load %arg11[%1211, %c0_470] : memref<64x384xf32, #tpu.memory_space<vmem>>, vector<8x384xf32>
    %c0_471 = arith.constant 0 : index
    %c0_472 = arith.constant 0 : index
    %1213 = vector.load %arg12[%c0_471, %c0_472] : memref<8x128xf32, #tpu.memory_space<vmem>>, vector<8x128xf32>
    %1214 = arith.index_cast %c3_i32_376 : i32 to index
    %c0_473 = arith.constant 0 : index
    %c0_474 = arith.constant 0 : index
    %1215 = vector.load %arg2[%1214, %c0_473, %c0_474] : memref<4x128x384xf32, #tpu.memory_space<vmem>>, vector<1x128x384xf32>
    %1216 = vector.shape_cast %1215 : vector<1x128x384xf32> to vector<128x384xf32>
    %cst_475 = arith.constant dense<0.000000e+00> : vector<8x384xf32>
    %1217 = tpu.matmul %1213, %1216, %cst_475 {dimension_numbers = #tpu.dot_dimension_numbers<[1], [0], [0], [1], [0, 0, 1, 1], [], []>} : vector<8x128xf32>, vector<128x384xf32>, vector<8x384xf32> -> vector<8x384xf32>
    %1218 = vector.extract_strided_slice %1212 {offsets = [0, 0], sizes = [8, 128], strides = [1, 1]} : vector<8x384xf32> to vector<8x128xf32>
    %1219 = vector.extract_strided_slice %1217 {offsets = [0, 0], sizes = [8, 128], strides = [1, 1]} : vector<8x384xf32> to vector<8x128xf32>
    %1220 = arith.addf %1218, %1219 : vector<8x128xf32>
    %1221 = arith.negf %1220 : vector<8x128xf32>
    %1222 = math.exp %1221 : vector<8x128xf32>
    %cst_476 = arith.constant 1.000000e+00 : f32
    %1223 = vector.broadcast %cst_476 : f32 to vector<8x128xf32>
    %1224 = arith.addf %1223, %1222 : vector<8x128xf32>
    %1225 = arith.divf %1223, %1224 : vector<8x128xf32>
    %1226 = vector.extract_strided_slice %1212 {offsets = [0, 128], sizes = [8, 128], strides = [1, 1]} : vector<8x384xf32> to vector<8x128xf32>
    %1227 = vector.extract_strided_slice %1217 {offsets = [0, 128], sizes = [8, 128], strides = [1, 1]} : vector<8x384xf32> to vector<8x128xf32>
    %1228 = arith.addf %1226, %1227 : vector<8x128xf32>
    %1229 = arith.negf %1228 : vector<8x128xf32>
    %1230 = math.exp %1229 : vector<8x128xf32>
    %cst_477 = arith.constant 1.000000e+00 : f32
    %1231 = vector.broadcast %cst_477 : f32 to vector<8x128xf32>
    %1232 = arith.addf %1231, %1230 : vector<8x128xf32>
    %1233 = arith.divf %1231, %1232 : vector<8x128xf32>
    %1234 = vector.extract_strided_slice %1212 {offsets = [0, 256], sizes = [8, 128], strides = [1, 1]} : vector<8x384xf32> to vector<8x128xf32>
    %1235 = vector.extract_strided_slice %1217 {offsets = [0, 256], sizes = [8, 128], strides = [1, 1]} : vector<8x384xf32> to vector<8x128xf32>
    %1236 = arith.addf %1235, %947 : vector<8x128xf32>
    %1237 = arith.mulf %1225, %1236 : vector<8x128xf32>
    %1238 = arith.addf %1234, %1237 : vector<8x128xf32>
    %1239 = math.tanh %1238 : vector<8x128xf32>
    %1240 = arith.subf %1213, %1239 : vector<8x128xf32>
    %1241 = arith.mulf %1233, %1240 : vector<8x128xf32>
    %1242 = arith.addf %1239, %1241 : vector<8x128xf32>
    %c0_478 = arith.constant 0 : index
    %c0_479 = arith.constant 0 : index
    %1243 = vector.load %arg12[%c0_478, %c0_479] : memref<8x128xf32, #tpu.memory_space<vmem>>, vector<8x128xf32>
    tpu.vector_store %arg12[%c0_478, %c0_479], %1242 {strides = array<i32>} : memref<8x128xf32, #tpu.memory_space<vmem>>, vector<8x128xf32>,
    %1244 = arith.index_cast %1210 : i32 to index
    %c0_480 = arith.constant 0 : index
    %1245 = vector.load %arg10[%1244, %c0_480] : memref<64x128xf32, #tpu.memory_space<vmem>>, vector<8x128xf32>
    tpu.vector_store %arg10[%1244, %c0_480], %1242 {strides = array<i32>} : memref<64x128xf32, #tpu.memory_space<vmem>>, vector<8x128xf32>,
    %c8_i32_481 = arith.constant 8 : i32
    %c0_482 = arith.constant 0 : index
    %c0_483 = arith.constant 0 : index
    %1246 = vector.load %arg10[%c0_482, %c0_483] : memref<64x128xf32, #tpu.memory_space<vmem>>, vector<64x128xf32>
    %c0_484 = arith.constant 0 : index
    %c0_485 = arith.constant 0 : index
    %1247 = vector.load %arg5[%c0_484, %c0_485] : memref<128x128xf32, #tpu.memory_space<vmem>>, vector<128x128xf32>
    %cst_486 = arith.constant dense<0.000000e+00> : vector<64x128xf32>
    %1248 = tpu.matmul %1246, %1247, %cst_486 {dimension_numbers = #tpu.dot_dimension_numbers<[1], [0], [0], [1], [0, 0, 1, 1], [], []>} : vector<64x128xf32>, vector<128x128xf32>, vector<64x128xf32> -> vector<64x128xf32>
    %c0_487 = arith.constant 0 : index
    %c0_488 = arith.constant 0 : index
    %1249 = vector.load %arg6[%c0_487, %c0_488] : memref<1x128xf32, #tpu.memory_space<vmem>>, vector<1x128xf32>
    %1250 = vector.broadcast %1249 : vector<1x128xf32> to vector<64x128xf32>
    %1251 = arith.addf %1248, %1250 : vector<64x128xf32>
    %cst_489 = arith.constant 0.000000e+00 : f32
    %1252 = vector.broadcast %cst_489 : f32 to vector<64x128xf32>
    %1253 = arith.maximumf %1251, %1252 : vector<64x128xf32>
    %c0_490 = arith.constant 0 : index
    %c0_491 = arith.constant 0 : index
    %1254 = vector.load %arg7[%c0_490, %c0_491] : memref<128x128xf32, #tpu.memory_space<vmem>>, vector<128x128xf32>
    %cst_492 = arith.constant dense<0.000000e+00> : vector<64x128xf32>
    %1255 = tpu.matmul %1253, %1254, %cst_492 {dimension_numbers = #tpu.dot_dimension_numbers<[1], [0], [0], [1], [0, 0, 1, 1], [], []>} : vector<64x128xf32>, vector<128x128xf32>, vector<64x128xf32> -> vector<64x128xf32>
    %c0_493 = arith.constant 0 : index
    %c0_494 = arith.constant 0 : index
    %1256 = vector.load %arg8[%c0_493, %c0_494] : memref<1x128xf32, #tpu.memory_space<vmem>>, vector<1x128xf32>
    %1257 = vector.broadcast %1256 : vector<1x128xf32> to vector<64x128xf32>
    %1258 = arith.addf %1255, %1257 : vector<64x128xf32>
    %c0_495 = arith.constant 0 : index
    %c0_496 = arith.constant 0 : index
    %1259 = vector.load %arg9[%c0_495, %c0_496] : memref<64x128xf32, #tpu.memory_space<vmem>>, vector<64x128xf32>
    tpu.vector_store %arg9[%c0_495, %c0_496], %1258 {strides = array<i32>} : memref<64x128xf32, #tpu.memory_space<vmem>>, vector<64x128xf32>,
    return
  }
}

</mosaic_0001>

<bundles_post_ra>
// kernel: my_model_forward.1
= control target key start
LH: loop header
LB: loop body
LE: loop exit
PB: predicated region body
PF: predicated region fallthrough
CT: control target
= control target key end

     0   :  { %14 = vsyncpa [#allocation6], 0  ;;  %s14921_s0 = inlined_call_operand.vmem [shape: f32[64,128], index: 0, kind: input, shape index: {}]   ;;  %s14922_s1 = inlined_call_operand.hbm [shape: f32[4,128,384], index: 1, kind: input, shape index: {}]   ;;  %s14923_s2 = inlined_call_operand.hbm [shape: f32[4,128,384], index: 2, kind: input, shape index: {}]   ;;  %s14924_s3 = inlined_call_operand.vmem [shape: f32[4,1,384], index: 3, kind: input, shape index: {}]   ;;  %s14925_s4 = inlined_call_operand.vmem [shape: f32[4,1,128], index: 4, kind: input, shape index: {}]   ;;  %s14926_s5 = inlined_call_operand.hbm [shape: f32[128,128], index: 5, kind: input, shape index: {}]   ;;  %s14927_s6 = inlined_call_operand.vmem [shape: f32[1,128], index: 6, kind: input, shape index: {}]   ;;  %s14928_s7 = inlined_call_operand.hbm [shape: f32[128,128], index: 7, kind: input, shape index: {}]   ;;  %s14929_s8 = inlined_call_operand.vmem [shape: f32[1,128], index: 8, kind: input, shape index: {}]   ;;  %s14930_s9 = inlined_call_operand.vmem [shape: f32[64,128], index: 9, kind: output, shape index: {}]  }
   0x1   :  { %15 = vsyncpa [#allocation8], 0 }
   0x2   :  { %16 = vsyncpa [#allocation11], 0  ;;  %s11212_s30 = smov [#allocation7]   ;;  %s11213_s11 = smov [#allocation5]  }
   0x3   :  { %s36_s10 = sshll.u32 %s11212_s30, 4  ;;  %s24_s12 = sshll.u32 %s11213_s11, 4  ;;  %s37_s10 = int_to_ptr.vmem [resolvable:$true] %s36_s10  ;;  %s25_s12 = int_to_ptr.vmem [resolvable:$true] %s24_s12 }
   0x4   :  { %s11134_s13 = scalar_lea.vmem %s37_s10, 24576  ;;  %p11139_p1 = scmp.lt.s32.totalorder %s37_s10, %s37_s10 }
   0x5   :  { %p11135_p0 = scmp.ne.s32.totalorder %s37_s10, %s11134_s13  ;;  %p11140_p2 = scmp.lt.s32.totalorder %s11134_s13, %s11134_s13 }
   0x7   :  { %p11141_p3 = por %p11140_p2, %p11139_p1 }
   0x9   :  { %p11142_p4 = pnand %p11141_p3, %p11135_p0 }
   0xb   :  { %11145 = shalt.err (!%p11142_p4)
}
   0xc   :  { %s11214_s14 = smov 384   ;;  %s11215_s15 = smov 24  }
   0xd   :  { %42 = dma.hbm_to_vmem [thread:$0]  %s14923_s2, 24576, %s37_s10, [#allocation8], %s11214_s14, %s11214_s14, %s11215_s15  }
   0xe   :  { %s11154_s18 = scalar_lea.vmem %s25_s12, 24576  ;;  %p11159_p6 = scmp.lt.s32.totalorder %s25_s12, %s25_s12 }
   0xf   :  { %p11155_p5 = scmp.ne.s32.totalorder %s25_s12, %s11154_s18  ;;  %p11160_p7 = scmp.lt.s32.totalorder %s11154_s18, %s11154_s18 }
  0x11   :  { %p11161_p8 = por %p11160_p7, %p11159_p6 }
  0x13   :  { %p11162_p9 = pnand %p11161_p8, %p11155_p5 }
  0x15   :  { %11165 = shalt.err (!%p11162_p9)
}
  0x16   :  { %30 = dma.hbm_to_vmem [thread:$0]  %s14922_s1, 24576, %s25_s12, [#allocation6], %s11214_s14, %s11214_s14, %s11215_s15  }
  0x17   :  { %s11216_s21 = smov [#allocation9]  }
  0x18   :  { %s52_s22 = sshll.u32 %s11216_s21, 4  ;;  %s53_s22 = int_to_ptr.vmem [resolvable:$true] %s52_s22 }
  0x19   :  { %s11174_s23 = scalar_lea.vmem %s53_s22, 2048  ;;  %p11179_p11 = scmp.lt.s32.totalorder %s53_s22, %s53_s22 }
  0x1a   :  { %p11175_p10 = scmp.ne.s32.totalorder %s53_s22, %s11174_s23  ;;  %p11180_p12 = scmp.lt.s32.totalorder %s11174_s23, %s11174_s23 }
  0x1c   :  { %p11181_p13 = por %p11180_p12, %p11179_p11 }
  0x1e   :  { %p11182_p0 = pnand %p11181_p13, %p11175_p10 }
  0x20   :  { %11185 = shalt.err (!%p11182_p0)
}
  0x21   :  { %s11217_s2 = smov 128   ;;  %s11218_s24 = smov 8  }
  0x22   :  { %58 = dma.hbm_to_vmem [thread:$0]  %s14926_s5, 2048, %s53_s22, [#allocation8], %s11217_s2, %s11217_s2, %s11218_s24  }
  0x23   :  { %s11219_s27 = smov [#allocation10]  }
  0x24   :  { %s66_s28 = sshll.u32 %s11219_s27, 4  ;;  %s67_s28 = int_to_ptr.vmem [resolvable:$true] %s66_s28 }
  0x25   :  { %s11194_s1 = scalar_lea.vmem %s67_s28, 2048  ;;  %p11199_p2 = scmp.lt.s32.totalorder %s67_s28, %s67_s28 }
  0x26   :  { %p11195_p1 = scmp.ne.s32.totalorder %s67_s28, %s11194_s1  ;;  %p11200_p3 = scmp.lt.s32.totalorder %s11194_s1, %s11194_s1 }
  0x28   :  { %p11201_p4 = por %p11200_p3, %p11199_p2 }
  0x2a   :  { %p11202_p5 = pnand %p11201_p4, %p11195_p1 }
  0x2c   :  { %11205 = shalt.err (!%p11202_p5)
}
  0x2d   :  { %72 = dma.hbm_to_vmem [thread:$0]  %s14928_s7, 2048, %s67_s28, [#allocation11], %s11217_s2, %s11217_s2, %s11218_s24  }
  0x2e   :  { %11206 = dma.done.wait [#allocation6], 24576  }
  0x2f   :  { %11207 = vsyncadd [#allocation6], 4294942720 }
  0x30   :  { %11208 = dma.done.wait [#allocation8], 26624  }
  0x31   :  { %11209 = vsyncadd [#allocation8], 4294940672 }
  0x32   :  { %11210 = dma.done.wait [#allocation11], 2048  }
  0x33   :  { %11211 = vsyncadd [#allocation11], 4294965248  ;;  %v14931_v0 = vmov 0.0   ;;  %v157_v1 = vld [vmem:[#allocation5 + $0x170] sm:$0xff]  ;;  %v156_v2 = vld [vmem:[#allocation5 + $0x168] sm:$0xff]  ;;  %vm11221_vm0 = vmmov 0  }
  0x34   :  { %240 = vmatprep.mubr.f32.mxu0 %v14931_v0  ;;  %v154_v3 = vld [vmem:[#allocation5 + $0x158] sm:$0xff]  ;;  %176 = vmatprep.subr.mxu0 %v157_v1  ;;  %v153_v4 = vld [vmem:[#allocation5 + $0x150] sm:$0xff]  ;;  %v151_v5 = vld [vmem:[#allocation5 + $0x140] sm:$0xff] }
  0x35   :  { %177 = vmatpush1.msra.mxu0 %v156_v2  ;;  %v150_v6 = vld [vmem:[#allocation5 + $0x138] sm:$0xff]  ;;  %v148_v7 = vld [vmem:[#allocation5 + $0x128] sm:$0xff]  ;;  %v147_v8 = vld [vmem:[#allocation5 + $0x120] sm:$0xff] }
  0x36   :  { %178 = vmatprep.subr.mxu0 %v154_v3  ;;  %v145_v9 = vld [vmem:[#allocation5 + $0x110] sm:$0xff]  ;;  %v144_v10 = vld [vmem:[#allocation5 + $0x108] sm:$0xff]  ;;  %v142_v11 = vld [vmem:[#allocation5 + $0xf8] sm:$0xff] }
  0x37   :  { %179 = vmatpush1.msra.mxu0 %v153_v4  ;;  %v141_v12 = vld [vmem:[#allocation5 + $0xf0] sm:$0xff]  ;;  %v139_v13 = vld [vmem:[#allocation5 + $0xe0] sm:$0xff]  ;;  %v158_v14 = vld [vmem:[#allocation5 + $0x178] sm:$0xff] }
  0x38   :  { %180 = vmatprep.subr.mxu0 %v151_v5  ;;  %v138_v15 = vld [vmem:[#allocation5 + $0xd8] sm:$0xff]  ;;  %9408 = vmatprep.subr.mxu1 %v158_v14  ;;  %v155_v16 = vld [vmem:[#allocation5 + $0x160] sm:$0xff]  ;;  %v136_v17 = vld [vmem:[#allocation5 + $0xc8] sm:$0xff] }
  0x39   :  { %181 = vmatpush1.msra.mxu0 %v150_v6  ;;  %9409 = vmatpush3.msra.mxu1 %v158_v14  ;;  %v152_v18 = vld [vmem:[#allocation5 + $0x148] sm:$0xff]  ;;  %v135_v19 = vld [vmem:[#allocation5 + $0xc0] sm:$0xff]  ;;  %v133_v20 = vld [vmem:[#allocation5 + $0xb0] sm:$0xff] }
  0x3a   :  { %182 = vmatprep.subr.mxu0 %v148_v7  ;;  %9410 = vmatprep.subr.mxu1 %v155_v16  ;;  %v149_v21 = vld [vmem:[#allocation5 + $0x130] sm:$0xff]  ;;  %v132_v22 = vld [vmem:[#allocation5 + $0xa8] sm:$0xff]  ;;  %v130_v23 = vld [vmem:[#allocation5 + $0x98] sm:$0xff] }
  0x3b   :  { %183 = vmatpush1.msra.mxu0 %v147_v8  ;;  %9411 = vmatpush3.msra.mxu1 %v155_v16  ;;  %v146_v24 = vld [vmem:[#allocation5 + $0x118] sm:$0xff]  ;;  %v129_v25 = vld [vmem:[#allocation5 + $0x90] sm:$0xff]  ;;  %v127_v26 = vld [vmem:[#allocation5 + $0x80] sm:$0xff] }
  0x3c   :  { %184 = vmatprep.subr.mxu0 %v145_v9  ;;  %9412 = vmatprep.subr.mxu1 %v152_v18  ;;  %v143_v27 = vld [vmem:[#allocation5 + $0x100] sm:$0xff]  ;;  %v126_v28 = vld [vmem:[#allocation5 + $0x78] sm:$0xff]  ;;  %v124_v29 = vld [vmem:[#allocation5 + $0x68] sm:$0xff] }
  0x3d   :  { %185 = vmatpush1.msra.mxu0 %v144_v10  ;;  %9413 = vmatpush3.msra.mxu1 %v152_v18  ;;  %v140_v30 = vld [vmem:[#allocation5 + $0xe8] sm:$0xff]  ;;  %v123_v31 = vld [vmem:[#allocation5 + $0x60] sm:$0xff]  ;;  %v121_v32 = vld [vmem:[#allocation5 + $0x50] sm:$0xff] }
  0x3e   :  { %186 = vmatprep.subr.mxu0 %v142_v11  ;;  %9414 = vmatprep.subr.mxu1 %v149_v21  ;;  %v137_v33 = vld [vmem:[#allocation5 + $0xd0] sm:$0xff]  ;;  %v120_v34 = vld [vmem:[#allocation5 + $0x48] sm:$0xff]  ;;  %v118_v35 = vld [vmem:[#allocation5 + $0x38] sm:$0xff] }
  0x3f   :  { %187 = vmatpush1.msra.mxu0 %v141_v12  ;;  %9415 = vmatpush3.msra.mxu1 %v149_v21  ;;  %v134_v36 = vld [vmem:[#allocation5 + $0xb8] sm:$0xff]  ;;  %v117_v37 = vld [vmem:[#allocation5 + $0x30] sm:$0xff]  ;;  %v115_v38 = vld [vmem:[#allocation5 + $0x20] sm:$0xff] }
  0x40   :  { %188 = vmatprep.subr.mxu0 %v139_v13  ;;  %9416 = vmatprep.subr.mxu1 %v146_v24  ;;  %v131_v39 = vld [vmem:[#allocation5 + $0xa0] sm:$0xff]  ;;  %v114_v40 = vld [vmem:[#allocation5 + $0x18] sm:$0xff]  ;;  %v112_v41 = vld [vmem:[#allocation5 + $0x8] sm:$0xff] }
  0x41   :  { %189 = vmatpush1.msra.mxu0 %v138_v15  ;;  %9417 = vmatpush3.msra.mxu1 %v146_v24  ;;  %v128_v42 = vld [vmem:[#allocation5 + $0x88] sm:$0xff]  ;;  %v111_v43 = vld [vmem:[#allocation5] sm:$0xff]  ;;  %v11290_v45 = vld [vmem:[#allocation7 + $0x170] sm:$0xff] }
  0x42   :  { %190 = vmatprep.subr.mxu0 %v136_v17  ;;  %9418 = vmatprep.subr.mxu1 %v143_v27  ;;  %v11288_v44 = vld [vmem:[%s14921_s0] sm:$0xff]  ;;  %v11292_v46 = vld [vmem:[#allocation7 + $0x168] sm:$0xff]  ;;  %v11294_v47 = vld [vmem:[#allocation7 + $0x158] sm:$0xff] }
  0x43   :  { %191 = vmatpush1.msra.mxu0 %v135_v19  ;;  %9419 = vmatpush3.msra.mxu1 %v143_v27  ;;  %v125_v48 = vld [vmem:[#allocation5 + $0x70] sm:$0xff]  ;;  %v11305_v50 = vld [vmem:[%s14921_s0 + $0x8] sm:$0xff]  ;;  %v11307_v51 = vld [vmem:[#allocation7 + $0x140] sm:$0xff] }
  0x44   :  { %192 = vmatprep.subr.mxu0 %v133_v20  ;;  %9420 = vmatprep.subr.mxu1 %v140_v30  ;;  %v11298_v49 = vld [vmem:[#allocation7 + $0x150] sm:$0xff]  ;;  %v11310_v52 = vld [vmem:[#allocation7 + $0x138] sm:$0xff]  ;;  %v11313_v53 = vld [vmem:[#allocation7 + $0x128] sm:$0xff] }
  0x45   :  { %193 = vmatpush1.msra.mxu0 %v132_v22  ;;  %9421 = vmatpush3.msra.mxu1 %v140_v30  ;;  %v122_v54 = vld [vmem:[#allocation5 + $0x58] sm:$0xff]  ;;  %v11317_v55 = vld [vmem:[#allocation7 + $0x120] sm:$0xff]  ;;  %v11324_v56 = vld [vmem:[%s14921_s0 + $0x10] sm:$0xff] }
  0x46   :  { %194 = vmatprep.subr.mxu0 %v130_v23  ;;  %9422 = vmatprep.subr.mxu1 %v137_v33  ;;  %v11326_v57 = vld [vmem:[#allocation7 + $0x110] sm:$0xff]  ;;  %v11329_v58 = vld [vmem:[#allocation7 + $0x108] sm:$0xff]  ;;  %v11332_v59 = vld [vmem:[#allocation7 + $0xf8] sm:$0xff] }
  0x47   :  { %195 = vmatpush1.msra.mxu0 %v129_v25  ;;  %9423 = vmatpush3.msra.mxu1 %v137_v33  ;;  %v119_v60 = vld [vmem:[#allocation5 + $0x40] sm:$0xff]  ;;  %v11336_v61 = vld [vmem:[#allocation7 + $0xf0] sm:$0xff]  ;;  %v11343_v62 = vld [vmem:[%s14921_s0 + $0x18] sm:$0xff] }
  0x48   :  { %196 = vmatprep.subr.mxu0 %v127_v26  ;;  %9424 = vmatprep.subr.mxu1 %v134_v36  ;;  %v11345_v63 = vld [vmem:[#allocation7 + $0xe0] sm:$0xff]  ;;  %v11348_v1 = vld [vmem:[#allocation7 + $0xd8] sm:$0xff]  ;;  %v11351_v2 = vld [vmem:[#allocation7 + $0xc8] sm:$0xff] }
  0x49   :  { %197 = vmatpush1.msra.mxu0 %v126_v28  ;;  %9425 = vmatpush3.msra.mxu1 %v134_v36  ;;  %v116_v3 = vld [vmem:[#allocation5 + $0x28] sm:$0xff]  ;;  %v11355_v4 = vld [vmem:[#allocation7 + $0xc0] sm:$0xff]  ;;  %v11364_v6 = vld [vmem:[#allocation7 + $0xb0] sm:$0xff] }
  0x4a   :  { %198 = vmatprep.subr.mxu0 %v124_v29  ;;  %9426 = vmatprep.subr.mxu1 %v131_v39  ;;  %v11362_v5 = vld [vmem:[%s14921_s0 + $0x20] sm:$0xff]  ;;  %v11367_v7 = vld [vmem:[#allocation7 + $0xa8] sm:$0xff]  ;;  %v11370_v8 = vld [vmem:[#allocation7 + $0x98] sm:$0xff] }
  0x4b   :  { %199 = vmatpush1.msra.mxu0 %v123_v31  ;;  %9427 = vmatpush3.msra.mxu1 %v131_v39  ;;  %v113_v9 = vld [vmem:[#allocation5 + $0x10] sm:$0xff]  ;;  %v92_v11 = vld [vmem:[%s14921_s0 + $0x28] sm:$0xff]  ;;  %v11381_v12 = vld [vmem:[#allocation7 + $0x80] sm:$0xff] }
  0x4c   :  { %200 = vmatprep.subr.mxu0 %v121_v32  ;;  %9428 = vmatprep.subr.mxu1 %v128_v42  ;;  %v11374_v10 = vld [vmem:[#allocation7 + $0x90] sm:$0xff]  ;;  %v11384_v13 = vld [vmem:[#allocation7 + $0x78] sm:$0xff]  ;;  %v11387_v14 = vld [vmem:[#allocation7 + $0x68] sm:$0xff] }
  0x4d   :  { %201 = vmatpush1.msra.mxu0 %v120_v34  ;;  %9429 = vmatpush3.msra.mxu1 %v128_v42  ;;  %v11390_v15 = vld [vmem:[#allocation7 + $0x60] sm:$0xff]  ;;  %v93_v16 = vld [vmem:[%s14921_s0 + $0x30] sm:$0xff]  ;;  %v11400_v18 = vld [vmem:[#allocation7 + $0x48] sm:$0xff]  ;;  %v161_v42 = vlaneseq }
  0x4e   :  { %202 = vmatprep.subr.mxu0 %v118_v35  ;;  %9430 = vmatprep.subr.mxu1 %v125_v48  ;;  %v11397_v17 = vld [vmem:[#allocation7 + $0x50] sm:$0xff]  ;;  %v11404_v19 = vld [vmem:[#allocation7 + $0x38] sm:$0xff]  ;;  %v11417_v23 = vld [vmem:[#allocation7 + $0x20] sm:$0xff] }
  0x4f   :  { %203 = vmatpush1.msra.mxu0 %v117_v37  ;;  %9431 = vmatpush3.msra.mxu1 %v125_v48  ;;  %v11408_v20 = vld [vmem:[#allocation7 + $0x30] sm:$0xff]  ;;  %v11410_v21 = vld [vmem:[#allocation7 + $0x178] sm:$0xff]  ;;  %v11424_v25 = vld [vmem:[#allocation7 + $0x8] sm:$0xff] }
  0x50   :  { %204 = vmatprep.subr.mxu0 %v115_v38  ;;  %9432 = vmatprep.subr.mxu1 %v122_v54  ;;  %v94_v22 = vld [vmem:[%s14921_s0 + $0x38] sm:$0xff]  ;;  %15063 = vst [vmem:[#allocation15_spill] sm:$0xff] %v11424_v25  ;;  %v11428_v26 = vld [vmem:[#allocation7] sm:$0xff]  ;;  %v11436_v28 = vld [vmem:[#allocation7 + $0x148] sm:$0xff] }
  0x51   :  { %205 = vmatpush1.msra.mxu0 %v114_v40  ;;  %9433 = vmatpush3.msra.mxu1 %v122_v54  ;;  %v11420_v24 = vld [vmem:[#allocation7 + $0x18] sm:$0xff]  ;;  %15064 = vst [vmem:[#allocation16_spill] sm:$0xff] %v11428_v26  ;;  %v11430_v27 = vld [vmem:[#allocation7 + $0x160] sm:$0xff]  ;;  %v11442_v29 = vld [vmem:[#allocation7 + $0x130] sm:$0xff] }
  0x52   :  { %206 = vmatprep.subr.mxu0 %v112_v41  ;;  %9434 = vmatprep.subr.mxu1 %v119_v60  ;;  %v11447_v30 = vld [vmem:[#allocation7 + $0x118] sm:$0xff]  ;;  %v11453_v31 = vld [vmem:[#allocation7 + $0x100] sm:$0xff]  ;;  %v11459_v32 = vld [vmem:[#allocation7 + $0xe8] sm:$0xff] }
  0x53   :  { %207 = vmatpush1.msra.mxu0 %v111_v43  ;;  %9435 = vmatpush3.msra.mxu1 %v119_v60  ;;  %v11463_v33 = vld [vmem:[#allocation7 + $0xd0] sm:$0xff]  ;;  %v11469_v34 = vld [vmem:[#allocation7 + $0xb8] sm:$0xff]  ;;  %v11475_v35 = vld [vmem:[#allocation7 + $0xa0] sm:$0xff]  ;;  %v162_v43 = vshrl.u32 %v161_v42, 7 }
  0x54   :  { %241 = vmatmul.mubr.f32.vlgmr.msra.gmra.mxu0 %v11288_v44  ;;  %481 = vmatprep.subr.mxu0 %v11290_v45  ;;  %v11481_v36 = vld [vmem:[#allocation7 + $0x88] sm:$0xff]  ;;  %v11487_v37 = vld [vmem:[#allocation7 + $0x70] sm:$0xff]  ;;  %v11493_v38 = vld [vmem:[#allocation7 + $0x58] sm:$0xff] }
  0x55   :  { %482 = vmatpush1.msra.mxu0 %v11292_v46  ;;  %246 = vmatprep.mubr.f32.mxu0 %v14931_v0  ;;  %v11499_v39 = vld [vmem:[#allocation7 + $0x40] sm:$0xff]  ;;  %v11505_v40 = vld [vmem:[#allocation7 + $0x28] sm:$0xff]  ;;  %v11511_v41 = vld [vmem:[#allocation7 + $0x10] sm:$0xff] }
  0x56   :  { %483 = vmatprep.subr.mxu0 %v11294_v47  ;;  %9436 = vmatprep.subr.mxu1 %v116_v3  ;;  %15065 = vst [vmem:[#allocation17_spill] sm:$0xff] %v11505_v40  ;;  %15066 = vst [vmem:[#allocation18_spill] sm:$0xff] %v11511_v41 }
  0x57   :  { %484 = vmatpush1.msra.mxu0 %v11298_v49  ;;  %9437 = vmatpush3.msra.mxu1 %v116_v3 }
  0x58   :  { %247 = vmatmul.mubr.f32.gmra.mxu0 %v11305_v50  ;;  %485 = vmatprep.subr.mxu0 %v11307_v51 }
  0x59   :  { %486 = vmatpush1.msra.mxu0 %v11310_v52  ;;  %252 = vmatprep.mubr.f32.mxu0 %v14931_v0 }
  0x5a   :  { %487 = vmatprep.subr.mxu0 %v11313_v53  ;;  %9438 = vmatprep.subr.mxu1 %v113_v9 }
  0x5b   :  { %488 = vmatpush1.msra.mxu0 %v11317_v55  ;;  %9439 = vmatpush3.msra.mxu1 %v113_v9 }
  0x5c   :  { %253 = vmatmul.mubr.f32.gmra.mxu0 %v11324_v56  ;;  %489 = vmatprep.subr.mxu0 %v11326_v57 }
  0x5d   :  { %490 = vmatpush1.msra.mxu0 %v11329_v58  ;;  %258 = vmatprep.mubr.f32.mxu0 %v14931_v0 }
  0x5e   :  { %491 = vmatprep.subr.mxu0 %v11332_v59  ;;  %9440 = vmatprep.mubr.f32.mxu1 %v11288_v44  ;;  %v11570_v44 = vsub.s32 0, %v162_v43 }
  0x5f   :  { %492 = vmatpush1.msra.mxu0 %v11336_v61  ;;  %9452 = vmatprep.subr.mxu1 %v14931_v0 }
  0x60   :  { %259 = vmatmul.mubr.f32.gmra.mxu0 %v11343_v62  ;;  %493 = vmatprep.subr.mxu0 %v11345_v63  ;;  %15067 = vst [vmem:[#allocation19_spill] sm:$0xff] %v11570_v44 }
  0x61   :  { %494 = vmatpush1.msra.mxu0 %v11348_v1  ;;  %264 = vmatprep.mubr.f32.mxu0 %v14931_v0 }
  0x62   :  { %495 = vmatprep.subr.mxu0 %v11351_v2  ;;  %9441 = vmatmul.mubr.f32.vlgmr.msra.gmra.mxu1 %v11305_v50 }
  0x63   :  { %496 = vmatpush1.msra.mxu0 %v11355_v4  ;;  %9453 = vmatpush3.msra.mxu1 %v11410_v21 }
  0x64   :  { %265 = vmatmul.mubr.f32.gmra.mxu0 %v11362_v5  ;;  %497 = vmatprep.subr.mxu0 %v11364_v6 }
  0x65   :  { %498 = vmatpush1.msra.mxu0 %v11367_v7  ;;  %270 = vmatprep.mubr.f32.mxu0 %v14931_v0 }
  0x66   :  { %499 = vmatprep.subr.mxu0 %v11370_v8  ;;  %9454 = vmatprep.subr.mxu1 %v14931_v0 }
  0x67   :  { %500 = vmatpush1.msra.mxu0 %v11374_v10  ;;  %9455 = vmatpush3.msra.mxu1 %v11430_v27 }
  0x68   :  { %271 = vmatmul.mubr.f32.gmra.mxu0 %v92_v11  ;;  %501 = vmatprep.subr.mxu0 %v11381_v12 }
  0x69   :  { %502 = vmatpush1.msra.mxu0 %v11384_v13  ;;  %276 = vmatprep.mubr.f32.mxu0 %v14931_v0 }
  0x6a   :  { %503 = vmatprep.subr.mxu0 %v11387_v14  ;;  %9456 = vmatprep.subr.mxu1 %v14931_v0 }
  0x6b   :  { %504 = vmatpush1.msra.mxu0 %v11390_v15  ;;  %9457 = vmatpush3.msra.mxu1 %v11436_v28 }
  0x6c   :  { %277 = vmatmul.mubr.f32.gmra.mxu0 %v93_v16  ;;  %505 = vmatprep.subr.mxu0 %v11397_v17 }
  0x6d   :  { %506 = vmatpush1.msra.mxu0 %v11400_v18  ;;  %282 = vmatprep.mubr.f32.mxu0 %v14931_v0 }
  0x6e   :  { %507 = vmatprep.subr.mxu0 %v11404_v19  ;;  %9443 = vmatprep.mubr.f32.mxu1 %v11324_v56 }
  0x6f   :  { %508 = vmatpush1.msra.mxu0 %v11408_v20  ;;  %9458 = vmatprep.subr.mxu1 %v14931_v0 }
  0x70   :  { %283 = vmatmul.mubr.f32.gmra.mxu0 %v94_v22  ;;  %509 = vmatprep.subr.mxu0 %v11417_v23 }
  0x71   :  { %510 = vmatpush1.msra.mxu0 %v11420_v24  ;;  %545 = vmatprep.mubr.f32.mxu0 %v14931_v0 }
  0x72   :  { %511 = vmatprep.subr.mxu0 %v11424_v25  ;;  %9444 = vmatmul.mubr.f32.gmra.mxu1 %v11343_v62 }
  0x73   :  { %512 = vmatpush1.msra.mxu0 %v11428_v26  ;;  %9459 = vmatpush3.msra.mxu1 %v11442_v29 }
  0x74   :  { %546 = vmatmul.mubr.f32.vlgmr.msra.gmra.mxu0 %v14931_v0  ;;  %9446 = vmatprep.mubr.f32.mxu1 %v11362_v5 }
  0x75   :  { %9460 = vmatprep.subr.mxu1 %v14931_v0  ;;  %700 = vmatprep.subr.mxu0 %v11290_v45 }
  0x76   :  { %9461 = vmatpush3.msra.mxu1 %v11447_v30  ;;  %701 = vmatpush1.msra.mxu0 %v11292_v46 }
  0x77   :  { %9462 = vmatprep.subr.mxu1 %v14931_v0  ;;  %9447 = vmatmul.mubr.f32.gmra.mxu1 %v92_v11 }
  0x78   :  { %9463 = vmatpush3.msra.mxu1 %v11453_v31  ;;  %9449 = vmatprep.mubr.f32.mxu1 %v93_v16 }
  0x79   :  { %9464 = vmatprep.subr.mxu1 %v14931_v0  ;;  %702 = vmatprep.subr.mxu0 %v11294_v47 }
  0x7a   :  { %9465 = vmatpush3.msra.mxu1 %v11459_v32  ;;  %703 = vmatpush1.msra.mxu0 %v11298_v49 }
  0x7b   :  { %9466 = vmatprep.subr.mxu1 %v14931_v0  ;;  %9450 = vmatmul.mubr.f32.gmra.mxu1 %v94_v22 }
  0x7c   :  { %9467 = vmatpush3.msra.mxu1 %v11463_v33  ;;  %9484 = vmatprep.mubr.msk.f32.mxu1 %vm11221_vm0, %v14931_v0 }
  0x7d   :  { %9468 = vmatprep.subr.mxu1 %v14931_v0  ;;  %704 = vmatprep.subr.mxu0 %v11307_v51 }
  0x7e   :  { %9469 = vmatpush3.msra.mxu1 %v11469_v34  ;;  %705 = vmatpush1.msra.mxu0 %v11310_v52 }
  0x7f   :  { %9470 = vmatprep.subr.mxu1 %v14931_v0  ;;  %706 = vmatprep.subr.mxu0 %v11313_v53 }
  0x80   :  { %9471 = vmatpush3.msra.mxu1 %v11475_v35  ;;  %707 = vmatpush1.msra.mxu0 %v11317_v55 }
  0x81   :  { %9472 = vmatprep.subr.mxu1 %v14931_v0  ;;  %708 = vmatprep.subr.mxu0 %v11326_v57 }
  0x82   :  { %9473 = vmatpush3.msra.mxu1 %v11481_v36  ;;  %709 = vmatpush1.msra.mxu0 %v11329_v58 }
  0x83   :  { %9474 = vmatprep.subr.mxu1 %v14931_v0  ;;  %710 = vmatprep.subr.mxu0 %v11332_v59 }
  0x84   :  { %9475 = vmatpush3.msra.mxu1 %v11487_v37  ;;  %711 = vmatpush1.msra.mxu0 %v11336_v61 }
  0x85   :  { %9476 = vmatprep.subr.mxu1 %v14931_v0  ;;  %712 = vmatprep.subr.mxu0 %v11345_v63 }
  0x86   :  { %9477 = vmatpush3.msra.mxu1 %v11493_v38  ;;  %713 = vmatpush1.msra.mxu0 %v11348_v1 }
  0x87   :  { %9478 = vmatprep.subr.mxu1 %v14931_v0  ;;  %714 = vmatprep.subr.mxu0 %v11351_v2 }
  0x88   :  { %9479 = vmatpush3.msra.mxu1 %v11499_v39  ;;  %715 = vmatpush1.msra.mxu0 %v11355_v4 }
  0x89   :  { %9480 = vmatprep.subr.mxu1 %v14931_v0  ;;  %716 = vmatprep.subr.mxu0 %v11364_v6 }
  0x8a   :  { %9481 = vmatpush3.msra.mxu1 %v11505_v40  ;;  %717 = vmatpush1.msra.mxu0 %v11367_v7 }
  0x8b   :  { %9482 = vmatprep.subr.mxu1 %v14931_v0  ;;  %718 = vmatprep.subr.mxu0 %v11370_v8 }
  0x8c   :  { %9483 = vmatpush3.msra.mxu1 %v11511_v41  ;;  %719 = vmatpush1.msra.mxu0 %v11374_v10 }
  0x8d   :  { %9485 = vmatmul.mubr.f32.vlgmr.msra.gmra.mxu1 %v14931_v0  ;;  %9487 = vmatprep.subr.mxu1 %v14931_v0 }
  0x8e   :  { %9488 = vmatpush3.msra.mxu1 %v11410_v21  ;;  %720 = vmatprep.subr.mxu0 %v11381_v12 }
  0x8f   :  { %9489 = vmatprep.subr.mxu1 %v14931_v0  ;;  %721 = vmatpush1.msra.mxu0 %v11384_v13 }
  0x90   :  { %9490 = vmatpush3.msra.mxu1 %v11430_v27  ;;  %722 = vmatprep.subr.mxu0 %v11387_v14 }
  0x91   :  { %9491 = vmatprep.subr.mxu1 %v14931_v0  ;;  %723 = vmatpush1.msra.mxu0 %v11390_v15 }
  0x92   :  { %9492 = vmatpush3.msra.mxu1 %v11436_v28  ;;  %724 = vmatprep.subr.mxu0 %v11397_v17 }
  0x93   :  { %9493 = vmatprep.subr.mxu1 %v14931_v0  ;;  %725 = vmatpush1.msra.mxu0 %v11400_v18 }
  0x94   :  { %9494 = vmatpush3.msra.mxu1 %v11442_v29  ;;  %726 = vmatprep.subr.mxu0 %v11404_v19 }
  0x95   :  { %9495 = vmatprep.subr.mxu1 %v14931_v0  ;;  %727 = vmatpush1.msra.mxu0 %v11408_v20 }
  0x96   :  { %9496 = vmatpush3.msra.mxu1 %v11447_v30  ;;  %728 = vmatprep.subr.mxu0 %v11417_v23 }
  0x97   :  { %9497 = vmatprep.subr.mxu1 %v14931_v0  ;;  %729 = vmatpush1.msra.mxu0 %v11420_v24 }
  0x98   :  { %9498 = vmatpush3.msra.mxu1 %v11453_v31  ;;  %730 = vmatprep.subr.mxu0 %v11424_v25 }
  0x99   :  { %9499 = vmatprep.subr.mxu1 %v14931_v0  ;;  %731 = vmatpush1.msra.mxu0 %v11428_v26 }
  0x9a   :  { %9500 = vmatpush3.msra.mxu1 %v11459_v32  ;;  %764 = vmatprep.mubr.f32.mxu0 %v14931_v0 }
  0x9b   :  { %9501 = vmatprep.subr.mxu1 %v14931_v0  ;;  %9519 = vmatprep.mubr.msk.f32.mxu1 %vm11221_vm0, %v14931_v0 }
  0x9c   :  { %9502 = vmatpush3.msra.mxu1 %v11463_v33  ;;  %920 = vmatprep.subr.mxu0 %v11290_v45  ;;  %v159_v45 = vld [vmem:[%s14924_s3] sm:$0x7] }
  0x9d   :  { %9503 = vmatprep.subr.mxu1 %v14931_v0  ;;  %v164_v54 = vrot.slane %v159_v45, %v11570_v44  ;;  %v11592_v44 = vsub.s32 2, %v162_v43 }
  0x9e   :  { %9504 = vmatpush3.msra.mxu1 %v11469_v34 }
  0x9f   :  { %9505 = vmatprep.subr.mxu1 %v14931_v0  ;;  %15076 = vst [vmem:[#allocation28_spill] sm:$0xff] %v11592_v44 }
  0xa0   :  { %9506 = vmatpush3.msra.mxu1 %v11475_v35 }
  0xa1   :  { %9507 = vmatprep.subr.mxu1 %v14931_v0 }
  0xa2   :  { %9508 = vmatpush3.msra.mxu1 %v11481_v36 }
  0xa3   :  { %9509 = vmatprep.subr.mxu1 %v14931_v0 }
  0xa4   :  { %9510 = vmatpush3.msra.mxu1 %v11487_v37 }
  0xa5   :  { %9511 = vmatprep.subr.mxu1 %v14931_v0 }
  0xa6   :  { %9512 = vmatpush3.msra.mxu1 %v11493_v38 }
  0xa7   :  { %9513 = vmatprep.subr.mxu1 %v14931_v0 }
  0xa8   :  { %9514 = vmatpush3.msra.mxu1 %v11499_v39 }
  0xa9   :  { %9515 = vmatprep.subr.mxu1 %v14931_v0 }
  0xaa   :  { %9516 = vmatpush3.msra.mxu1 %v11505_v40 }
  0xab   :  { %9517 = vmatprep.subr.mxu1 %v14931_v0 }
  0xac   :  { %9518 = vmatpush3.msra.mxu1 %v11511_v41 }
  0xad   :  { %9522 = vmatprep.subr.mxu1 %v14931_v0 }
 0x114   :  { %v242_v48 = vpop.f32.mrf.mxu0 }
 0x115   :  { %v243_v26 = vadd.f32 %v242_v48, %v164_v54 }
 0x116   :  { %v244_v50 = vpop.f32.mrf.mxu0 }
 0x118   :  { %v248_v56 = vpop.f32.mrf.mxu0 }
 0x119   :  { %v11576_v60 = vadd.f32 %v248_v56, %v164_v54 }
 0x11a   :  { %v11578_v62 = vpop.f32.mrf.mxu0 }
 0x11b   :  { %15068 = vst [vmem:[#allocation20_spill] sm:$0xff] %v11576_v60  ;;  %15069 = vst [vmem:[#allocation21_spill] sm:$0xff] %v11578_v62 }
 0x11c   :  { %v254_v3 = vpop.f32.mrf.mxu0 }
 0x11d   :  { %v11580_v5 = vadd.f32 %v254_v3, %v164_v54  ;;  %v172_v3 = vrot.slane %v159_v45, %v11592_v44 }
 0x11e   :  { %v11582_v9 = vpop.f32.mrf.mxu0 }
 0x11f   :  { %15070 = vst [vmem:[#allocation22_spill] sm:$0xff] %v11580_v5  ;;  %15071 = vst [vmem:[#allocation23_spill] sm:$0xff] %v11582_v9 }
 0x120   :  { %v260_v11 = vpop.f32.mrf.mxu0 }
 0x121   :  { %v11584_v16 = vadd.f32 %v260_v11, %v164_v54 }
 0x122   :  { %v11586_v22 = vpop.f32.mrf.mxu0 }
 0x123   :  { %15072 = vst [vmem:[#allocation24_spill] sm:$0xff] %v11584_v16  ;;  %15073 = vst [vmem:[#allocation25_spill] sm:$0xff] %v11586_v22  ;;  %v9442_v22 = vpop.f32.mrf.mxu1 }
 0x124   :  { %v266_v42 = vpop.f32.mrf.mxu0  ;;  %v11603_v16 = vadd.f32 %v9442_v22, %v172_v3 }
 0x125   :  { %v11588_v0 = vadd.f32 %v266_v42, %v164_v54 }
 0x126   :  { %v11590_v41 = vpop.f32.mrf.mxu0 }
 0x127   :  { %15074 = vst [vmem:[#allocation26_spill] sm:$0xff] %v11588_v0  ;;  %15075 = vst [vmem:[#allocation27_spill] sm:$0xff] %v11590_v41 }
 0x128   :  { %v272_v56 = vpop.f32.mrf.mxu0 }
 0x129   :  { %v11594_v60 = vadd.f32 %v272_v56, %v164_v54 }
 0x12a   :  { %v11596_v62 = vpop.f32.mrf.mxu0 }
 0x12b   :  { %15077 = vst [vmem:[#allocation29_spill] sm:$0xff] %v11594_v60  ;;  %15078 = vst [vmem:[#allocation30_spill] sm:$0xff] %v11596_v62  ;;  %v355_v60 = vpop.f32.mrf.mxu1  ;;  %v11609_v62 = vsub.s32 1, %v162_v43 }
 0x12c   :  { %v278_v9 = vpop.f32.mrf.mxu0 }
 0x12d   :  { %v11599_v5 = vadd.f32 %v278_v9, %v164_v54  ;;  %15083 = vst [vmem:[#allocation35_spill] sm:$0xff] %v11609_v62  ;;  %v11616_v22 = vrot.slane %v159_v45, %v11609_v62 }
 0x12e   :  { %v11601_v11 = vpop.f32.mrf.mxu0 }
 0x12f   :  { %15079 = vst [vmem:[#allocation31_spill] sm:$0xff] %v11599_v5  ;;  %15080 = vst [vmem:[#allocation32_spill] sm:$0xff] %v11601_v11 }
 0x130   :  { %v284_v42 = vpop.f32.mrf.mxu0 }
 0x131   :  { %v11605_v0 = vadd.f32 %v284_v42, %v164_v54 }
 0x132   :  { %v11607_v41 = vpop.f32.mrf.mxu0  ;;  %v9445_v44 = vpop.f32.mrf.mxu1 }
 0x133   :  { %15081 = vst [vmem:[#allocation33_spill] sm:$0xff] %v11605_v0  ;;  %15082 = vst [vmem:[#allocation34_spill] sm:$0xff] %v11607_v41  ;;  %v11611_v9 = vadd.f32 %v9445_v44, %v172_v3 }
 0x134   :  { %v547_v56 = vpop.f32.mrf.mxu0  ;;  %v365_v5 = vpop.f32.mrf.mxu1 }
 0x135   :  { %v622_v25 = vadd.f32 %v547_v56, %v243_v26  ;;  %15084 = vst [vmem:[#allocation36_spill] sm:$0xff] %v11611_v9  ;;  %v11613_v11 = vadd.f32 %v365_v5, %v172_v3  ;;  %v245_v26 = vadd.f32 %v244_v50, %v11616_v22 }
 0x136   :  { %v549_v54 = vpop.f32.mrf.mxu0 }
 0x137   :  { %v8645_v40 = vmul.f32 -1.442695, %v622_v25  ;;  %v9448_v42 = vpop.f32.mrf.mxu1  ;;  %v629_v44 = vadd.f32 %v549_v54, %v245_v26  ;;  %v356_v54 = vadd.f32 %v355_v60, %v172_v3  ;;  %v15090_v60 = vmov 0.0  }
 0x138   :  { %v11618_v0 = vadd.f32 %v9448_v42, %v172_v3  ;;  %v11630_v42 = vld [vmem:[%s14925_s4] ss:$0 sm:$0xff] }
 0x139   :  { %10802 = vpow2.f32 %v8645_v40  ;;  %v375_v48 = vpop.f32.mrf.mxu1  ;;  %v8646_v5 = vmul.f32 -1.442695, %v629_v44 }
 0x13a   :  { %15085 = vst [vmem:[#allocation37_spill] sm:$0xff] %v11618_v0  ;;  %v11620_v41 = vadd.f32 %v375_v48, %v172_v3 }
 0x13b   :  { %v9451_v43 = vpop.f32.mrf.mxu1  ;;  %10804 = vpow2.f32 %v8646_v5 }
 0x13c   :  { %15086 = vst [vmem:[#allocation38_spill] sm:$0xff] %v11620_v41  ;;  %v11623_v25 = vadd.f32 %v9451_v43, %v172_v3 }
 0x13d   :  { %v385_v56 = vpop.f32.mrf.mxu1 }
 0x13e   :  { %15087 = vst [vmem:[#allocation39_spill] sm:$0xff] %v11623_v25  ;;  %v11625_v40 = vadd.f32 %v385_v56, %v172_v3  ;;  %v11797_v3 = vld [vmem:[#allocation7 + $0xa8] sm:$0xff] }
 0x140   :  { %15088 = vst [vmem:[#allocation40_spill] sm:$0xff] %v11625_v40 }
 0x146   :  { %v10803_v9 = vpop.eup %10802 }
 0x147   :  { %v626_v45 = vadd.f32 1.0, %v10803_v9 }
 0x148   :  { %v10805_v43 = vpop.eup %10804 }
 0x149   :  { %10806 = vrcp.f32 %v626_v45  ;;  %v633_v56 = vadd.f32 1.0, %v10805_v43  ;;  %v11812_v43 = vld [vmem:[#allocation7 + $0x68] sm:$0xff] }
 0x14d   :  { %v618_v48 = vpop.f32.mrf.mxu1 }
 0x14e   :  { %v636_v50 = vadd.f32 %v11630_v42, %v618_v48  ;;  %v11806_v48 = vld [vmem:[#allocation7 + $0x80] sm:$0xff] }
 0x14f   :  { %v9486_v62 = vpop.f32.mrf.mxu1 }
 0x150   :  { %v11791_v62 = vld [vmem:[#allocation7 + $0xc0] sm:$0xff] }
 0x156   :  { %v10807_v25 = vpop.eup %10806 }
 0x157   :  { %v637_v26 = vmul.f32 %v10807_v25, %v636_v50  ;;  %v11800_v25 = vld [vmem:[#allocation7 + $0x98] sm:$0xff] }
 0x158   :  { %v11809_v50 = vld [vmem:[#allocation7 + $0x78] sm:$0xff] }
 0x159   :  { %v638_v40 = vadd.f32 %v637_v26, %v356_v54  ;;  %v11815_v54 = vld [vmem:[#allocation7 + $0x60] sm:$0xff]  ;;  %v11818_v26 = vld [vmem:[#allocation7 + $0x50] sm:$0xff] }
 0x15b   :  { %10808 = vtanh.f32 %v638_v40  ;;  %v11803_v40 = vld [vmem:[#allocation7 + $0x90] sm:$0xff] }
 0x15c   :  { %10810 = vrcp.f32 %v633_v56  ;;  %v11821_v56 = vld [vmem:[#allocation7 + $0x48] sm:$0xff] }
 0x168   :  { %v10809_v9 = vpop.eup %10808 }
 0x169   :  { %v640_v44 = vsub.f32 0.0, %v10809_v9  ;;  %v10811_v5 = vpop.eup %10810 }
 0x16b   :  { %v641_v45 = vmul.f32 %v10811_v5, %v640_v44  ;;  %v11827_v44 = vld [vmem:[#allocation7 + $0x30] sm:$0xff]  ;;  %v11830_v5 = vld [vmem:[#allocation7 + $0x20] sm:$0xff] }
 0x16d   :  { %v11633_v0 = vadd.f32 %v10809_v9, %v641_v45  ;;  %v11824_v9 = vld [vmem:[#allocation7 + $0x38] sm:$0xff] }
 0x16e   :  { %v11833_v45 = vld [vmem:[#allocation7 + $0x18] sm:$0xff] }
 0x16f   :  { %15089 = vst [vmem:[#allocation41_spill] sm:$0xff] %v11633_v0  ;;  %765 = vmatmul.mubr.f32.vlgmr.msra.gmra.mxu0 %v11633_v0  ;;  %9520 = vmatmul.mubr.f32.vlgmr.msra.gmra.mxu1 %v11633_v0 }
 0x170   :  { %921 = vmatpush1.msra.mxu0 %v11292_v46  ;;  %9523 = vmatpush3.msra.mxu1 %v11410_v21  ;;  %v15091_v46 = vld [vmem:[#allocation17_spill] sm:$0xff] }
 0x171   :  { %922 = vmatprep.subr.mxu0 %v11294_v47  ;;  %9524 = vmatprep.subr.mxu1 %v15090_v60  ;;  %v15092_v47 = vld [vmem:[#allocation15_spill] sm:$0xff] }
 0x172   :  { %923 = vmatpush1.msra.mxu0 %v11298_v49  ;;  %9525 = vmatpush3.msra.mxu1 %v11430_v27  ;;  %v15093_v49 = vld [vmem:[#allocation16_spill] sm:$0xff] }
 0x173   :  { %924 = vmatprep.subr.mxu0 %v11307_v51  ;;  %9526 = vmatprep.subr.mxu1 %v15090_v60  ;;  %v15094_v51 = vld [vmem:[#allocation18_spill] sm:$0xff]  ;;  %15099 = vst [vmem:[#allocation16_spill] sm:$0xff] %v11833_v45 }
 0x174   :  { %925 = vmatpush1.msra.mxu0 %v11310_v52  ;;  %9527 = vmatpush3.msra.mxu1 %v11436_v28 }
 0x175   :  { %926 = vmatprep.subr.mxu0 %v11313_v53  ;;  %9528 = vmatprep.subr.mxu1 %v15090_v60 }
 0x176   :  { %927 = vmatpush1.msra.mxu0 %v11317_v55  ;;  %9529 = vmatpush3.msra.mxu1 %v11442_v29  ;;  %v15095_v55 = vld [vmem:[#allocation20_spill] sm:$0xff] }
 0x177   :  { %928 = vmatprep.subr.mxu0 %v11326_v57  ;;  %9530 = vmatprep.subr.mxu1 %v15090_v60 }
 0x178   :  { %929 = vmatpush1.msra.mxu0 %v11329_v58  ;;  %9531 = vmatpush3.msra.mxu1 %v11447_v30 }
 0x179   :  { %930 = vmatprep.subr.mxu0 %v11332_v59  ;;  %9532 = vmatprep.subr.mxu1 %v15090_v60 }
 0x17a   :  { %931 = vmatpush1.msra.mxu0 %v11336_v61  ;;  %9533 = vmatpush3.msra.mxu1 %v11453_v31 }
 0x17b   :  { %932 = vmatprep.subr.mxu0 %v11345_v63  ;;  %9534 = vmatprep.subr.mxu1 %v15090_v60  ;;  %v15096_v63 = vld [vmem:[#allocation21_spill] sm:$0xff] }
 0x17c   :  { %933 = vmatpush1.msra.mxu0 %v11348_v1  ;;  %9535 = vmatpush3.msra.mxu1 %v11459_v32  ;;  %v251_v1 = vadd.f32 %v15096_v63, %v11616_v22 }
 0x17d   :  { %934 = vmatprep.subr.mxu0 %v11351_v2  ;;  %9536 = vmatprep.subr.mxu1 %v15090_v60 }
 0x17e   :  { %935 = vmatpush1.msra.mxu0 %v11355_v4  ;;  %9537 = vmatpush3.msra.mxu1 %v11463_v33 }
 0x17f   :  { %936 = vmatprep.subr.mxu0 %v11364_v6  ;;  %9538 = vmatprep.subr.mxu1 %v15090_v60 }
 0x180   :  { %937 = vmatpush1.msra.mxu0 %v11367_v7  ;;  %9539 = vmatpush3.msra.mxu1 %v11469_v34 }
 0x181   :  { %938 = vmatprep.subr.mxu0 %v11370_v8  ;;  %9540 = vmatprep.subr.mxu1 %v15090_v60 }
 0x182   :  { %939 = vmatpush1.msra.mxu0 %v11374_v10  ;;  %9541 = vmatpush3.msra.mxu1 %v11475_v35 }
 0x183   :  { %940 = vmatprep.subr.mxu0 %v11381_v12  ;;  %9542 = vmatprep.subr.mxu1 %v15090_v60 }
 0x184   :  { %941 = vmatpush1.msra.mxu0 %v11384_v13  ;;  %9543 = vmatpush3.msra.mxu1 %v11481_v36 }
 0x185   :  { %942 = vmatprep.subr.mxu0 %v11387_v14  ;;  %9544 = vmatprep.subr.mxu1 %v15090_v60 }
 0x186   :  { %943 = vmatpush1.msra.mxu0 %v11390_v15  ;;  %9545 = vmatpush3.msra.mxu1 %v11487_v37 }
 0x187   :  { %944 = vmatprep.subr.mxu0 %v11397_v17  ;;  %9546 = vmatprep.subr.mxu1 %v15090_v60 }
 0x188   :  { %945 = vmatpush1.msra.mxu0 %v11400_v18  ;;  %9547 = vmatpush3.msra.mxu1 %v11493_v38 }
 0x189   :  { %946 = vmatprep.subr.mxu0 %v11404_v19  ;;  %9548 = vmatprep.subr.mxu1 %v15090_v60 }
 0x18a   :  { %947 = vmatpush1.msra.mxu0 %v11408_v20  ;;  %9549 = vmatpush3.msra.mxu1 %v11499_v39 }
 0x18b   :  { %948 = vmatprep.subr.mxu0 %v11417_v23  ;;  %9550 = vmatprep.subr.mxu1 %v15090_v60 }
 0x18c   :  { %949 = vmatpush1.msra.mxu0 %v11420_v24  ;;  %9551 = vmatpush3.msra.mxu1 %v15091_v46  ;;  %v11751_v24 = vld [vmem:[#allocation7 + $0x168] sm:$0xff] }
 0x18d   :  { %950 = vmatprep.subr.mxu0 %v15092_v47  ;;  %9552 = vmatprep.subr.mxu1 %v15090_v60  ;;  %v11839_v47 = vld [vmem:[#allocation7] sm:$0xff] }
 0x18e   :  { %951 = vmatpush1.msra.mxu0 %v15093_v49  ;;  %984 = vmatprep.mubr.f32.mxu0 %v15090_v60  ;;  %15101 = vst [vmem:[#allocation20_spill] sm:$0xff] %v11839_v47 }
 0x18f   :  { %9553 = vmatpush3.msra.mxu1 %v15094_v51  ;;  %9554 = vmatprep.mubr.msk.f32.mxu1 %vm11221_vm0, %v15090_v60 }
 0x190   :  { %9557 = vmatprep.subr.mxu1 %v15090_v60 }
 0x22f   :  { %v766_v52 = vpop.f32.mrf.mxu0  ;;  %v837_v53 = vpop.f32.mrf.mxu1 }
 0x230   :  { %v841_v57 = vadd.f32 %v766_v52, %v15095_v55  ;;  %v855_v10 = vadd.f32 %v11630_v42, %v837_v53  ;;  %v15102_v52 = vld [vmem:[#allocation22_spill] sm:$0xff] }
 0x231   :  { %v9521_v58 = vpop.f32.mrf.mxu1  ;;  %v768_v61 = vpop.f32.mrf.mxu0 }
 0x232   :  { %v8647_v59 = vmul.f32 -1.442695, %v841_v57  ;;  %v848_v2 = vadd.f32 %v768_v61, %v251_v1 }
 0x234   :  { %10812 = vpow2.f32 %v8647_v59  ;;  %v8648_v4 = vmul.f32 -1.442695, %v848_v2  ;;  %v15103_v59 = vld [vmem:[#allocation23_spill] sm:$0xff] }
 0x235   :  { %v257_v61 = vadd.f32 %v15103_v59, %v11616_v22  ;;  %v11924_v59 = vld [vmem:[#allocation7 + $0xa0] sm:$0xff] }
 0x236   :  { %10814 = vpow2.f32 %v8648_v4 }
 0x241   :  { %v10813_v6 = vpop.eup %10812 }
 0x242   :  { %v845_v7 = vadd.f32 1.0, %v10813_v6 }
 0x243   :  { %v10815_v8 = vpop.eup %10814 }
 0x244   :  { %10816 = vrcp.f32 %v845_v7  ;;  %v852_v15 = vadd.f32 1.0, %v10815_v8 }
 0x251   :  { %v10817_v12 = vpop.eup %10816 }
 0x252   :  { %v856_v13 = vmul.f32 %v10817_v12, %v855_v10 }
 0x254   :  { %v857_v14 = vadd.f32 %v856_v13, %v11603_v16  ;;  %v11794_v16 = vld [vmem:[#allocation7 + $0xb0] sm:$0xff] }
 0x256   :  { %10818 = vtanh.f32 %v857_v14 }
 0x257   :  { %10820 = vrcp.f32 %v852_v15 }
 0x263   :  { %v10819_v17 = vpop.eup %10818 }
 0x264   :  { %v859_v18 = vsub.f32 %v11633_v0, %v10819_v17  ;;  %v10821_v19 = vpop.eup %10820 }
 0x266   :  { %v860_v20 = vmul.f32 %v10821_v19, %v859_v18 }
 0x268   :  { %v11709_v23 = vadd.f32 %v10819_v17, %v860_v20  ;;  %v11894_v20 = vld [vmem:[#allocation7 + $0x160] sm:$0xff] }
 0x26a   :  { %15097 = vst [vmem:[#allocation17_spill] sm:$0xff] %v11709_v23  ;;  %985 = vmatmul.mubr.f32.vlgmr.msra.gmra.mxu0 %v11709_v23  ;;  %9555 = vmatmul.mubr.f32.vlgmr.msra.gmra.mxu1 %v11709_v23 }
 0x26b   :  { %9558 = vmatpush3.msra.mxu1 %v11410_v21  ;;  %1204 = vmatprep.mubr.f32.mxu0 %v15090_v60  ;;  %v11748_v21 = vld [vmem:[#allocation7 + $0x170] sm:$0xff] }
 0x26c   :  { %9559 = vmatprep.subr.mxu1 %v15090_v60  ;;  %9589 = vmatprep.mubr.msk.f32.mxu1 %vm11221_vm0, %v15090_v60  ;;  %15098 = vst [vmem:[#allocation15_spill] sm:$0xff] %v11748_v21 }
 0x26d   :  { %9560 = vmatpush3.msra.mxu1 %v11430_v27  ;;  %1140 = vmatprep.subr.mxu0 %v11748_v21  ;;  %v11754_v27 = vld [vmem:[#allocation7 + $0x158] sm:$0xff] }
 0x26e   :  { %9561 = vmatprep.subr.mxu1 %v15090_v60  ;;  %1141 = vmatpush1.msra.mxu0 %v11751_v24 }
 0x26f   :  { %9562 = vmatpush3.msra.mxu1 %v11436_v28  ;;  %1142 = vmatprep.subr.mxu0 %v11754_v27  ;;  %v11757_v28 = vld [vmem:[#allocation7 + $0x150] sm:$0xff] }
 0x270   :  { %9563 = vmatprep.subr.mxu1 %v15090_v60  ;;  %1143 = vmatpush1.msra.mxu0 %v11757_v28 }
 0x271   :  { %9564 = vmatpush3.msra.mxu1 %v11442_v29  ;;  %v11760_v29 = vld [vmem:[#allocation7 + $0x140] sm:$0xff] }
 0x272   :  { %9565 = vmatprep.subr.mxu1 %v15090_v60  ;;  %1144 = vmatprep.subr.mxu0 %v11760_v29 }
 0x273   :  { %9566 = vmatpush3.msra.mxu1 %v11447_v30  ;;  %v11763_v30 = vld [vmem:[#allocation7 + $0x138] sm:$0xff] }
 0x274   :  { %9567 = vmatprep.subr.mxu1 %v15090_v60  ;;  %1145 = vmatpush1.msra.mxu0 %v11763_v30 }
 0x275   :  { %9568 = vmatpush3.msra.mxu1 %v11453_v31  ;;  %v11766_v31 = vld [vmem:[#allocation7 + $0x128] sm:$0xff] }
 0x276   :  { %9569 = vmatprep.subr.mxu1 %v15090_v60  ;;  %1146 = vmatprep.subr.mxu0 %v11766_v31 }
 0x277   :  { %9570 = vmatpush3.msra.mxu1 %v11459_v32  ;;  %v11769_v32 = vld [vmem:[#allocation7 + $0x120] sm:$0xff] }
 0x278   :  { %9571 = vmatprep.subr.mxu1 %v15090_v60  ;;  %1147 = vmatpush1.msra.mxu0 %v11769_v32 }
 0x279   :  { %9572 = vmatpush3.msra.mxu1 %v11463_v33  ;;  %v11772_v33 = vld [vmem:[#allocation7 + $0x110] sm:$0xff] }
 0x27a   :  { %9573 = vmatprep.subr.mxu1 %v15090_v60  ;;  %1148 = vmatprep.subr.mxu0 %v11772_v33 }
 0x27b   :  { %9574 = vmatpush3.msra.mxu1 %v11469_v34  ;;  %v11775_v34 = vld [vmem:[#allocation7 + $0x108] sm:$0xff] }
 0x27c   :  { %9575 = vmatprep.subr.mxu1 %v15090_v60  ;;  %1149 = vmatpush1.msra.mxu0 %v11775_v34 }
 0x27d   :  { %9576 = vmatpush3.msra.mxu1 %v11475_v35  ;;  %v11778_v35 = vld [vmem:[#allocation7 + $0xf8] sm:$0xff] }
 0x27e   :  { %9577 = vmatprep.subr.mxu1 %v15090_v60  ;;  %1150 = vmatprep.subr.mxu0 %v11778_v35 }
 0x27f   :  { %9578 = vmatpush3.msra.mxu1 %v11481_v36  ;;  %v11781_v36 = vld [vmem:[#allocation7 + $0xf0] sm:$0xff] }
 0x280   :  { %9579 = vmatprep.subr.mxu1 %v15090_v60  ;;  %1151 = vmatpush1.msra.mxu0 %v11781_v36 }
 0x281   :  { %9580 = vmatpush3.msra.mxu1 %v11487_v37  ;;  %v11784_v37 = vld [vmem:[#allocation7 + $0xe0] sm:$0xff] }
 0x282   :  { %9581 = vmatprep.subr.mxu1 %v15090_v60  ;;  %1152 = vmatprep.subr.mxu0 %v11784_v37 }
 0x283   :  { %9582 = vmatpush3.msra.mxu1 %v11493_v38  ;;  %v11787_v38 = vld [vmem:[#allocation7 + $0xd8] sm:$0xff] }
 0x284   :  { %9583 = vmatprep.subr.mxu1 %v15090_v60  ;;  %1153 = vmatpush1.msra.mxu0 %v11787_v38 }
 0x285   :  { %9584 = vmatpush3.msra.mxu1 %v11499_v39  ;;  %v11789_v39 = vld [vmem:[#allocation7 + $0xc8] sm:$0xff] }
 0x286   :  { %9585 = vmatprep.subr.mxu1 %v15090_v60  ;;  %1154 = vmatprep.subr.mxu0 %v11789_v39 }
 0x287   :  { %9586 = vmatpush3.msra.mxu1 %v15091_v46  ;;  %1155 = vmatpush1.msra.mxu0 %v11791_v62  ;;  %v11836_v46 = vld [vmem:[#allocation7 + $0x8] sm:$0xff] }
 0x288   :  { %9587 = vmatprep.subr.mxu1 %v15090_v60  ;;  %1156 = vmatprep.subr.mxu0 %v11794_v16  ;;  %15100 = vst [vmem:[#allocation18_spill] sm:$0xff] %v11836_v46 }
 0x289   :  { %9588 = vmatpush3.msra.mxu1 %v15094_v51  ;;  %1157 = vmatpush1.msra.mxu0 %v11797_v3 }
 0x28a   :  { %9592 = vmatprep.subr.mxu1 %v15090_v60  ;;  %1158 = vmatprep.subr.mxu0 %v11800_v25 }
 0x28b   :  { %1159 = vmatpush1.msra.mxu0 %v11803_v40 }
 0x28c   :  { %1160 = vmatprep.subr.mxu0 %v11806_v48 }
 0x28d   :  { %1161 = vmatpush1.msra.mxu0 %v11809_v50 }
 0x28e   :  { %1162 = vmatprep.subr.mxu0 %v11812_v43 }
 0x28f   :  { %1163 = vmatpush1.msra.mxu0 %v11815_v54 }
 0x290   :  { %1164 = vmatprep.subr.mxu0 %v11818_v26 }
 0x291   :  { %1165 = vmatpush1.msra.mxu0 %v11821_v56 }
 0x292   :  { %1166 = vmatprep.subr.mxu0 %v11824_v9 }
 0x293   :  { %1167 = vmatpush1.msra.mxu0 %v11827_v44 }
 0x294   :  { %1168 = vmatprep.subr.mxu0 %v11830_v5 }
 0x295   :  { %1169 = vmatpush1.msra.mxu0 %v11833_v45 }
 0x296   :  { %1170 = vmatprep.subr.mxu0 %v11836_v46 }
 0x297   :  { %1171 = vmatpush1.msra.mxu0 %v11839_v47 }
 0x298   :  { %1360 = vmatprep.subr.mxu0 %v11748_v21 }
 0x32a   :  { %v986_v49 = vpop.f32.mrf.mxu0  ;;  %v1057_v51 = vpop.f32.mrf.mxu1 }
 0x32b   :  { %v1061_v53 = vadd.f32 %v986_v49, %v15102_v52  ;;  %v1075_v7 = vadd.f32 %v11630_v42, %v1057_v51  ;;  %v11898_v49 = vld [vmem:[#allocation7 + $0x148] sm:$0xff]  ;;  %v11902_v51 = vld [vmem:[#allocation7 + $0x130] sm:$0xff]  ;;  %v11906_v52 = vld [vmem:[#allocation7 + $0x118] sm:$0xff] }
 0x32c   :  { %v9556_v55 = vpop.f32.mrf.mxu1  ;;  %v988_v58 = vpop.f32.mrf.mxu0 }
 0x32d   :  { %v8649_v57 = vmul.f32 -1.442695, %v1061_v53  ;;  %v1068_v63 = vadd.f32 %v988_v58, %v257_v61  ;;  %v11910_v53 = vld [vmem:[#allocation7 + $0x100] sm:$0xff]  ;;  %v11914_v55 = vld [vmem:[#allocation7 + $0xe8] sm:$0xff]  ;;  %v11920_v58 = vld [vmem:[#allocation7 + $0xb8] sm:$0xff] }
 0x32e   :  { %v11928_v61 = vld [vmem:[#allocation7 + $0x88] sm:$0xff] }
 0x32f   :  { %10822 = vpow2.f32 %v8649_v57  ;;  %v8650_v1 = vmul.f32 -1.442695, %v1068_v63  ;;  %v11916_v57 = vld [vmem:[#allocation7 + $0xd0] sm:$0xff] }
 0x330   :  { %v11932_v63 = vld [vmem:[#allocation7 + $0x70] sm:$0xff] }
 0x331   :  { %10824 = vpow2.f32 %v8650_v1  ;;  %v11936_v1 = vld [vmem:[#allocation7 + $0x58] sm:$0xff] }
 0x33c   :  { %v10823_v2 = vpop.eup %10822 }
 0x33d   :  { %v1065_v4 = vadd.f32 1.0, %v10823_v2  ;;  %v11940_v2 = vld [vmem:[#allocation7 + $0x40] sm:$0xff] }
 0x33e   :  { %v10825_v6 = vpop.eup %10824 }
 0x33f   :  { %10826 = vrcp.f32 %v1065_v4  ;;  %v1072_v13 = vadd.f32 1.0, %v10825_v6  ;;  %v11944_v4 = vld [vmem:[#allocation7 + $0x28] sm:$0xff]  ;;  %v11948_v6 = vld [vmem:[#allocation7 + $0x10] sm:$0xff] }
 0x340   :  { %15105 = vst [vmem:[#allocation22_spill] sm:$0xff] %v11944_v4  ;;  %15106 = vst [vmem:[#allocation23_spill] sm:$0xff] %v11948_v6 }
 0x34c   :  { %v10827_v8 = vpop.eup %10826 }
 0x34d   :  { %v1076_v10 = vmul.f32 %v10827_v8, %v1075_v7 }
 0x34f   :  { %v1077_v12 = vadd.f32 %v1076_v10, %v11613_v11  ;;  %v11890_v11 = vld [vmem:[#allocation7 + $0x178] sm:$0xff]  ;;  %v15107_v10 = vld [vmem:[#allocation24_spill] sm:$0xff] }
 0x351   :  { %10828 = vtanh.f32 %v1077_v12 }
 0x352   :  { %10830 = vrcp.f32 %v1072_v13 }
 0x35e   :  { %v10829_v14 = vpop.eup %10828 }
 0x35f   :  { %v1079_v15 = vsub.f32 %v11709_v23, %v10829_v14  ;;  %v10831_v17 = vpop.eup %10830 }
 0x361   :  { %v1080_v18 = vmul.f32 %v10831_v17, %v1079_v15  ;;  %v15108_v17 = vld [vmem:[#allocation25_spill] sm:$0xff] }
 0x363   :  { %v11851_v19 = vadd.f32 %v10829_v14, %v1080_v18  ;;  %v263_v18 = vadd.f32 %v15108_v17, %v11616_v22 }
 0x365   :  { %15104 = vst [vmem:[#allocation21_spill] sm:$0xff] %v11851_v19  ;;  %1205 = vmatmul.mubr.f32.vlgmr.msra.gmra.mxu0 %v11851_v19  ;;  %9590 = vmatmul.mubr.f32.vlgmr.msra.gmra.mxu1 %v11851_v19 }
 0x366   :  { %1361 = vmatpush1.msra.mxu0 %v11751_v24  ;;  %1424 = vmatprep.mubr.f32.mxu0 %v15090_v60 }
 0x367   :  { %1362 = vmatprep.subr.mxu0 %v11754_v27  ;;  %9624 = vmatprep.mubr.msk.f32.mxu1 %vm11221_vm0, %v15090_v60 }
 0x368   :  { %1363 = vmatpush1.msra.mxu0 %v11757_v28  ;;  %9593 = vmatpush3.msra.mxu1 %v11890_v11 }
 0x369   :  { %1364 = vmatprep.subr.mxu0 %v11760_v29  ;;  %9594 = vmatprep.subr.mxu1 %v15090_v60 }
 0x36a   :  { %1365 = vmatpush1.msra.mxu0 %v11763_v30  ;;  %9595 = vmatpush3.msra.mxu1 %v11894_v20 }
 0x36b   :  { %1366 = vmatprep.subr.mxu0 %v11766_v31  ;;  %9596 = vmatprep.subr.mxu1 %v15090_v60 }
 0x36c   :  { %1367 = vmatpush1.msra.mxu0 %v11769_v32  ;;  %9597 = vmatpush3.msra.mxu1 %v11898_v49 }
 0x36d   :  { %1368 = vmatprep.subr.mxu0 %v11772_v33  ;;  %9598 = vmatprep.subr.mxu1 %v15090_v60 }
 0x36e   :  { %1369 = vmatpush1.msra.mxu0 %v11775_v34  ;;  %9599 = vmatpush3.msra.mxu1 %v11902_v51 }
 0x36f   :  { %1370 = vmatprep.subr.mxu0 %v11778_v35  ;;  %9600 = vmatprep.subr.mxu1 %v15090_v60 }
 0x370   :  { %1371 = vmatpush1.msra.mxu0 %v11781_v36  ;;  %9601 = vmatpush3.msra.mxu1 %v11906_v52 }
 0x371   :  { %1372 = vmatprep.subr.mxu0 %v11784_v37  ;;  %9602 = vmatprep.subr.mxu1 %v15090_v60 }
 0x372   :  { %1373 = vmatpush1.msra.mxu0 %v11787_v38  ;;  %9603 = vmatpush3.msra.mxu1 %v11910_v53 }
 0x373   :  { %1374 = vmatprep.subr.mxu0 %v11789_v39  ;;  %9604 = vmatprep.subr.mxu1 %v15090_v60 }
 0x374   :  { %1375 = vmatpush1.msra.mxu0 %v11791_v62  ;;  %9605 = vmatpush3.msra.mxu1 %v11914_v55 }
 0x375   :  { %1376 = vmatprep.subr.mxu0 %v11794_v16  ;;  %9606 = vmatprep.subr.mxu1 %v15090_v60 }
 0x376   :  { %1377 = vmatpush1.msra.mxu0 %v11797_v3  ;;  %9607 = vmatpush3.msra.mxu1 %v11916_v57 }
 0x377   :  { %1378 = vmatprep.subr.mxu0 %v11800_v25  ;;  %9608 = vmatprep.subr.mxu1 %v15090_v60 }
 0x378   :  { %1379 = vmatpush1.msra.mxu0 %v11803_v40  ;;  %9609 = vmatpush3.msra.mxu1 %v11920_v58 }
 0x379   :  { %1380 = vmatprep.subr.mxu0 %v11806_v48  ;;  %9610 = vmatprep.subr.mxu1 %v15090_v60 }
 0x37a   :  { %1381 = vmatpush1.msra.mxu0 %v11809_v50  ;;  %9611 = vmatpush3.msra.mxu1 %v11924_v59 }
 0x37b   :  { %1382 = vmatprep.subr.mxu0 %v11812_v43  ;;  %9612 = vmatprep.subr.mxu1 %v15090_v60 }
 0x37c   :  { %1383 = vmatpush1.msra.mxu0 %v11815_v54  ;;  %9613 = vmatpush3.msra.mxu1 %v11928_v61 }
 0x37d   :  { %1384 = vmatprep.subr.mxu0 %v11818_v26  ;;  %9614 = vmatprep.subr.mxu1 %v15090_v60 }
 0x37e   :  { %1385 = vmatpush1.msra.mxu0 %v11821_v56  ;;  %9615 = vmatpush3.msra.mxu1 %v11932_v63 }
 0x37f   :  { %1386 = vmatprep.subr.mxu0 %v11824_v9  ;;  %9616 = vmatprep.subr.mxu1 %v15090_v60 }
 0x380   :  { %1387 = vmatpush1.msra.mxu0 %v11827_v44  ;;  %9617 = vmatpush3.msra.mxu1 %v11936_v1 }
 0x381   :  { %1388 = vmatprep.subr.mxu0 %v11830_v5  ;;  %9618 = vmatprep.subr.mxu1 %v15090_v60 }
 0x382   :  { %1389 = vmatpush1.msra.mxu0 %v11833_v45  ;;  %9619 = vmatpush3.msra.mxu1 %v11940_v2  ;;  %v15109_v45 = vld [vmem:[#allocation36_spill] sm:$0xff] }
 0x383   :  { %1390 = vmatprep.subr.mxu0 %v11836_v46  ;;  %9620 = vmatprep.subr.mxu1 %v15090_v60 }
 0x384   :  { %1391 = vmatpush1.msra.mxu0 %v11839_v47  ;;  %9621 = vmatpush3.msra.mxu1 %v11944_v4 }
 0x385   :  { %1580 = vmatprep.subr.mxu0 %v11748_v21  ;;  %9622 = vmatprep.subr.mxu1 %v15090_v60 }
 0x386   :  { %9623 = vmatpush3.msra.mxu1 %v11948_v6 }
 0x387   :  { %9627 = vmatprep.subr.mxu1 %v15090_v60 }
 0x425   :  { %v1206_v7 = vpop.f32.mrf.mxu0  ;;  %v1277_v8 = vpop.f32.mrf.mxu1 }
 0x426   :  { %v1281_v12 = vadd.f32 %v1206_v7, %v15107_v10  ;;  %v1295_v47 = vadd.f32 %v11630_v42, %v1277_v8  ;;  %v15116_v8 = vld [vmem:[#allocation26_spill] sm:$0xff] }
 0x427   :  { %v9591_v13 = vpop.f32.mrf.mxu1  ;;  %v1208_v15 = vpop.f32.mrf.mxu0 }
 0x428   :  { %v8651_v14 = vmul.f32 -1.442695, %v1281_v12  ;;  %v1288_v23 = vadd.f32 %v1208_v15, %v263_v18 }
 0x42a   :  { %10832 = vpow2.f32 %v8651_v14  ;;  %v8652_v0 = vmul.f32 -1.442695, %v1288_v23 }
 0x42c   :  { %10834 = vpow2.f32 %v8652_v0  ;;  %v15110_v0 = vld [vmem:[#allocation16_spill] sm:$0xff] }
 0x437   :  { %v10833_v41 = vpop.eup %10832 }
 0x438   :  { %v1285_v21 = vadd.f32 1.0, %v10833_v41  ;;  %v15111_v41 = vld [vmem:[#allocation22_spill] sm:$0xff] }
 0x439   :  { %v10835_v6 = vpop.eup %10834 }
 0x43a   :  { %10836 = vrcp.f32 %v1285_v21  ;;  %v1292_v10 = vadd.f32 1.0, %v10835_v6  ;;  %v15112_v21 = vld [vmem:[#allocation18_spill] sm:$0xff] }
 0x447   :  { %v10837_v46 = vpop.eup %10836 }
 0x448   :  { %v1296_v4 = vmul.f32 %v10837_v46, %v1295_v47  ;;  %v15114_v46 = vld [vmem:[#allocation23_spill] sm:$0xff] }
 0x449   :  { %v15115_v47 = vld [vmem:[#allocation15_spill] sm:$0xff] }
 0x44a   :  { %v1297_v7 = vadd.f32 %v1296_v4, %v15109_v45  ;;  %v15113_v45 = vld [vmem:[#allocation20_spill] sm:$0xff] }
 0x44c   :  { %10838 = vtanh.f32 %v1297_v7 }
 0x44d   :  { %10840 = vrcp.f32 %v1292_v10 }
 0x459   :  { %v10839_v12 = vpop.eup %10838 }
 0x45a   :  { %v1299_v13 = vsub.f32 %v11851_v19, %v10839_v12  ;;  %v10841_v14 = vpop.eup %10840 }
 0x45c   :  { %v1300_v15 = vmul.f32 %v10841_v14, %v1299_v13 }
 0x45e   :  { %v11960_v23 = vadd.f32 %v10839_v12, %v1300_v15  ;;  %v15117_v12 = vld [vmem:[#allocation27_spill] sm:$0xff] }
 0x45f   :  { %v269_v13 = vadd.f32 %v15117_v12, %v11616_v22 }
 0x460   :  { %1425 = vmatmul.mubr.f32.vlgmr.msra.gmra.mxu0 %v11960_v23  ;;  %9625 = vmatmul.mubr.f32.vlgmr.msra.gmra.mxu1 %v11960_v23 }
 0x461   :  { %1581 = vmatpush1.msra.mxu0 %v11751_v24  ;;  %9628 = vmatpush3.msra.mxu1 %v11890_v11 }
 0x462   :  { %1582 = vmatprep.subr.mxu0 %v11754_v27  ;;  %9629 = vmatprep.subr.mxu1 %v15090_v60 }
 0x463   :  { %1583 = vmatpush1.msra.mxu0 %v11757_v28  ;;  %9630 = vmatpush3.msra.mxu1 %v11894_v20 }
 0x464   :  { %1584 = vmatprep.subr.mxu0 %v11760_v29  ;;  %9631 = vmatprep.subr.mxu1 %v15090_v60 }
 0x465   :  { %1585 = vmatpush1.msra.mxu0 %v11763_v30  ;;  %9632 = vmatpush3.msra.mxu1 %v11898_v49 }
 0x466   :  { %1586 = vmatprep.subr.mxu0 %v11766_v31  ;;  %9633 = vmatprep.subr.mxu1 %v15090_v60 }
 0x467   :  { %1587 = vmatpush1.msra.mxu0 %v11769_v32  ;;  %9634 = vmatpush3.msra.mxu1 %v11902_v51 }
 0x468   :  { %1588 = vmatprep.subr.mxu0 %v11772_v33  ;;  %9635 = vmatprep.subr.mxu1 %v15090_v60 }
 0x469   :  { %1589 = vmatpush1.msra.mxu0 %v11775_v34  ;;  %9636 = vmatpush3.msra.mxu1 %v11906_v52 }
 0x46a   :  { %1590 = vmatprep.subr.mxu0 %v11778_v35  ;;  %9637 = vmatprep.subr.mxu1 %v15090_v60 }
 0x46b   :  { %1591 = vmatpush1.msra.mxu0 %v11781_v36  ;;  %9638 = vmatpush3.msra.mxu1 %v11910_v53 }
 0x46c   :  { %1592 = vmatprep.subr.mxu0 %v11784_v37  ;;  %9639 = vmatprep.subr.mxu1 %v15090_v60 }
 0x46d   :  { %1593 = vmatpush1.msra.mxu0 %v11787_v38  ;;  %9640 = vmatpush3.msra.mxu1 %v11914_v55 }
 0x46e   :  { %1594 = vmatprep.subr.mxu0 %v11789_v39  ;;  %9641 = vmatprep.subr.mxu1 %v15090_v60 }
 0x46f   :  { %1595 = vmatpush1.msra.mxu0 %v11791_v62  ;;  %9642 = vmatpush3.msra.mxu1 %v11916_v57 }
 0x470   :  { %1596 = vmatprep.subr.mxu0 %v11794_v16  ;;  %9643 = vmatprep.subr.mxu1 %v15090_v60 }
 0x471   :  { %1597 = vmatpush1.msra.mxu0 %v11797_v3  ;;  %9644 = vmatpush3.msra.mxu1 %v11920_v58 }
 0x472   :  { %1598 = vmatprep.subr.mxu0 %v11800_v25  ;;  %9645 = vmatprep.subr.mxu1 %v15090_v60 }
 0x473   :  { %1599 = vmatpush1.msra.mxu0 %v11803_v40  ;;  %9646 = vmatpush3.msra.mxu1 %v11924_v59 }
 0x474   :  { %1600 = vmatprep.subr.mxu0 %v11806_v48  ;;  %9647 = vmatprep.subr.mxu1 %v15090_v60 }
 0x475   :  { %1601 = vmatpush1.msra.mxu0 %v11809_v50  ;;  %9648 = vmatpush3.msra.mxu1 %v11928_v61 }
 0x476   :  { %1602 = vmatprep.subr.mxu0 %v11812_v43  ;;  %9649 = vmatprep.subr.mxu1 %v15090_v60 }
 0x477   :  { %1603 = vmatpush1.msra.mxu0 %v11815_v54  ;;  %9650 = vmatpush3.msra.mxu1 %v11932_v63 }
 0x478   :  { %1604 = vmatprep.subr.mxu0 %v11818_v26  ;;  %9651 = vmatprep.subr.mxu1 %v15090_v60 }
 0x479   :  { %1605 = vmatpush1.msra.mxu0 %v11821_v56  ;;  %9652 = vmatpush3.msra.mxu1 %v11936_v1 }
 0x47a   :  { %1606 = vmatprep.subr.mxu0 %v11824_v9  ;;  %9653 = vmatprep.subr.mxu1 %v15090_v60 }
 0x47b   :  { %1607 = vmatpush1.msra.mxu0 %v11827_v44  ;;  %9654 = vmatpush3.msra.mxu1 %v11940_v2 }
 0x47c   :  { %1608 = vmatprep.subr.mxu0 %v11830_v5  ;;  %9655 = vmatprep.subr.mxu1 %v15090_v60 }
 0x47d   :  { %1609 = vmatpush1.msra.mxu0 %v15110_v0  ;;  %9656 = vmatpush3.msra.mxu1 %v15111_v41  ;;  %v15118_v0 = vld [vmem:[#allocation38_spill] sm:$0xff] }
 0x47e   :  { %1610 = vmatprep.subr.mxu0 %v15112_v21  ;;  %9657 = vmatprep.subr.mxu1 %v15090_v60 }
 0x47f   :  { %1611 = vmatpush1.msra.mxu0 %v15113_v45  ;;  %1644 = vmatprep.mubr.f32.mxu0 %v15090_v60 }
 0x480   :  { %9658 = vmatpush3.msra.mxu1 %v15114_v46  ;;  %9659 = vmatprep.mubr.msk.f32.mxu1 %vm11221_vm0, %v15090_v60 }
 0x481   :  { %1800 = vmatprep.subr.mxu0 %v15115_v47  ;;  %9662 = vmatprep.subr.mxu1 %v15090_v60 }
 0x520   :  { %v1426_v4 = vpop.f32.mrf.mxu0  ;;  %v1497_v6 = vpop.f32.mrf.mxu1 }
 0x521   :  { %v1501_v17 = vadd.f32 %v1426_v4, %v15116_v8  ;;  %v1515_v45 = vadd.f32 %v11630_v42, %v1497_v6  ;;  %v15119_v42 = vld [vmem:[#allocation16_spill] sm:$0xff]  ;;  %v1991_v6 = vld [vmem:[#allocation7 + $0x98] sm:$0xff] }
 0x522   :  { %v9626_v18 = vpop.f32.mrf.mxu1  ;;  %v1428_v10 = vpop.f32.mrf.mxu0 }
 0x523   :  { %v8653_v7 = vmul.f32 -1.442695, %v1501_v17  ;;  %v1508_v14 = vadd.f32 %v1428_v10, %v269_v13  ;;  %v1990_v13 = vld [vmem:[#allocation7 + $0x90] sm:$0xff] }
 0x525   :  { %10842 = vpow2.f32 %v8653_v7  ;;  %v8654_v15 = vmul.f32 -1.442695, %v1508_v14  ;;  %v1988_v14 = vld [vmem:[#allocation7 + $0x80] sm:$0xff] }
 0x527   :  { %10844 = vpow2.f32 %v8654_v15  ;;  %v1987_v15 = vld [vmem:[#allocation7 + $0x78] sm:$0xff] }
 0x532   :  { %v10843_v19 = vpop.eup %10842 }
 0x533   :  { %v1505_v46 = vadd.f32 1.0, %v10843_v19 }
 0x534   :  { %v10845_v47 = vpop.eup %10844 }
 0x535   :  { %10846 = vrcp.f32 %v1505_v46  ;;  %v1512_v8 = vadd.f32 1.0, %v10845_v47  ;;  %v1993_v46 = vld [vmem:[#allocation7 + $0xa8] sm:$0xff] }
 0x536   :  { %v1985_v47 = vld [vmem:[#allocation7 + $0x68] sm:$0xff] }
 0x542   :  { %v10847_v21 = vpop.eup %10846 }
 0x543   :  { %v1516_v41 = vmul.f32 %v10847_v21, %v1515_v45  ;;  %v1996_v21 = vld [vmem:[#allocation7 + $0xc0] sm:$0xff]  ;;  %v1994_v45 = vld [vmem:[#allocation7 + $0xb0] sm:$0xff] }
 0x545   :  { %v1517_v4 = vadd.f32 %v1516_v41, %v15118_v0  ;;  %v1997_v41 = vld [vmem:[#allocation7 + $0xc8] sm:$0xff] }
 0x547   :  { %10848 = vtanh.f32 %v1517_v4  ;;  %v2241_v4 = vld [vmem:[#allocation5 + $0x2f8] sm:$0xff] }
 0x548   :  { %10850 = vrcp.f32 %v1512_v8  ;;  %v1984_v8 = vld [vmem:[#allocation7 + $0x60] sm:$0xff] }
 0x554   :  { %v10849_v17 = vpop.eup %10848 }
 0x555   :  { %v1519_v18 = vsub.f32 %v11960_v23, %v10849_v17  ;;  %v10851_v7 = vpop.eup %10850 }
 0x557   :  { %v1520_v10 = vmul.f32 %v10851_v7, %v1519_v18  ;;  %v1981_v18 = vld [vmem:[#allocation7 + $0x48] sm:$0xff]  ;;  %v1979_v7 = vld [vmem:[#allocation7 + $0x38] sm:$0xff] }
 0x559   :  { %v12037_v12 = vadd.f32 %v10849_v17, %v1520_v10  ;;  %v1982_v17 = vld [vmem:[#allocation7 + $0x50] sm:$0xff] }
 0x55a   :  { %v1978_v10 = vld [vmem:[#allocation7 + $0x30] sm:$0xff] }
 0x55b   :  { %1645 = vmatmul.mubr.f32.vlgmr.msra.gmra.mxu0 %v12037_v12  ;;  %9660 = vmatmul.mubr.f32.vlgmr.msra.gmra.mxu1 %v12037_v12 }
 0x55c   :  { %1801 = vmatpush1.msra.mxu0 %v11751_v24  ;;  %9663 = vmatpush3.msra.mxu1 %v11890_v11  ;;  %v15120_v24 = vld [vmem:[#allocation22_spill] sm:$0xff] }
 0x55d   :  { %1802 = vmatprep.subr.mxu0 %v11754_v27  ;;  %9664 = vmatprep.subr.mxu1 %v15090_v60  ;;  %v15121_v27 = vld [vmem:[#allocation18_spill] sm:$0xff] }
 0x55e   :  { %1803 = vmatpush1.msra.mxu0 %v11757_v28  ;;  %9665 = vmatpush3.msra.mxu1 %v11894_v20  ;;  %v15122_v28 = vld [vmem:[#allocation20_spill] sm:$0xff] }
 0x55f   :  { %1804 = vmatprep.subr.mxu0 %v11760_v29  ;;  %9666 = vmatprep.subr.mxu1 %v15090_v60  ;;  %v15123_v29 = vld [vmem:[#allocation23_spill] sm:$0xff] }
 0x560   :  { %1805 = vmatpush1.msra.mxu0 %v11763_v30  ;;  %9667 = vmatpush3.msra.mxu1 %v11898_v49 }
 0x561   :  { %1806 = vmatprep.subr.mxu0 %v11766_v31  ;;  %9668 = vmatprep.subr.mxu1 %v15090_v60 }
 0x562   :  { %1807 = vmatpush1.msra.mxu0 %v11769_v32  ;;  %9669 = vmatpush3.msra.mxu1 %v11902_v51  ;;  %v15124_v32 = vld [vmem:[#allocation29_spill] sm:$0xff] }
 0x563   :  { %1808 = vmatprep.subr.mxu0 %v11772_v33  ;;  %9670 = vmatprep.subr.mxu1 %v15090_v60 }
 0x564   :  { %1809 = vmatpush1.msra.mxu0 %v11775_v34  ;;  %9671 = vmatpush3.msra.mxu1 %v11906_v52 }
 0x565   :  { %1810 = vmatprep.subr.mxu0 %v11778_v35  ;;  %9672 = vmatprep.subr.mxu1 %v15090_v60 }
 0x566   :  { %1811 = vmatpush1.msra.mxu0 %v11781_v36  ;;  %9673 = vmatpush3.msra.mxu1 %v11910_v53 }
 0x567   :  { %1812 = vmatprep.subr.mxu0 %v11784_v37  ;;  %9674 = vmatprep.subr.mxu1 %v15090_v60  ;;  %v15125_v37 = vld [vmem:[#allocation30_spill] sm:$0xff] }
 0x568   :  { %1813 = vmatpush1.msra.mxu0 %v11787_v38  ;;  %9675 = vmatpush3.msra.mxu1 %v11914_v55  ;;  %v275_v38 = vadd.f32 %v15125_v37, %v11616_v22  ;;  %v15128_v37 = vld [vmem:[#allocation32_spill] sm:$0xff] }
 0x569   :  { %1814 = vmatprep.subr.mxu0 %v11789_v39  ;;  %9676 = vmatprep.subr.mxu1 %v15090_v60 }
 0x56a   :  { %1815 = vmatpush1.msra.mxu0 %v11791_v62  ;;  %9677 = vmatpush3.msra.mxu1 %v11916_v57 }
 0x56b   :  { %1816 = vmatprep.subr.mxu0 %v11794_v16  ;;  %9678 = vmatprep.subr.mxu1 %v15090_v60 }
 0x56c   :  { %1817 = vmatpush1.msra.mxu0 %v11797_v3  ;;  %9679 = vmatpush3.msra.mxu1 %v11920_v58 }
 0x56d   :  { %1818 = vmatprep.subr.mxu0 %v11800_v25  ;;  %9680 = vmatprep.subr.mxu1 %v15090_v60 }
 0x56e   :  { %1819 = vmatpush1.msra.mxu0 %v11803_v40  ;;  %9681 = vmatpush3.msra.mxu1 %v11924_v59  ;;  %v12113_v40 = vld [vmem:[%s14925_s4] ss:$0 sm:$0xff] }
 0x56f   :  { %1820 = vmatprep.subr.mxu0 %v11806_v48  ;;  %9682 = vmatprep.subr.mxu1 %v15090_v60 }
 0x570   :  { %1821 = vmatpush1.msra.mxu0 %v11809_v50  ;;  %9683 = vmatpush3.msra.mxu1 %v11928_v61 }
 0x571   :  { %1822 = vmatprep.subr.mxu0 %v11812_v43  ;;  %9684 = vmatprep.subr.mxu1 %v15090_v60 }
 0x572   :  { %1823 = vmatpush1.msra.mxu0 %v11815_v54  ;;  %9685 = vmatpush3.msra.mxu1 %v11932_v63  ;;  %v15126_v54 = vld [vmem:[#allocation37_spill] sm:$0xff] }
 0x573   :  { %1824 = vmatprep.subr.mxu0 %v11818_v26  ;;  %9686 = vmatprep.subr.mxu1 %v15090_v60 }
 0x574   :  { %1825 = vmatpush1.msra.mxu0 %v11821_v56  ;;  %9687 = vmatpush3.msra.mxu1 %v11936_v1 }
 0x575   :  { %1826 = vmatprep.subr.mxu0 %v11824_v9  ;;  %9688 = vmatprep.subr.mxu1 %v15090_v60 }
 0x576   :  { %1827 = vmatpush1.msra.mxu0 %v11827_v44  ;;  %9689 = vmatpush3.msra.mxu1 %v11940_v2 }
 0x577   :  { %1828 = vmatprep.subr.mxu0 %v11830_v5  ;;  %9690 = vmatprep.subr.mxu1 %v15090_v60 }
 0x578   :  { %1829 = vmatpush1.msra.mxu0 %v15119_v42  ;;  %9691 = vmatpush3.msra.mxu1 %v15120_v24  ;;  %v1976_v42 = vld [vmem:[#allocation7 + $0x20] sm:$0xff] }
 0x579   :  { %1830 = vmatprep.subr.mxu0 %v15121_v27  ;;  %9692 = vmatprep.subr.mxu1 %v15090_v60  ;;  %v1973_v27 = vld [vmem:[#allocation7 + $0x8] sm:$0xff] }
 0x57a   :  { %1831 = vmatpush1.msra.mxu0 %v15122_v28  ;;  %1864 = vmatprep.mubr.f32.mxu0 %v15090_v60  ;;  %v1972_v28 = vld [vmem:[#allocation7] sm:$0xff] }
 0x57b   :  { %9693 = vmatpush3.msra.mxu1 %v15123_v29  ;;  %9694 = vmatprep.mubr.msk.f32.mxu1 %vm11221_vm0, %v15090_v60 }
 0x57c   :  { %9697 = vmatprep.subr.mxu1 %v15090_v60 }
 0x61b   :  { %v1646_v30 = vpop.f32.mrf.mxu0  ;;  %v1717_v31 = vpop.f32.mrf.mxu1 }
 0x61c   :  { %v1721_v33 = vadd.f32 %v1646_v30, %v15124_v32  ;;  %v1735_v48 = vadd.f32 %v12113_v40, %v1717_v31  ;;  %v15127_v32 = vld [vmem:[#allocation31_spill] sm:$0xff] }
 0x61d   :  { %v9661_v34 = vpop.f32.mrf.mxu1  ;;  %v1648_v36 = vpop.f32.mrf.mxu0 }
 0x61e   :  { %v8655_v35 = vmul.f32 -1.442695, %v1721_v33  ;;  %v1728_v39 = vadd.f32 %v1648_v36, %v275_v38  ;;  %v281_v38 = vadd.f32 %v15128_v37, %v11616_v22  ;;  %v2200_v37 = vld [vmem:[#allocation5 + $0x1b0] sm:$0xff] }
 0x620   :  { %10852 = vpow2.f32 %v8655_v35  ;;  %v8656_v62 = vmul.f32 -1.442695, %v1728_v39 }
 0x622   :  { %10854 = vpow2.f32 %v8656_v62 }
 0x62d   :  { %v10853_v16 = vpop.eup %10852 }
 0x62e   :  { %v1725_v3 = vadd.f32 1.0, %v10853_v16 }
 0x62f   :  { %v10855_v25 = vpop.eup %10854 }
 0x630   :  { %10856 = vrcp.f32 %v1725_v3  ;;  %v1732_v56 = vadd.f32 1.0, %v10855_v25 }
 0x63d   :  { %v10857_v50 = vpop.eup %10856 }
 0x63e   :  { %v1736_v43 = vmul.f32 %v10857_v50, %v1735_v48 }
 0x640   :  { %v1737_v26 = vadd.f32 %v1736_v43, %v15126_v54  ;;  %v15129_v54 = vld [vmem:[#allocation40_spill] sm:$0xff] }
 0x642   :  { %10858 = vtanh.f32 %v1737_v26 }
 0x643   :  { %10860 = vrcp.f32 %v1732_v56 }
 0x64f   :  { %v10859_v9 = vpop.eup %10858 }
 0x650   :  { %v1739_v44 = vsub.f32 %v12037_v12, %v10859_v9  ;;  %v10861_v5 = vpop.eup %10860 }
 0x652   :  { %v1740_v19 = vmul.f32 %v10861_v5, %v1739_v44 }
 0x654   :  { %v12118_v0 = vadd.f32 %v10859_v9, %v1740_v19 }
 0x656   :  { %1865 = vmatmul.mubr.f32.vlgmr.msra.gmra.mxu0 %v12118_v0  ;;  %9695 = vmatmul.mubr.f32.vlgmr.msra.gmra.mxu1 %v12118_v0 }
 0x657   :  { %9698 = vmatpush3.msra.mxu1 %v11890_v11  ;;  %2084 = vmatprep.mubr.f32.mxu0 %v15090_v60  ;;  %v2018_v11 = vld [vmem:[#allocation7 + $0x170] sm:$0xff] }
 0x658   :  { %9699 = vmatprep.subr.mxu1 %v15090_v60  ;;  %9729 = vmatprep.mubr.msk.f32.mxu1 %vm11221_vm0, %v15090_v60 }
 0x659   :  { %9700 = vmatpush3.msra.mxu1 %v11894_v20  ;;  %2020 = vmatprep.subr.mxu0 %v2018_v11  ;;  %v2017_v20 = vld [vmem:[#allocation7 + $0x168] sm:$0xff] }
 0x65a   :  { %9701 = vmatprep.subr.mxu1 %v15090_v60  ;;  %2021 = vmatpush1.msra.mxu0 %v2017_v20  ;;  %v2239_v20 = vld [vmem:[#allocation5 + $0x2e8] sm:$0xff] }
 0x65b   :  { %9702 = vmatpush3.msra.mxu1 %v11898_v49  ;;  %v2015_v49 = vld [vmem:[#allocation7 + $0x158] sm:$0xff] }
 0x65c   :  { %9703 = vmatprep.subr.mxu1 %v15090_v60  ;;  %2022 = vmatprep.subr.mxu0 %v2015_v49  ;;  %v2237_v49 = vld [vmem:[#allocation5 + $0x2d8] sm:$0xff] }
 0x65d   :  { %9704 = vmatpush3.msra.mxu1 %v11902_v51  ;;  %v2014_v51 = vld [vmem:[#allocation7 + $0x150] sm:$0xff] }
 0x65e   :  { %9705 = vmatprep.subr.mxu1 %v15090_v60  ;;  %2023 = vmatpush1.msra.mxu0 %v2014_v51  ;;  %v2238_v51 = vld [vmem:[#allocation5 + $0x2e0] sm:$0xff] }
 0x65f   :  { %9706 = vmatpush3.msra.mxu1 %v11906_v52  ;;  %v2012_v52 = vld [vmem:[#allocation7 + $0x140] sm:$0xff] }
 0x660   :  { %9707 = vmatprep.subr.mxu1 %v15090_v60  ;;  %2024 = vmatprep.subr.mxu0 %v2012_v52  ;;  %v2236_v52 = vld [vmem:[#allocation5 + $0x2d0] sm:$0xff] }
 0x661   :  { %9708 = vmatpush3.msra.mxu1 %v11910_v53  ;;  %v2011_v53 = vld [vmem:[#allocation7 + $0x138] sm:$0xff] }
 0x662   :  { %9709 = vmatprep.subr.mxu1 %v15090_v60  ;;  %2025 = vmatpush1.msra.mxu0 %v2011_v53  ;;  %v2234_v53 = vld [vmem:[#allocation5 + $0x2c0] sm:$0xff] }
 0x663   :  { %9710 = vmatpush3.msra.mxu1 %v11914_v55  ;;  %v2009_v55 = vld [vmem:[#allocation7 + $0x128] sm:$0xff] }
 0x664   :  { %9711 = vmatprep.subr.mxu1 %v15090_v60  ;;  %2026 = vmatprep.subr.mxu0 %v2009_v55  ;;  %v2235_v55 = vld [vmem:[#allocation5 + $0x2c8] sm:$0xff] }
 0x665   :  { %9712 = vmatpush3.msra.mxu1 %v11916_v57  ;;  %v2008_v57 = vld [vmem:[#allocation7 + $0x120] sm:$0xff] }
 0x666   :  { %9713 = vmatprep.subr.mxu1 %v15090_v60  ;;  %2027 = vmatpush1.msra.mxu0 %v2008_v57  ;;  %v2233_v57 = vld [vmem:[#allocation5 + $0x2b8] sm:$0xff] }
 0x667   :  { %9714 = vmatpush3.msra.mxu1 %v11920_v58  ;;  %v2006_v58 = vld [vmem:[#allocation7 + $0x110] sm:$0xff] }
 0x668   :  { %9715 = vmatprep.subr.mxu1 %v15090_v60  ;;  %2028 = vmatprep.subr.mxu0 %v2006_v58  ;;  %v15130_v58 = vld [vmem:[#allocation41_spill] sm:$0xff] }
 0x669   :  { %9716 = vmatpush3.msra.mxu1 %v11924_v59  ;;  %v2005_v59 = vld [vmem:[#allocation7 + $0x108] sm:$0xff] }
 0x66a   :  { %9717 = vmatprep.subr.mxu1 %v15090_v60  ;;  %2029 = vmatpush1.msra.mxu0 %v2005_v59  ;;  %v2231_v59 = vld [vmem:[#allocation5 + $0x2a8] sm:$0xff] }
 0x66b   :  { %9718 = vmatpush3.msra.mxu1 %v11928_v61  ;;  %v2003_v61 = vld [vmem:[#allocation7 + $0xf8] sm:$0xff] }
 0x66c   :  { %9719 = vmatprep.subr.mxu1 %v15090_v60  ;;  %2030 = vmatprep.subr.mxu0 %v2003_v61  ;;  %v2232_v61 = vld [vmem:[#allocation5 + $0x2b0] sm:$0xff] }
 0x66d   :  { %9720 = vmatpush3.msra.mxu1 %v11932_v63  ;;  %v2002_v63 = vld [vmem:[#allocation7 + $0xf0] sm:$0xff] }
 0x66e   :  { %9721 = vmatprep.subr.mxu1 %v15090_v60  ;;  %2031 = vmatpush1.msra.mxu0 %v2002_v63  ;;  %v2230_v63 = vld [vmem:[#allocation5 + $0x2a0] sm:$0xff] }
 0x66f   :  { %9722 = vmatpush3.msra.mxu1 %v11936_v1  ;;  %v2000_v1 = vld [vmem:[#allocation7 + $0xe0] sm:$0xff] }
 0x670   :  { %9723 = vmatprep.subr.mxu1 %v15090_v60  ;;  %2032 = vmatprep.subr.mxu0 %v2000_v1  ;;  %v2228_v1 = vld [vmem:[#allocation5 + $0x290] sm:$0xff] }
 0x671   :  { %9724 = vmatpush3.msra.mxu1 %v11940_v2  ;;  %v1999_v2 = vld [vmem:[#allocation7 + $0xd8] sm:$0xff] }
 0x672   :  { %9725 = vmatprep.subr.mxu1 %v15090_v60  ;;  %2033 = vmatpush1.msra.mxu0 %v1999_v2  ;;  %v2229_v2 = vld [vmem:[#allocation5 + $0x298] sm:$0xff] }
 0x673   :  { %9726 = vmatpush3.msra.mxu1 %v15120_v24  ;;  %2034 = vmatprep.subr.mxu0 %v1997_v41  ;;  %v1975_v24 = vld [vmem:[#allocation7 + $0x18] sm:$0xff]  ;;  %v2227_v41 = vld [vmem:[#allocation5 + $0x288] sm:$0xff] }
 0x674   :  { %9727 = vmatprep.subr.mxu1 %v15090_v60  ;;  %2035 = vmatpush1.msra.mxu0 %v1996_v21  ;;  %v2225_v21 = vld [vmem:[#allocation5 + $0x278] sm:$0xff] }
 0x675   :  { %9728 = vmatpush3.msra.mxu1 %v15123_v29  ;;  %2036 = vmatprep.subr.mxu0 %v1994_v45  ;;  %v2240_v29 = vld [vmem:[#allocation5 + $0x2f0] sm:$0xff]  ;;  %v2226_v45 = vld [vmem:[#allocation5 + $0x280] sm:$0xff] }
 0x676   :  { %2037 = vmatpush1.msra.mxu0 %v1993_v46  ;;  %9732 = vmatprep.subr.mxu1 %v2241_v4  ;;  %v2224_v46 = vld [vmem:[#allocation5 + $0x270] sm:$0xff] }
 0x677   :  { %2038 = vmatprep.subr.mxu0 %v1991_v6  ;;  %v2222_v6 = vld [vmem:[#allocation5 + $0x260] sm:$0xff] }
 0x678   :  { %2039 = vmatpush1.msra.mxu0 %v1990_v13  ;;  %v2223_v13 = vld [vmem:[#allocation5 + $0x268] sm:$0xff] }
 0x679   :  { %2040 = vmatprep.subr.mxu0 %v1988_v14  ;;  %v2221_v14 = vld [vmem:[#allocation5 + $0x258] sm:$0xff] }
 0x67a   :  { %2041 = vmatpush1.msra.mxu0 %v1987_v15  ;;  %v2219_v15 = vld [vmem:[#allocation5 + $0x248] sm:$0xff] }
 0x67b   :  { %2042 = vmatprep.subr.mxu0 %v1985_v47  ;;  %v2220_v47 = vld [vmem:[#allocation5 + $0x250] sm:$0xff] }
 0x67c   :  { %2043 = vmatpush1.msra.mxu0 %v1984_v8  ;;  %v2216_v8 = vld [vmem:[#allocation5 + $0x230] sm:$0xff] }
 0x67d   :  { %2044 = vmatprep.subr.mxu0 %v1982_v17  ;;  %v2217_v17 = vld [vmem:[#allocation5 + $0x238] sm:$0xff] }
 0x67e   :  { %2045 = vmatpush1.msra.mxu0 %v1981_v18  ;;  %v2215_v18 = vld [vmem:[#allocation5 + $0x228] sm:$0xff] }
 0x67f   :  { %2046 = vmatprep.subr.mxu0 %v1979_v7  ;;  %v2213_v7 = vld [vmem:[#allocation5 + $0x218] sm:$0xff] }
 0x680   :  { %2047 = vmatpush1.msra.mxu0 %v1978_v10  ;;  %v2214_v10 = vld [vmem:[#allocation5 + $0x220] sm:$0xff] }
 0x681   :  { %2048 = vmatprep.subr.mxu0 %v1976_v42  ;;  %v2212_v42 = vld [vmem:[#allocation5 + $0x210] sm:$0xff] }
 0x682   :  { %2049 = vmatpush1.msra.mxu0 %v1975_v24  ;;  %v2210_v24 = vld [vmem:[#allocation5 + $0x200] sm:$0xff] }
 0x683   :  { %2050 = vmatprep.subr.mxu0 %v1973_v27  ;;  %v2211_v27 = vld [vmem:[#allocation5 + $0x208] sm:$0xff] }
 0x684   :  { %2051 = vmatpush1.msra.mxu0 %v1972_v28  ;;  %v2209_v28 = vld [vmem:[#allocation5 + $0x1f8] sm:$0xff] }
 0x685   :  { %2260 = vmatprep.subr.mxu0 %v2240_v29  ;;  %v2207_v29 = vld [vmem:[#allocation5 + $0x1e8] sm:$0xff] }
 0x716   :  { %v1866_v30 = vpop.f32.mrf.mxu0  ;;  %v1937_v31 = vpop.f32.mrf.mxu1 }
 0x717   :  { %v1941_v33 = vadd.f32 %v1866_v30, %v15127_v32  ;;  %v1955_v48 = vadd.f32 %v12113_v40, %v1937_v31  ;;  %v2208_v30 = vld [vmem:[#allocation5 + $0x1f0] sm:$0xff]  ;;  %v2206_v31 = vld [vmem:[#allocation5 + $0x1e0] sm:$0xff] }
 0x718   :  { %v9696_v34 = vpop.f32.mrf.mxu1  ;;  %v1868_v36 = vpop.f32.mrf.mxu0  ;;  %v2204_v32 = vld [vmem:[#allocation5 + $0x1d0] sm:$0xff] }
 0x719   :  { %v8657_v35 = vmul.f32 -1.442695, %v1941_v33  ;;  %v1948_v39 = vadd.f32 %v1868_v36, %v281_v38  ;;  %v2205_v33 = vld [vmem:[#allocation5 + $0x1d8] sm:$0xff]  ;;  %v2203_v34 = vld [vmem:[#allocation5 + $0x1c8] sm:$0xff]  ;;  %v2202_v36 = vld [vmem:[#allocation5 + $0x1c0] sm:$0xff] }
 0x71a   :  { %v2198_v38 = vld [vmem:[#allocation5 + $0x1a0] sm:$0xff] }
 0x71b   :  { %10862 = vpow2.f32 %v8657_v35  ;;  %v8658_v62 = vmul.f32 -1.442695, %v1948_v39  ;;  %v2201_v35 = vld [vmem:[#allocation5 + $0x1b8] sm:$0xff]  ;;  %v2199_v39 = vld [vmem:[#allocation5 + $0x1a8] sm:$0xff] }
 0x71d   :  { %10864 = vpow2.f32 %v8658_v62  ;;  %v2197_v62 = vld [vmem:[#allocation5 + $0x198] sm:$0xff] }
 0x728   :  { %v10863_v16 = vpop.eup %10862 }
 0x729   :  { %v1945_v3 = vadd.f32 1.0, %v10863_v16  ;;  %v2195_v16 = vld [vmem:[#allocation5 + $0x188] sm:$0xff] }
 0x72a   :  { %v10865_v25 = vpop.eup %10864 }
 0x72b   :  { %10866 = vrcp.f32 %v1945_v3  ;;  %v1952_v56 = vadd.f32 1.0, %v10865_v25  ;;  %v2196_v3 = vld [vmem:[#allocation5 + $0x190] sm:$0xff]  ;;  %v2194_v25 = vld [vmem:[#allocation5 + $0x180] sm:$0xff] }
 0x738   :  { %v10867_v50 = vpop.eup %10866 }
 0x739   :  { %v1956_v43 = vmul.f32 %v10867_v50, %v1955_v48  ;;  %v15131_v48 = vld [vmem:[#allocation17_spill] sm:$0xff] }
 0x73a   :  { %v15132_v50 = vld [vmem:[#allocation21_spill] sm:$0xff] }
 0x73b   :  { %v1957_v26 = vadd.f32 %v1956_v43, %v15129_v54  ;;  %v12189_v43 = vld [vmem:[#allocation7 + $0x2f0] sm:$0xff]  ;;  %v12192_v54 = vld [vmem:[#allocation7 + $0x2e8] sm:$0xff] }
 0x73c   :  { %15133 = vst [vmem:[#allocation24_spill] sm:$0xff] %v12189_v43 }
 0x73d   :  { %10868 = vtanh.f32 %v1957_v26  ;;  %v12204_v26 = vld [vmem:[#allocation7 + $0x2b8] sm:$0xff] }
 0x73e   :  { %10870 = vrcp.f32 %v1952_v56  ;;  %v12207_v56 = vld [vmem:[#allocation7 + $0x2a8] sm:$0xff] }
 0x74a   :  { %v10869_v9 = vpop.eup %10868 }
 0x74b   :  { %v1959_v44 = vsub.f32 %v12118_v0, %v10869_v9  ;;  %v10871_v5 = vpop.eup %10870 }
 0x74d   :  { %v1960_v19 = vmul.f32 %v10871_v5, %v1959_v44  ;;  %v12213_v44 = vld [vmem:[#allocation7 + $0x290] sm:$0xff]  ;;  %v12216_v5 = vld [vmem:[#allocation7 + $0x288] sm:$0xff] }
 0x74f   :  { %v12162_v11 = vadd.f32 %v10869_v9, %v1960_v19  ;;  %v12210_v9 = vld [vmem:[#allocation7 + $0x2a0] sm:$0xff]  ;;  %v12219_v19 = vld [vmem:[#allocation7 + $0x278] sm:$0xff] }
 0x751   :  { %2085 = vmatmul.mubr.f32.vlgmr.msra.gmra.mxu0 %v12162_v11  ;;  %9730 = vmatmul.mubr.f32.vlgmr.msra.gmra.mxu1 %v12162_v11 }
 0x752   :  { %2261 = vmatpush1.msra.mxu0 %v2239_v20  ;;  %9733 = vmatpush3.msra.mxu1 %v2241_v4  ;;  %v2218_v4 = vld [vmem:[#allocation5 + $0x240] sm:$0xff]  ;;  %v12222_v20 = vld [vmem:[#allocation7 + $0x270] sm:$0xff] }
 0x753   :  { %2262 = vmatprep.subr.mxu0 %v2237_v49  ;;  %9734 = vmatprep.subr.mxu1 %v2238_v51  ;;  %v12225_v49 = vld [vmem:[#allocation7 + $0x260] sm:$0xff] }
 0x754   :  { %9764 = vmatprep.mubr.f32.mxu1 %v15130_v58  ;;  %2263 = vmatpush1.msra.mxu0 %v2236_v52  ;;  %v12231_v52 = vld [vmem:[#allocation7 + $0x248] sm:$0xff] }
 0x755   :  { %9735 = vmatpush3.msra.mxu1 %v2238_v51  ;;  %2264 = vmatprep.subr.mxu0 %v2234_v53  ;;  %v12228_v51 = vld [vmem:[#allocation7 + $0x258] sm:$0xff]  ;;  %v12234_v53 = vld [vmem:[#allocation7 + $0x240] sm:$0xff] }
 0x756   :  { %9736 = vmatprep.subr.mxu1 %v2235_v55  ;;  %2265 = vmatpush1.msra.mxu0 %v2233_v57  ;;  %v12240_v57 = vld [vmem:[#allocation7 + $0x228] sm:$0xff] }
 0x757   :  { %9737 = vmatpush3.msra.mxu1 %v2235_v55  ;;  %2266 = vmatprep.subr.mxu0 %v2231_v59  ;;  %v12237_v55 = vld [vmem:[#allocation7 + $0x230] sm:$0xff] }
 0x758   :  { %9738 = vmatprep.subr.mxu1 %v2232_v61  ;;  %2267 = vmatpush1.msra.mxu0 %v2230_v63  ;;  %v12246_v59 = vld [vmem:[#allocation7 + $0x210] sm:$0xff]  ;;  %v12252_v63 = vld [vmem:[#allocation7 + $0x1f8] sm:$0xff] }
 0x759   :  { %9739 = vmatpush3.msra.mxu1 %v2232_v61  ;;  %2268 = vmatprep.subr.mxu0 %v2228_v1  ;;  %v12249_v61 = vld [vmem:[#allocation7 + $0x200] sm:$0xff]  ;;  %v12255_v1 = vld [vmem:[#allocation7 + $0x1e8] sm:$0xff] }
 0x75a   :  { %9740 = vmatprep.subr.mxu1 %v2229_v2  ;;  %2269 = vmatpush1.msra.mxu0 %v2227_v41  ;;  %v12261_v41 = vld [vmem:[#allocation7 + $0x1d0] sm:$0xff] }
 0x75b   :  { %9741 = vmatpush3.msra.mxu1 %v2229_v2  ;;  %2270 = vmatprep.subr.mxu0 %v2225_v21  ;;  %v12258_v2 = vld [vmem:[#allocation7 + $0x1e0] sm:$0xff]  ;;  %v12264_v21 = vld [vmem:[#allocation7 + $0x1c8] sm:$0xff] }
 0x75c   :  { %9742 = vmatprep.subr.mxu1 %v2226_v45  ;;  %2271 = vmatpush1.msra.mxu0 %v2224_v46  ;;  %v12270_v46 = vld [vmem:[#allocation7 + $0x1b0] sm:$0xff] }
 0x75d   :  { %9743 = vmatpush3.msra.mxu1 %v2226_v45  ;;  %2272 = vmatprep.subr.mxu0 %v2222_v6  ;;  %v12267_v45 = vld [vmem:[#allocation7 + $0x1b8] sm:$0xff]  ;;  %v12273_v6 = vld [vmem:[#allocation7 + $0x1a0] sm:$0xff] }
 0x75e   :  { %9744 = vmatprep.subr.mxu1 %v2223_v13  ;;  %2273 = vmatpush1.msra.mxu0 %v2221_v14  ;;  %v12277_v14 = vld [vmem:[#allocation7 + $0x188] sm:$0xff] }
 0x75f   :  { %9745 = vmatpush3.msra.mxu1 %v2223_v13  ;;  %2274 = vmatprep.subr.mxu0 %v2219_v15  ;;  %v12275_v13 = vld [vmem:[#allocation7 + $0x198] sm:$0xff]  ;;  %15135 = vst [vmem:[#allocation36_spill] sm:$0xff] %v12277_v14  ;;  %v12280_v15 = vld [vmem:[#allocation7 + $0x180] sm:$0xff] }
 0x760   :  { %9746 = vmatprep.subr.mxu1 %v2220_v47  ;;  %2275 = vmatpush1.msra.mxu0 %v2218_v4  ;;  %15134 = vst [vmem:[#allocation25_spill] sm:$0xff] %v12275_v13  ;;  %15136 = vst [vmem:[#allocation15_spill] sm:$0xff] %v12280_v15  ;;  %v12286_v4 = vld [vmem:[#allocation7 + $0x2e0] sm:$0xff] }
 0x761   :  { %9747 = vmatpush3.msra.mxu1 %v2220_v47  ;;  %2276 = vmatprep.subr.mxu0 %v2216_v8  ;;  %v12284_v47 = vld [vmem:[#allocation7 + $0x2f8] sm:$0xff]  ;;  %v12291_v8 = vld [vmem:[#allocation7 + $0x2c8] sm:$0xff] }
 0x762   :  { %9748 = vmatprep.subr.mxu1 %v2217_v17  ;;  %2277 = vmatpush1.msra.mxu0 %v2215_v18  ;;  %v12300_v18 = vld [vmem:[#allocation7 + $0x298] sm:$0xff] }
 0x763   :  { %9749 = vmatpush3.msra.mxu1 %v2217_v17  ;;  %2278 = vmatprep.subr.mxu0 %v2213_v7  ;;  %v12296_v17 = vld [vmem:[#allocation7 + $0x2b0] sm:$0xff]  ;;  %v12304_v7 = vld [vmem:[#allocation7 + $0x280] sm:$0xff] }
 0x764   :  { %9750 = vmatprep.subr.mxu1 %v2214_v10  ;;  %2279 = vmatpush1.msra.mxu0 %v2212_v42  ;;  %v12312_v42 = vld [vmem:[#allocation7 + $0x250] sm:$0xff] }
 0x765   :  { %9751 = vmatpush3.msra.mxu1 %v2214_v10  ;;  %2280 = vmatprep.subr.mxu0 %v2210_v24  ;;  %v12308_v10 = vld [vmem:[#allocation7 + $0x268] sm:$0xff]  ;;  %v12316_v24 = vld [vmem:[#allocation7 + $0x238] sm:$0xff] }
 0x766   :  { %9752 = vmatprep.subr.mxu1 %v2211_v27  ;;  %2281 = vmatpush1.msra.mxu0 %v2209_v28  ;;  %v12324_v28 = vld [vmem:[#allocation7 + $0x208] sm:$0xff] }
 0x767   :  { %9753 = vmatpush3.msra.mxu1 %v2211_v27  ;;  %2282 = vmatprep.subr.mxu0 %v2207_v29  ;;  %v12320_v27 = vld [vmem:[#allocation7 + $0x220] sm:$0xff]  ;;  %v12328_v29 = vld [vmem:[#allocation7 + $0x1f0] sm:$0xff] }
 0x768   :  { %9754 = vmatprep.subr.mxu1 %v2208_v30  ;;  %2283 = vmatpush1.msra.mxu0 %v2206_v31  ;;  %v12336_v31 = vld [vmem:[#allocation7 + $0x1c0] sm:$0xff] }
 0x769   :  { %9755 = vmatpush3.msra.mxu1 %v2208_v30  ;;  %2284 = vmatprep.subr.mxu0 %v2204_v32  ;;  %v12332_v30 = vld [vmem:[#allocation7 + $0x1d8] sm:$0xff]  ;;  %v12340_v32 = vld [vmem:[#allocation7 + $0x1a8] sm:$0xff] }
 0x76a   :  { %9756 = vmatprep.subr.mxu1 %v2205_v33  ;;  %2285 = vmatpush1.msra.mxu0 %v2203_v34  ;;  %15137 = vst [vmem:[#allocation26_spill] sm:$0xff] %v12340_v32 }
 0x76b   :  { %9757 = vmatpush3.msra.mxu1 %v2205_v33  ;;  %2286 = vmatprep.subr.mxu0 %v2201_v35  ;;  %v12344_v33 = vld [vmem:[#allocation7 + $0x190] sm:$0xff] }
 0x76c   :  { %9758 = vmatprep.subr.mxu1 %v2202_v36  ;;  %2287 = vmatpush1.msra.mxu0 %v2200_v37  ;;  %15138 = vst [vmem:[#allocation27_spill] sm:$0xff] %v12344_v33 }
 0x76d   :  { %9759 = vmatpush3.msra.mxu1 %v2202_v36  ;;  %2288 = vmatprep.subr.mxu0 %v2198_v38  ;;  %v15139_v36 = vld [vmem:[#allocation33_spill] sm:$0xff] }
 0x76e   :  { %9760 = vmatprep.subr.mxu1 %v2199_v39  ;;  %2289 = vmatpush1.msra.mxu0 %v2197_v62 }
 0x76f   :  { %9761 = vmatpush3.msra.mxu1 %v2199_v39  ;;  %2290 = vmatprep.subr.mxu0 %v2195_v16  ;;  %v15140_v16 = vld [vmem:[#allocation34_spill] sm:$0xff] }
 0x770   :  { %9762 = vmatprep.subr.mxu1 %v2196_v3  ;;  %2291 = vmatpush1.msra.mxu0 %v2194_v25 }
 0x771   :  { %2324 = vmatprep.mubr.f32.mxu0 %v15090_v60  ;;  %9763 = vmatpush3.msra.mxu1 %v2196_v3  ;;  %v287_v3 = vadd.f32 %v15140_v16, %v11616_v22 }
 0x772   :  { %2325 = vmatmul.mubr.f32.vlgmr.msra.gmra.mxu0 %v15130_v58  ;;  %9765 = vmatmul.mubr.f32.vlgmr.msra.gmra.mxu1 %v15131_v48  ;;  %v12243_v58 = vld [vmem:[#allocation7 + $0x218] sm:$0xff] }
 0x773   :  { %9767 = vmatprep.mubr.f32.mxu1 %v15132_v50  ;;  %2330 = vmatprep.mubr.f32.mxu0 %v15090_v60 }
 0x774   :  { %9776 = vmatprep.subr.mxu1 %v15090_v60  ;;  %2564 = vmatprep.subr.mxu0 %v12189_v43 }
 0x775   :  { %2565 = vmatpush1.msra.mxu0 %v12192_v54  ;;  %9777 = vmatpush3.msra.mxu1 %v12284_v47 }
 0x776   :  { %2331 = vmatmul.mubr.f32.gmra.mxu0 %v15131_v48  ;;  %9768 = vmatmul.mubr.f32.gmra.mxu1 %v11960_v23 }
 0x777   :  { %9770 = vmatprep.mubr.f32.mxu1 %v12037_v12  ;;  %2336 = vmatprep.mubr.f32.mxu0 %v15090_v60 }
 0x778   :  { %9778 = vmatprep.subr.mxu1 %v15090_v60 }
 0x779   :  { %9779 = vmatpush3.msra.mxu1 %v12286_v4 }
 0x77a   :  { %2337 = vmatmul.mubr.f32.gmra.mxu0 %v15132_v50  ;;  %9771 = vmatmul.mubr.f32.gmra.mxu1 %v12118_v0 }
 0x77b   :  { %9773 = vmatprep.mubr.f32.mxu1 %v12162_v11  ;;  %2342 = vmatprep.mubr.f32.mxu0 %v15090_v60 }
 0x77c   :  { %9780 = vmatprep.subr.mxu1 %v15090_v60 }
 0x77d   :  { %9781 = vmatpush3.msra.mxu1 %v12291_v8 }
 0x77e   :  { %2343 = vmatmul.mubr.f32.gmra.mxu0 %v11960_v23  ;;  %v12195_v23 = vld [vmem:[#allocation7 + $0x2d8] sm:$0xff]  ;;  %9782 = vmatprep.subr.mxu1 %v15090_v60 }
 0x77f   :  { %2348 = vmatprep.mubr.f32.mxu0 %v15090_v60  ;;  %2566 = vmatprep.subr.mxu0 %v12195_v23 }
 0x780   :  { %9783 = vmatpush3.msra.mxu1 %v12296_v17 }
 0x781   :  { %9784 = vmatprep.subr.mxu1 %v15090_v60 }
 0x782   :  { %2349 = vmatmul.mubr.f32.gmra.mxu0 %v12037_v12  ;;  %v12198_v12 = vld [vmem:[#allocation7 + $0x2d0] sm:$0xff]  ;;  %9785 = vmatpush3.msra.mxu1 %v12300_v18 }
 0x783   :  { %2354 = vmatprep.mubr.f32.mxu0 %v15090_v60  ;;  %2567 = vmatpush1.msra.mxu0 %v12198_v12 }
 0x784   :  { %9786 = vmatprep.subr.mxu1 %v15090_v60 }
 0x785   :  { %9787 = vmatpush3.msra.mxu1 %v12304_v7 }
 0x786   :  { %2355 = vmatmul.mubr.f32.gmra.mxu0 %v12118_v0  ;;  %v12201_v0 = vld [vmem:[#allocation7 + $0x2c0] sm:$0xff]  ;;  %9788 = vmatprep.subr.mxu1 %v15090_v60 }
 0x787   :  { %2360 = vmatprep.mubr.f32.mxu0 %v15090_v60  ;;  %2568 = vmatprep.subr.mxu0 %v12201_v0 }
 0x788   :  { %2569 = vmatpush1.msra.mxu0 %v12204_v26  ;;  %9789 = vmatpush3.msra.mxu1 %v12308_v10 }
 0x789   :  { %2570 = vmatprep.subr.mxu0 %v12207_v56  ;;  %9790 = vmatprep.subr.mxu1 %v15090_v60 }
 0x78a   :  { %2361 = vmatmul.mubr.f32.gmra.mxu0 %v12162_v11  ;;  %9791 = vmatpush3.msra.mxu1 %v12312_v42 }
 0x78b   :  { %2366 = vmatprep.mubr.f32.mxu0 %v15090_v60  ;;  %2571 = vmatpush1.msra.mxu0 %v12210_v9 }
 0x78c   :  { %2572 = vmatprep.subr.mxu0 %v12213_v44  ;;  %9792 = vmatprep.subr.mxu1 %v15090_v60 }
 0x78d   :  { %2573 = vmatpush1.msra.mxu0 %v12216_v5  ;;  %9793 = vmatpush3.msra.mxu1 %v12316_v24 }
 0x78e   :  { %2574 = vmatprep.subr.mxu0 %v12219_v19  ;;  %9794 = vmatprep.subr.mxu1 %v15090_v60 }
 0x78f   :  { %2575 = vmatpush1.msra.mxu0 %v12222_v20  ;;  %9795 = vmatpush3.msra.mxu1 %v12320_v27 }
 0x790   :  { %2576 = vmatprep.subr.mxu0 %v12225_v49  ;;  %9796 = vmatprep.subr.mxu1 %v15090_v60 }
 0x791   :  { %2577 = vmatpush1.msra.mxu0 %v12228_v51  ;;  %9797 = vmatpush3.msra.mxu1 %v12324_v28 }
 0x792   :  { %2578 = vmatprep.subr.mxu0 %v12231_v52  ;;  %9798 = vmatprep.subr.mxu1 %v15090_v60 }
 0x793   :  { %2579 = vmatpush1.msra.mxu0 %v12234_v53  ;;  %9799 = vmatpush3.msra.mxu1 %v12328_v29 }
 0x794   :  { %2580 = vmatprep.subr.mxu0 %v12237_v55  ;;  %9800 = vmatprep.subr.mxu1 %v15090_v60 }
 0x795   :  { %2581 = vmatpush1.msra.mxu0 %v12240_v57  ;;  %9801 = vmatpush3.msra.mxu1 %v12332_v30 }
 0x796   :  { %2582 = vmatprep.subr.mxu0 %v12243_v58  ;;  %9802 = vmatprep.subr.mxu1 %v15090_v60 }
 0x797   :  { %2583 = vmatpush1.msra.mxu0 %v12246_v59  ;;  %9803 = vmatpush3.msra.mxu1 %v12336_v31 }
 0x798   :  { %2584 = vmatprep.subr.mxu0 %v12249_v61  ;;  %9804 = vmatprep.subr.mxu1 %v15090_v60 }
 0x799   :  { %2585 = vmatpush1.msra.mxu0 %v12252_v63  ;;  %9805 = vmatpush3.msra.mxu1 %v12340_v32 }
 0x79a   :  { %2586 = vmatprep.subr.mxu0 %v12255_v1  ;;  %9806 = vmatprep.subr.mxu1 %v15090_v60 }
 0x79b   :  { %2587 = vmatpush1.msra.mxu0 %v12258_v2  ;;  %9807 = vmatpush3.msra.mxu1 %v12344_v33 }
 0x79c   :  { %2588 = vmatprep.subr.mxu0 %v12261_v41  ;;  %9811 = vmatprep.subr.mxu1 %v15090_v60 }
 0x79d   :  { %2589 = vmatpush1.msra.mxu0 %v12264_v21 }
 0x79e   :  { %2590 = vmatprep.subr.mxu0 %v12267_v45 }
 0x79f   :  { %2591 = vmatpush1.msra.mxu0 %v12270_v46 }
 0x7a0   :  { %2592 = vmatprep.subr.mxu0 %v12273_v6 }
 0x7a1   :  { %2593 = vmatpush1.msra.mxu0 %v12275_v13  ;;  %v15141_v13 = vld [vmem:[#allocation39_spill] sm:$0xff] }
 0x7a2   :  { %2594 = vmatprep.subr.mxu0 %v12277_v14 }
 0x7a3   :  { %2595 = vmatpush1.msra.mxu0 %v12280_v15 }
 0x7a4   :  { %2780 = vmatprep.subr.mxu0 %v12189_v43 }
 0x811   :  { %v2086_v34 = vpop.f32.mrf.mxu0  ;;  %v2157_v35 = vpop.f32.mrf.mxu1 }
 0x812   :  { %v2161_v37 = vadd.f32 %v2086_v34, %v15139_v36  ;;  %v2175_v15 = vadd.f32 %v12113_v40, %v2157_v35  ;;  %v15142_v40 = vld [vmem:[#allocation25_spill] sm:$0xff] }
 0x813   :  { %v9731_v38 = vpop.f32.mrf.mxu1  ;;  %v2088_v62 = vpop.f32.mrf.mxu0 }
 0x814   :  { %v8659_v39 = vmul.f32 -1.442695, %v2161_v37  ;;  %v2168_v25 = vadd.f32 %v2088_v62, %v287_v3 }
 0x816   :  { %10872 = vpow2.f32 %v8659_v39  ;;  %v8660_v48 = vmul.f32 -1.442695, %v2168_v25 }
 0x818   :  { %10874 = vpow2.f32 %v8660_v48 }
 0x823   :  { %v10873_v50 = vpop.eup %10872 }
 0x824   :  { %v2165_v43 = vadd.f32 1.0, %v10873_v50 }
 0x825   :  { %v10875_v33 = vpop.eup %10874 }
 0x826   :  { %10876 = vrcp.f32 %v2165_v43  ;;  %v2172_v36 = vadd.f32 1.0, %v10875_v33  ;;  %v15144_v43 = vld [vmem:[#allocation36_spill] sm:$0xff] }
 0x833   :  { %v10877_v14 = vpop.eup %10876 }
 0x834   :  { %v2176_v32 = vmul.f32 %v10877_v14, %v2175_v15  ;;  %v15146_v14 = vld [vmem:[#allocation27_spill] sm:$0xff]  ;;  %v15147_v15 = vld [vmem:[#allocation24_spill] sm:$0xff] }
 0x836   :  { %v2177_v34 = vadd.f32 %v2176_v32, %v15141_v13  ;;  %v15145_v13 = vld [vmem:[#allocation15_spill] sm:$0xff]  ;;  %v2326_v32 = vpop.f32.mrf.mxu0 }
 0x838   :  { %10878 = vtanh.f32 %v2177_v34  ;;  %v2328_v33 = vpop.f32.mrf.mxu0  ;;  %v12440_v34 = vpop.f32.mrf.mxu1 }
 0x839   :  { %10880 = vrcp.f32 %v2172_v36  ;;  %15154 = vst [vmem:[#allocation29_spill] sm:$0xff] %v12440_v34 }
 0x83a   :  { %v12428_v35 = vpop.f32.mrf.mxu0 }
 0x83b   :  { %15148 = vst [vmem:[#allocation38_spill] sm:$0xff] %v12428_v35 }
 0x83c   :  { %v12430_v16 = vpop.f32.mrf.mxu0 }
 0x83d   :  { %15149 = vst [vmem:[#allocation16_spill] sm:$0xff] %v12430_v16 }
 0x83e   :  { %v12432_v3 = vpop.f32.mrf.mxu0 }
 0x83f   :  { %15150 = vst [vmem:[#allocation22_spill] sm:$0xff] %v12432_v3 }
 0x840   :  { %v12434_v25 = vpop.f32.mrf.mxu0 }
 0x841   :  { %15151 = vst [vmem:[#allocation18_spill] sm:$0xff] %v12434_v25 }
 0x842   :  { %v12436_v48 = vpop.f32.mrf.mxu0 }
 0x843   :  { %15152 = vst [vmem:[#allocation20_spill] sm:$0xff] %v12436_v48 }
 0x844   :  { %v12438_v50 = vpop.f32.mrf.mxu0 }
 0x845   :  { %v10879_v37 = vpop.eup %10878  ;;  %15153 = vst [vmem:[#allocation23_spill] sm:$0xff] %v12438_v50  ;;  %v8661_v50 = vld [vmem:[%s14924_s3 + $0x3] sm:$0x7] }
 0x846   :  { %v2179_v38 = vsub.f32 %v12162_v11, %v10879_v37  ;;  %v10881_v22 = vpop.eup %10880  ;;  %v15143_v11 = vld [vmem:[#allocation26_spill] sm:$0xff]  ;;  %v12442_v36 = vpop.f32.mrf.mxu0 }
 0x847   :  { %15155 = vst [vmem:[#allocation30_spill] sm:$0xff] %v12442_v36 }
 0x848   :  { %v2180_v39 = vmul.f32 %v10881_v22, %v2179_v38  ;;  %v12444_v38 = vpop.f32.mrf.mxu0 }
 0x849   :  { %15156 = vst [vmem:[#allocation37_spill] sm:$0xff] %v12444_v38  ;;  %v15165_v38 = vld [vmem:[#allocation19_spill] sm:$0xff] }
 0x84a   :  { %v2181_v62 = vadd.f32 %v10879_v37, %v2180_v39  ;;  %v2439_v37 = vpop.f32.mrf.mxu1  ;;  %v12448_v39 = vpop.f32.mrf.mxu0 }
 0x84b   :  { %15158 = vst [vmem:[#allocation32_spill] sm:$0xff] %v12448_v39 }
 0x84c   :  { %2367 = vmatmul.mubr.f32.gmra.mxu0 %v2181_v62  ;;  %9774 = vmatmul.mubr.f32.gmra.mxu1 %v2181_v62  ;;  %v12446_v22 = vpop.f32.mrf.mxu1  ;;  %v12452_v3 = vpop.f32.mrf.mxu0 }
 0x84d   :  { %2628 = vmatprep.mubr.f32.mxu0 %v15090_v60  ;;  %9808 = vmatprep.mubr.msk.f32.mxu1 %vm11221_vm0, %v15090_v60  ;;  %15157 = vst [vmem:[#allocation31_spill] sm:$0xff] %v12446_v22  ;;  %15160 = vst [vmem:[#allocation41_spill] sm:$0xff] %v12452_v3  ;;  %v12466_v22 = vrot.slane %v8661_v50, %v15165_v38 }
 0x84e   :  { %v12450_v62 = vpop.f32.mrf.mxu1  ;;  %v12456_v48 = vpop.f32.mrf.mxu0 }
 0x84f   :  { %15159 = vst [vmem:[#allocation40_spill] sm:$0xff] %v12450_v62  ;;  %15162 = vst [vmem:[#allocation21_spill] sm:$0xff] %v12456_v48  ;;  %v2327_v48 = vadd.f32 %v2326_v32, %v12466_v22  ;;  %v12484_v32 = vld [vmem:[%s14925_s4 + $0x1] ss:$0 sm:$0xff] }
 0x850   :  { %2629 = vmatmul.mubr.f32.vlgmr.msra.gmra.mxu0 %v15090_v60  ;;  %9809 = vmatmul.mubr.f32.vlgmr.msra.gmra.mxu1 %v15090_v60  ;;  %v12454_v25 = vpop.f32.mrf.mxu1  ;;  %v12463_v34 = vpop.f32.mrf.mxu0  ;;  %15166 = vst [vmem:[#allocation39_spill] sm:$0xff] %v12466_v22 }
 0x851   :  { %2781 = vmatpush1.msra.mxu0 %v12192_v54  ;;  %9812 = vmatpush3.msra.mxu1 %v12284_v47  ;;  %15161 = vst [vmem:[#allocation17_spill] sm:$0xff] %v12454_v25  ;;  %15164 = vst [vmem:[#allocation34_spill] sm:$0xff] %v12463_v34  ;;  %v15171_v34 = vld [vmem:[#allocation35_spill] sm:$0xff] }
 0x852   :  { %2782 = vmatprep.subr.mxu0 %v12195_v23  ;;  %9813 = vmatprep.subr.mxu1 %v15090_v60  ;;  %v12461_v36 = vpop.f32.mrf.mxu1 }
 0x853   :  { %2783 = vmatpush1.msra.mxu0 %v12198_v12  ;;  %9814 = vmatpush3.msra.mxu1 %v12286_v4  ;;  %15163 = vst [vmem:[#allocation33_spill] sm:$0xff] %v12461_v36 }
 0x854   :  { %2784 = vmatprep.subr.mxu0 %v12201_v0  ;;  %9815 = vmatprep.subr.mxu1 %v15090_v60 }
 0x855   :  { %2785 = vmatpush1.msra.mxu0 %v12204_v26  ;;  %9816 = vmatpush3.msra.mxu1 %v12291_v8 }
 0x856   :  { %2786 = vmatprep.subr.mxu0 %v12207_v56  ;;  %9817 = vmatprep.subr.mxu1 %v15090_v60 }
 0x857   :  { %2787 = vmatpush1.msra.mxu0 %v12210_v9  ;;  %9818 = vmatpush3.msra.mxu1 %v12296_v17 }
 0x858   :  { %2788 = vmatprep.subr.mxu0 %v12213_v44  ;;  %9819 = vmatprep.subr.mxu1 %v15090_v60 }
 0x859   :  { %2789 = vmatpush1.msra.mxu0 %v12216_v5  ;;  %9820 = vmatpush3.msra.mxu1 %v12300_v18 }
 0x85a   :  { %2790 = vmatprep.subr.mxu0 %v12219_v19  ;;  %9821 = vmatprep.subr.mxu1 %v15090_v60 }
 0x85b   :  { %2791 = vmatpush1.msra.mxu0 %v12222_v20  ;;  %9822 = vmatpush3.msra.mxu1 %v12304_v7 }
 0x85c   :  { %2792 = vmatprep.subr.mxu0 %v12225_v49  ;;  %9823 = vmatprep.subr.mxu1 %v15090_v60 }
 0x85d   :  { %2793 = vmatpush1.msra.mxu0 %v12228_v51  ;;  %9824 = vmatpush3.msra.mxu1 %v12308_v10 }
 0x85e   :  { %2794 = vmatprep.subr.mxu0 %v12231_v52  ;;  %9825 = vmatprep.subr.mxu1 %v15090_v60 }
 0x85f   :  { %2795 = vmatpush1.msra.mxu0 %v12234_v53  ;;  %9826 = vmatpush3.msra.mxu1 %v12312_v42 }
 0x860   :  { %2796 = vmatprep.subr.mxu0 %v12237_v55  ;;  %9827 = vmatprep.subr.mxu1 %v15090_v60 }
 0x861   :  { %2797 = vmatpush1.msra.mxu0 %v12240_v57  ;;  %9828 = vmatpush3.msra.mxu1 %v12316_v24 }
 0x862   :  { %2798 = vmatprep.subr.mxu0 %v12243_v58  ;;  %9829 = vmatprep.subr.mxu1 %v15090_v60 }
 0x863   :  { %2799 = vmatpush1.msra.mxu0 %v12246_v59  ;;  %9830 = vmatpush3.msra.mxu1 %v12320_v27 }
 0x864   :  { %2800 = vmatprep.subr.mxu0 %v12249_v61  ;;  %9831 = vmatprep.subr.mxu1 %v15090_v60 }
 0x865   :  { %2801 = vmatpush1.msra.mxu0 %v12252_v63  ;;  %9832 = vmatpush3.msra.mxu1 %v12324_v28 }
 0x866   :  { %2802 = vmatprep.subr.mxu0 %v12255_v1  ;;  %9833 = vmatprep.subr.mxu1 %v15090_v60 }
 0x867   :  { %2803 = vmatpush1.msra.mxu0 %v12258_v2  ;;  %9834 = vmatpush3.msra.mxu1 %v12328_v29 }
 0x868   :  { %2804 = vmatprep.subr.mxu0 %v12261_v41  ;;  %9835 = vmatprep.subr.mxu1 %v15090_v60 }
 0x869   :  { %2805 = vmatpush1.msra.mxu0 %v12264_v21  ;;  %9836 = vmatpush3.msra.mxu1 %v12332_v30 }
 0x86a   :  { %2806 = vmatprep.subr.mxu0 %v12267_v45  ;;  %9837 = vmatprep.subr.mxu1 %v15090_v60 }
 0x86b   :  { %2807 = vmatpush1.msra.mxu0 %v12270_v46  ;;  %9838 = vmatpush3.msra.mxu1 %v12336_v31 }
 0x86c   :  { %2808 = vmatprep.subr.mxu0 %v12273_v6  ;;  %9839 = vmatprep.subr.mxu1 %v15090_v60 }
 0x86d   :  { %2809 = vmatpush1.msra.mxu0 %v15142_v40  ;;  %9840 = vmatpush3.msra.mxu1 %v15143_v11 }
 0x86e   :  { %2810 = vmatprep.subr.mxu0 %v15144_v43  ;;  %9841 = vmatprep.subr.mxu1 %v15090_v60 }
 0x86f   :  { %2811 = vmatpush1.msra.mxu0 %v15145_v13  ;;  %2844 = vmatprep.mubr.f32.mxu0 %v15090_v60  ;;  %v12478_v13 = vrot.slane %v8661_v50, %v15171_v34 }
 0x870   :  { %9842 = vmatpush3.msra.mxu1 %v15146_v14  ;;  %9843 = vmatprep.mubr.msk.f32.mxu1 %vm11221_vm0, %v15090_v60 }
 0x871   :  { %2996 = vmatprep.subr.mxu0 %v15147_v15  ;;  %9846 = vmatprep.subr.mxu1 %v15090_v60 }
 0x90c   :  { %v12468_v39 = vpop.f32.mrf.mxu0  ;;  %v12470_v62 = vpop.f32.mrf.mxu1 }
 0x90d   :  { %15167 = vst [vmem:[#allocation42_spill] sm:$0xff] %v12468_v39  ;;  %15168 = vst [vmem:[#allocation43_spill] sm:$0xff] %v12470_v62  ;;  %v2329_v39 = vadd.f32 %v2328_v33, %v12478_v13 }
 0x90e   :  { %v12472_v3 = vpop.f32.mrf.mxu0  ;;  %v12474_v25 = vpop.f32.mrf.mxu1 }
 0x90f   :  { %15169 = vst [vmem:[#allocation44_spill] sm:$0xff] %v12472_v3  ;;  %15170 = vst [vmem:[#allocation45_spill] sm:$0xff] %v12474_v25 }
 0x910   :  { %v2630_v16 = vpop.f32.mrf.mxu0  ;;  %v2701_v35 = vpop.f32.mrf.mxu1 }
 0x911   :  { %v2705_v15 = vadd.f32 %v2630_v16, %v2327_v48  ;;  %v15172_v16 = vld [vmem:[#allocation28_spill] sm:$0xff] }
 0x912   :  { %v9810_v14 = vpop.f32.mrf.mxu1  ;;  %v2632_v38 = vpop.f32.mrf.mxu0  ;;  %v12488_v48 = vrot.slane %v8661_v50, %v15172_v16  ;;  %v15175_v50 = vld [vmem:[#allocation36_spill] sm:$0xff] }
 0x913   :  { %v8664_v36 = vmul.f32 -1.442695, %v2705_v15  ;;  %v2712_v43 = vadd.f32 %v2632_v38, %v2329_v39  ;;  %v2719_v14 = vadd.f32 %v12484_v32, %v2701_v35  ;;  %v15174_v35 = vld [vmem:[#allocation26_spill] sm:$0xff] }
 0x914   :  { %v2440_v33 = vadd.f32 %v2439_v37, %v12488_v48  ;;  %v15177_v37 = vld [vmem:[#allocation27_spill] sm:$0xff] }
 0x915   :  { %10882 = vpow2.f32 %v8664_v36  ;;  %v8665_v62 = vmul.f32 -1.442695, %v2712_v43 }
 0x917   :  { %10884 = vpow2.f32 %v8665_v62 }
 0x922   :  { %v10883_v11 = vpop.eup %10882 }
 0x923   :  { %v2709_v3 = vadd.f32 1.0, %v10883_v11 }
 0x924   :  { %v10885_v15 = vpop.eup %10884 }
 0x925   :  { %10886 = vrcp.f32 %v2709_v3  ;;  %v2716_v43 = vadd.f32 1.0, %v10885_v15  ;;  %v15179_v15 = vld [vmem:[#allocation38_spill] sm:$0xff] }
 0x932   :  { %v10887_v36 = vpop.eup %10886 }
 0x933   :  { %v2720_v38 = vmul.f32 %v10887_v36, %v2719_v14  ;;  %v15178_v14 = vld [vmem:[#allocation24_spill] sm:$0xff]  ;;  %v2333_v36 = vadd.f32 %v15179_v15, %v12466_v22  ;;  %v15181_v22 = vld [vmem:[#allocation29_spill] sm:$0xff] }
 0x935   :  { %v2721_v39 = vadd.f32 %v2720_v38, %v2440_v33 }
 0x937   :  { %10888 = vtanh.f32 %v2721_v39 }
 0x938   :  { %10890 = vrcp.f32 %v2716_v43 }
 0x944   :  { %v10889_v11 = vpop.eup %10888 }
 0x945   :  { %v2723_v3 = vsub.f32 0.0, %v10889_v11  ;;  %v10891_v62 = vpop.eup %10890 }
 0x947   :  { %v2724_v34 = vmul.f32 %v10891_v62, %v2723_v3  ;;  %v15180_v62 = vld [vmem:[#allocation16_spill] sm:$0xff] }
 0x948   :  { %v2335_v16 = vadd.f32 %v15180_v62, %v12478_v13  ;;  %v12707_v62 = vld [vmem:[#allocation7 + $0x268] sm:$0xff] }
 0x949   :  { %v12491_v25 = vadd.f32 %v10889_v11, %v2724_v34  ;;  %v15176_v34 = vld [vmem:[#allocation15_spill] sm:$0xff] }
 0x94b   :  { %15173 = vst [vmem:[#allocation46_spill] sm:$0xff] %v12491_v25  ;;  %2845 = vmatmul.mubr.f32.vlgmr.msra.gmra.mxu0 %v12491_v25  ;;  %9844 = vmatmul.mubr.f32.vlgmr.msra.gmra.mxu1 %v12491_v25 }
 0x94c   :  { %2997 = vmatpush1.msra.mxu0 %v12192_v54  ;;  %9847 = vmatpush3.msra.mxu1 %v12284_v47 }
 0x94d   :  { %2998 = vmatprep.subr.mxu0 %v12195_v23  ;;  %9848 = vmatprep.subr.mxu1 %v15090_v60 }
 0x94e   :  { %2999 = vmatpush1.msra.mxu0 %v12198_v12  ;;  %9849 = vmatpush3.msra.mxu1 %v12286_v4 }
 0x94f   :  { %3000 = vmatprep.subr.mxu0 %v12201_v0  ;;  %9850 = vmatprep.subr.mxu1 %v15090_v60 }
 0x950   :  { %3001 = vmatpush1.msra.mxu0 %v12204_v26  ;;  %9851 = vmatpush3.msra.mxu1 %v12291_v8 }
 0x951   :  { %3002 = vmatprep.subr.mxu0 %v12207_v56  ;;  %9852 = vmatprep.subr.mxu1 %v15090_v60 }
 0x952   :  { %3003 = vmatpush1.msra.mxu0 %v12210_v9  ;;  %9853 = vmatpush3.msra.mxu1 %v12296_v17 }
 0x953   :  { %3004 = vmatprep.subr.mxu0 %v12213_v44  ;;  %9854 = vmatprep.subr.mxu1 %v15090_v60 }
 0x954   :  { %3005 = vmatpush1.msra.mxu0 %v12216_v5  ;;  %9855 = vmatpush3.msra.mxu1 %v12300_v18 }
 0x955   :  { %3006 = vmatprep.subr.mxu0 %v12219_v19  ;;  %9856 = vmatprep.subr.mxu1 %v15090_v60 }
 0x956   :  { %3007 = vmatpush1.msra.mxu0 %v12222_v20  ;;  %9857 = vmatpush3.msra.mxu1 %v12304_v7 }
 0x957   :  { %3008 = vmatprep.subr.mxu0 %v12225_v49  ;;  %9858 = vmatprep.subr.mxu1 %v15090_v60 }
 0x958   :  { %3009 = vmatpush1.msra.mxu0 %v12228_v51  ;;  %9859 = vmatpush3.msra.mxu1 %v12308_v10 }
 0x959   :  { %3010 = vmatprep.subr.mxu0 %v12231_v52  ;;  %9860 = vmatprep.subr.mxu1 %v15090_v60 }
 0x95a   :  { %3011 = vmatpush1.msra.mxu0 %v12234_v53  ;;  %9861 = vmatpush3.msra.mxu1 %v12312_v42 }
 0x95b   :  { %3012 = vmatprep.subr.mxu0 %v12237_v55  ;;  %9862 = vmatprep.subr.mxu1 %v15090_v60 }
 0x95c   :  { %3013 = vmatpush1.msra.mxu0 %v12240_v57  ;;  %9863 = vmatpush3.msra.mxu1 %v12316_v24 }
 0x95d   :  { %3014 = vmatprep.subr.mxu0 %v12243_v58  ;;  %9864 = vmatprep.subr.mxu1 %v15090_v60 }
 0x95e   :  { %3015 = vmatpush1.msra.mxu0 %v12246_v59  ;;  %9865 = vmatpush3.msra.mxu1 %v12320_v27 }
 0x95f   :  { %3016 = vmatprep.subr.mxu0 %v12249_v61  ;;  %9866 = vmatprep.subr.mxu1 %v15090_v60 }
 0x960   :  { %3017 = vmatpush1.msra.mxu0 %v12252_v63  ;;  %9867 = vmatpush3.msra.mxu1 %v12324_v28 }
 0x961   :  { %3018 = vmatprep.subr.mxu0 %v12255_v1  ;;  %9868 = vmatprep.subr.mxu1 %v15090_v60 }
 0x962   :  { %3019 = vmatpush1.msra.mxu0 %v12258_v2  ;;  %9869 = vmatpush3.msra.mxu1 %v12328_v29 }
 0x963   :  { %3020 = vmatprep.subr.mxu0 %v12261_v41  ;;  %9870 = vmatprep.subr.mxu1 %v15090_v60 }
 0x964   :  { %3021 = vmatpush1.msra.mxu0 %v12264_v21  ;;  %9871 = vmatpush3.msra.mxu1 %v12332_v30 }
 0x965   :  { %3022 = vmatprep.subr.mxu0 %v12267_v45  ;;  %9872 = vmatprep.subr.mxu1 %v15090_v60 }
 0x966   :  { %3023 = vmatpush1.msra.mxu0 %v12270_v46  ;;  %9873 = vmatpush3.msra.mxu1 %v12336_v31 }
 0x967   :  { %3024 = vmatprep.subr.mxu0 %v12273_v6  ;;  %9874 = vmatprep.subr.mxu1 %v15090_v60 }
 0x968   :  { %3025 = vmatpush1.msra.mxu0 %v15142_v40  ;;  %9875 = vmatpush3.msra.mxu1 %v15174_v35 }
 0x969   :  { %3026 = vmatprep.subr.mxu0 %v15175_v50  ;;  %9876 = vmatprep.subr.mxu1 %v15090_v60 }
 0x96a   :  { %3027 = vmatpush1.msra.mxu0 %v15176_v34  ;;  %3060 = vmatprep.mubr.f32.mxu0 %v15090_v60 }
 0x96b   :  { %9877 = vmatpush3.msra.mxu1 %v15177_v37  ;;  %9878 = vmatprep.mubr.msk.f32.mxu1 %vm11221_vm0, %v15090_v60 }
 0x96c   :  { %3212 = vmatprep.subr.mxu0 %v15178_v14  ;;  %9881 = vmatprep.subr.mxu1 %v15090_v60 }
 0xa0b   :  { %v2846_v33 = vpop.f32.mrf.mxu0  ;;  %v2917_v38 = vpop.f32.mrf.mxu1 }
 0xa0c   :  { %v2921_v43 = vadd.f32 %v2846_v33, %v2333_v36  ;;  %v2935_v40 = vadd.f32 %v12484_v32, %v2917_v38  ;;  %v2445_v36 = vadd.f32 %v15181_v22, %v12488_v48  ;;  %v12697_v22 = vld [vmem:[#allocation7 + $0x278] sm:$0xff] }
 0xa0d   :  { %v9845_v39 = vpop.f32.mrf.mxu1  ;;  %v2848_v3 = vpop.f32.mrf.mxu0  ;;  %v12704_v38 = vld [vmem:[#allocation7 + $0x258] sm:$0xff] }
 0xa0e   :  { %v8666_v11 = vmul.f32 -1.442695, %v2921_v43  ;;  %v2928_v37 = vadd.f32 %v2848_v3, %v2335_v16 }
 0xa10   :  { %10892 = vpow2.f32 %v8666_v11  ;;  %v8667_v34 = vmul.f32 -1.442695, %v2928_v37 }
 0xa12   :  { %10894 = vpow2.f32 %v8667_v34  ;;  %v12702_v34 = vld [vmem:[#allocation7 + $0x260] sm:$0xff] }
 0xa1d   :  { %v10893_v50 = vpop.eup %10892 }
 0xa1e   :  { %v2925_v35 = vadd.f32 1.0, %v10893_v50 }
 0xa1f   :  { %v10895_v14 = vpop.eup %10894 }
 0xa20   :  { %10896 = vrcp.f32 %v2925_v35  ;;  %v2932_v39 = vadd.f32 1.0, %v10895_v14  ;;  %v12700_v35 = vld [vmem:[#allocation7 + $0x270] sm:$0xff]  ;;  %v12709_v14 = vld [vmem:[#allocation7 + $0x248] sm:$0xff] }
 0xa2d   :  { %v10897_v15 = vpop.eup %10896 }
 0xa2e   :  { %v2936_v33 = vmul.f32 %v10897_v15, %v2935_v40  ;;  %v12694_v40 = vld [vmem:[#allocation7 + $0x288] sm:$0xff]  ;;  %v12713_v15 = vld [vmem:[#allocation7 + $0x240] sm:$0xff] }
 0xa30   :  { %v2937_v43 = vadd.f32 %v2936_v33, %v2445_v36  ;;  %v12715_v36 = vld [vmem:[#allocation7 + $0x250] sm:$0xff] }
 0xa31   :  { %v12719_v33 = vld [vmem:[#allocation7 + $0x230] sm:$0xff] }
 0xa32   :  { %10898 = vtanh.f32 %v2937_v43  ;;  %v12721_v43 = vld [vmem:[#allocation7 + $0x238] sm:$0xff] }
 0xa33   :  { %10900 = vrcp.f32 %v2932_v39  ;;  %v12725_v39 = vld [vmem:[#allocation7 + $0x228] sm:$0xff] }
 0xa3f   :  { %v10899_v11 = vpop.eup %10898 }
 0xa40   :  { %v2939_v16 = vsub.f32 %v12491_v25, %v10899_v11  ;;  %v10901_v37 = vpop.eup %10900 }
 0xa42   :  { %v2940_v3 = vmul.f32 %v10901_v37, %v2939_v16  ;;  %v12731_v16 = vld [vmem:[#allocation7 + $0x220] sm:$0xff]  ;;  %v12735_v37 = vld [vmem:[#allocation7 + $0x210] sm:$0xff] }
 0xa44   :  { %v12570_v50 = vadd.f32 %v10899_v11, %v2940_v3  ;;  %v12729_v11 = vld [vmem:[#allocation7 + $0x218] sm:$0xff]  ;;  %v12739_v3 = vld [vmem:[#allocation7 + $0x200] sm:$0xff] }
 0xa46   :  { %15182 = vst [vmem:[#allocation24_spill] sm:$0xff] %v12570_v50  ;;  %3061 = vmatmul.mubr.f32.vlgmr.msra.gmra.mxu0 %v12570_v50  ;;  %9879 = vmatmul.mubr.f32.vlgmr.msra.gmra.mxu1 %v12570_v50 }
 0xa47   :  { %3213 = vmatpush1.msra.mxu0 %v12192_v54  ;;  %9882 = vmatpush3.msra.mxu1 %v12284_v47  ;;  %v15183_v54 = vld [vmem:[#allocation25_spill] sm:$0xff] }
 0xa48   :  { %3214 = vmatprep.subr.mxu0 %v12195_v23  ;;  %9883 = vmatprep.subr.mxu1 %v15090_v60  ;;  %v15184_v23 = vld [vmem:[#allocation26_spill] sm:$0xff] }
 0xa49   :  { %3215 = vmatpush1.msra.mxu0 %v12198_v12  ;;  %9884 = vmatpush3.msra.mxu1 %v12286_v4  ;;  %v15185_v12 = vld [vmem:[#allocation36_spill] sm:$0xff] }
 0xa4a   :  { %3216 = vmatprep.subr.mxu0 %v12201_v0  ;;  %9885 = vmatprep.subr.mxu1 %v15090_v60  ;;  %v15186_v0 = vld [vmem:[#allocation15_spill] sm:$0xff] }
 0xa4b   :  { %3217 = vmatpush1.msra.mxu0 %v12204_v26  ;;  %9886 = vmatpush3.msra.mxu1 %v12291_v8  ;;  %v15187_v26 = vld [vmem:[#allocation27_spill] sm:$0xff] }
 0xa4c   :  { %3218 = vmatprep.subr.mxu0 %v12207_v56  ;;  %9887 = vmatprep.subr.mxu1 %v15090_v60  ;;  %v15188_v56 = vld [vmem:[#allocation39_spill] sm:$0xff] }
 0xa4d   :  { %3219 = vmatpush1.msra.mxu0 %v12210_v9  ;;  %9888 = vmatpush3.msra.mxu1 %v12296_v17  ;;  %v15189_v9 = vld [vmem:[#allocation22_spill] sm:$0xff] }
 0xa4e   :  { %3220 = vmatprep.subr.mxu0 %v12213_v44  ;;  %9889 = vmatprep.subr.mxu1 %v15090_v60  ;;  %v2339_v44 = vadd.f32 %v15189_v9, %v15188_v56  ;;  %v12759_v9 = vld [vmem:[#allocation7 + $0x1d0] sm:$0xff] }
 0xa4f   :  { %3221 = vmatpush1.msra.mxu0 %v12216_v5  ;;  %9890 = vmatpush3.msra.mxu1 %v12300_v18 }
 0xa50   :  { %3222 = vmatprep.subr.mxu0 %v12219_v19  ;;  %9891 = vmatprep.subr.mxu1 %v15090_v60 }
 0xa51   :  { %3223 = vmatpush1.msra.mxu0 %v12222_v20  ;;  %9892 = vmatpush3.msra.mxu1 %v12304_v7 }
 0xa52   :  { %3224 = vmatprep.subr.mxu0 %v12225_v49  ;;  %9893 = vmatprep.subr.mxu1 %v15090_v60 }
 0xa53   :  { %3225 = vmatpush1.msra.mxu0 %v12228_v51  ;;  %9894 = vmatpush3.msra.mxu1 %v12308_v10 }
 0xa54   :  { %3226 = vmatprep.subr.mxu0 %v12231_v52  ;;  %9895 = vmatprep.subr.mxu1 %v15090_v60 }
 0xa55   :  { %3227 = vmatpush1.msra.mxu0 %v12234_v53  ;;  %9896 = vmatpush3.msra.mxu1 %v12312_v42  ;;  %v15190_v53 = vld [vmem:[#allocation18_spill] sm:$0xff] }
 0xa56   :  { %3228 = vmatprep.subr.mxu0 %v12237_v55  ;;  %9897 = vmatprep.subr.mxu1 %v15090_v60  ;;  %v2341_v55 = vadd.f32 %v15190_v53, %v12478_v13  ;;  %v12785_v53 = vld [vmem:[#allocation7 + $0x198] sm:$0xff] }
 0xa57   :  { %3229 = vmatpush1.msra.mxu0 %v12240_v57  ;;  %9898 = vmatpush3.msra.mxu1 %v12316_v24  ;;  %15195 = vst [vmem:[#allocation25_spill] sm:$0xff] %v12785_v53 }
 0xa58   :  { %3230 = vmatprep.subr.mxu0 %v12243_v58  ;;  %9899 = vmatprep.subr.mxu1 %v15090_v60 }
 0xa59   :  { %3231 = vmatpush1.msra.mxu0 %v12246_v59  ;;  %9900 = vmatpush3.msra.mxu1 %v12320_v27 }
 0xa5a   :  { %3232 = vmatprep.subr.mxu0 %v12249_v61  ;;  %9901 = vmatprep.subr.mxu1 %v15090_v60 }
 0xa5b   :  { %3233 = vmatpush1.msra.mxu0 %v12252_v63  ;;  %9902 = vmatpush3.msra.mxu1 %v12324_v28 }
 0xa5c   :  { %3234 = vmatprep.subr.mxu0 %v12255_v1  ;;  %9903 = vmatprep.subr.mxu1 %v15090_v60 }
 0xa5d   :  { %3235 = vmatpush1.msra.mxu0 %v12258_v2  ;;  %9904 = vmatpush3.msra.mxu1 %v12328_v29  ;;  %v12685_v29 = vld [vmem:[#allocation7 + $0x2a8] sm:$0xff] }
 0xa5e   :  { %3236 = vmatprep.subr.mxu0 %v12261_v41  ;;  %9905 = vmatprep.subr.mxu1 %v15090_v60  ;;  %v15191_v41 = vld [vmem:[#allocation40_spill] sm:$0xff] }
 0xa5f   :  { %3237 = vmatpush1.msra.mxu0 %v12264_v21  ;;  %9906 = vmatpush3.msra.mxu1 %v12332_v30  ;;  %v2450_v21 = vadd.f32 %v15191_v41, %v12488_v48  ;;  %v12688_v30 = vld [vmem:[#allocation7 + $0x2a0] sm:$0xff] }
 0xa60   :  { %3238 = vmatprep.subr.mxu0 %v12267_v45  ;;  %9907 = vmatprep.subr.mxu1 %v15090_v60 }
 0xa61   :  { %3239 = vmatpush1.msra.mxu0 %v12270_v46  ;;  %9908 = vmatpush3.msra.mxu1 %v12336_v31  ;;  %v12691_v31 = vld [vmem:[#allocation7 + $0x290] sm:$0xff] }
 0xa62   :  { %3240 = vmatprep.subr.mxu0 %v12273_v6  ;;  %9909 = vmatprep.subr.mxu1 %v15090_v60 }
 0xa63   :  { %3241 = vmatpush1.msra.mxu0 %v15183_v54  ;;  %9910 = vmatpush3.msra.mxu1 %v15184_v23  ;;  %v12741_v54 = vld [vmem:[#allocation7 + $0x208] sm:$0xff]  ;;  %v12745_v23 = vld [vmem:[#allocation7 + $0x1f8] sm:$0xff] }
 0xa64   :  { %3242 = vmatprep.subr.mxu0 %v15185_v12  ;;  %9911 = vmatprep.subr.mxu1 %v15090_v60  ;;  %v12749_v12 = vld [vmem:[#allocation7 + $0x1e8] sm:$0xff] }
 0xa65   :  { %3243 = vmatpush1.msra.mxu0 %v15186_v0  ;;  %3276 = vmatprep.mubr.f32.mxu0 %v15090_v60  ;;  %v12751_v0 = vld [vmem:[#allocation7 + $0x1f0] sm:$0xff] }
 0xa66   :  { %9912 = vmatpush3.msra.mxu1 %v15187_v26  ;;  %9913 = vmatprep.mubr.msk.f32.mxu1 %vm11221_vm0, %v15090_v60  ;;  %v12755_v26 = vld [vmem:[#allocation7 + $0x1e0] sm:$0xff] }
 0xa67   :  { %9916 = vmatprep.subr.mxu1 %v15090_v60 }
 0xb06   :  { %v3062_v5 = vpop.f32.mrf.mxu0  ;;  %v3133_v19 = vpop.f32.mrf.mxu1 }
 0xb07   :  { %v3137_v20 = vadd.f32 %v3062_v5, %v2339_v44  ;;  %v3151_v1 = vadd.f32 %v12484_v32, %v3133_v19  ;;  %v12761_v44 = vld [vmem:[#allocation7 + $0x1d8] sm:$0xff]  ;;  %v12765_v5 = vld [vmem:[#allocation7 + $0x1c8] sm:$0xff] }
 0xb08   :  { %v9880_v49 = vpop.f32.mrf.mxu1  ;;  %v3064_v52 = vpop.f32.mrf.mxu0  ;;  %v12769_v19 = vld [vmem:[#allocation7 + $0x1b8] sm:$0xff] }
 0xb09   :  { %v8668_v51 = vmul.f32 -1.442695, %v3137_v20  ;;  %v3144_v57 = vadd.f32 %v3064_v52, %v2341_v55  ;;  %v12771_v20 = vld [vmem:[#allocation7 + $0x1c0] sm:$0xff]  ;;  %v12775_v49 = vld [vmem:[#allocation7 + $0x1b0] sm:$0xff]  ;;  %v12781_v52 = vld [vmem:[#allocation7 + $0x1a8] sm:$0xff] }
 0xb0a   :  { %15194 = vst [vmem:[#allocation29_spill] sm:$0xff] %v12781_v52  ;;  %v12789_v55 = vld [vmem:[#allocation7 + $0x188] sm:$0xff] }
 0xb0b   :  { %10902 = vpow2.f32 %v8668_v51  ;;  %v8669_v58 = vmul.f32 -1.442695, %v3144_v57  ;;  %v12779_v51 = vld [vmem:[#allocation7 + $0x1a0] sm:$0xff]  ;;  %15196 = vst [vmem:[#allocation26_spill] sm:$0xff] %v12789_v55  ;;  %v12791_v57 = vld [vmem:[#allocation7 + $0x190] sm:$0xff] }
 0xb0c   :  { %15197 = vst [vmem:[#allocation36_spill] sm:$0xff] %v12791_v57 }
 0xb0d   :  { %10904 = vpow2.f32 %v8669_v58  ;;  %v12795_v58 = vld [vmem:[#allocation7 + $0x180] sm:$0xff] }
 0xb0e   :  { %15198 = vst [vmem:[#allocation15_spill] sm:$0xff] %v12795_v58 }
 0xb18   :  { %v10903_v59 = vpop.eup %10902 }
 0xb19   :  { %v3141_v61 = vadd.f32 1.0, %v10903_v59  ;;  %v15199_v59 = vld [vmem:[#allocation20_spill] sm:$0xff] }
 0xb1a   :  { %v10905_v63 = vpop.eup %10904 }
 0xb1b   :  { %10906 = vrcp.f32 %v3141_v61  ;;  %v3148_v6 = vadd.f32 1.0, %v10905_v63  ;;  %v2345_v61 = vadd.f32 %v15199_v59, %v15188_v56  ;;  %v15201_v56 = vld [vmem:[#allocation31_spill] sm:$0xff] }
 0xb28   :  { %v10907_v2 = vpop.eup %10906 }
 0xb29   :  { %v3152_v45 = vmul.f32 %v10907_v2, %v3151_v1 }
 0xb2b   :  { %v3153_v46 = vadd.f32 %v3152_v45, %v2450_v21 }
 0xb2d   :  { %10908 = vtanh.f32 %v3153_v46  ;;  %v15200_v46 = vld [vmem:[#allocation23_spill] sm:$0xff] }
 0xb2e   :  { %10910 = vrcp.f32 %v3148_v6  ;;  %v2347_v6 = vadd.f32 %v15200_v46, %v12478_v13 }
 0xb3a   :  { %v10909_v10 = vpop.eup %10908 }
 0xb3b   :  { %v3155_v42 = vsub.f32 %v12570_v50, %v10909_v10  ;;  %v10911_v24 = vpop.eup %10910 }
 0xb3d   :  { %v3156_v27 = vmul.f32 %v10911_v24, %v3155_v42 }
 0xb3f   :  { %v12648_v28 = vadd.f32 %v10909_v10, %v3156_v27 }
 0xb41   :  { %15192 = vst [vmem:[#allocation38_spill] sm:$0xff] %v12648_v28  ;;  %3277 = vmatmul.mubr.f32.vlgmr.msra.gmra.mxu0 %v12648_v28  ;;  %9914 = vmatmul.mubr.f32.vlgmr.msra.gmra.mxu1 %v12648_v28 }
 0xb42   :  { %9917 = vmatpush3.msra.mxu1 %v12284_v47  ;;  %3492 = vmatprep.mubr.f32.mxu0 %v15090_v60  ;;  %v12667_v47 = vld [vmem:[#allocation7 + $0x2f0] sm:$0xff] }
 0xb43   :  { %9918 = vmatprep.subr.mxu1 %v15090_v60  ;;  %9948 = vmatprep.mubr.msk.f32.mxu1 %vm11221_vm0, %v15090_v60  ;;  %15193 = vst [vmem:[#allocation16_spill] sm:$0xff] %v12667_v47 }
 0xb44   :  { %9919 = vmatpush3.msra.mxu1 %v12286_v4  ;;  %3428 = vmatprep.subr.mxu0 %v12667_v47  ;;  %v12670_v4 = vld [vmem:[#allocation7 + $0x2e8] sm:$0xff] }
 0xb45   :  { %9920 = vmatprep.subr.mxu1 %v15090_v60  ;;  %3429 = vmatpush1.msra.mxu0 %v12670_v4 }
 0xb46   :  { %9921 = vmatpush3.msra.mxu1 %v12291_v8  ;;  %v12673_v8 = vld [vmem:[#allocation7 + $0x2d8] sm:$0xff] }
 0xb47   :  { %9922 = vmatprep.subr.mxu1 %v15090_v60  ;;  %3430 = vmatprep.subr.mxu0 %v12673_v8 }
 0xb48   :  { %9923 = vmatpush3.msra.mxu1 %v12296_v17  ;;  %v12676_v17 = vld [vmem:[#allocation7 + $0x2d0] sm:$0xff] }
 0xb49   :  { %9924 = vmatprep.subr.mxu1 %v15090_v60  ;;  %3431 = vmatpush1.msra.mxu0 %v12676_v17 }
 0xb4a   :  { %9925 = vmatpush3.msra.mxu1 %v12300_v18  ;;  %v12679_v18 = vld [vmem:[#allocation7 + $0x2c0] sm:$0xff] }
 0xb4b   :  { %9926 = vmatprep.subr.mxu1 %v15090_v60  ;;  %3432 = vmatprep.subr.mxu0 %v12679_v18 }
 0xb4c   :  { %9927 = vmatpush3.msra.mxu1 %v12304_v7  ;;  %v12682_v7 = vld [vmem:[#allocation7 + $0x2b8] sm:$0xff] }
 0xb4d   :  { %9928 = vmatprep.subr.mxu1 %v15090_v60  ;;  %3433 = vmatpush1.msra.mxu0 %v12682_v7 }
 0xb4e   :  { %3434 = vmatprep.subr.mxu0 %v12685_v29  ;;  %9929 = vmatpush3.msra.mxu1 %v12707_v62 }
 0xb4f   :  { %3435 = vmatpush1.msra.mxu0 %v12688_v30  ;;  %9930 = vmatprep.subr.mxu1 %v15090_v60 }
 0xb50   :  { %3436 = vmatprep.subr.mxu0 %v12691_v31  ;;  %9931 = vmatpush3.msra.mxu1 %v12715_v36 }
 0xb51   :  { %3437 = vmatpush1.msra.mxu0 %v12694_v40  ;;  %9932 = vmatprep.subr.mxu1 %v15090_v60 }
 0xb52   :  { %3438 = vmatprep.subr.mxu0 %v12697_v22  ;;  %9933 = vmatpush3.msra.mxu1 %v12721_v43 }
 0xb53   :  { %3439 = vmatpush1.msra.mxu0 %v12700_v35  ;;  %9934 = vmatprep.subr.mxu1 %v15090_v60 }
 0xb54   :  { %3440 = vmatprep.subr.mxu0 %v12702_v34  ;;  %9935 = vmatpush3.msra.mxu1 %v12731_v16 }
 0xb55   :  { %3441 = vmatpush1.msra.mxu0 %v12704_v38  ;;  %9936 = vmatprep.subr.mxu1 %v15090_v60 }
 0xb56   :  { %3442 = vmatprep.subr.mxu0 %v12709_v14  ;;  %9937 = vmatpush3.msra.mxu1 %v12741_v54 }
 0xb57   :  { %3443 = vmatpush1.msra.mxu0 %v12713_v15  ;;  %9938 = vmatprep.subr.mxu1 %v15090_v60 }
 0xb58   :  { %3444 = vmatprep.subr.mxu0 %v12719_v33  ;;  %9939 = vmatpush3.msra.mxu1 %v12751_v0 }
 0xb59   :  { %3445 = vmatpush1.msra.mxu0 %v12725_v39  ;;  %9940 = vmatprep.subr.mxu1 %v15090_v60 }
 0xb5a   :  { %3446 = vmatprep.subr.mxu0 %v12729_v11  ;;  %9941 = vmatpush3.msra.mxu1 %v12761_v44 }
 0xb5b   :  { %3447 = vmatpush1.msra.mxu0 %v12735_v37  ;;  %9942 = vmatprep.subr.mxu1 %v15090_v60 }
 0xb5c   :  { %3448 = vmatprep.subr.mxu0 %v12739_v3  ;;  %9943 = vmatpush3.msra.mxu1 %v12771_v20 }
 0xb5d   :  { %3449 = vmatpush1.msra.mxu0 %v12745_v23  ;;  %9944 = vmatprep.subr.mxu1 %v15090_v60 }
 0xb5e   :  { %3450 = vmatprep.subr.mxu0 %v12749_v12  ;;  %9945 = vmatpush3.msra.mxu1 %v12781_v52 }
 0xb5f   :  { %3451 = vmatpush1.msra.mxu0 %v12755_v26  ;;  %9946 = vmatprep.subr.mxu1 %v15090_v60 }
 0xb60   :  { %3452 = vmatprep.subr.mxu0 %v12759_v9  ;;  %9947 = vmatpush3.msra.mxu1 %v12791_v57 }
 0xb61   :  { %3453 = vmatpush1.msra.mxu0 %v12765_v5  ;;  %9951 = vmatprep.subr.mxu1 %v15090_v60 }
 0xb62   :  { %3454 = vmatprep.subr.mxu0 %v12769_v19 }
 0xb63   :  { %3455 = vmatpush1.msra.mxu0 %v12775_v49 }
 0xb64   :  { %3456 = vmatprep.subr.mxu0 %v12779_v51 }
 0xb65   :  { %3457 = vmatpush1.msra.mxu0 %v12785_v53 }
 0xb66   :  { %3458 = vmatprep.subr.mxu0 %v12789_v55 }
 0xb67   :  { %3459 = vmatpush1.msra.mxu0 %v12795_v58 }
 0xb68   :  { %3644 = vmatprep.subr.mxu0 %v12667_v47 }
 0xc01   :  { %v3278_v63 = vpop.f32.mrf.mxu0  ;;  %v3349_v1 = vpop.f32.mrf.mxu1 }
 0xc02   :  { %v3353_v2 = vadd.f32 %v3278_v63, %v2345_v61  ;;  %v3367_v25 = vadd.f32 %v12484_v32, %v3349_v1  ;;  %v2455_v61 = vadd.f32 %v15201_v56, %v12488_v48  ;;  %v12859_v56 = vld [vmem:[#allocation7 + $0x2c8] sm:$0xff]  ;;  %v12863_v1 = vld [vmem:[#allocation7 + $0x2b0] sm:$0xff] }
 0xc03   :  { %v9915_v41 = vpop.f32.mrf.mxu1  ;;  %v3280_v45 = vpop.f32.mrf.mxu0 }
 0xc04   :  { %v8670_v21 = vmul.f32 -1.442695, %v3353_v2  ;;  %v3360_v10 = vadd.f32 %v3280_v45, %v2347_v6 }
 0xc06   :  { %10912 = vpow2.f32 %v8670_v21  ;;  %v8671_v42 = vmul.f32 -1.442695, %v3360_v10 }
 0xc08   :  { %10914 = vpow2.f32 %v8671_v42  ;;  %v12867_v42 = vld [vmem:[#allocation7 + $0x298] sm:$0xff] }
 0xc13   :  { %v10913_v24 = vpop.eup %10912 }
 0xc14   :  { %v3357_v27 = vadd.f32 1.0, %v10913_v24  ;;  %v12871_v24 = vld [vmem:[#allocation7 + $0x280] sm:$0xff] }
 0xc15   :  { %v10915_v50 = vpop.eup %10914 }
 0xc16   :  { %10916 = vrcp.f32 %v3357_v27  ;;  %v3364_v41 = vadd.f32 1.0, %v10915_v50  ;;  %v12855_v50 = vld [vmem:[#allocation7 + $0x2e0] sm:$0xff] }
 0xc17   :  { %v15203_v27 = vld [vmem:[#allocation39_spill] sm:$0xff] }
 0xc23   :  { %v10917_v59 = vpop.eup %10916 }
 0xc24   :  { %v3368_v63 = vmul.f32 %v10917_v59, %v3367_v25  ;;  %v12851_v25 = vld [vmem:[#allocation7 + $0x2f8] sm:$0xff] }
 0xc25   :  { %v15204_v59 = vld [vmem:[#allocation30_spill] sm:$0xff] }
 0xc26   :  { %v3369_v2 = vadd.f32 %v3368_v63, %v2455_v61  ;;  %v2351_v61 = vadd.f32 %v15204_v59, %v15203_v27  ;;  %v15206_v27 = vld [vmem:[#allocation33_spill] sm:$0xff] }
 0xc28   :  { %10918 = vtanh.f32 %v3369_v2 }
 0xc29   :  { %10920 = vrcp.f32 %v3364_v41 }
 0xc35   :  { %v10919_v21 = vpop.eup %10918 }
 0xc36   :  { %v3371_v45 = vsub.f32 %v12648_v28, %v10919_v21  ;;  %v10921_v46 = vpop.eup %10920 }
 0xc38   :  { %v3372_v6 = vmul.f32 %v10921_v46, %v3371_v45 }
 0xc3a   :  { %v12812_v10 = vadd.f32 %v10919_v21, %v3372_v6  ;;  %v15205_v6 = vld [vmem:[#allocation37_spill] sm:$0xff] }
 0xc3b   :  { %v2353_v28 = vadd.f32 %v15205_v6, %v12478_v13  ;;  %v15214_v6 = vld [vmem:[#allocation32_spill] sm:$0xff] }
 0xc3c   :  { %15202 = vst [vmem:[#allocation27_spill] sm:$0xff] %v12812_v10  ;;  %3493 = vmatmul.mubr.f32.vlgmr.msra.gmra.mxu0 %v12812_v10  ;;  %9949 = vmatmul.mubr.f32.vlgmr.msra.gmra.mxu1 %v12812_v10 }
 0xc3d   :  { %3645 = vmatpush1.msra.mxu0 %v12670_v4  ;;  %3708 = vmatprep.mubr.f32.mxu0 %v15090_v60 }
 0xc3e   :  { %3646 = vmatprep.subr.mxu0 %v12673_v8  ;;  %9983 = vmatprep.mubr.msk.f32.mxu1 %vm11221_vm0, %v15090_v60 }
 0xc3f   :  { %3647 = vmatpush1.msra.mxu0 %v12676_v17  ;;  %9952 = vmatpush3.msra.mxu1 %v12851_v25 }
 0xc40   :  { %3648 = vmatprep.subr.mxu0 %v12679_v18  ;;  %9953 = vmatprep.subr.mxu1 %v15090_v60 }
 0xc41   :  { %3649 = vmatpush1.msra.mxu0 %v12682_v7  ;;  %9954 = vmatpush3.msra.mxu1 %v12855_v50 }
 0xc42   :  { %3650 = vmatprep.subr.mxu0 %v12685_v29  ;;  %9955 = vmatprep.subr.mxu1 %v15090_v60 }
 0xc43   :  { %3651 = vmatpush1.msra.mxu0 %v12688_v30  ;;  %9956 = vmatpush3.msra.mxu1 %v12859_v56 }
 0xc44   :  { %3652 = vmatprep.subr.mxu0 %v12691_v31  ;;  %9957 = vmatprep.subr.mxu1 %v15090_v60 }
 0xc45   :  { %3653 = vmatpush1.msra.mxu0 %v12694_v40  ;;  %9958 = vmatpush3.msra.mxu1 %v12863_v1 }
 0xc46   :  { %3654 = vmatprep.subr.mxu0 %v12697_v22  ;;  %9959 = vmatprep.subr.mxu1 %v15090_v60 }
 0xc47   :  { %3655 = vmatpush1.msra.mxu0 %v12700_v35  ;;  %9960 = vmatpush3.msra.mxu1 %v12867_v42 }
 0xc48   :  { %3656 = vmatprep.subr.mxu0 %v12702_v34  ;;  %9961 = vmatprep.subr.mxu1 %v15090_v60 }
 0xc49   :  { %3657 = vmatpush1.msra.mxu0 %v12704_v38  ;;  %9962 = vmatpush3.msra.mxu1 %v12871_v24 }
 0xc4a   :  { %3658 = vmatprep.subr.mxu0 %v12709_v14  ;;  %9963 = vmatprep.subr.mxu1 %v15090_v60 }
 0xc4b   :  { %3659 = vmatpush1.msra.mxu0 %v12713_v15  ;;  %9964 = vmatpush3.msra.mxu1 %v12707_v62 }
 0xc4c   :  { %3660 = vmatprep.subr.mxu0 %v12719_v33  ;;  %9965 = vmatprep.subr.mxu1 %v15090_v60 }
 0xc4d   :  { %3661 = vmatpush1.msra.mxu0 %v12725_v39  ;;  %9966 = vmatpush3.msra.mxu1 %v12715_v36 }
 0xc4e   :  { %3662 = vmatprep.subr.mxu0 %v12729_v11  ;;  %9967 = vmatprep.subr.mxu1 %v15090_v60 }
 0xc4f   :  { %3663 = vmatpush1.msra.mxu0 %v12735_v37  ;;  %9968 = vmatpush3.msra.mxu1 %v12721_v43 }
 0xc50   :  { %3664 = vmatprep.subr.mxu0 %v12739_v3  ;;  %9969 = vmatprep.subr.mxu1 %v15090_v60 }
 0xc51   :  { %3665 = vmatpush1.msra.mxu0 %v12745_v23  ;;  %9970 = vmatpush3.msra.mxu1 %v12731_v16 }
 0xc52   :  { %3666 = vmatprep.subr.mxu0 %v12749_v12  ;;  %9971 = vmatprep.subr.mxu1 %v15090_v60 }
 0xc53   :  { %3667 = vmatpush1.msra.mxu0 %v12755_v26  ;;  %9972 = vmatpush3.msra.mxu1 %v12741_v54 }
 0xc54   :  { %3668 = vmatprep.subr.mxu0 %v12759_v9  ;;  %9973 = vmatprep.subr.mxu1 %v15090_v60 }
 0xc55   :  { %3669 = vmatpush1.msra.mxu0 %v12765_v5  ;;  %9974 = vmatpush3.msra.mxu1 %v12751_v0 }
 0xc56   :  { %3670 = vmatprep.subr.mxu0 %v12769_v19  ;;  %9975 = vmatprep.subr.mxu1 %v15090_v60 }
 0xc57   :  { %3671 = vmatpush1.msra.mxu0 %v12775_v49  ;;  %9976 = vmatpush3.msra.mxu1 %v12761_v44 }
 0xc58   :  { %3672 = vmatprep.subr.mxu0 %v12779_v51  ;;  %9977 = vmatprep.subr.mxu1 %v15090_v60 }
 0xc59   :  { %3673 = vmatpush1.msra.mxu0 %v12785_v53  ;;  %9978 = vmatpush3.msra.mxu1 %v12771_v20 }
 0xc5a   :  { %3674 = vmatprep.subr.mxu0 %v12789_v55  ;;  %9979 = vmatprep.subr.mxu1 %v15090_v60 }
 0xc5b   :  { %3675 = vmatpush1.msra.mxu0 %v12795_v58  ;;  %9980 = vmatpush3.msra.mxu1 %v12781_v52 }
 0xc5c   :  { %3860 = vmatprep.subr.mxu0 %v12667_v47  ;;  %9981 = vmatprep.subr.mxu1 %v15090_v60 }
 0xc5d   :  { %9982 = vmatpush3.msra.mxu1 %v12791_v57 }
 0xc5e   :  { %9986 = vmatprep.subr.mxu1 %v15090_v60 }
 0xcfc   :  { %v3494_v63 = vpop.f32.mrf.mxu0  ;;  %v3565_v2 = vpop.f32.mrf.mxu1 }
 0xcfd   :  { %v3569_v41 = vadd.f32 %v3494_v63, %v2351_v61  ;;  %v3583_v53 = vadd.f32 %v12484_v32, %v3565_v2  ;;  %v2460_v61 = vadd.f32 %v15206_v27, %v12488_v48  ;;  %v15207_v32 = vld [vmem:[#allocation25_spill] sm:$0xff]  ;;  %v15212_v27 = vld [vmem:[#allocation16_spill] sm:$0xff]  ;;  %v15213_v2 = vld [vmem:[#allocation39_spill] sm:$0xff] }
 0xcfe   :  { %v9950_v21 = vpop.f32.mrf.mxu1  ;;  %v3496_v46 = vpop.f32.mrf.mxu0 }
 0xcff   :  { %v8672_v45 = vmul.f32 -1.442695, %v3569_v41  ;;  %v3576_v47 = vadd.f32 %v3496_v46, %v2353_v28 }
 0xd01   :  { %10922 = vpow2.f32 %v8672_v45  ;;  %v8673_v58 = vmul.f32 -1.442695, %v3576_v47 }
 0xd03   :  { %10924 = vpow2.f32 %v8673_v58  ;;  %v15211_v58 = vld [vmem:[#allocation36_spill] sm:$0xff] }
 0xd0e   :  { %v10923_v55 = vpop.eup %10922 }
 0xd0f   :  { %v3573_v52 = vadd.f32 1.0, %v10923_v55 }
 0xd10   :  { %v10925_v57 = vpop.eup %10924 }
 0xd11   :  { %10926 = vrcp.f32 %v3573_v52  ;;  %v3580_v21 = vadd.f32 1.0, %v10925_v57  ;;  %v15208_v52 = vld [vmem:[#allocation29_spill] sm:$0xff]  ;;  %v15210_v57 = vld [vmem:[#allocation15_spill] sm:$0xff] }
 0xd1e   :  { %v10927_v59 = vpop.eup %10926 }
 0xd1f   :  { %v3584_v63 = vmul.f32 %v10927_v59, %v3583_v53  ;;  %v15209_v53 = vld [vmem:[#allocation26_spill] sm:$0xff]  ;;  %v2357_v59 = vadd.f32 %v15214_v6, %v15213_v2  ;;  %v12981_v6 = vld [vmem:[%s14925_s4 + $0x1] ss:$0 sm:$0xff] }
 0xd21   :  { %v3585_v41 = vadd.f32 %v3584_v63, %v2460_v61 }
 0xd23   :  { %10928 = vtanh.f32 %v3585_v41 }
 0xd24   :  { %10930 = vrcp.f32 %v3580_v21 }
 0xd30   :  { %v10929_v45 = vpop.eup %10928 }
 0xd31   :  { %v3587_v28 = vsub.f32 %v12812_v10, %v10929_v45  ;;  %v10931_v47 = vpop.eup %10930 }
 0xd33   :  { %v3588_v46 = vmul.f32 %v10931_v47, %v3587_v28  ;;  %v15215_v47 = vld [vmem:[#allocation41_spill] sm:$0xff] }
 0xd35   :  { %v12903_v55 = vadd.f32 %v10929_v45, %v3588_v46  ;;  %v2359_v46 = vadd.f32 %v15215_v47, %v12478_v13 }
 0xd37   :  { %3709 = vmatmul.mubr.f32.vlgmr.msra.gmra.mxu0 %v12903_v55  ;;  %9984 = vmatmul.mubr.f32.vlgmr.msra.gmra.mxu1 %v12903_v55 }
 0xd38   :  { %3861 = vmatpush1.msra.mxu0 %v12670_v4  ;;  %9987 = vmatpush3.msra.mxu1 %v12851_v25 }
 0xd39   :  { %3862 = vmatprep.subr.mxu0 %v12673_v8  ;;  %9988 = vmatprep.subr.mxu1 %v15090_v60 }
 0xd3a   :  { %3863 = vmatpush1.msra.mxu0 %v12676_v17  ;;  %9989 = vmatpush3.msra.mxu1 %v12855_v50 }
 0xd3b   :  { %3864 = vmatprep.subr.mxu0 %v12679_v18  ;;  %9990 = vmatprep.subr.mxu1 %v15090_v60 }
 0xd3c   :  { %3865 = vmatpush1.msra.mxu0 %v12682_v7  ;;  %9991 = vmatpush3.msra.mxu1 %v12859_v56 }
 0xd3d   :  { %3866 = vmatprep.subr.mxu0 %v12685_v29  ;;  %9992 = vmatprep.subr.mxu1 %v15090_v60 }
 0xd3e   :  { %3867 = vmatpush1.msra.mxu0 %v12688_v30  ;;  %9993 = vmatpush3.msra.mxu1 %v12863_v1 }
 0xd3f   :  { %3868 = vmatprep.subr.mxu0 %v12691_v31  ;;  %9994 = vmatprep.subr.mxu1 %v15090_v60 }
 0xd40   :  { %3869 = vmatpush1.msra.mxu0 %v12694_v40  ;;  %9995 = vmatpush3.msra.mxu1 %v12867_v42 }
 0xd41   :  { %3870 = vmatprep.subr.mxu0 %v12697_v22  ;;  %9996 = vmatprep.subr.mxu1 %v15090_v60 }
 0xd42   :  { %3871 = vmatpush1.msra.mxu0 %v12700_v35  ;;  %9997 = vmatpush3.msra.mxu1 %v12871_v24 }
 0xd43   :  { %3872 = vmatprep.subr.mxu0 %v12702_v34  ;;  %9998 = vmatprep.subr.mxu1 %v15090_v60 }
 0xd44   :  { %3873 = vmatpush1.msra.mxu0 %v12704_v38  ;;  %9999 = vmatpush3.msra.mxu1 %v12707_v62 }
 0xd45   :  { %3874 = vmatprep.subr.mxu0 %v12709_v14  ;;  %10000 = vmatprep.subr.mxu1 %v15090_v60 }
 0xd46   :  { %3875 = vmatpush1.msra.mxu0 %v12713_v15  ;;  %10001 = vmatpush3.msra.mxu1 %v12715_v36 }
 0xd47   :  { %3876 = vmatprep.subr.mxu0 %v12719_v33  ;;  %10002 = vmatprep.subr.mxu1 %v15090_v60 }
 0xd48   :  { %3877 = vmatpush1.msra.mxu0 %v12725_v39  ;;  %10003 = vmatpush3.msra.mxu1 %v12721_v43 }
 0xd49   :  { %3878 = vmatprep.subr.mxu0 %v12729_v11  ;;  %10004 = vmatprep.subr.mxu1 %v15090_v60 }
 0xd4a   :  { %3879 = vmatpush1.msra.mxu0 %v12735_v37  ;;  %10005 = vmatpush3.msra.mxu1 %v12731_v16 }
 0xd4b   :  { %3880 = vmatprep.subr.mxu0 %v12739_v3  ;;  %10006 = vmatprep.subr.mxu1 %v15090_v60 }
 0xd4c   :  { %3881 = vmatpush1.msra.mxu0 %v12745_v23  ;;  %10007 = vmatpush3.msra.mxu1 %v12741_v54 }
 0xd4d   :  { %3882 = vmatprep.subr.mxu0 %v12749_v12  ;;  %10008 = vmatprep.subr.mxu1 %v15090_v60 }
 0xd4e   :  { %3883 = vmatpush1.msra.mxu0 %v12755_v26  ;;  %10009 = vmatpush3.msra.mxu1 %v12751_v0 }
 0xd4f   :  { %3884 = vmatprep.subr.mxu0 %v12759_v9  ;;  %10010 = vmatprep.subr.mxu1 %v15090_v60 }
 0xd50   :  { %3885 = vmatpush1.msra.mxu0 %v12765_v5  ;;  %10011 = vmatpush3.msra.mxu1 %v12761_v44 }
 0xd51   :  { %3886 = vmatprep.subr.mxu0 %v12769_v19  ;;  %10012 = vmatprep.subr.mxu1 %v15090_v60 }
 0xd52   :  { %3887 = vmatpush1.msra.mxu0 %v12775_v49  ;;  %10013 = vmatpush3.msra.mxu1 %v12771_v20 }
 0xd53   :  { %3888 = vmatprep.subr.mxu0 %v12779_v51  ;;  %10014 = vmatprep.subr.mxu1 %v15090_v60 }
 0xd54   :  { %3889 = vmatpush1.msra.mxu0 %v15207_v32  ;;  %10015 = vmatpush3.msra.mxu1 %v15208_v52 }
 0xd55   :  { %3890 = vmatprep.subr.mxu0 %v15209_v53  ;;  %10016 = vmatprep.subr.mxu1 %v15090_v60 }
 0xd56   :  { %3891 = vmatpush1.msra.mxu0 %v15210_v57  ;;  %3924 = vmatprep.mubr.f32.mxu0 %v15090_v60 }
 0xd57   :  { %10017 = vmatpush3.msra.mxu1 %v15211_v58  ;;  %10018 = vmatprep.mubr.msk.f32.mxu1 %vm11221_vm0, %v15090_v60 }
 0xd58   :  { %4076 = vmatprep.subr.mxu0 %v15212_v27  ;;  %10021 = vmatprep.subr.mxu1 %v15090_v60 }
 0xdf7   :  { %v3710_v61 = vpop.f32.mrf.mxu0  ;;  %v3781_v63 = vpop.f32.mrf.mxu1 }
 0xdf8   :  { %v3785_v41 = vadd.f32 %v3710_v61, %v2357_v59  ;;  %v3799_v59 = vadd.f32 %v12981_v6, %v3781_v63  ;;  %v4284_v63 = vld [vmem:[#allocation5 + $0x418] sm:$0xff] }
 0xdf9   :  { %v9985_v21 = vpop.f32.mrf.mxu1  ;;  %v3712_v28 = vpop.f32.mrf.mxu0 }
 0xdfa   :  { %v8674_v45 = vmul.f32 -1.442695, %v3785_v41  ;;  %v3792_v10 = vadd.f32 %v3712_v28, %v2359_v46  ;;  %v15216_v41 = vld [vmem:[#allocation17_spill] sm:$0xff] }
 0xdfb   :  { %v2465_v21 = vadd.f32 %v15216_v41, %v12488_v48  ;;  %v4279_v41 = vld [vmem:[#allocation5 + $0x3f0] sm:$0xff] }
 0xdfc   :  { %10932 = vpow2.f32 %v8674_v45  ;;  %v8675_v58 = vmul.f32 -1.442695, %v3792_v10 }
 0xdfe   :  { %10934 = vpow2.f32 %v8675_v58 }
 0xe09   :  { %v10933_v57 = vpop.eup %10932 }
 0xe0a   :  { %v3789_v53 = vadd.f32 1.0, %v10933_v57 }
 0xe0b   :  { %v10935_v27 = vpop.eup %10934 }
 0xe0c   :  { %10936 = vrcp.f32 %v3789_v53  ;;  %v3796_v28 = vadd.f32 1.0, %v10935_v27  ;;  %v4282_v27 = vld [vmem:[#allocation5 + $0x408] sm:$0xff] }
 0xe19   :  { %v10937_v61 = vpop.eup %10936 }
 0xe1a   :  { %v3800_v45 = vmul.f32 %v10937_v61, %v3799_v59  ;;  %v4280_v59 = vld [vmem:[#allocation5 + $0x3f8] sm:$0xff]  ;;  %v4281_v61 = vld [vmem:[#allocation5 + $0x400] sm:$0xff] }
 0xe1c   :  { %v3801_v47 = vadd.f32 %v3800_v45, %v2465_v21  ;;  %v4277_v21 = vld [vmem:[#allocation5 + $0x3e0] sm:$0xff]  ;;  %v4278_v45 = vld [vmem:[#allocation5 + $0x3e8] sm:$0xff] }
 0xe1e   :  { %10938 = vtanh.f32 %v3801_v47  ;;  %v4276_v47 = vld [vmem:[#allocation5 + $0x3d8] sm:$0xff] }
 0xe1f   :  { %10940 = vrcp.f32 %v3796_v28  ;;  %v4274_v28 = vld [vmem:[#allocation5 + $0x3c8] sm:$0xff] }
 0xe2b   :  { %v10939_v10 = vpop.eup %10938 }
 0xe2c   :  { %v3803_v53 = vsub.f32 %v12903_v55, %v10939_v10  ;;  %v10941_v57 = vpop.eup %10940 }
 0xe2e   :  { %v3804_v58 = vmul.f32 %v10941_v57, %v3803_v53  ;;  %v4273_v53 = vld [vmem:[#allocation5 + $0x3c0] sm:$0xff]  ;;  %v4271_v57 = vld [vmem:[#allocation5 + $0x3b0] sm:$0xff] }
 0xe30   :  { %v12987_v46 = vadd.f32 %v10939_v10, %v3804_v58  ;;  %v4275_v10 = vld [vmem:[#allocation5 + $0x3d0] sm:$0xff]  ;;  %v4272_v58 = vld [vmem:[#allocation5 + $0x3b8] sm:$0xff] }
 0xe32   :  { %3925 = vmatmul.mubr.f32.vlgmr.msra.gmra.mxu0 %v12987_v46  ;;  %10019 = vmatmul.mubr.f32.vlgmr.msra.gmra.mxu1 %v12987_v46 }
 0xe33   :  { %4077 = vmatpush1.msra.mxu0 %v12670_v4  ;;  %10022 = vmatpush3.msra.mxu1 %v12851_v25  ;;  %v15217_v4 = vld [vmem:[#allocation26_spill] sm:$0xff]  ;;  %v4289_v25 = vld [vmem:[#allocation5 + $0x440] sm:$0xff] }
 0xe34   :  { %4078 = vmatprep.subr.mxu0 %v12673_v8  ;;  %10023 = vmatprep.subr.mxu1 %v15090_v60  ;;  %v15218_v8 = vld [vmem:[#allocation15_spill] sm:$0xff] }
 0xe35   :  { %4079 = vmatpush1.msra.mxu0 %v12676_v17  ;;  %10024 = vmatpush3.msra.mxu1 %v12855_v50  ;;  %v15219_v17 = vld [vmem:[#allocation36_spill] sm:$0xff] }
 0xe36   :  { %4080 = vmatprep.subr.mxu0 %v12679_v18  ;;  %10025 = vmatprep.subr.mxu1 %v15090_v60  ;;  %v4295_v18 = vld [vmem:[#allocation5 + $0x470] sm:$0xff]  ;;  %v4290_v50 = vld [vmem:[#allocation5 + $0x448] sm:$0xff] }
 0xe37   :  { %4081 = vmatpush1.msra.mxu0 %v12682_v7  ;;  %10026 = vmatpush3.msra.mxu1 %v12859_v56  ;;  %v4296_v7 = vld [vmem:[#allocation5 + $0x478] sm:$0xff] }
 0xe38   :  { %4082 = vmatprep.subr.mxu0 %v12685_v29  ;;  %10027 = vmatprep.subr.mxu1 %v15090_v60  ;;  %v15220_v29 = vld [vmem:[#allocation21_spill] sm:$0xff]  ;;  %v4288_v56 = vld [vmem:[#allocation5 + $0x438] sm:$0xff] }
 0xe39   :  { %4083 = vmatpush1.msra.mxu0 %v12688_v30  ;;  %10028 = vmatpush3.msra.mxu1 %v12863_v1  ;;  %v2363_v30 = vadd.f32 %v15220_v29, %v15213_v2  ;;  %v15223_v1 = vld [vmem:[#allocation46_spill] sm:$0xff]  ;;  %v4266_v29 = vld [vmem:[#allocation5 + $0x388] sm:$0xff] }
 0xe3a   :  { %4084 = vmatprep.subr.mxu0 %v12691_v31  ;;  %10029 = vmatprep.subr.mxu1 %v15090_v60 }
 0xe3b   :  { %4085 = vmatpush1.msra.mxu0 %v12694_v40  ;;  %10030 = vmatpush3.msra.mxu1 %v12867_v42  ;;  %v4286_v42 = vld [vmem:[#allocation5 + $0x428] sm:$0xff] }
 0xe3c   :  { %4086 = vmatprep.subr.mxu0 %v12697_v22  ;;  %10031 = vmatprep.subr.mxu1 %v15090_v60 }
 0xe3d   :  { %4087 = vmatpush1.msra.mxu0 %v12700_v35  ;;  %10032 = vmatpush3.msra.mxu1 %v12871_v24  ;;  %v4287_v24 = vld [vmem:[#allocation5 + $0x430] sm:$0xff] }
 0xe3e   :  { %4088 = vmatprep.subr.mxu0 %v12702_v34  ;;  %10033 = vmatprep.subr.mxu1 %v15090_v60 }
 0xe3f   :  { %4089 = vmatpush1.msra.mxu0 %v12704_v38  ;;  %10034 = vmatpush3.msra.mxu1 %v12707_v62  ;;  %v15221_v62 = vld [vmem:[#allocation34_spill] sm:$0xff] }
 0xe40   :  { %4090 = vmatprep.subr.mxu0 %v12709_v14  ;;  %10035 = vmatprep.subr.mxu1 %v15090_v60  ;;  %v2365_v14 = vadd.f32 %v15221_v62, %v12478_v13  ;;  %v4256_v62 = vld [vmem:[#allocation5 + $0x338] sm:$0xff] }
 0xe41   :  { %4091 = vmatpush1.msra.mxu0 %v12713_v15  ;;  %10036 = vmatpush3.msra.mxu1 %v12715_v36 }
 0xe42   :  { %4092 = vmatprep.subr.mxu0 %v12719_v33  ;;  %10037 = vmatprep.subr.mxu1 %v15090_v60 }
 0xe43   :  { %4093 = vmatpush1.msra.mxu0 %v12725_v39  ;;  %10038 = vmatpush3.msra.mxu1 %v12721_v43 }
 0xe44   :  { %4094 = vmatprep.subr.mxu0 %v12729_v11  ;;  %10039 = vmatprep.subr.mxu1 %v15090_v60 }
 0xe45   :  { %4095 = vmatpush1.msra.mxu0 %v12735_v37  ;;  %10040 = vmatpush3.msra.mxu1 %v12731_v16  ;;  %v15222_v37 = vld [vmem:[#allocation45_spill] sm:$0xff] }
 0xe46   :  { %4096 = vmatprep.subr.mxu0 %v12739_v3  ;;  %10041 = vmatprep.subr.mxu1 %v15090_v60  ;;  %v2470_v3 = vadd.f32 %v15222_v37, %v12488_v48  ;;  %v15224_v37 = vld [vmem:[#allocation24_spill] sm:$0xff] }
 0xe47   :  { %4097 = vmatpush1.msra.mxu0 %v12745_v23  ;;  %10042 = vmatpush3.msra.mxu1 %v12741_v54 }
 0xe48   :  { %4098 = vmatprep.subr.mxu0 %v12749_v12  ;;  %10043 = vmatprep.subr.mxu1 %v15090_v60 }
 0xe49   :  { %4099 = vmatpush1.msra.mxu0 %v12755_v26  ;;  %10044 = vmatpush3.msra.mxu1 %v12751_v0 }
 0xe4a   :  { %4100 = vmatprep.subr.mxu0 %v12759_v9  ;;  %10045 = vmatprep.subr.mxu1 %v15090_v60 }
 0xe4b   :  { %4101 = vmatpush1.msra.mxu0 %v12765_v5  ;;  %10046 = vmatpush3.msra.mxu1 %v12761_v44 }
 0xe4c   :  { %4102 = vmatprep.subr.mxu0 %v12769_v19  ;;  %10047 = vmatprep.subr.mxu1 %v15090_v60  ;;  %v4294_v19 = vld [vmem:[#allocation5 + $0x468] sm:$0xff] }
 0xe4d   :  { %4103 = vmatpush1.msra.mxu0 %v12775_v49  ;;  %10048 = vmatpush3.msra.mxu1 %v12771_v20  ;;  %v4292_v20 = vld [vmem:[#allocation5 + $0x458] sm:$0xff]  ;;  %v4293_v49 = vld [vmem:[#allocation5 + $0x460] sm:$0xff] }
 0xe4e   :  { %4104 = vmatprep.subr.mxu0 %v12779_v51  ;;  %10049 = vmatprep.subr.mxu1 %v15090_v60  ;;  %v4291_v51 = vld [vmem:[#allocation5 + $0x450] sm:$0xff] }
 0xe4f   :  { %4105 = vmatpush1.msra.mxu0 %v15207_v32  ;;  %10050 = vmatpush3.msra.mxu1 %v15208_v52  ;;  %v4285_v32 = vld [vmem:[#allocation5 + $0x420] sm:$0xff]  ;;  %v4283_v52 = vld [vmem:[#allocation5 + $0x410] sm:$0xff] }
 0xe50   :  { %4106 = vmatprep.subr.mxu0 %v15217_v4  ;;  %10051 = vmatprep.subr.mxu1 %v15090_v60  ;;  %v4270_v4 = vld [vmem:[#allocation5 + $0x3a8] sm:$0xff] }
 0xe51   :  { %4107 = vmatpush1.msra.mxu0 %v15218_v8  ;;  %10052 = vmatpush3.msra.mxu1 %v15219_v17  ;;  %v4268_v8 = vld [vmem:[#allocation5 + $0x398] sm:$0xff]  ;;  %v4269_v17 = vld [vmem:[#allocation5 + $0x3a0] sm:$0xff] }
 0xe52   :  { %4140 = vmatprep.mubr.f32.mxu0 %v15090_v60  ;;  %10053 = vmatprep.mubr.msk.f32.mxu1 %vm11221_vm0, %v15090_v60 }
 0xe53   :  { %4315 = vmatprep.subr.mxu0 %v4295_v18  ;;  %10056 = vmatprep.subr.mxu1 %v4296_v7  ;;  %v4267_v18 = vld [vmem:[#allocation5 + $0x390] sm:$0xff] }
 0xef2   :  { %v3926_v31 = vpop.f32.mrf.mxu0  ;;  %v3997_v40 = vpop.f32.mrf.mxu1 }
 0xef3   :  { %v4001_v22 = vadd.f32 %v3926_v31, %v2363_v30  ;;  %v4015_v11 = vadd.f32 %v12981_v6, %v3997_v40  ;;  %v4264_v30 = vld [vmem:[#allocation5 + $0x378] sm:$0xff]  ;;  %v4262_v31 = vld [vmem:[#allocation5 + $0x368] sm:$0xff]  ;;  %v4263_v40 = vld [vmem:[#allocation5 + $0x370] sm:$0xff] }
 0xef4   :  { %v10020_v35 = vpop.f32.mrf.mxu1  ;;  %v3928_v38 = vpop.f32.mrf.mxu0 }
 0xef5   :  { %v8676_v34 = vmul.f32 -1.442695, %v4001_v22  ;;  %v4008_v15 = vadd.f32 %v3928_v38, %v2365_v14  ;;  %v4261_v22 = vld [vmem:[#allocation5 + $0x360] sm:$0xff]  ;;  %v4259_v35 = vld [vmem:[#allocation5 + $0x350] sm:$0xff]  ;;  %v4258_v38 = vld [vmem:[#allocation5 + $0x348] sm:$0xff] }
 0xef6   :  { %v4257_v14 = vld [vmem:[#allocation5 + $0x340] sm:$0xff] }
 0xef7   :  { %10942 = vpow2.f32 %v8676_v34  ;;  %v8677_v36 = vmul.f32 -1.442695, %v4008_v15  ;;  %v4260_v34 = vld [vmem:[#allocation5 + $0x358] sm:$0xff]  ;;  %v4255_v15 = vld [vmem:[#allocation5 + $0x330] sm:$0xff] }
 0xef9   :  { %10944 = vpow2.f32 %v8677_v36  ;;  %v4253_v36 = vld [vmem:[#allocation5 + $0x320] sm:$0xff] }
 0xf04   :  { %v10943_v33 = vpop.eup %10942 }
 0xf05   :  { %v4005_v43 = vadd.f32 1.0, %v10943_v33  ;;  %v4254_v33 = vld [vmem:[#allocation5 + $0x328] sm:$0xff] }
 0xf06   :  { %v10945_v39 = vpop.eup %10944 }
 0xf07   :  { %10946 = vrcp.f32 %v4005_v43  ;;  %v4012_v12 = vadd.f32 1.0, %v10945_v39  ;;  %v4252_v43 = vld [vmem:[#allocation5 + $0x318] sm:$0xff]  ;;  %v4250_v39 = vld [vmem:[#allocation5 + $0x308] sm:$0xff] }
 0xf14   :  { %v10947_v16 = vpop.eup %10946 }
 0xf15   :  { %v4016_v54 = vmul.f32 %v10947_v16, %v4015_v11  ;;  %v4251_v11 = vld [vmem:[#allocation5 + $0x310] sm:$0xff]  ;;  %v4249_v16 = vld [vmem:[#allocation5 + $0x300] sm:$0xff] }
 0xf17   :  { %v4017_v23 = vadd.f32 %v4016_v54, %v2470_v3  ;;  %v15225_v3 = vld [vmem:[#allocation38_spill] sm:$0xff]  ;;  %v15226_v54 = vld [vmem:[#allocation27_spill] sm:$0xff] }
 0xf19   :  { %10948 = vtanh.f32 %v4017_v23  ;;  %v13091_v23 = vld [vmem:[#allocation7 + $0x470] sm:$0xff] }
 0xf1a   :  { %10950 = vrcp.f32 %v4012_v12  ;;  %15227 = vst [vmem:[#allocation22_spill] sm:$0xff] %v13091_v23  ;;  %v13094_v12 = vld [vmem:[#allocation7 + $0x468] sm:$0xff] }
 0xf26   :  { %v10949_v0 = vpop.eup %10948 }
 0xf27   :  { %v4019_v26 = vsub.f32 %v12987_v46, %v10949_v0  ;;  %v10951_v9 = vpop.eup %10950 }
 0xf29   :  { %v4020_v44 = vmul.f32 %v10951_v9, %v4019_v26  ;;  %v13106_v26 = vld [vmem:[#allocation7 + $0x438] sm:$0xff]  ;;  %v13109_v9 = vld [vmem:[#allocation7 + $0x428] sm:$0xff] }
 0xf2b   :  { %v13064_v5 = vadd.f32 %v10949_v0, %v4020_v44  ;;  %v13097_v0 = vld [vmem:[#allocation7 + $0x458] sm:$0xff]  ;;  %v13112_v44 = vld [vmem:[#allocation7 + $0x420] sm:$0xff] }
 0xf2d   :  { %4141 = vmatmul.mubr.f32.vlgmr.msra.gmra.mxu0 %v13064_v5  ;;  %10054 = vmatmul.mubr.f32.vlgmr.msra.gmra.mxu1 %v13064_v5 }
 0xf2e   :  { %4316 = vmatpush1.msra.mxu0 %v4294_v19  ;;  %10057 = vmatpush3.msra.mxu1 %v4296_v7  ;;  %v4265_v7 = vld [vmem:[#allocation5 + $0x380] sm:$0xff]  ;;  %v13115_v19 = vld [vmem:[#allocation7 + $0x410] sm:$0xff] }
 0xf2f   :  { %4317 = vmatprep.subr.mxu0 %v4292_v20  ;;  %10058 = vmatprep.subr.mxu1 %v4293_v49  ;;  %v13118_v20 = vld [vmem:[#allocation7 + $0x408] sm:$0xff] }
 0xf30   :  { %10088 = vmatprep.mubr.f32.mxu1 %v15223_v1  ;;  %4318 = vmatpush1.msra.mxu0 %v4291_v51  ;;  %v13124_v51 = vld [vmem:[#allocation7 + $0x3f0] sm:$0xff] }
 0xf31   :  { %10059 = vmatpush3.msra.mxu1 %v4293_v49  ;;  %4319 = vmatprep.subr.mxu0 %v4289_v25  ;;  %v13121_v49 = vld [vmem:[#allocation7 + $0x3f8] sm:$0xff]  ;;  %v13127_v25 = vld [vmem:[#allocation7 + $0x3e0] sm:$0xff] }
 0xf32   :  { %10060 = vmatprep.subr.mxu1 %v4290_v50  ;;  %4320 = vmatpush1.msra.mxu0 %v4288_v56  ;;  %v13133_v56 = vld [vmem:[#allocation7 + $0x3c8] sm:$0xff] }
 0xf33   :  { %10061 = vmatpush3.msra.mxu1 %v4290_v50  ;;  %4321 = vmatprep.subr.mxu0 %v4286_v42  ;;  %v13130_v50 = vld [vmem:[#allocation7 + $0x3d8] sm:$0xff]  ;;  %v13139_v42 = vld [vmem:[#allocation7 + $0x3b0] sm:$0xff] }
 0xf34   :  { %10062 = vmatprep.subr.mxu1 %v4287_v24  ;;  %4322 = vmatpush1.msra.mxu0 %v4285_v32  ;;  %v13145_v32 = vld [vmem:[#allocation7 + $0x398] sm:$0xff] }
 0xf35   :  { %10063 = vmatpush3.msra.mxu1 %v4287_v24  ;;  %4323 = vmatprep.subr.mxu0 %v4283_v52  ;;  %v13142_v24 = vld [vmem:[#allocation7 + $0x3a8] sm:$0xff]  ;;  %v13148_v52 = vld [vmem:[#allocation7 + $0x390] sm:$0xff] }
 0xf36   :  { %10064 = vmatprep.subr.mxu1 %v4284_v63  ;;  %4324 = vmatpush1.msra.mxu0 %v4282_v27  ;;  %v13154_v27 = vld [vmem:[#allocation7 + $0x378] sm:$0xff] }
 0xf37   :  { %10065 = vmatpush3.msra.mxu1 %v4284_v63  ;;  %4325 = vmatprep.subr.mxu0 %v4280_v59  ;;  %v13151_v63 = vld [vmem:[#allocation7 + $0x380] sm:$0xff]  ;;  %v13157_v59 = vld [vmem:[#allocation7 + $0x368] sm:$0xff] }
 0xf38   :  { %10066 = vmatprep.subr.mxu1 %v4281_v61  ;;  %4326 = vmatpush1.msra.mxu0 %v4279_v41  ;;  %v13163_v41 = vld [vmem:[#allocation7 + $0x350] sm:$0xff] }
 0xf39   :  { %10067 = vmatpush3.msra.mxu1 %v4281_v61  ;;  %4327 = vmatprep.subr.mxu0 %v4277_v21  ;;  %v13160_v61 = vld [vmem:[#allocation7 + $0x360] sm:$0xff]  ;;  %v13166_v21 = vld [vmem:[#allocation7 + $0x348] sm:$0xff] }
 0xf3a   :  { %10068 = vmatprep.subr.mxu1 %v4278_v45  ;;  %4328 = vmatpush1.msra.mxu0 %v4276_v47  ;;  %v13172_v47 = vld [vmem:[#allocation7 + $0x330] sm:$0xff] }
 0xf3b   :  { %10069 = vmatpush3.msra.mxu1 %v4278_v45  ;;  %4329 = vmatprep.subr.mxu0 %v4274_v28  ;;  %v13169_v45 = vld [vmem:[#allocation7 + $0x338] sm:$0xff]  ;;  %v13175_v28 = vld [vmem:[#allocation7 + $0x320] sm:$0xff] }
 0xf3c   :  { %10070 = vmatprep.subr.mxu1 %v4275_v10  ;;  %4330 = vmatpush1.msra.mxu0 %v4273_v53  ;;  %v13179_v53 = vld [vmem:[#allocation7 + $0x308] sm:$0xff] }
 0xf3d   :  { %10071 = vmatpush3.msra.mxu1 %v4275_v10  ;;  %4331 = vmatprep.subr.mxu0 %v4271_v57  ;;  %v13177_v10 = vld [vmem:[#allocation7 + $0x318] sm:$0xff]  ;;  %15229 = vst [vmem:[#allocation40_spill] sm:$0xff] %v13179_v53  ;;  %v13182_v57 = vld [vmem:[#allocation7 + $0x300] sm:$0xff] }
 0xf3e   :  { %10072 = vmatprep.subr.mxu1 %v4272_v58  ;;  %4332 = vmatpush1.msra.mxu0 %v4270_v4  ;;  %15228 = vst [vmem:[#allocation18_spill] sm:$0xff] %v13177_v10  ;;  %15230 = vst [vmem:[#allocation20_spill] sm:$0xff] %v13182_v57  ;;  %v13188_v4 = vld [vmem:[#allocation7 + $0x460] sm:$0xff] }
 0xf3f   :  { %10073 = vmatpush3.msra.mxu1 %v4272_v58  ;;  %4333 = vmatprep.subr.mxu0 %v4268_v8  ;;  %v13186_v58 = vld [vmem:[#allocation7 + $0x478] sm:$0xff]  ;;  %v13193_v8 = vld [vmem:[#allocation7 + $0x448] sm:$0xff] }
 0xf40   :  { %10074 = vmatprep.subr.mxu1 %v4269_v17  ;;  %4334 = vmatpush1.msra.mxu0 %v4267_v18  ;;  %v13202_v18 = vld [vmem:[#allocation7 + $0x418] sm:$0xff] }
 0xf41   :  { %10075 = vmatpush3.msra.mxu1 %v4269_v17  ;;  %4335 = vmatprep.subr.mxu0 %v4265_v7  ;;  %v13198_v17 = vld [vmem:[#allocation7 + $0x430] sm:$0xff]  ;;  %v13206_v7 = vld [vmem:[#allocation7 + $0x400] sm:$0xff] }
 0xf42   :  { %10076 = vmatprep.subr.mxu1 %v4266_v29  ;;  %4336 = vmatpush1.msra.mxu0 %v4264_v30  ;;  %v13214_v30 = vld [vmem:[#allocation7 + $0x3d0] sm:$0xff] }
 0xf43   :  { %10077 = vmatpush3.msra.mxu1 %v4266_v29  ;;  %4337 = vmatprep.subr.mxu0 %v4262_v31  ;;  %v13210_v29 = vld [vmem:[#allocation7 + $0x3e8] sm:$0xff]  ;;  %v13218_v31 = vld [vmem:[#allocation7 + $0x3b8] sm:$0xff] }
 0xf44   :  { %10078 = vmatprep.subr.mxu1 %v4263_v40  ;;  %4338 = vmatpush1.msra.mxu0 %v4261_v22  ;;  %v13226_v22 = vld [vmem:[#allocation7 + $0x388] sm:$0xff] }
 0xf45   :  { %10079 = vmatpush3.msra.mxu1 %v4263_v40  ;;  %4339 = vmatprep.subr.mxu0 %v4259_v35  ;;  %v13222_v40 = vld [vmem:[#allocation7 + $0x3a0] sm:$0xff]  ;;  %v13230_v35 = vld [vmem:[#allocation7 + $0x370] sm:$0xff] }
 0xf46   :  { %10080 = vmatprep.subr.mxu1 %v4260_v34  ;;  %4340 = vmatpush1.msra.mxu0 %v4258_v38  ;;  %v13238_v38 = vld [vmem:[#allocation7 + $0x340] sm:$0xff] }
 0xf47   :  { %10081 = vmatpush3.msra.mxu1 %v4260_v34  ;;  %4341 = vmatprep.subr.mxu0 %v4256_v62  ;;  %v13234_v34 = vld [vmem:[#allocation7 + $0x358] sm:$0xff]  ;;  %v13242_v62 = vld [vmem:[#allocation7 + $0x328] sm:$0xff] }
 0xf48   :  { %10082 = vmatprep.subr.mxu1 %v4257_v14  ;;  %4342 = vmatpush1.msra.mxu0 %v4255_v15  ;;  %15231 = vst [vmem:[#allocation23_spill] sm:$0xff] %v13242_v62  ;;  %v15233_v15 = vld [vmem:[#allocation42_spill] sm:$0xff] }
 0xf49   :  { %10083 = vmatpush3.msra.mxu1 %v4257_v14  ;;  %4343 = vmatprep.subr.mxu0 %v4253_v36  ;;  %v13246_v14 = vld [vmem:[#allocation7 + $0x310] sm:$0xff]  ;;  %v2369_v36 = vadd.f32 %v15233_v15, %v15213_v2  ;;  %v15235_v15 = vld [vmem:[#allocation43_spill] sm:$0xff] }
 0xf4a   :  { %10084 = vmatprep.subr.mxu1 %v4254_v33  ;;  %4344 = vmatpush1.msra.mxu0 %v4252_v43  ;;  %15232 = vst [vmem:[#allocation31_spill] sm:$0xff] %v13246_v14 }
 0xf4b   :  { %10085 = vmatpush3.msra.mxu1 %v4254_v33  ;;  %4345 = vmatprep.subr.mxu0 %v4250_v39 }
 0xf4c   :  { %10086 = vmatprep.subr.mxu1 %v4251_v11  ;;  %4346 = vmatpush1.msra.mxu0 %v4249_v16 }
 0xf4d   :  { %4379 = vmatprep.mubr.f32.mxu0 %v15090_v60  ;;  %10087 = vmatpush3.msra.mxu1 %v4251_v11 }
 0xf4e   :  { %4380 = vmatmul.mubr.f32.vlgmr.msra.gmra.mxu0 %v15223_v1  ;;  %10089 = vmatmul.mubr.f32.vlgmr.msra.gmra.mxu1 %v15224_v37  ;;  %v13136_v1 = vld [vmem:[#allocation7 + $0x3c0] sm:$0xff] }
 0xf4f   :  { %10091 = vmatprep.mubr.f32.mxu1 %v15225_v3  ;;  %4385 = vmatprep.mubr.f32.mxu0 %v15090_v60 }
 0xf50   :  { %10100 = vmatprep.subr.mxu1 %v15090_v60  ;;  %4619 = vmatprep.subr.mxu0 %v13091_v23 }
 0xf51   :  { %4620 = vmatpush1.msra.mxu0 %v13094_v12  ;;  %10101 = vmatpush3.msra.mxu1 %v13186_v58 }
 0xf52   :  { %4386 = vmatmul.mubr.f32.gmra.mxu0 %v15224_v37  ;;  %10092 = vmatmul.mubr.f32.gmra.mxu1 %v15226_v54 }
 0xf53   :  { %10094 = vmatprep.mubr.f32.mxu1 %v12903_v55  ;;  %4391 = vmatprep.mubr.f32.mxu0 %v15090_v60 }
 0xf54   :  { %4621 = vmatprep.subr.mxu0 %v13097_v0  ;;  %10102 = vmatprep.subr.mxu1 %v15090_v60 }
 0xf55   :  { %10103 = vmatpush3.msra.mxu1 %v13188_v4 }
 0xf56   :  { %4392 = vmatmul.mubr.f32.gmra.mxu0 %v15225_v3  ;;  %10095 = vmatmul.mubr.f32.gmra.mxu1 %v12987_v46  ;;  %v15234_v3 = vld [vmem:[#allocation44_spill] sm:$0xff] }
 0xf57   :  { %10097 = vmatprep.mubr.f32.mxu1 %v13064_v5  ;;  %4397 = vmatprep.mubr.f32.mxu0 %v15090_v60 }
 0xf58   :  { %10104 = vmatprep.subr.mxu1 %v15090_v60 }
 0xf59   :  { %10105 = vmatpush3.msra.mxu1 %v13193_v8 }
 0xf5a   :  { %4398 = vmatmul.mubr.f32.gmra.mxu0 %v15226_v54  ;;  %10106 = vmatprep.subr.mxu1 %v15090_v60  ;;  %v2371_v54 = vadd.f32 %v15234_v3, %v12478_v13 }
 0xf5b   :  { %4403 = vmatprep.mubr.f32.mxu0 %v15090_v60  ;;  %10107 = vmatpush3.msra.mxu1 %v13198_v17 }
 0xf5c   :  { %10108 = vmatprep.subr.mxu1 %v15090_v60 }
 0xf5d   :  { %10109 = vmatpush3.msra.mxu1 %v13202_v18 }
 0xf5e   :  { %4404 = vmatmul.mubr.f32.gmra.mxu0 %v12903_v55  ;;  %v13100_v55 = vld [vmem:[#allocation7 + $0x450] sm:$0xff]  ;;  %10110 = vmatprep.subr.mxu1 %v15090_v60 }
 0xf5f   :  { %4409 = vmatprep.mubr.f32.mxu0 %v15090_v60  ;;  %4622 = vmatpush1.msra.mxu0 %v13100_v55 }
 0xf60   :  { %10111 = vmatpush3.msra.mxu1 %v13206_v7 }
 0xf61   :  { %10112 = vmatprep.subr.mxu1 %v15090_v60 }
 0xf62   :  { %4410 = vmatmul.mubr.f32.gmra.mxu0 %v12987_v46  ;;  %v13103_v46 = vld [vmem:[#allocation7 + $0x440] sm:$0xff]  ;;  %10113 = vmatpush3.msra.mxu1 %v13210_v29 }
 0xf63   :  { %4415 = vmatprep.mubr.f32.mxu0 %v15090_v60  ;;  %4623 = vmatprep.subr.mxu0 %v13103_v46 }
 0xf64   :  { %4624 = vmatpush1.msra.mxu0 %v13106_v26  ;;  %10114 = vmatprep.subr.mxu1 %v15090_v60 }
 0xf65   :  { %4625 = vmatprep.subr.mxu0 %v13109_v9  ;;  %10115 = vmatpush3.msra.mxu1 %v13214_v30 }
 0xf66   :  { %4416 = vmatmul.mubr.f32.gmra.mxu0 %v13064_v5  ;;  %10116 = vmatprep.subr.mxu1 %v15090_v60 }
 0xf67   :  { %4421 = vmatprep.mubr.f32.mxu0 %v15090_v60  ;;  %4626 = vmatpush1.msra.mxu0 %v13112_v44 }
 0xf68   :  { %4627 = vmatprep.subr.mxu0 %v13115_v19  ;;  %10117 = vmatpush3.msra.mxu1 %v13218_v31 }
 0xf69   :  { %4628 = vmatpush1.msra.mxu0 %v13118_v20  ;;  %10118 = vmatprep.subr.mxu1 %v15090_v60 }
 0xf6a   :  { %4629 = vmatprep.subr.mxu0 %v13121_v49  ;;  %10119 = vmatpush3.msra.mxu1 %v13222_v40 }
 0xf6b   :  { %4630 = vmatpush1.msra.mxu0 %v13124_v51  ;;  %10120 = vmatprep.subr.mxu1 %v15090_v60 }
 0xf6c   :  { %4631 = vmatprep.subr.mxu0 %v13127_v25  ;;  %10121 = vmatpush3.msra.mxu1 %v13226_v22 }
 0xf6d   :  { %4632 = vmatpush1.msra.mxu0 %v13130_v50  ;;  %10122 = vmatprep.subr.mxu1 %v15090_v60 }
 0xf6e   :  { %4633 = vmatprep.subr.mxu0 %v13133_v56  ;;  %10123 = vmatpush3.msra.mxu1 %v13230_v35 }
 0xf6f   :  { %4634 = vmatpush1.msra.mxu0 %v13136_v1  ;;  %10124 = vmatprep.subr.mxu1 %v15090_v60 }
 0xf70   :  { %4635 = vmatprep.subr.mxu0 %v13139_v42  ;;  %10125 = vmatpush3.msra.mxu1 %v13234_v34 }
 0xf71   :  { %4636 = vmatpush1.msra.mxu0 %v13142_v24  ;;  %10126 = vmatprep.subr.mxu1 %v15090_v60 }
 0xf72   :  { %4637 = vmatprep.subr.mxu0 %v13145_v32  ;;  %10127 = vmatpush3.msra.mxu1 %v13238_v38 }
 0xf73   :  { %4638 = vmatpush1.msra.mxu0 %v13148_v52  ;;  %10128 = vmatprep.subr.mxu1 %v15090_v60 }
 0xf74   :  { %4639 = vmatprep.subr.mxu0 %v13151_v63  ;;  %10129 = vmatpush3.msra.mxu1 %v13242_v62 }
 0xf75   :  { %4640 = vmatpush1.msra.mxu0 %v13154_v27  ;;  %10130 = vmatprep.subr.mxu1 %v15090_v60 }
 0xf76   :  { %4641 = vmatprep.subr.mxu0 %v13157_v59  ;;  %10131 = vmatpush3.msra.mxu1 %v13246_v14 }
 0xf77   :  { %4642 = vmatpush1.msra.mxu0 %v13160_v61  ;;  %10135 = vmatprep.subr.mxu1 %v15090_v60 }
 0xf78   :  { %4643 = vmatprep.subr.mxu0 %v13163_v41 }
 0xf79   :  { %4644 = vmatpush1.msra.mxu0 %v13166_v21 }
 0xf7a   :  { %4645 = vmatprep.subr.mxu0 %v13169_v45 }
 0xf7b   :  { %4646 = vmatpush1.msra.mxu0 %v13172_v47 }
 0xf7c   :  { %4647 = vmatprep.subr.mxu0 %v13175_v28 }
 0xf7d   :  { %4648 = vmatpush1.msra.mxu0 %v13177_v10 }
 0xf7e   :  { %4649 = vmatprep.subr.mxu0 %v13179_v53 }
 0xf7f   :  { %4650 = vmatpush1.msra.mxu0 %v13182_v57 }
 0xf80   :  { %4835 = vmatprep.subr.mxu0 %v13091_v23 }
 0xfed   :  { %v4142_v33 = vpop.f32.mrf.mxu0  ;;  %v4213_v43 = vpop.f32.mrf.mxu1 }
 0xfee   :  { %v4217_v39 = vadd.f32 %v4142_v33, %v2369_v36  ;;  %v4231_v10 = vadd.f32 %v12981_v6, %v4213_v43  ;;  %v2475_v36 = vadd.f32 %v15235_v15, %v12488_v48  ;;  %v15236_v48 = vld [vmem:[#allocation18_spill] sm:$0xff]  ;;  %v15237_v6 = vld [vmem:[#allocation23_spill] sm:$0xff] }
 0xfef   :  { %v10055_v11 = vpop.f32.mrf.mxu1  ;;  %v4144_v37 = vpop.f32.mrf.mxu0 }
 0xff0   :  { %v8678_v16 = vmul.f32 -1.442695, %v4217_v39  ;;  %v4224_v23 = vadd.f32 %v4144_v37, %v2371_v54 }
 0xff2   :  { %10952 = vpow2.f32 %v8678_v16  ;;  %v8679_v57 = vmul.f32 -1.442695, %v4224_v23 }
 0xff4   :  { %10954 = vpow2.f32 %v8679_v57  ;;  %v15240_v57 = vld [vmem:[#allocation31_spill] sm:$0xff] }
 0xfff   :  { %v10953_v53 = vpop.eup %10952 }
0x1000   :  { %v4221_v62 = vadd.f32 1.0, %v10953_v53 }
0x1001   :  { %v10955_v14 = vpop.eup %10954 }
0x1002   :  { %10956 = vrcp.f32 %v4221_v62  ;;  %v4228_v11 = vadd.f32 1.0, %v10955_v14  ;;  %v15241_v62 = vld [vmem:[#allocation22_spill] sm:$0xff] }
0x100e   :  { %v4381_v14 = vpop.f32.mrf.mxu0 }
0x100f   :  { %v10957_v2 = vpop.eup %10956 }
0x1010   :  { %v4232_v33 = vmul.f32 %v10957_v2, %v4231_v10  ;;  %v15239_v10 = vld [vmem:[#allocation20_spill] sm:$0xff]  ;;  %v4383_v43 = vpop.f32.mrf.mxu0 }
0x1012   :  { %v4233_v39 = vadd.f32 %v4232_v33, %v2475_v36  ;;  %v13332_v3 = vpop.f32.mrf.mxu0 }
0x1013   :  { %15242 = vst [vmem:[#allocation30_spill] sm:$0xff] %v13332_v3 }
0x1014   :  { %10958 = vtanh.f32 %v4233_v39  ;;  %v13334_v54 = vpop.f32.mrf.mxu0  ;;  %v13344_v39 = vpop.f32.mrf.mxu1 }
0x1015   :  { %10960 = vrcp.f32 %v4228_v11  ;;  %15243 = vst [vmem:[#allocation37_spill] sm:$0xff] %v13334_v54  ;;  %15248 = vst [vmem:[#allocation39_spill] sm:$0xff] %v13344_v39 }
0x1016   :  { %v13336_v2 = vpop.f32.mrf.mxu0 }
0x1017   :  { %15244 = vst [vmem:[#allocation33_spill] sm:$0xff] %v13336_v2 }
0x1018   :  { %v13338_v15 = vpop.f32.mrf.mxu0 }
0x1019   :  { %15245 = vst [vmem:[#allocation25_spill] sm:$0xff] %v13338_v15 }
0x101a   :  { %v13340_v36 = vpop.f32.mrf.mxu0 }
0x101b   :  { %15246 = vst [vmem:[#allocation29_spill] sm:$0xff] %v13340_v36 }
0x101c   :  { %v13342_v33 = vpop.f32.mrf.mxu0 }
0x101d   :  { %15247 = vst [vmem:[#allocation16_spill] sm:$0xff] %v13342_v33  ;;  %v8680_v33 = vld [vmem:[%s14924_s3 + $0x6] sm:$0x7] }
0x101e   :  { %v13346_v11 = vpop.f32.mrf.mxu0 }
0x101f   :  { %15249 = vst [vmem:[#allocation32_spill] sm:$0xff] %v13346_v11 }
0x1021   :  { %v10959_v16 = vpop.eup %10958 }
0x1022   :  { %v4235_v13 = vsub.f32 %v13064_v5, %v10959_v16  ;;  %v10961_v23 = vpop.eup %10960  ;;  %v15238_v5 = vld [vmem:[#allocation40_spill] sm:$0xff] }
0x1024   :  { %v4236_v37 = vmul.f32 %v10961_v23, %v4235_v13  ;;  %v13348_v13 = vpop.f32.mrf.mxu0 }
0x1025   :  { %15250 = vst [vmem:[#allocation41_spill] sm:$0xff] %v13348_v13  ;;  %v15259_v13 = vld [vmem:[#allocation19_spill] sm:$0xff] }
0x1026   :  { %v4237_v53 = vadd.f32 %v10959_v16, %v4236_v37  ;;  %v4494_v16 = vpop.f32.mrf.mxu1  ;;  %v13352_v37 = vpop.f32.mrf.mxu0 }
0x1027   :  { %15252 = vst [vmem:[#allocation26_spill] sm:$0xff] %v13352_v37 }
0x1028   :  { %4422 = vmatmul.mubr.f32.gmra.mxu0 %v4237_v53  ;;  %10098 = vmatmul.mubr.f32.gmra.mxu1 %v4237_v53  ;;  %v13350_v23 = vpop.f32.mrf.mxu1  ;;  %v13356_v2 = vpop.f32.mrf.mxu0 }
0x1029   :  { %4683 = vmatprep.mubr.f32.mxu0 %v15090_v60  ;;  %10132 = vmatprep.mubr.msk.f32.mxu1 %vm11221_vm0, %v15090_v60  ;;  %15251 = vst [vmem:[#allocation17_spill] sm:$0xff] %v13350_v23  ;;  %15254 = vst [vmem:[#allocation36_spill] sm:$0xff] %v13356_v2  ;;  %v13370_v23 = vrot.slane %v8680_v33, %v15259_v13 }
0x102a   :  { %v13354_v53 = vpop.f32.mrf.mxu1  ;;  %v13360_v36 = vpop.f32.mrf.mxu0 }
0x102b   :  { %15253 = vst [vmem:[#allocation15_spill] sm:$0xff] %v13354_v53  ;;  %15256 = vst [vmem:[#allocation34_spill] sm:$0xff] %v13360_v36  ;;  %v4382_v36 = vadd.f32 %v4381_v14, %v13370_v23  ;;  %v13388_v14 = vld [vmem:[%s14925_s4 + $0x2] ss:$0 sm:$0xff] }
0x102c   :  { %4684 = vmatmul.mubr.f32.vlgmr.msra.gmra.mxu0 %v15090_v60  ;;  %10133 = vmatmul.mubr.f32.vlgmr.msra.gmra.mxu1 %v15090_v60  ;;  %v13358_v15 = vpop.f32.mrf.mxu1  ;;  %v13367_v39 = vpop.f32.mrf.mxu0  ;;  %15260 = vst [vmem:[#allocation24_spill] sm:$0xff] %v13370_v23 }
0x102d   :  { %4836 = vmatpush1.msra.mxu0 %v13094_v12  ;;  %10136 = vmatpush3.msra.mxu1 %v13186_v58  ;;  %15255 = vst [vmem:[#allocation21_spill] sm:$0xff] %v13358_v15  ;;  %15258 = vst [vmem:[#allocation46_spill] sm:$0xff] %v13367_v39  ;;  %v15265_v39 = vld [vmem:[#allocation35_spill] sm:$0xff] }
0x102e   :  { %4837 = vmatprep.subr.mxu0 %v13097_v0  ;;  %10137 = vmatprep.subr.mxu1 %v15090_v60  ;;  %v13365_v11 = vpop.f32.mrf.mxu1 }
0x102f   :  { %4838 = vmatpush1.msra.mxu0 %v13100_v55  ;;  %10138 = vmatpush3.msra.mxu1 %v13188_v4  ;;  %15257 = vst [vmem:[#allocation45_spill] sm:$0xff] %v13365_v11 }
0x1030   :  { %4839 = vmatprep.subr.mxu0 %v13103_v46  ;;  %10139 = vmatprep.subr.mxu1 %v15090_v60 }
0x1031   :  { %4840 = vmatpush1.msra.mxu0 %v13106_v26  ;;  %10140 = vmatpush3.msra.mxu1 %v13193_v8 }
0x1032   :  { %4841 = vmatprep.subr.mxu0 %v13109_v9  ;;  %10141 = vmatprep.subr.mxu1 %v15090_v60 }
0x1033   :  { %4842 = vmatpush1.msra.mxu0 %v13112_v44  ;;  %10142 = vmatpush3.msra.mxu1 %v13198_v17 }
0x1034   :  { %4843 = vmatprep.subr.mxu0 %v13115_v19  ;;  %10143 = vmatprep.subr.mxu1 %v15090_v60 }
0x1035   :  { %4844 = vmatpush1.msra.mxu0 %v13118_v20  ;;  %10144 = vmatpush3.msra.mxu1 %v13202_v18 }
0x1036   :  { %4845 = vmatprep.subr.mxu0 %v13121_v49  ;;  %10145 = vmatprep.subr.mxu1 %v15090_v60 }
0x1037   :  { %4846 = vmatpush1.msra.mxu0 %v13124_v51  ;;  %10146 = vmatpush3.msra.mxu1 %v13206_v7 }
0x1038   :  { %4847 = vmatprep.subr.mxu0 %v13127_v25  ;;  %10147 = vmatprep.subr.mxu1 %v15090_v60 }
0x1039   :  { %4848 = vmatpush1.msra.mxu0 %v13130_v50  ;;  %10148 = vmatpush3.msra.mxu1 %v13210_v29 }
0x103a   :  { %4849 = vmatprep.subr.mxu0 %v13133_v56  ;;  %10149 = vmatprep.subr.mxu1 %v15090_v60 }
0x103b   :  { %4850 = vmatpush1.msra.mxu0 %v13136_v1  ;;  %10150 = vmatpush3.msra.mxu1 %v13214_v30 }
0x103c   :  { %4851 = vmatprep.subr.mxu0 %v13139_v42  ;;  %10151 = vmatprep.subr.mxu1 %v15090_v60 }
0x103d   :  { %4852 = vmatpush1.msra.mxu0 %v13142_v24  ;;  %10152 = vmatpush3.msra.mxu1 %v13218_v31 }
0x103e   :  { %4853 = vmatprep.subr.mxu0 %v13145_v32  ;;  %10153 = vmatprep.subr.mxu1 %v15090_v60 }
0x103f   :  { %4854 = vmatpush1.msra.mxu0 %v13148_v52  ;;  %10154 = vmatpush3.msra.mxu1 %v13222_v40 }
0x1040   :  { %4855 = vmatprep.subr.mxu0 %v13151_v63  ;;  %10155 = vmatprep.subr.mxu1 %v15090_v60 }
0x1041   :  { %4856 = vmatpush1.msra.mxu0 %v13154_v27  ;;  %10156 = vmatpush3.msra.mxu1 %v13226_v22 }
0x1042   :  { %4857 = vmatprep.subr.mxu0 %v13157_v59  ;;  %10157 = vmatprep.subr.mxu1 %v15090_v60 }
0x1043   :  { %4858 = vmatpush1.msra.mxu0 %v13160_v61  ;;  %10158 = vmatpush3.msra.mxu1 %v13230_v35 }
0x1044   :  { %4859 = vmatprep.subr.mxu0 %v13163_v41  ;;  %10159 = vmatprep.subr.mxu1 %v15090_v60 }
0x1045   :  { %4860 = vmatpush1.msra.mxu0 %v13166_v21  ;;  %10160 = vmatpush3.msra.mxu1 %v13234_v34 }
0x1046   :  { %4861 = vmatprep.subr.mxu0 %v13169_v45  ;;  %10161 = vmatprep.subr.mxu1 %v15090_v60 }
0x1047   :  { %4862 = vmatpush1.msra.mxu0 %v13172_v47  ;;  %10162 = vmatpush3.msra.mxu1 %v13238_v38 }
0x1048   :  { %4863 = vmatprep.subr.mxu0 %v13175_v28  ;;  %10163 = vmatprep.subr.mxu1 %v15090_v60 }
0x1049   :  { %4864 = vmatpush1.msra.mxu0 %v15236_v48  ;;  %10164 = vmatpush3.msra.mxu1 %v15237_v6 }
0x104a   :  { %4865 = vmatprep.subr.mxu0 %v15238_v5  ;;  %10165 = vmatprep.subr.mxu1 %v15090_v60 }
0x104b   :  { %4866 = vmatpush1.msra.mxu0 %v15239_v10  ;;  %4899 = vmatprep.mubr.f32.mxu0 %v15090_v60  ;;  %v13382_v10 = vrot.slane %v8680_v33, %v15265_v39 }
0x104c   :  { %10166 = vmatpush3.msra.mxu1 %v15240_v57  ;;  %10167 = vmatprep.mubr.msk.f32.mxu1 %vm11221_vm0, %v15090_v60 }
0x104d   :  { %5051 = vmatprep.subr.mxu0 %v15241_v62  ;;  %10170 = vmatprep.subr.mxu1 %v15090_v60 }
0x10e8   :  { %v13372_v37 = vpop.f32.mrf.mxu0  ;;  %v13374_v53 = vpop.f32.mrf.mxu1 }
0x10e9   :  { %15261 = vst [vmem:[#allocation38_spill] sm:$0xff] %v13372_v37  ;;  %15262 = vst [vmem:[#allocation27_spill] sm:$0xff] %v13374_v53  ;;  %v4384_v37 = vadd.f32 %v4383_v43, %v13382_v10 }
0x10ea   :  { %v13376_v2 = vpop.f32.mrf.mxu0  ;;  %v13378_v15 = vpop.f32.mrf.mxu1 }
0x10eb   :  { %15263 = vst [vmem:[#allocation42_spill] sm:$0xff] %v13376_v2  ;;  %15264 = vst [vmem:[#allocation44_spill] sm:$0xff] %v13378_v15 }
0x10ec   :  { %v4685_v54 = vpop.f32.mrf.mxu0  ;;  %v4756_v3 = vpop.f32.mrf.mxu1 }
0x10ed   :  { %v4760_v62 = vadd.f32 %v4685_v54, %v4382_v36  ;;  %v15266_v54 = vld [vmem:[#allocation28_spill] sm:$0xff] }
0x10ee   :  { %v10134_v57 = vpop.f32.mrf.mxu1  ;;  %v4687_v13 = vpop.f32.mrf.mxu0  ;;  %v13392_v36 = vrot.slane %v8680_v33, %v15266_v54  ;;  %v15269_v33 = vld [vmem:[#allocation40_spill] sm:$0xff] }
0x10ef   :  { %v8683_v11 = vmul.f32 -1.442695, %v4760_v62  ;;  %v4767_v5 = vadd.f32 %v4687_v13, %v4384_v37  ;;  %v4774_v57 = vadd.f32 %v13388_v14, %v4756_v3  ;;  %v15268_v3 = vld [vmem:[#allocation23_spill] sm:$0xff] }
0x10f0   :  { %v4495_v43 = vadd.f32 %v4494_v16, %v13392_v36  ;;  %v15271_v16 = vld [vmem:[#allocation31_spill] sm:$0xff] }
0x10f1   :  { %10962 = vpow2.f32 %v8683_v11  ;;  %v8684_v53 = vmul.f32 -1.442695, %v4767_v5 }
0x10f3   :  { %10964 = vpow2.f32 %v8684_v53 }
0x10fe   :  { %v10963_v6 = vpop.eup %10962 }
0x10ff   :  { %v4764_v2 = vadd.f32 1.0, %v10963_v6 }
0x1100   :  { %v10965_v62 = vpop.eup %10964 }
0x1101   :  { %10966 = vrcp.f32 %v4764_v2  ;;  %v4771_v5 = vadd.f32 1.0, %v10965_v62  ;;  %v15273_v62 = vld [vmem:[#allocation30_spill] sm:$0xff] }
0x110e   :  { %v10967_v11 = vpop.eup %10966 }
0x110f   :  { %v4775_v13 = vmul.f32 %v10967_v11, %v4774_v57  ;;  %v15272_v57 = vld [vmem:[#allocation22_spill] sm:$0xff]  ;;  %v4388_v11 = vadd.f32 %v15273_v62, %v13370_v23  ;;  %v15275_v23 = vld [vmem:[#allocation39_spill] sm:$0xff] }
0x1111   :  { %v4776_v37 = vadd.f32 %v4775_v13, %v4495_v43 }
0x1113   :  { %10968 = vtanh.f32 %v4776_v37 }
0x1114   :  { %10970 = vrcp.f32 %v4771_v5 }
0x1120   :  { %v10969_v6 = vpop.eup %10968 }
0x1121   :  { %v4778_v2 = vsub.f32 0.0, %v10969_v6  ;;  %v10971_v53 = vpop.eup %10970 }
0x1123   :  { %v4779_v39 = vmul.f32 %v10971_v53, %v4778_v2  ;;  %v15274_v53 = vld [vmem:[#allocation37_spill] sm:$0xff] }
0x1124   :  { %v4390_v54 = vadd.f32 %v15274_v53, %v13382_v10  ;;  %v13611_v53 = vld [vmem:[#allocation7 + $0x3e8] sm:$0xff] }
0x1125   :  { %v13395_v15 = vadd.f32 %v10969_v6, %v4779_v39  ;;  %v15270_v39 = vld [vmem:[#allocation20_spill] sm:$0xff] }
0x1127   :  { %15267 = vst [vmem:[#allocation43_spill] sm:$0xff] %v13395_v15  ;;  %4900 = vmatmul.mubr.f32.vlgmr.msra.gmra.mxu0 %v13395_v15  ;;  %10168 = vmatmul.mubr.f32.vlgmr.msra.gmra.mxu1 %v13395_v15 }
0x1128   :  { %5052 = vmatpush1.msra.mxu0 %v13094_v12  ;;  %10171 = vmatpush3.msra.mxu1 %v13186_v58 }
0x1129   :  { %5053 = vmatprep.subr.mxu0 %v13097_v0  ;;  %10172 = vmatprep.subr.mxu1 %v15090_v60 }
0x112a   :  { %5054 = vmatpush1.msra.mxu0 %v13100_v55  ;;  %10173 = vmatpush3.msra.mxu1 %v13188_v4 }
0x112b   :  { %5055 = vmatprep.subr.mxu0 %v13103_v46  ;;  %10174 = vmatprep.subr.mxu1 %v15090_v60 }
0x112c   :  { %5056 = vmatpush1.msra.mxu0 %v13106_v26  ;;  %10175 = vmatpush3.msra.mxu1 %v13193_v8 }
0x112d   :  { %5057 = vmatprep.subr.mxu0 %v13109_v9  ;;  %10176 = vmatprep.subr.mxu1 %v15090_v60 }
0x112e   :  { %5058 = vmatpush1.msra.mxu0 %v13112_v44  ;;  %10177 = vmatpush3.msra.mxu1 %v13198_v17 }
0x112f   :  { %5059 = vmatprep.subr.mxu0 %v13115_v19  ;;  %10178 = vmatprep.subr.mxu1 %v15090_v60 }
0x1130   :  { %5060 = vmatpush1.msra.mxu0 %v13118_v20  ;;  %10179 = vmatpush3.msra.mxu1 %v13202_v18 }
0x1131   :  { %5061 = vmatprep.subr.mxu0 %v13121_v49  ;;  %10180 = vmatprep.subr.mxu1 %v15090_v60 }
0x1132   :  { %5062 = vmatpush1.msra.mxu0 %v13124_v51  ;;  %10181 = vmatpush3.msra.mxu1 %v13206_v7 }
0x1133   :  { %5063 = vmatprep.subr.mxu0 %v13127_v25  ;;  %10182 = vmatprep.subr.mxu1 %v15090_v60 }
0x1134   :  { %5064 = vmatpush1.msra.mxu0 %v13130_v50  ;;  %10183 = vmatpush3.msra.mxu1 %v13210_v29 }
0x1135   :  { %5065 = vmatprep.subr.mxu0 %v13133_v56  ;;  %10184 = vmatprep.subr.mxu1 %v15090_v60 }
0x1136   :  { %5066 = vmatpush1.msra.mxu0 %v13136_v1  ;;  %10185 = vmatpush3.msra.mxu1 %v13214_v30 }
0x1137   :  { %5067 = vmatprep.subr.mxu0 %v13139_v42  ;;  %10186 = vmatprep.subr.mxu1 %v15090_v60 }
0x1138   :  { %5068 = vmatpush1.msra.mxu0 %v13142_v24  ;;  %10187 = vmatpush3.msra.mxu1 %v13218_v31 }
0x1139   :  { %5069 = vmatprep.subr.mxu0 %v13145_v32  ;;  %10188 = vmatprep.subr.mxu1 %v15090_v60 }
0x113a   :  { %5070 = vmatpush1.msra.mxu0 %v13148_v52  ;;  %10189 = vmatpush3.msra.mxu1 %v13222_v40 }
0x113b   :  { %5071 = vmatprep.subr.mxu0 %v13151_v63  ;;  %10190 = vmatprep.subr.mxu1 %v15090_v60 }
0x113c   :  { %5072 = vmatpush1.msra.mxu0 %v13154_v27  ;;  %10191 = vmatpush3.msra.mxu1 %v13226_v22 }
0x113d   :  { %5073 = vmatprep.subr.mxu0 %v13157_v59  ;;  %10192 = vmatprep.subr.mxu1 %v15090_v60 }
0x113e   :  { %5074 = vmatpush1.msra.mxu0 %v13160_v61  ;;  %10193 = vmatpush3.msra.mxu1 %v13230_v35 }
0x113f   :  { %5075 = vmatprep.subr.mxu0 %v13163_v41  ;;  %10194 = vmatprep.subr.mxu1 %v15090_v60 }
0x1140   :  { %5076 = vmatpush1.msra.mxu0 %v13166_v21  ;;  %10195 = vmatpush3.msra.mxu1 %v13234_v34 }
0x1141   :  { %5077 = vmatprep.subr.mxu0 %v13169_v45  ;;  %10196 = vmatprep.subr.mxu1 %v15090_v60 }
0x1142   :  { %5078 = vmatpush1.msra.mxu0 %v13172_v47  ;;  %10197 = vmatpush3.msra.mxu1 %v13238_v38 }
0x1143   :  { %5079 = vmatprep.subr.mxu0 %v13175_v28  ;;  %10198 = vmatprep.subr.mxu1 %v15090_v60 }
0x1144   :  { %5080 = vmatpush1.msra.mxu0 %v15236_v48  ;;  %10199 = vmatpush3.msra.mxu1 %v15268_v3 }
0x1145   :  { %5081 = vmatprep.subr.mxu0 %v15269_v33  ;;  %10200 = vmatprep.subr.mxu1 %v15090_v60 }
0x1146   :  { %5082 = vmatpush1.msra.mxu0 %v15270_v39  ;;  %5115 = vmatprep.mubr.f32.mxu0 %v15090_v60 }
0x1147   :  { %10201 = vmatpush3.msra.mxu1 %v15271_v16  ;;  %10202 = vmatprep.mubr.msk.f32.mxu1 %vm11221_vm0, %v15090_v60 }
0x1148   :  { %5267 = vmatprep.subr.mxu0 %v15272_v57  ;;  %10205 = vmatprep.subr.mxu1 %v15090_v60 }
0x11e7   :  { %v4901_v43 = vpop.f32.mrf.mxu0  ;;  %v4972_v13 = vpop.f32.mrf.mxu1 }
0x11e8   :  { %v4976_v5 = vadd.f32 %v4901_v43, %v4388_v11  ;;  %v4990_v48 = vadd.f32 %v13388_v14, %v4972_v13  ;;  %v4500_v11 = vadd.f32 %v15275_v23, %v13392_v36  ;;  %v13601_v23 = vld [vmem:[#allocation7 + $0x3f8] sm:$0xff] }
0x11e9   :  { %v10169_v37 = vpop.f32.mrf.mxu1  ;;  %v4903_v2 = vpop.f32.mrf.mxu0  ;;  %v13608_v13 = vld [vmem:[#allocation7 + $0x3d8] sm:$0xff] }
0x11ea   :  { %v8685_v6 = vmul.f32 -1.442695, %v4976_v5  ;;  %v4983_v16 = vadd.f32 %v4903_v2, %v4390_v54 }
0x11ec   :  { %10972 = vpow2.f32 %v8685_v6  ;;  %v8686_v39 = vmul.f32 -1.442695, %v4983_v16 }
0x11ee   :  { %10974 = vpow2.f32 %v8686_v39  ;;  %v13606_v39 = vld [vmem:[#allocation7 + $0x3e0] sm:$0xff] }
0x11f9   :  { %v10973_v33 = vpop.eup %10972 }
0x11fa   :  { %v4980_v3 = vadd.f32 1.0, %v10973_v33 }
0x11fb   :  { %v10975_v57 = vpop.eup %10974 }
0x11fc   :  { %10976 = vrcp.f32 %v4980_v3  ;;  %v4987_v37 = vadd.f32 1.0, %v10975_v57  ;;  %v13604_v3 = vld [vmem:[#allocation7 + $0x3f0] sm:$0xff]  ;;  %v13613_v57 = vld [vmem:[#allocation7 + $0x3c8] sm:$0xff] }
0x1209   :  { %v10977_v62 = vpop.eup %10976 }
0x120a   :  { %v4991_v43 = vmul.f32 %v10977_v62, %v4990_v48  ;;  %v13598_v48 = vld [vmem:[#allocation7 + $0x408] sm:$0xff]  ;;  %v13617_v62 = vld [vmem:[#allocation7 + $0x3c0] sm:$0xff] }
0x120c   :  { %v4992_v5 = vadd.f32 %v4991_v43, %v4500_v11  ;;  %v13619_v11 = vld [vmem:[#allocation7 + $0x3d0] sm:$0xff] }
0x120d   :  { %v13623_v43 = vld [vmem:[#allocation7 + $0x3b0] sm:$0xff] }
0x120e   :  { %10978 = vtanh.f32 %v4992_v5  ;;  %v13625_v5 = vld [vmem:[#allocation7 + $0x3b8] sm:$0xff] }
0x120f   :  { %10980 = vrcp.f32 %v4987_v37  ;;  %v13629_v37 = vld [vmem:[#allocation7 + $0x3a8] sm:$0xff] }
0x121b   :  { %v10979_v6 = vpop.eup %10978 }
0x121c   :  { %v4994_v54 = vsub.f32 %v13395_v15, %v10979_v6  ;;  %v10981_v16 = vpop.eup %10980 }
0x121e   :  { %v4995_v2 = vmul.f32 %v10981_v16, %v4994_v54  ;;  %v13635_v54 = vld [vmem:[#allocation7 + $0x3a0] sm:$0xff]  ;;  %v13639_v16 = vld [vmem:[#allocation7 + $0x390] sm:$0xff] }
0x1220   :  { %v13474_v33 = vadd.f32 %v10979_v6, %v4995_v2  ;;  %v13633_v6 = vld [vmem:[#allocation7 + $0x398] sm:$0xff]  ;;  %v13643_v2 = vld [vmem:[#allocation7 + $0x380] sm:$0xff] }
0x1222   :  { %15276 = vst [vmem:[#allocation22_spill] sm:$0xff] %v13474_v33  ;;  %5116 = vmatmul.mubr.f32.vlgmr.msra.gmra.mxu0 %v13474_v33  ;;  %10203 = vmatmul.mubr.f32.vlgmr.msra.gmra.mxu1 %v13474_v33 }
0x1223   :  { %5268 = vmatpush1.msra.mxu0 %v13094_v12  ;;  %10206 = vmatpush3.msra.mxu1 %v13186_v58  ;;  %v15277_v12 = vld [vmem:[#allocation18_spill] sm:$0xff] }
0x1224   :  { %5269 = vmatprep.subr.mxu0 %v13097_v0  ;;  %10207 = vmatprep.subr.mxu1 %v15090_v60  ;;  %v15278_v0 = vld [vmem:[#allocation23_spill] sm:$0xff] }
0x1225   :  { %5270 = vmatpush1.msra.mxu0 %v13100_v55  ;;  %10208 = vmatpush3.msra.mxu1 %v13188_v4  ;;  %v15279_v55 = vld [vmem:[#allocation40_spill] sm:$0xff] }
0x1226   :  { %5271 = vmatprep.subr.mxu0 %v13103_v46  ;;  %10209 = vmatprep.subr.mxu1 %v15090_v60  ;;  %v15280_v46 = vld [vmem:[#allocation20_spill] sm:$0xff] }
0x1227   :  { %5272 = vmatpush1.msra.mxu0 %v13106_v26  ;;  %10210 = vmatpush3.msra.mxu1 %v13193_v8  ;;  %v15281_v26 = vld [vmem:[#allocation31_spill] sm:$0xff] }
0x1228   :  { %5273 = vmatprep.subr.mxu0 %v13109_v9  ;;  %10211 = vmatprep.subr.mxu1 %v15090_v60  ;;  %v15282_v9 = vld [vmem:[#allocation24_spill] sm:$0xff] }
0x1229   :  { %5274 = vmatpush1.msra.mxu0 %v13112_v44  ;;  %10212 = vmatpush3.msra.mxu1 %v13198_v17  ;;  %v15283_v44 = vld [vmem:[#allocation33_spill] sm:$0xff] }
0x122a   :  { %5275 = vmatprep.subr.mxu0 %v13115_v19  ;;  %10213 = vmatprep.subr.mxu1 %v15090_v60  ;;  %v4394_v19 = vadd.f32 %v15283_v44, %v15282_v9  ;;  %v13663_v44 = vld [vmem:[#allocation7 + $0x350] sm:$0xff] }
0x122b   :  { %5276 = vmatpush1.msra.mxu0 %v13118_v20  ;;  %10214 = vmatpush3.msra.mxu1 %v13202_v18 }
0x122c   :  { %5277 = vmatprep.subr.mxu0 %v13121_v49  ;;  %10215 = vmatprep.subr.mxu1 %v15090_v60 }
0x122d   :  { %5278 = vmatpush1.msra.mxu0 %v13124_v51  ;;  %10216 = vmatpush3.msra.mxu1 %v13206_v7 }
0x122e   :  { %5279 = vmatprep.subr.mxu0 %v13127_v25  ;;  %10217 = vmatprep.subr.mxu1 %v15090_v60 }
0x122f   :  { %5280 = vmatpush1.msra.mxu0 %v13130_v50  ;;  %10218 = vmatpush3.msra.mxu1 %v13210_v29 }
0x1230   :  { %5281 = vmatprep.subr.mxu0 %v13133_v56  ;;  %10219 = vmatprep.subr.mxu1 %v15090_v60 }
0x1231   :  { %5282 = vmatpush1.msra.mxu0 %v13136_v1  ;;  %10220 = vmatpush3.msra.mxu1 %v13214_v30  ;;  %v15284_v1 = vld [vmem:[#allocation25_spill] sm:$0xff] }
0x1232   :  { %5283 = vmatprep.subr.mxu0 %v13139_v42  ;;  %10221 = vmatprep.subr.mxu1 %v15090_v60  ;;  %v4396_v42 = vadd.f32 %v15284_v1, %v13382_v10  ;;  %v13689_v1 = vld [vmem:[#allocation7 + $0x318] sm:$0xff] }
0x1233   :  { %5284 = vmatpush1.msra.mxu0 %v13142_v24  ;;  %10222 = vmatpush3.msra.mxu1 %v13218_v31  ;;  %15289 = vst [vmem:[#allocation18_spill] sm:$0xff] %v13689_v1 }
0x1234   :  { %5285 = vmatprep.subr.mxu0 %v13145_v32  ;;  %10223 = vmatprep.subr.mxu1 %v15090_v60 }
0x1235   :  { %5286 = vmatpush1.msra.mxu0 %v13148_v52  ;;  %10224 = vmatpush3.msra.mxu1 %v13222_v40 }
0x1236   :  { %5287 = vmatprep.subr.mxu0 %v13151_v63  ;;  %10225 = vmatprep.subr.mxu1 %v15090_v60 }
0x1237   :  { %5288 = vmatpush1.msra.mxu0 %v13154_v27  ;;  %10226 = vmatpush3.msra.mxu1 %v13226_v22 }
0x1238   :  { %5289 = vmatprep.subr.mxu0 %v13157_v59  ;;  %10227 = vmatprep.subr.mxu1 %v15090_v60 }
0x1239   :  { %5290 = vmatpush1.msra.mxu0 %v13160_v61  ;;  %10228 = vmatpush3.msra.mxu1 %v13230_v35  ;;  %v13589_v35 = vld [vmem:[#allocation7 + $0x428] sm:$0xff] }
0x123a   :  { %5291 = vmatprep.subr.mxu0 %v13163_v41  ;;  %10229 = vmatprep.subr.mxu1 %v15090_v60  ;;  %v15285_v41 = vld [vmem:[#allocation15_spill] sm:$0xff] }
0x123b   :  { %5292 = vmatpush1.msra.mxu0 %v13166_v21  ;;  %10230 = vmatpush3.msra.mxu1 %v13234_v34  ;;  %v4505_v21 = vadd.f32 %v15285_v41, %v13392_v36  ;;  %v13592_v34 = vld [vmem:[#allocation7 + $0x420] sm:$0xff] }
0x123c   :  { %5293 = vmatprep.subr.mxu0 %v13169_v45  ;;  %10231 = vmatprep.subr.mxu1 %v15090_v60 }
0x123d   :  { %5294 = vmatpush1.msra.mxu0 %v13172_v47  ;;  %10232 = vmatpush3.msra.mxu1 %v13238_v38  ;;  %v13595_v38 = vld [vmem:[#allocation7 + $0x410] sm:$0xff] }
0x123e   :  { %5295 = vmatprep.subr.mxu0 %v13175_v28  ;;  %10233 = vmatprep.subr.mxu1 %v15090_v60 }
0x123f   :  { %5296 = vmatpush1.msra.mxu0 %v15277_v12  ;;  %10234 = vmatpush3.msra.mxu1 %v15278_v0  ;;  %v13645_v12 = vld [vmem:[#allocation7 + $0x388] sm:$0xff]  ;;  %v13649_v0 = vld [vmem:[#allocation7 + $0x378] sm:$0xff] }
0x1240   :  { %5297 = vmatprep.subr.mxu0 %v15279_v55  ;;  %10235 = vmatprep.subr.mxu1 %v15090_v60  ;;  %v13653_v55 = vld [vmem:[#allocation7 + $0x368] sm:$0xff] }
0x1241   :  { %5298 = vmatpush1.msra.mxu0 %v15280_v46  ;;  %5331 = vmatprep.mubr.f32.mxu0 %v15090_v60  ;;  %v13655_v46 = vld [vmem:[#allocation7 + $0x370] sm:$0xff] }
0x1242   :  { %10236 = vmatpush3.msra.mxu1 %v15281_v26  ;;  %10237 = vmatprep.mubr.msk.f32.mxu1 %vm11221_vm0, %v15090_v60  ;;  %v13659_v26 = vld [vmem:[#allocation7 + $0x360] sm:$0xff] }
0x1243   :  { %10240 = vmatprep.subr.mxu1 %v15090_v60 }
0x12e2   :  { %v5117_v20 = vpop.f32.mrf.mxu0  ;;  %v5188_v49 = vpop.f32.mrf.mxu1 }
0x12e3   :  { %v5192_v51 = vadd.f32 %v5117_v20, %v4394_v19  ;;  %v5206_v59 = vadd.f32 %v13388_v14, %v5188_v49  ;;  %v13665_v19 = vld [vmem:[#allocation7 + $0x358] sm:$0xff]  ;;  %v13669_v20 = vld [vmem:[#allocation7 + $0x348] sm:$0xff] }
0x12e4   :  { %v10204_v25 = vpop.f32.mrf.mxu1  ;;  %v5119_v56 = vpop.f32.mrf.mxu0  ;;  %v13673_v49 = vld [vmem:[#allocation7 + $0x338] sm:$0xff] }
0x12e5   :  { %v8687_v50 = vmul.f32 -1.442695, %v5192_v51  ;;  %v5199_v24 = vadd.f32 %v5119_v56, %v4396_v42  ;;  %v13675_v51 = vld [vmem:[#allocation7 + $0x340] sm:$0xff]  ;;  %v13679_v25 = vld [vmem:[#allocation7 + $0x330] sm:$0xff]  ;;  %v13685_v56 = vld [vmem:[#allocation7 + $0x328] sm:$0xff] }
0x12e6   :  { %15288 = vst [vmem:[#allocation39_spill] sm:$0xff] %v13685_v56  ;;  %v13693_v42 = vld [vmem:[#allocation7 + $0x308] sm:$0xff] }
0x12e7   :  { %10982 = vpow2.f32 %v8687_v50  ;;  %v8688_v32 = vmul.f32 -1.442695, %v5199_v24  ;;  %v13683_v50 = vld [vmem:[#allocation7 + $0x320] sm:$0xff]  ;;  %15290 = vst [vmem:[#allocation23_spill] sm:$0xff] %v13693_v42  ;;  %v13695_v24 = vld [vmem:[#allocation7 + $0x310] sm:$0xff] }
0x12e8   :  { %15291 = vst [vmem:[#allocation40_spill] sm:$0xff] %v13695_v24 }
0x12e9   :  { %10984 = vpow2.f32 %v8688_v32  ;;  %v13699_v32 = vld [vmem:[#allocation7 + $0x300] sm:$0xff] }
0x12ea   :  { %15292 = vst [vmem:[#allocation20_spill] sm:$0xff] %v13699_v32 }
0x12f4   :  { %v10983_v52 = vpop.eup %10982 }
0x12f5   :  { %v5196_v63 = vadd.f32 1.0, %v10983_v52  ;;  %v15293_v52 = vld [vmem:[#allocation29_spill] sm:$0xff] }
0x12f6   :  { %v10985_v27 = vpop.eup %10984 }
0x12f7   :  { %10986 = vrcp.f32 %v5196_v63  ;;  %v5203_v28 = vadd.f32 1.0, %v10985_v27  ;;  %v4400_v63 = vadd.f32 %v15293_v52, %v15282_v9  ;;  %v15295_v9 = vld [vmem:[#allocation17_spill] sm:$0xff] }
0x1304   :  { %v10987_v61 = vpop.eup %10986 }
0x1305   :  { %v5207_v45 = vmul.f32 %v10987_v61, %v5206_v59 }
0x1307   :  { %v5208_v47 = vadd.f32 %v5207_v45, %v4505_v21 }
0x1309   :  { %10988 = vtanh.f32 %v5208_v47  ;;  %v15294_v47 = vld [vmem:[#allocation16_spill] sm:$0xff] }
0x130a   :  { %10990 = vrcp.f32 %v5203_v28  ;;  %v4402_v28 = vadd.f32 %v15294_v47, %v13382_v10 }
0x1316   :  { %v10989_v29 = vpop.eup %10988 }
0x1317   :  { %v5210_v30 = vsub.f32 %v13474_v33, %v10989_v29  ;;  %v10991_v31 = vpop.eup %10990 }
0x1319   :  { %v5211_v40 = vmul.f32 %v10991_v31, %v5210_v30 }
0x131b   :  { %v13552_v22 = vadd.f32 %v10989_v29, %v5211_v40 }
0x131d   :  { %15286 = vst [vmem:[#allocation30_spill] sm:$0xff] %v13552_v22  ;;  %5332 = vmatmul.mubr.f32.vlgmr.msra.gmra.mxu0 %v13552_v22  ;;  %10238 = vmatmul.mubr.f32.vlgmr.msra.gmra.mxu1 %v13552_v22 }
0x131e   :  { %10241 = vmatpush3.msra.mxu1 %v13186_v58  ;;  %5547 = vmatprep.mubr.f32.mxu0 %v15090_v60  ;;  %v13571_v58 = vld [vmem:[#allocation7 + $0x470] sm:$0xff] }
0x131f   :  { %10242 = vmatprep.subr.mxu1 %v15090_v60  ;;  %10272 = vmatprep.mubr.msk.f32.mxu1 %vm11221_vm0, %v15090_v60  ;;  %15287 = vst [vmem:[#allocation37_spill] sm:$0xff] %v13571_v58 }
0x1320   :  { %10243 = vmatpush3.msra.mxu1 %v13188_v4  ;;  %5483 = vmatprep.subr.mxu0 %v13571_v58  ;;  %v13574_v4 = vld [vmem:[#allocation7 + $0x468] sm:$0xff] }
0x1321   :  { %10244 = vmatprep.subr.mxu1 %v15090_v60  ;;  %5484 = vmatpush1.msra.mxu0 %v13574_v4 }
0x1322   :  { %10245 = vmatpush3.msra.mxu1 %v13193_v8  ;;  %v13577_v8 = vld [vmem:[#allocation7 + $0x458] sm:$0xff] }
0x1323   :  { %10246 = vmatprep.subr.mxu1 %v15090_v60  ;;  %5485 = vmatprep.subr.mxu0 %v13577_v8 }
0x1324   :  { %10247 = vmatpush3.msra.mxu1 %v13198_v17  ;;  %v13580_v17 = vld [vmem:[#allocation7 + $0x450] sm:$0xff] }
0x1325   :  { %10248 = vmatprep.subr.mxu1 %v15090_v60  ;;  %5486 = vmatpush1.msra.mxu0 %v13580_v17 }
0x1326   :  { %10249 = vmatpush3.msra.mxu1 %v13202_v18  ;;  %v13583_v18 = vld [vmem:[#allocation7 + $0x440] sm:$0xff] }
0x1327   :  { %10250 = vmatprep.subr.mxu1 %v15090_v60  ;;  %5487 = vmatprep.subr.mxu0 %v13583_v18 }
0x1328   :  { %10251 = vmatpush3.msra.mxu1 %v13206_v7  ;;  %v13586_v7 = vld [vmem:[#allocation7 + $0x438] sm:$0xff] }
0x1329   :  { %10252 = vmatprep.subr.mxu1 %v15090_v60  ;;  %5488 = vmatpush1.msra.mxu0 %v13586_v7 }
0x132a   :  { %5489 = vmatprep.subr.mxu0 %v13589_v35  ;;  %10253 = vmatpush3.msra.mxu1 %v13611_v53 }
0x132b   :  { %5490 = vmatpush1.msra.mxu0 %v13592_v34  ;;  %10254 = vmatprep.subr.mxu1 %v15090_v60 }
0x132c   :  { %5491 = vmatprep.subr.mxu0 %v13595_v38  ;;  %10255 = vmatpush3.msra.mxu1 %v13619_v11 }
0x132d   :  { %5492 = vmatpush1.msra.mxu0 %v13598_v48  ;;  %10256 = vmatprep.subr.mxu1 %v15090_v60 }
0x132e   :  { %5493 = vmatprep.subr.mxu0 %v13601_v23  ;;  %10257 = vmatpush3.msra.mxu1 %v13625_v5 }
0x132f   :  { %5494 = vmatpush1.msra.mxu0 %v13604_v3  ;;  %10258 = vmatprep.subr.mxu1 %v15090_v60 }
0x1330   :  { %5495 = vmatprep.subr.mxu0 %v13606_v39  ;;  %10259 = vmatpush3.msra.mxu1 %v13635_v54 }
0x1331   :  { %5496 = vmatpush1.msra.mxu0 %v13608_v13  ;;  %10260 = vmatprep.subr.mxu1 %v15090_v60 }
0x1332   :  { %5497 = vmatprep.subr.mxu0 %v13613_v57  ;;  %10261 = vmatpush3.msra.mxu1 %v13645_v12 }
0x1333   :  { %5498 = vmatpush1.msra.mxu0 %v13617_v62  ;;  %10262 = vmatprep.subr.mxu1 %v15090_v60 }
0x1334   :  { %5499 = vmatprep.subr.mxu0 %v13623_v43  ;;  %10263 = vmatpush3.msra.mxu1 %v13655_v46 }
0x1335   :  { %5500 = vmatpush1.msra.mxu0 %v13629_v37  ;;  %10264 = vmatprep.subr.mxu1 %v15090_v60 }
0x1336   :  { %5501 = vmatprep.subr.mxu0 %v13633_v6  ;;  %10265 = vmatpush3.msra.mxu1 %v13665_v19 }
0x1337   :  { %5502 = vmatpush1.msra.mxu0 %v13639_v16  ;;  %10266 = vmatprep.subr.mxu1 %v15090_v60 }
0x1338   :  { %5503 = vmatprep.subr.mxu0 %v13643_v2  ;;  %10267 = vmatpush3.msra.mxu1 %v13675_v51 }
0x1339   :  { %5504 = vmatpush1.msra.mxu0 %v13649_v0  ;;  %10268 = vmatprep.subr.mxu1 %v15090_v60 }
0x133a   :  { %5505 = vmatprep.subr.mxu0 %v13653_v55  ;;  %10269 = vmatpush3.msra.mxu1 %v13685_v56 }
0x133b   :  { %5506 = vmatpush1.msra.mxu0 %v13659_v26  ;;  %10270 = vmatprep.subr.mxu1 %v15090_v60 }
0x133c   :  { %5507 = vmatprep.subr.mxu0 %v13663_v44  ;;  %10271 = vmatpush3.msra.mxu1 %v13695_v24 }
0x133d   :  { %5508 = vmatpush1.msra.mxu0 %v13669_v20  ;;  %10275 = vmatprep.subr.mxu1 %v15090_v60 }
0x133e   :  { %5509 = vmatprep.subr.mxu0 %v13673_v49 }
0x133f   :  { %5510 = vmatpush1.msra.mxu0 %v13679_v25 }
0x1340   :  { %5511 = vmatprep.subr.mxu0 %v13683_v50 }
0x1341   :  { %5512 = vmatpush1.msra.mxu0 %v13689_v1 }
0x1342   :  { %5513 = vmatprep.subr.mxu0 %v13693_v42 }
0x1343   :  { %5514 = vmatpush1.msra.mxu0 %v13699_v32 }
0x1344   :  { %5699 = vmatprep.subr.mxu0 %v13571_v58 }
0x13dd   :  { %v5333_v27 = vpop.f32.mrf.mxu0  ;;  %v5404_v59 = vpop.f32.mrf.mxu1 }
0x13de   :  { %v5408_v61 = vadd.f32 %v5333_v27, %v4400_v63  ;;  %v5422_v15 = vadd.f32 %v13388_v14, %v5404_v59  ;;  %v4510_v63 = vadd.f32 %v15295_v9, %v13392_v36  ;;  %v13763_v9 = vld [vmem:[#allocation7 + $0x448] sm:$0xff]  ;;  %v13767_v59 = vld [vmem:[#allocation7 + $0x430] sm:$0xff] }
0x13df   :  { %v10239_v41 = vpop.f32.mrf.mxu1  ;;  %v5335_v45 = vpop.f32.mrf.mxu0 }
0x13e0   :  { %v8689_v21 = vmul.f32 -1.442695, %v5408_v61  ;;  %v5415_v29 = vadd.f32 %v5335_v45, %v4402_v28 }
0x13e2   :  { %10992 = vpow2.f32 %v8689_v21  ;;  %v8690_v30 = vmul.f32 -1.442695, %v5415_v29 }
0x13e4   :  { %10994 = vpow2.f32 %v8690_v30  ;;  %v13771_v30 = vld [vmem:[#allocation7 + $0x418] sm:$0xff] }
0x13ef   :  { %v10993_v31 = vpop.eup %10992 }
0x13f0   :  { %v5412_v40 = vadd.f32 1.0, %v10993_v31  ;;  %v13775_v31 = vld [vmem:[#allocation7 + $0x400] sm:$0xff] }
0x13f1   :  { %v10995_v33 = vpop.eup %10994 }
0x13f2   :  { %10996 = vrcp.f32 %v5412_v40  ;;  %v5419_v41 = vadd.f32 1.0, %v10995_v33  ;;  %v13759_v33 = vld [vmem:[#allocation7 + $0x460] sm:$0xff]  ;;  %v15297_v40 = vld [vmem:[#allocation24_spill] sm:$0xff] }
0x13ff   :  { %v10997_v52 = vpop.eup %10996 }
0x1400   :  { %v5423_v27 = vmul.f32 %v10997_v52, %v5422_v15  ;;  %v13755_v15 = vld [vmem:[#allocation7 + $0x478] sm:$0xff]  ;;  %v15298_v52 = vld [vmem:[#allocation32_spill] sm:$0xff] }
0x1402   :  { %v5424_v61 = vadd.f32 %v5423_v27, %v4510_v63  ;;  %v4406_v63 = vadd.f32 %v15298_v52, %v15297_v40  ;;  %v15300_v40 = vld [vmem:[#allocation45_spill] sm:$0xff] }
0x1404   :  { %10998 = vtanh.f32 %v5424_v61 }
0x1405   :  { %11000 = vrcp.f32 %v5419_v41 }
0x1411   :  { %v10999_v21 = vpop.eup %10998 }
0x1412   :  { %v5426_v45 = vsub.f32 %v13552_v22, %v10999_v21  ;;  %v11001_v47 = vpop.eup %11000 }
0x1414   :  { %v5427_v28 = vmul.f32 %v11001_v47, %v5426_v45 }
0x1416   :  { %v13716_v29 = vadd.f32 %v10999_v21, %v5427_v28  ;;  %v15299_v28 = vld [vmem:[#allocation41_spill] sm:$0xff] }
0x1417   :  { %v4408_v22 = vadd.f32 %v15299_v28, %v13382_v10  ;;  %v15308_v28 = vld [vmem:[#allocation26_spill] sm:$0xff] }
0x1418   :  { %15296 = vst [vmem:[#allocation31_spill] sm:$0xff] %v13716_v29  ;;  %5548 = vmatmul.mubr.f32.vlgmr.msra.gmra.mxu0 %v13716_v29  ;;  %10273 = vmatmul.mubr.f32.vlgmr.msra.gmra.mxu1 %v13716_v29 }
0x1419   :  { %5700 = vmatpush1.msra.mxu0 %v13574_v4  ;;  %5763 = vmatprep.mubr.f32.mxu0 %v15090_v60 }
0x141a   :  { %5701 = vmatprep.subr.mxu0 %v13577_v8  ;;  %10307 = vmatprep.mubr.msk.f32.mxu1 %vm11221_vm0, %v15090_v60 }
0x141b   :  { %5702 = vmatpush1.msra.mxu0 %v13580_v17  ;;  %10276 = vmatpush3.msra.mxu1 %v13755_v15 }
0x141c   :  { %5703 = vmatprep.subr.mxu0 %v13583_v18  ;;  %10277 = vmatprep.subr.mxu1 %v15090_v60 }
0x141d   :  { %5704 = vmatpush1.msra.mxu0 %v13586_v7  ;;  %10278 = vmatpush3.msra.mxu1 %v13759_v33 }
0x141e   :  { %5705 = vmatprep.subr.mxu0 %v13589_v35  ;;  %10279 = vmatprep.subr.mxu1 %v15090_v60 }
0x141f   :  { %5706 = vmatpush1.msra.mxu0 %v13592_v34  ;;  %10280 = vmatpush3.msra.mxu1 %v13763_v9 }
0x1420   :  { %5707 = vmatprep.subr.mxu0 %v13595_v38  ;;  %10281 = vmatprep.subr.mxu1 %v15090_v60 }
0x1421   :  { %5708 = vmatpush1.msra.mxu0 %v13598_v48  ;;  %10282 = vmatpush3.msra.mxu1 %v13767_v59 }
0x1422   :  { %5709 = vmatprep.subr.mxu0 %v13601_v23  ;;  %10283 = vmatprep.subr.mxu1 %v15090_v60 }
0x1423   :  { %5710 = vmatpush1.msra.mxu0 %v13604_v3  ;;  %10284 = vmatpush3.msra.mxu1 %v13771_v30 }
0x1424   :  { %5711 = vmatprep.subr.mxu0 %v13606_v39  ;;  %10285 = vmatprep.subr.mxu1 %v15090_v60 }
0x1425   :  { %5712 = vmatpush1.msra.mxu0 %v13608_v13  ;;  %10286 = vmatpush3.msra.mxu1 %v13775_v31 }
0x1426   :  { %5713 = vmatprep.subr.mxu0 %v13613_v57  ;;  %10287 = vmatprep.subr.mxu1 %v15090_v60 }
0x1427   :  { %5714 = vmatpush1.msra.mxu0 %v13617_v62  ;;  %10288 = vmatpush3.msra.mxu1 %v13611_v53 }
0x1428   :  { %5715 = vmatprep.subr.mxu0 %v13623_v43  ;;  %10289 = vmatprep.subr.mxu1 %v15090_v60 }
0x1429   :  { %5716 = vmatpush1.msra.mxu0 %v13629_v37  ;;  %10290 = vmatpush3.msra.mxu1 %v13619_v11 }
0x142a   :  { %5717 = vmatprep.subr.mxu0 %v13633_v6  ;;  %10291 = vmatprep.subr.mxu1 %v15090_v60 }
0x142b   :  { %5718 = vmatpush1.msra.mxu0 %v13639_v16  ;;  %10292 = vmatpush3.msra.mxu1 %v13625_v5 }
0x142c   :  { %5719 = vmatprep.subr.mxu0 %v13643_v2  ;;  %10293 = vmatprep.subr.mxu1 %v15090_v60 }
0x142d   :  { %5720 = vmatpush1.msra.mxu0 %v13649_v0  ;;  %10294 = vmatpush3.msra.mxu1 %v13635_v54 }
0x142e   :  { %5721 = vmatprep.subr.mxu0 %v13653_v55  ;;  %10295 = vmatprep.subr.mxu1 %v15090_v60 }
0x142f   :  { %5722 = vmatpush1.msra.mxu0 %v13659_v26  ;;  %10296 = vmatpush3.msra.mxu1 %v13645_v12 }
0x1430   :  { %5723 = vmatprep.subr.mxu0 %v13663_v44  ;;  %10297 = vmatprep.subr.mxu1 %v15090_v60 }
0x1431   :  { %5724 = vmatpush1.msra.mxu0 %v13669_v20  ;;  %10298 = vmatpush3.msra.mxu1 %v13655_v46 }
0x1432   :  { %5725 = vmatprep.subr.mxu0 %v13673_v49  ;;  %10299 = vmatprep.subr.mxu1 %v15090_v60 }
0x1433   :  { %5726 = vmatpush1.msra.mxu0 %v13679_v25  ;;  %10300 = vmatpush3.msra.mxu1 %v13665_v19 }
0x1434   :  { %5727 = vmatprep.subr.mxu0 %v13683_v50  ;;  %10301 = vmatprep.subr.mxu1 %v15090_v60 }
0x1435   :  { %5728 = vmatpush1.msra.mxu0 %v13689_v1  ;;  %10302 = vmatpush3.msra.mxu1 %v13675_v51 }
0x1436   :  { %5729 = vmatprep.subr.mxu0 %v13693_v42  ;;  %10303 = vmatprep.subr.mxu1 %v15090_v60 }
0x1437   :  { %5730 = vmatpush1.msra.mxu0 %v13699_v32  ;;  %10304 = vmatpush3.msra.mxu1 %v13685_v56 }
0x1438   :  { %5915 = vmatprep.subr.mxu0 %v13571_v58  ;;  %10305 = vmatprep.subr.mxu1 %v15090_v60 }
0x1439   :  { %10306 = vmatpush3.msra.mxu1 %v13695_v24 }
0x143a   :  { %10310 = vmatprep.subr.mxu1 %v15090_v60 }
0x14d8   :  { %v5549_v27 = vpop.f32.mrf.mxu0  ;;  %v5620_v61 = vpop.f32.mrf.mxu1 }
0x14d9   :  { %v5624_v41 = vadd.f32 %v5549_v27, %v4406_v63  ;;  %v5638_v1 = vadd.f32 %v13388_v14, %v5620_v61  ;;  %v4515_v63 = vadd.f32 %v15300_v40, %v13392_v36  ;;  %v15301_v14 = vld [vmem:[#allocation18_spill] sm:$0xff]  ;;  %v15306_v40 = vld [vmem:[#allocation37_spill] sm:$0xff]  ;;  %v15307_v61 = vld [vmem:[#allocation24_spill] sm:$0xff] }
0x14da   :  { %v10274_v21 = vpop.f32.mrf.mxu1  ;;  %v5551_v47 = vpop.f32.mrf.mxu0 }
0x14db   :  { %v8691_v45 = vmul.f32 -1.442695, %v5624_v41  ;;  %v5631_v58 = vadd.f32 %v5551_v47, %v4408_v22 }
0x14dd   :  { %11002 = vpow2.f32 %v8691_v45  ;;  %v8692_v32 = vmul.f32 -1.442695, %v5631_v58 }
0x14df   :  { %11004 = vpow2.f32 %v8692_v32  ;;  %v15305_v32 = vld [vmem:[#allocation40_spill] sm:$0xff] }
0x14ea   :  { %v11003_v42 = vpop.eup %11002 }
0x14eb   :  { %v5628_v56 = vadd.f32 1.0, %v11003_v42 }
0x14ec   :  { %v11005_v24 = vpop.eup %11004 }
0x14ed   :  { %11006 = vrcp.f32 %v5628_v56  ;;  %v5635_v21 = vadd.f32 1.0, %v11005_v24  ;;  %v15302_v56 = vld [vmem:[#allocation39_spill] sm:$0xff]  ;;  %v15304_v24 = vld [vmem:[#allocation20_spill] sm:$0xff] }
0x14fa   :  { %v11007_v52 = vpop.eup %11006 }
0x14fb   :  { %v5639_v27 = vmul.f32 %v11007_v52, %v5638_v1  ;;  %v15303_v1 = vld [vmem:[#allocation23_spill] sm:$0xff]  ;;  %v4412_v52 = vadd.f32 %v15308_v28, %v15307_v61 }
0x14fc   :  { %v13885_v28 = vld [vmem:[%s14925_s4 + $0x2] ss:$0 sm:$0xff] }
0x14fd   :  { %v5640_v41 = vadd.f32 %v5639_v27, %v4515_v63 }
0x14ff   :  { %11008 = vtanh.f32 %v5640_v41 }
0x1500   :  { %11010 = vrcp.f32 %v5635_v21 }
0x150c   :  { %v11009_v45 = vpop.eup %11008 }
0x150d   :  { %v5642_v22 = vsub.f32 %v13716_v29, %v11009_v45  ;;  %v11011_v58 = vpop.eup %11010 }
0x150f   :  { %v5643_v47 = vmul.f32 %v11011_v58, %v5642_v22  ;;  %v15309_v58 = vld [vmem:[#allocation36_spill] sm:$0xff] }
0x1511   :  { %v13807_v42 = vadd.f32 %v11009_v45, %v5643_v47  ;;  %v4414_v47 = vadd.f32 %v15309_v58, %v13382_v10 }
0x1513   :  { %5764 = vmatmul.mubr.f32.vlgmr.msra.gmra.mxu0 %v13807_v42  ;;  %10308 = vmatmul.mubr.f32.vlgmr.msra.gmra.mxu1 %v13807_v42 }
0x1514   :  { %5916 = vmatpush1.msra.mxu0 %v13574_v4  ;;  %10311 = vmatpush3.msra.mxu1 %v13755_v15 }
0x1515   :  { %5917 = vmatprep.subr.mxu0 %v13577_v8  ;;  %10312 = vmatprep.subr.mxu1 %v15090_v60 }
0x1516   :  { %5918 = vmatpush1.msra.mxu0 %v13580_v17  ;;  %10313 = vmatpush3.msra.mxu1 %v13759_v33 }
0x1517   :  { %5919 = vmatprep.subr.mxu0 %v13583_v18  ;;  %10314 = vmatprep.subr.mxu1 %v15090_v60 }
0x1518   :  { %5920 = vmatpush1.msra.mxu0 %v13586_v7  ;;  %10315 = vmatpush3.msra.mxu1 %v13763_v9 }
0x1519   :  { %5921 = vmatprep.subr.mxu0 %v13589_v35  ;;  %10316 = vmatprep.subr.mxu1 %v15090_v60 }
0x151a   :  { %5922 = vmatpush1.msra.mxu0 %v13592_v34  ;;  %10317 = vmatpush3.msra.mxu1 %v13767_v59 }
0x151b   :  { %5923 = vmatprep.subr.mxu0 %v13595_v38  ;;  %10318 = vmatprep.subr.mxu1 %v15090_v60 }
0x151c   :  { %5924 = vmatpush1.msra.mxu0 %v13598_v48  ;;  %10319 = vmatpush3.msra.mxu1 %v13771_v30 }
0x151d   :  { %5925 = vmatprep.subr.mxu0 %v13601_v23  ;;  %10320 = vmatprep.subr.mxu1 %v15090_v60 }
0x151e   :  { %5926 = vmatpush1.msra.mxu0 %v13604_v3  ;;  %10321 = vmatpush3.msra.mxu1 %v13775_v31 }
0x151f   :  { %5927 = vmatprep.subr.mxu0 %v13606_v39  ;;  %10322 = vmatprep.subr.mxu1 %v15090_v60 }
0x1520   :  { %5928 = vmatpush1.msra.mxu0 %v13608_v13  ;;  %10323 = vmatpush3.msra.mxu1 %v13611_v53 }
0x1521   :  { %5929 = vmatprep.subr.mxu0 %v13613_v57  ;;  %10324 = vmatprep.subr.mxu1 %v15090_v60 }
0x1522   :  { %5930 = vmatpush1.msra.mxu0 %v13617_v62  ;;  %10325 = vmatpush3.msra.mxu1 %v13619_v11 }
0x1523   :  { %5931 = vmatprep.subr.mxu0 %v13623_v43  ;;  %10326 = vmatprep.subr.mxu1 %v15090_v60 }
0x1524   :  { %5932 = vmatpush1.msra.mxu0 %v13629_v37  ;;  %10327 = vmatpush3.msra.mxu1 %v13625_v5 }
0x1525   :  { %5933 = vmatprep.subr.mxu0 %v13633_v6  ;;  %10328 = vmatprep.subr.mxu1 %v15090_v60 }
0x1526   :  { %5934 = vmatpush1.msra.mxu0 %v13639_v16  ;;  %10329 = vmatpush3.msra.mxu1 %v13635_v54 }
0x1527   :  { %5935 = vmatprep.subr.mxu0 %v13643_v2  ;;  %10330 = vmatprep.subr.mxu1 %v15090_v60 }
0x1528   :  { %5936 = vmatpush1.msra.mxu0 %v13649_v0  ;;  %10331 = vmatpush3.msra.mxu1 %v13645_v12 }
0x1529   :  { %5937 = vmatprep.subr.mxu0 %v13653_v55  ;;  %10332 = vmatprep.subr.mxu1 %v15090_v60 }
0x152a   :  { %5938 = vmatpush1.msra.mxu0 %v13659_v26  ;;  %10333 = vmatpush3.msra.mxu1 %v13655_v46 }
0x152b   :  { %5939 = vmatprep.subr.mxu0 %v13663_v44  ;;  %10334 = vmatprep.subr.mxu1 %v15090_v60 }
0x152c   :  { %5940 = vmatpush1.msra.mxu0 %v13669_v20  ;;  %10335 = vmatpush3.msra.mxu1 %v13665_v19 }
0x152d   :  { %5941 = vmatprep.subr.mxu0 %v13673_v49  ;;  %10336 = vmatprep.subr.mxu1 %v15090_v60 }
0x152e   :  { %5942 = vmatpush1.msra.mxu0 %v13679_v25  ;;  %10337 = vmatpush3.msra.mxu1 %v13675_v51 }
0x152f   :  { %5943 = vmatprep.subr.mxu0 %v13683_v50  ;;  %10338 = vmatprep.subr.mxu1 %v15090_v60 }
0x1530   :  { %5944 = vmatpush1.msra.mxu0 %v15301_v14  ;;  %10339 = vmatpush3.msra.mxu1 %v15302_v56 }
0x1531   :  { %5945 = vmatprep.subr.mxu0 %v15303_v1  ;;  %10340 = vmatprep.subr.mxu1 %v15090_v60 }
0x1532   :  { %5946 = vmatpush1.msra.mxu0 %v15304_v24  ;;  %5979 = vmatprep.mubr.f32.mxu0 %v15090_v60 }
0x1533   :  { %10341 = vmatpush3.msra.mxu1 %v15305_v32  ;;  %10342 = vmatprep.mubr.msk.f32.mxu1 %vm11221_vm0, %v15090_v60 }
0x1534   :  { %6131 = vmatprep.subr.mxu0 %v15306_v40  ;;  %10345 = vmatprep.subr.mxu1 %v15090_v60 }
0x15d3   :  { %v5765_v63 = vpop.f32.mrf.mxu0  ;;  %v5836_v27 = vpop.f32.mrf.mxu1 }
0x15d4   :  { %v5840_v41 = vadd.f32 %v5765_v63, %v4412_v52  ;;  %v5854_v52 = vadd.f32 %v13885_v28, %v5836_v27  ;;  %v6339_v27 = vld [vmem:[#allocation5 + $0x598] sm:$0xff] }
0x15d5   :  { %v10309_v21 = vpop.f32.mrf.mxu1  ;;  %v5767_v22 = vpop.f32.mrf.mxu0 }
0x15d6   :  { %v8693_v45 = vmul.f32 -1.442695, %v5840_v41  ;;  %v5847_v29 = vadd.f32 %v5767_v22, %v4414_v47  ;;  %v15310_v41 = vld [vmem:[#allocation21_spill] sm:$0xff] }
0x15d7   :  { %v4520_v21 = vadd.f32 %v15310_v41, %v13392_v36  ;;  %v6334_v41 = vld [vmem:[#allocation5 + $0x570] sm:$0xff] }
0x15d8   :  { %11012 = vpow2.f32 %v8693_v45  ;;  %v8694_v32 = vmul.f32 -1.442695, %v5847_v29 }
0x15da   :  { %11014 = vpow2.f32 %v8694_v32 }
0x15e5   :  { %v11013_v24 = vpop.eup %11012 }
0x15e6   :  { %v5844_v1 = vadd.f32 1.0, %v11013_v24 }
0x15e7   :  { %v11015_v40 = vpop.eup %11014 }
0x15e8   :  { %11016 = vrcp.f32 %v5844_v1  ;;  %v5851_v22 = vadd.f32 1.0, %v11015_v40  ;;  %v6337_v40 = vld [vmem:[#allocation5 + $0x588] sm:$0xff] }
0x15f5   :  { %v11017_v63 = vpop.eup %11016 }
0x15f6   :  { %v5855_v45 = vmul.f32 %v11017_v63, %v5854_v52  ;;  %v6335_v52 = vld [vmem:[#allocation5 + $0x578] sm:$0xff]  ;;  %v6336_v63 = vld [vmem:[#allocation5 + $0x580] sm:$0xff] }
0x15f8   :  { %v5856_v58 = vadd.f32 %v5855_v45, %v4520_v21  ;;  %v6332_v21 = vld [vmem:[#allocation5 + $0x560] sm:$0xff]  ;;  %v6333_v45 = vld [vmem:[#allocation5 + $0x568] sm:$0xff] }
0x15fa   :  { %11018 = vtanh.f32 %v5856_v58  ;;  %v6331_v58 = vld [vmem:[#allocation5 + $0x558] sm:$0xff] }
0x15fb   :  { %11020 = vrcp.f32 %v5851_v22  ;;  %v6329_v22 = vld [vmem:[#allocation5 + $0x548] sm:$0xff] }
0x1607   :  { %v11019_v29 = vpop.eup %11018 }
0x1608   :  { %v5858_v1 = vsub.f32 %v13807_v42, %v11019_v29  ;;  %v11021_v24 = vpop.eup %11020 }
0x160a   :  { %v5859_v32 = vmul.f32 %v11021_v24, %v5858_v1  ;;  %v6328_v1 = vld [vmem:[#allocation5 + $0x540] sm:$0xff]  ;;  %v6326_v24 = vld [vmem:[#allocation5 + $0x530] sm:$0xff] }
0x160c   :  { %v13891_v47 = vadd.f32 %v11019_v29, %v5859_v32  ;;  %v6330_v29 = vld [vmem:[#allocation5 + $0x550] sm:$0xff]  ;;  %v6327_v32 = vld [vmem:[#allocation5 + $0x538] sm:$0xff] }
0x160e   :  { %5980 = vmatmul.mubr.f32.vlgmr.msra.gmra.mxu0 %v13891_v47  ;;  %10343 = vmatmul.mubr.f32.vlgmr.msra.gmra.mxu1 %v13891_v47 }
0x160f   :  { %6132 = vmatpush1.msra.mxu0 %v13574_v4  ;;  %10346 = vmatpush3.msra.mxu1 %v13755_v15  ;;  %v15311_v4 = vld [vmem:[#allocation23_spill] sm:$0xff] }
0x1610   :  { %6133 = vmatprep.subr.mxu0 %v13577_v8  ;;  %10347 = vmatprep.subr.mxu1 %v15090_v60  ;;  %v15312_v8 = vld [vmem:[#allocation20_spill] sm:$0xff]  ;;  %v6344_v15 = vld [vmem:[#allocation5 + $0x5c0] sm:$0xff] }
0x1611   :  { %6134 = vmatpush1.msra.mxu0 %v13580_v17  ;;  %10348 = vmatpush3.msra.mxu1 %v13759_v33  ;;  %v15313_v17 = vld [vmem:[#allocation40_spill] sm:$0xff] }
0x1612   :  { %6135 = vmatprep.subr.mxu0 %v13583_v18  ;;  %10349 = vmatprep.subr.mxu1 %v15090_v60  ;;  %v6350_v18 = vld [vmem:[#allocation5 + $0x5f0] sm:$0xff]  ;;  %v6345_v33 = vld [vmem:[#allocation5 + $0x5c8] sm:$0xff] }
0x1613   :  { %6136 = vmatpush1.msra.mxu0 %v13586_v7  ;;  %10350 = vmatpush3.msra.mxu1 %v13763_v9  ;;  %v6351_v7 = vld [vmem:[#allocation5 + $0x5f8] sm:$0xff] }
0x1614   :  { %6137 = vmatprep.subr.mxu0 %v13589_v35  ;;  %10351 = vmatprep.subr.mxu1 %v15090_v60  ;;  %v15314_v35 = vld [vmem:[#allocation34_spill] sm:$0xff] }
0x1615   :  { %6138 = vmatpush1.msra.mxu0 %v13592_v34  ;;  %10352 = vmatpush3.msra.mxu1 %v13767_v59  ;;  %v4418_v34 = vadd.f32 %v15314_v35, %v15307_v61  ;;  %v6343_v9 = vld [vmem:[#allocation5 + $0x5b8] sm:$0xff]  ;;  %v15317_v59 = vld [vmem:[#allocation43_spill] sm:$0xff]  ;;  %v6321_v35 = vld [vmem:[#allocation5 + $0x508] sm:$0xff] }
0x1616   :  { %6139 = vmatprep.subr.mxu0 %v13595_v38  ;;  %10353 = vmatprep.subr.mxu1 %v15090_v60 }
0x1617   :  { %6140 = vmatpush1.msra.mxu0 %v13598_v48  ;;  %10354 = vmatpush3.msra.mxu1 %v13771_v30  ;;  %v6341_v30 = vld [vmem:[#allocation5 + $0x5a8] sm:$0xff] }
0x1618   :  { %6141 = vmatprep.subr.mxu0 %v13601_v23  ;;  %10355 = vmatprep.subr.mxu1 %v15090_v60 }
0x1619   :  { %6142 = vmatpush1.msra.mxu0 %v13604_v3  ;;  %10356 = vmatpush3.msra.mxu1 %v13775_v31  ;;  %v6342_v31 = vld [vmem:[#allocation5 + $0x5b0] sm:$0xff] }
0x161a   :  { %6143 = vmatprep.subr.mxu0 %v13606_v39  ;;  %10357 = vmatprep.subr.mxu1 %v15090_v60 }
0x161b   :  { %6144 = vmatpush1.msra.mxu0 %v13608_v13  ;;  %10358 = vmatpush3.msra.mxu1 %v13611_v53  ;;  %v15315_v53 = vld [vmem:[#allocation46_spill] sm:$0xff] }
0x161c   :  { %6145 = vmatprep.subr.mxu0 %v13613_v57  ;;  %10359 = vmatprep.subr.mxu1 %v15090_v60  ;;  %v4420_v57 = vadd.f32 %v15315_v53, %v13382_v10  ;;  %v6311_v53 = vld [vmem:[#allocation5 + $0x4b8] sm:$0xff] }
0x161d   :  { %6146 = vmatpush1.msra.mxu0 %v13617_v62  ;;  %10360 = vmatpush3.msra.mxu1 %v13619_v11 }
0x161e   :  { %6147 = vmatprep.subr.mxu0 %v13623_v43  ;;  %10361 = vmatprep.subr.mxu1 %v15090_v60 }
0x161f   :  { %6148 = vmatpush1.msra.mxu0 %v13629_v37  ;;  %10362 = vmatpush3.msra.mxu1 %v13625_v5 }
0x1620   :  { %6149 = vmatprep.subr.mxu0 %v13633_v6  ;;  %10363 = vmatprep.subr.mxu1 %v15090_v60 }
0x1621   :  { %6150 = vmatpush1.msra.mxu0 %v13639_v16  ;;  %10364 = vmatpush3.msra.mxu1 %v13635_v54  ;;  %v15316_v16 = vld [vmem:[#allocation44_spill] sm:$0xff] }
0x1622   :  { %6151 = vmatprep.subr.mxu0 %v13643_v2  ;;  %10365 = vmatprep.subr.mxu1 %v15090_v60  ;;  %v4525_v2 = vadd.f32 %v15316_v16, %v13392_v36  ;;  %v15318_v16 = vld [vmem:[#allocation22_spill] sm:$0xff] }
0x1623   :  { %6152 = vmatpush1.msra.mxu0 %v13649_v0  ;;  %10366 = vmatpush3.msra.mxu1 %v13645_v12 }
0x1624   :  { %6153 = vmatprep.subr.mxu0 %v13653_v55  ;;  %10367 = vmatprep.subr.mxu1 %v15090_v60 }
0x1625   :  { %6154 = vmatpush1.msra.mxu0 %v13659_v26  ;;  %10368 = vmatpush3.msra.mxu1 %v13655_v46 }
0x1626   :  { %6155 = vmatprep.subr.mxu0 %v13663_v44  ;;  %10369 = vmatprep.subr.mxu1 %v15090_v60 }
0x1627   :  { %6156 = vmatpush1.msra.mxu0 %v13669_v20  ;;  %10370 = vmatpush3.msra.mxu1 %v13665_v19 }
0x1628   :  { %6157 = vmatprep.subr.mxu0 %v13673_v49  ;;  %10371 = vmatprep.subr.mxu1 %v15090_v60  ;;  %v6349_v49 = vld [vmem:[#allocation5 + $0x5e8] sm:$0xff] }
0x1629   :  { %6158 = vmatpush1.msra.mxu0 %v13679_v25  ;;  %10372 = vmatpush3.msra.mxu1 %v13675_v51  ;;  %v6347_v51 = vld [vmem:[#allocation5 + $0x5d8] sm:$0xff]  ;;  %v6348_v25 = vld [vmem:[#allocation5 + $0x5e0] sm:$0xff] }
0x162a   :  { %6159 = vmatprep.subr.mxu0 %v13683_v50  ;;  %10373 = vmatprep.subr.mxu1 %v15090_v60  ;;  %v6346_v50 = vld [vmem:[#allocation5 + $0x5d0] sm:$0xff] }
0x162b   :  { %6160 = vmatpush1.msra.mxu0 %v15301_v14  ;;  %10374 = vmatpush3.msra.mxu1 %v15302_v56  ;;  %v6340_v14 = vld [vmem:[#allocation5 + $0x5a0] sm:$0xff]  ;;  %v6338_v56 = vld [vmem:[#allocation5 + $0x590] sm:$0xff] }
0x162c   :  { %6161 = vmatprep.subr.mxu0 %v15311_v4  ;;  %10375 = vmatprep.subr.mxu1 %v15090_v60  ;;  %v6325_v4 = vld [vmem:[#allocation5 + $0x528] sm:$0xff] }
0x162d   :  { %6162 = vmatpush1.msra.mxu0 %v15312_v8  ;;  %10376 = vmatpush3.msra.mxu1 %v15313_v17  ;;  %v6323_v8 = vld [vmem:[#allocation5 + $0x518] sm:$0xff]  ;;  %v6324_v17 = vld [vmem:[#allocation5 + $0x520] sm:$0xff] }
0x162e   :  { %6195 = vmatprep.mubr.f32.mxu0 %v15090_v60  ;;  %10377 = vmatprep.mubr.msk.f32.mxu1 %vm11221_vm0, %v15090_v60 }
0x162f   :  { %6370 = vmatprep.subr.mxu0 %v6350_v18  ;;  %10380 = vmatprep.subr.mxu1 %v6351_v7  ;;  %v6322_v18 = vld [vmem:[#allocation5 + $0x510] sm:$0xff] }
0x16ce   :  { %v5981_v38 = vpop.f32.mrf.mxu0  ;;  %v6052_v48 = vpop.f32.mrf.mxu1 }
0x16cf   :  { %v6056_v23 = vadd.f32 %v5981_v38, %v4418_v34  ;;  %v6070_v6 = vadd.f32 %v13885_v28, %v6052_v48  ;;  %v6319_v34 = vld [vmem:[#allocation5 + $0x4f8] sm:$0xff]  ;;  %v6317_v38 = vld [vmem:[#allocation5 + $0x4e8] sm:$0xff]  ;;  %v6318_v48 = vld [vmem:[#allocation5 + $0x4f0] sm:$0xff] }
0x16d0   :  { %v10344_v3 = vpop.f32.mrf.mxu1  ;;  %v5983_v13 = vpop.f32.mrf.mxu0 }
0x16d1   :  { %v8695_v39 = vmul.f32 -1.442695, %v6056_v23  ;;  %v6063_v62 = vadd.f32 %v5983_v13, %v4420_v57  ;;  %v6316_v23 = vld [vmem:[#allocation5 + $0x4e0] sm:$0xff]  ;;  %v6314_v3 = vld [vmem:[#allocation5 + $0x4d0] sm:$0xff]  ;;  %v6313_v13 = vld [vmem:[#allocation5 + $0x4c8] sm:$0xff] }
0x16d2   :  { %v6312_v57 = vld [vmem:[#allocation5 + $0x4c0] sm:$0xff] }
0x16d3   :  { %11022 = vpow2.f32 %v8695_v39  ;;  %v8696_v11 = vmul.f32 -1.442695, %v6063_v62  ;;  %v6315_v39 = vld [vmem:[#allocation5 + $0x4d8] sm:$0xff]  ;;  %v6310_v62 = vld [vmem:[#allocation5 + $0x4b0] sm:$0xff] }
0x16d5   :  { %11024 = vpow2.f32 %v8696_v11  ;;  %v6308_v11 = vld [vmem:[#allocation5 + $0x4a0] sm:$0xff] }
0x16e0   :  { %v11023_v43 = vpop.eup %11022 }
0x16e1   :  { %v6060_v5 = vadd.f32 1.0, %v11023_v43  ;;  %v6309_v43 = vld [vmem:[#allocation5 + $0x4a8] sm:$0xff] }
0x16e2   :  { %v11025_v37 = vpop.eup %11024 }
0x16e3   :  { %11026 = vrcp.f32 %v6060_v5  ;;  %v6067_v55 = vadd.f32 1.0, %v11025_v37  ;;  %v6307_v5 = vld [vmem:[#allocation5 + $0x498] sm:$0xff]  ;;  %v6305_v37 = vld [vmem:[#allocation5 + $0x488] sm:$0xff] }
0x16f0   :  { %v11027_v54 = vpop.eup %11026 }
0x16f1   :  { %v6071_v12 = vmul.f32 %v11027_v54, %v6070_v6  ;;  %v6306_v6 = vld [vmem:[#allocation5 + $0x490] sm:$0xff]  ;;  %v6304_v54 = vld [vmem:[#allocation5 + $0x480] sm:$0xff] }
0x16f3   :  { %v6072_v0 = vadd.f32 %v6071_v12, %v4525_v2  ;;  %v15319_v2 = vld [vmem:[#allocation30_spill] sm:$0xff]  ;;  %v15320_v12 = vld [vmem:[#allocation31_spill] sm:$0xff] }
0x16f5   :  { %11028 = vtanh.f32 %v6072_v0  ;;  %v13995_v0 = vld [vmem:[#allocation7 + $0x5f0] sm:$0xff] }
0x16f6   :  { %11030 = vrcp.f32 %v6067_v55  ;;  %15321 = vst [vmem:[#allocation33_spill] sm:$0xff] %v13995_v0  ;;  %v13998_v55 = vld [vmem:[#allocation7 + $0x5e8] sm:$0xff] }
0x1702   :  { %v11029_v46 = vpop.eup %11028 }
0x1703   :  { %v6074_v26 = vsub.f32 %v13891_v47, %v11029_v46  ;;  %v11031_v44 = vpop.eup %11030 }
0x1705   :  { %v6075_v19 = vmul.f32 %v11031_v44, %v6074_v26  ;;  %v14010_v26 = vld [vmem:[#allocation7 + $0x5b8] sm:$0xff]  ;;  %v14013_v44 = vld [vmem:[#allocation7 + $0x5a8] sm:$0xff] }
0x1707   :  { %v13968_v20 = vadd.f32 %v11029_v46, %v6075_v19  ;;  %v14001_v46 = vld [vmem:[#allocation7 + $0x5d8] sm:$0xff]  ;;  %v14016_v19 = vld [vmem:[#allocation7 + $0x5a0] sm:$0xff] }
0x1709   :  { %6196 = vmatmul.mubr.f32.vlgmr.msra.gmra.mxu0 %v13968_v20  ;;  %10378 = vmatmul.mubr.f32.vlgmr.msra.gmra.mxu1 %v13968_v20 }
0x170a   :  { %6371 = vmatpush1.msra.mxu0 %v6349_v49  ;;  %10381 = vmatpush3.msra.mxu1 %v6351_v7  ;;  %v6320_v7 = vld [vmem:[#allocation5 + $0x500] sm:$0xff]  ;;  %v14019_v49 = vld [vmem:[#allocation7 + $0x590] sm:$0xff] }
0x170b   :  { %6372 = vmatprep.subr.mxu0 %v6347_v51  ;;  %10382 = vmatprep.subr.mxu1 %v6348_v25  ;;  %v14022_v51 = vld [vmem:[#allocation7 + $0x588] sm:$0xff] }
0x170c   :  { %10412 = vmatprep.mubr.f32.mxu1 %v15317_v59  ;;  %6373 = vmatpush1.msra.mxu0 %v6346_v50  ;;  %v14028_v50 = vld [vmem:[#allocation7 + $0x570] sm:$0xff] }
0x170d   :  { %10383 = vmatpush3.msra.mxu1 %v6348_v25  ;;  %6374 = vmatprep.subr.mxu0 %v6344_v15  ;;  %v14025_v25 = vld [vmem:[#allocation7 + $0x578] sm:$0xff]  ;;  %v14031_v15 = vld [vmem:[#allocation7 + $0x560] sm:$0xff] }
0x170e   :  { %10384 = vmatprep.subr.mxu1 %v6345_v33  ;;  %6375 = vmatpush1.msra.mxu0 %v6343_v9  ;;  %v14037_v9 = vld [vmem:[#allocation7 + $0x548] sm:$0xff] }
0x170f   :  { %10385 = vmatpush3.msra.mxu1 %v6345_v33  ;;  %6376 = vmatprep.subr.mxu0 %v6341_v30  ;;  %v14034_v33 = vld [vmem:[#allocation7 + $0x558] sm:$0xff]  ;;  %v14043_v30 = vld [vmem:[#allocation7 + $0x530] sm:$0xff] }
0x1710   :  { %10386 = vmatprep.subr.mxu1 %v6342_v31  ;;  %6377 = vmatpush1.msra.mxu0 %v6340_v14  ;;  %v14049_v14 = vld [vmem:[#allocation7 + $0x518] sm:$0xff] }
0x1711   :  { %10387 = vmatpush3.msra.mxu1 %v6342_v31  ;;  %6378 = vmatprep.subr.mxu0 %v6338_v56  ;;  %v14046_v31 = vld [vmem:[#allocation7 + $0x528] sm:$0xff]  ;;  %v14052_v56 = vld [vmem:[#allocation7 + $0x510] sm:$0xff] }
0x1712   :  { %10388 = vmatprep.subr.mxu1 %v6339_v27  ;;  %6379 = vmatpush1.msra.mxu0 %v6337_v40  ;;  %v14058_v40 = vld [vmem:[#allocation7 + $0x4f8] sm:$0xff] }
0x1713   :  { %10389 = vmatpush3.msra.mxu1 %v6339_v27  ;;  %6380 = vmatprep.subr.mxu0 %v6335_v52  ;;  %v14055_v27 = vld [vmem:[#allocation7 + $0x500] sm:$0xff]  ;;  %v14061_v52 = vld [vmem:[#allocation7 + $0x4e8] sm:$0xff] }
0x1714   :  { %10390 = vmatprep.subr.mxu1 %v6336_v63  ;;  %6381 = vmatpush1.msra.mxu0 %v6334_v41  ;;  %v14067_v41 = vld [vmem:[#allocation7 + $0x4d0] sm:$0xff] }
0x1715   :  { %10391 = vmatpush3.msra.mxu1 %v6336_v63  ;;  %6382 = vmatprep.subr.mxu0 %v6332_v21  ;;  %v14064_v63 = vld [vmem:[#allocation7 + $0x4e0] sm:$0xff]  ;;  %v14070_v21 = vld [vmem:[#allocation7 + $0x4c8] sm:$0xff] }
0x1716   :  { %10392 = vmatprep.subr.mxu1 %v6333_v45  ;;  %6383 = vmatpush1.msra.mxu0 %v6331_v58  ;;  %v14076_v58 = vld [vmem:[#allocation7 + $0x4b0] sm:$0xff] }
0x1717   :  { %10393 = vmatpush3.msra.mxu1 %v6333_v45  ;;  %6384 = vmatprep.subr.mxu0 %v6329_v22  ;;  %v14073_v45 = vld [vmem:[#allocation7 + $0x4b8] sm:$0xff]  ;;  %v14079_v22 = vld [vmem:[#allocation7 + $0x4a0] sm:$0xff] }
0x1718   :  { %10394 = vmatprep.subr.mxu1 %v6330_v29  ;;  %6385 = vmatpush1.msra.mxu0 %v6328_v1  ;;  %v14083_v1 = vld [vmem:[#allocation7 + $0x488] sm:$0xff] }
0x1719   :  { %10395 = vmatpush3.msra.mxu1 %v6330_v29  ;;  %6386 = vmatprep.subr.mxu0 %v6326_v24  ;;  %v14081_v29 = vld [vmem:[#allocation7 + $0x498] sm:$0xff]  ;;  %15323 = vst [vmem:[#allocation15_spill] sm:$0xff] %v14083_v1  ;;  %v14086_v24 = vld [vmem:[#allocation7 + $0x480] sm:$0xff] }
0x171a   :  { %10396 = vmatprep.subr.mxu1 %v6327_v32  ;;  %6387 = vmatpush1.msra.mxu0 %v6325_v4  ;;  %15322 = vst [vmem:[#allocation25_spill] sm:$0xff] %v14081_v29  ;;  %15324 = vst [vmem:[#allocation29_spill] sm:$0xff] %v14086_v24  ;;  %v14092_v4 = vld [vmem:[#allocation7 + $0x5e0] sm:$0xff] }
0x171b   :  { %10397 = vmatpush3.msra.mxu1 %v6327_v32  ;;  %6388 = vmatprep.subr.mxu0 %v6323_v8  ;;  %v14090_v32 = vld [vmem:[#allocation7 + $0x5f8] sm:$0xff]  ;;  %v14097_v8 = vld [vmem:[#allocation7 + $0x5c8] sm:$0xff] }
0x171c   :  { %10398 = vmatprep.subr.mxu1 %v6324_v17  ;;  %6389 = vmatpush1.msra.mxu0 %v6322_v18  ;;  %v14106_v18 = vld [vmem:[#allocation7 + $0x598] sm:$0xff] }
0x171d   :  { %10399 = vmatpush3.msra.mxu1 %v6324_v17  ;;  %6390 = vmatprep.subr.mxu0 %v6320_v7  ;;  %v14102_v17 = vld [vmem:[#allocation7 + $0x5b0] sm:$0xff]  ;;  %v14110_v7 = vld [vmem:[#allocation7 + $0x580] sm:$0xff] }
0x171e   :  { %10400 = vmatprep.subr.mxu1 %v6321_v35  ;;  %6391 = vmatpush1.msra.mxu0 %v6319_v34  ;;  %v14118_v34 = vld [vmem:[#allocation7 + $0x550] sm:$0xff] }
0x171f   :  { %10401 = vmatpush3.msra.mxu1 %v6321_v35  ;;  %6392 = vmatprep.subr.mxu0 %v6317_v38  ;;  %v14114_v35 = vld [vmem:[#allocation7 + $0x568] sm:$0xff]  ;;  %v14122_v38 = vld [vmem:[#allocation7 + $0x538] sm:$0xff] }
0x1720   :  { %10402 = vmatprep.subr.mxu1 %v6318_v48  ;;  %6393 = vmatpush1.msra.mxu0 %v6316_v23  ;;  %v14130_v23 = vld [vmem:[#allocation7 + $0x508] sm:$0xff] }
0x1721   :  { %10403 = vmatpush3.msra.mxu1 %v6318_v48  ;;  %6394 = vmatprep.subr.mxu0 %v6314_v3  ;;  %v14126_v48 = vld [vmem:[#allocation7 + $0x520] sm:$0xff]  ;;  %v14134_v3 = vld [vmem:[#allocation7 + $0x4f0] sm:$0xff] }
0x1722   :  { %10404 = vmatprep.subr.mxu1 %v6315_v39  ;;  %6395 = vmatpush1.msra.mxu0 %v6313_v13  ;;  %v14142_v13 = vld [vmem:[#allocation7 + $0x4c0] sm:$0xff] }
0x1723   :  { %10405 = vmatpush3.msra.mxu1 %v6315_v39  ;;  %6396 = vmatprep.subr.mxu0 %v6311_v53  ;;  %v14138_v39 = vld [vmem:[#allocation7 + $0x4d8] sm:$0xff]  ;;  %v14146_v53 = vld [vmem:[#allocation7 + $0x4a8] sm:$0xff] }
0x1724   :  { %10406 = vmatprep.subr.mxu1 %v6312_v57  ;;  %6397 = vmatpush1.msra.mxu0 %v6310_v62  ;;  %15325 = vst [vmem:[#allocation16_spill] sm:$0xff] %v14146_v53  ;;  %v15327_v62 = vld [vmem:[#allocation38_spill] sm:$0xff] }
0x1725   :  { %10407 = vmatpush3.msra.mxu1 %v6312_v57  ;;  %6398 = vmatprep.subr.mxu0 %v6308_v11  ;;  %v14150_v57 = vld [vmem:[#allocation7 + $0x490] sm:$0xff]  ;;  %v4424_v11 = vadd.f32 %v15327_v62, %v15307_v61  ;;  %v15329_v62 = vld [vmem:[#allocation27_spill] sm:$0xff] }
0x1726   :  { %10408 = vmatprep.subr.mxu1 %v6309_v43  ;;  %6399 = vmatpush1.msra.mxu0 %v6307_v5  ;;  %15326 = vst [vmem:[#allocation17_spill] sm:$0xff] %v14150_v57 }
0x1727   :  { %10409 = vmatpush3.msra.mxu1 %v6309_v43  ;;  %6400 = vmatprep.subr.mxu0 %v6305_v37 }
0x1728   :  { %10410 = vmatprep.subr.mxu1 %v6306_v6  ;;  %6401 = vmatpush1.msra.mxu0 %v6304_v54 }
0x1729   :  { %6434 = vmatprep.mubr.f32.mxu0 %v15090_v60  ;;  %10411 = vmatpush3.msra.mxu1 %v6306_v6 }
0x172a   :  { %6435 = vmatmul.mubr.f32.vlgmr.msra.gmra.mxu0 %v15317_v59  ;;  %10413 = vmatmul.mubr.f32.vlgmr.msra.gmra.mxu1 %v15318_v16  ;;  %v14040_v59 = vld [vmem:[#allocation7 + $0x540] sm:$0xff] }
0x172b   :  { %10415 = vmatprep.mubr.f32.mxu1 %v15319_v2  ;;  %6440 = vmatprep.mubr.f32.mxu0 %v15090_v60 }
0x172c   :  { %10424 = vmatprep.subr.mxu1 %v15090_v60  ;;  %6674 = vmatprep.subr.mxu0 %v13995_v0 }
0x172d   :  { %6675 = vmatpush1.msra.mxu0 %v13998_v55  ;;  %10425 = vmatpush3.msra.mxu1 %v14090_v32 }
0x172e   :  { %6441 = vmatmul.mubr.f32.gmra.mxu0 %v15318_v16  ;;  %10416 = vmatmul.mubr.f32.gmra.mxu1 %v15320_v12 }
0x172f   :  { %10418 = vmatprep.mubr.f32.mxu1 %v13807_v42  ;;  %6446 = vmatprep.mubr.f32.mxu0 %v15090_v60 }
0x1730   :  { %6676 = vmatprep.subr.mxu0 %v14001_v46  ;;  %10426 = vmatprep.subr.mxu1 %v15090_v60 }
0x1731   :  { %10427 = vmatpush3.msra.mxu1 %v14092_v4 }
0x1732   :  { %6447 = vmatmul.mubr.f32.gmra.mxu0 %v15319_v2  ;;  %10419 = vmatmul.mubr.f32.gmra.mxu1 %v13891_v47  ;;  %v15328_v2 = vld [vmem:[#allocation42_spill] sm:$0xff] }
0x1733   :  { %10421 = vmatprep.mubr.f32.mxu1 %v13968_v20  ;;  %6452 = vmatprep.mubr.f32.mxu0 %v15090_v60 }
0x1734   :  { %10428 = vmatprep.subr.mxu1 %v15090_v60 }
0x1735   :  { %10429 = vmatpush3.msra.mxu1 %v14097_v8 }
0x1736   :  { %6453 = vmatmul.mubr.f32.gmra.mxu0 %v15320_v12  ;;  %10430 = vmatprep.subr.mxu1 %v15090_v60  ;;  %v4426_v12 = vadd.f32 %v15328_v2, %v13382_v10 }
0x1737   :  { %6458 = vmatprep.mubr.f32.mxu0 %v15090_v60  ;;  %10431 = vmatpush3.msra.mxu1 %v14102_v17 }
0x1738   :  { %10432 = vmatprep.subr.mxu1 %v15090_v60 }
0x1739   :  { %10433 = vmatpush3.msra.mxu1 %v14106_v18 }
0x173a   :  { %6459 = vmatmul.mubr.f32.gmra.mxu0 %v13807_v42  ;;  %v14004_v42 = vld [vmem:[#allocation7 + $0x5d0] sm:$0xff]  ;;  %10434 = vmatprep.subr.mxu1 %v15090_v60 }
0x173b   :  { %6464 = vmatprep.mubr.f32.mxu0 %v15090_v60  ;;  %6677 = vmatpush1.msra.mxu0 %v14004_v42 }
0x173c   :  { %10435 = vmatpush3.msra.mxu1 %v14110_v7 }
0x173d   :  { %10436 = vmatprep.subr.mxu1 %v15090_v60 }
0x173e   :  { %6465 = vmatmul.mubr.f32.gmra.mxu0 %v13891_v47  ;;  %v14007_v47 = vld [vmem:[#allocation7 + $0x5c0] sm:$0xff]  ;;  %10437 = vmatpush3.msra.mxu1 %v14114_v35 }
0x173f   :  { %6470 = vmatprep.mubr.f32.mxu0 %v15090_v60  ;;  %6678 = vmatprep.subr.mxu0 %v14007_v47 }
0x1740   :  { %6679 = vmatpush1.msra.mxu0 %v14010_v26  ;;  %10438 = vmatprep.subr.mxu1 %v15090_v60 }
0x1741   :  { %6680 = vmatprep.subr.mxu0 %v14013_v44  ;;  %10439 = vmatpush3.msra.mxu1 %v14118_v34 }
0x1742   :  { %6471 = vmatmul.mubr.f32.gmra.mxu0 %v13968_v20  ;;  %10440 = vmatprep.subr.mxu1 %v15090_v60 }
0x1743   :  { %6476 = vmatprep.mubr.f32.mxu0 %v15090_v60  ;;  %6681 = vmatpush1.msra.mxu0 %v14016_v19 }
0x1744   :  { %6682 = vmatprep.subr.mxu0 %v14019_v49  ;;  %10441 = vmatpush3.msra.mxu1 %v14122_v38 }
0x1745   :  { %6683 = vmatpush1.msra.mxu0 %v14022_v51  ;;  %10442 = vmatprep.subr.mxu1 %v15090_v60 }
0x1746   :  { %6684 = vmatprep.subr.mxu0 %v14025_v25  ;;  %10443 = vmatpush3.msra.mxu1 %v14126_v48 }
0x1747   :  { %6685 = vmatpush1.msra.mxu0 %v14028_v50  ;;  %10444 = vmatprep.subr.mxu1 %v15090_v60 }
0x1748   :  { %6686 = vmatprep.subr.mxu0 %v14031_v15  ;;  %10445 = vmatpush3.msra.mxu1 %v14130_v23 }
0x1749   :  { %6687 = vmatpush1.msra.mxu0 %v14034_v33  ;;  %10446 = vmatprep.subr.mxu1 %v15090_v60 }
0x174a   :  { %6688 = vmatprep.subr.mxu0 %v14037_v9  ;;  %10447 = vmatpush3.msra.mxu1 %v14134_v3 }
0x174b   :  { %6689 = vmatpush1.msra.mxu0 %v14040_v59  ;;  %10448 = vmatprep.subr.mxu1 %v15090_v60 }
0x174c   :  { %6690 = vmatprep.subr.mxu0 %v14043_v30  ;;  %10449 = vmatpush3.msra.mxu1 %v14138_v39 }
0x174d   :  { %6691 = vmatpush1.msra.mxu0 %v14046_v31  ;;  %10450 = vmatprep.subr.mxu1 %v15090_v60 }
0x174e   :  { %6692 = vmatprep.subr.mxu0 %v14049_v14  ;;  %10451 = vmatpush3.msra.mxu1 %v14142_v13 }
0x174f   :  { %6693 = vmatpush1.msra.mxu0 %v14052_v56  ;;  %10452 = vmatprep.subr.mxu1 %v15090_v60 }
0x1750   :  { %6694 = vmatprep.subr.mxu0 %v14055_v27  ;;  %10453 = vmatpush3.msra.mxu1 %v14146_v53 }
0x1751   :  { %6695 = vmatpush1.msra.mxu0 %v14058_v40  ;;  %10454 = vmatprep.subr.mxu1 %v15090_v60 }
0x1752   :  { %6696 = vmatprep.subr.mxu0 %v14061_v52  ;;  %10455 = vmatpush3.msra.mxu1 %v14150_v57 }
0x1753   :  { %6697 = vmatpush1.msra.mxu0 %v14064_v63  ;;  %10459 = vmatprep.subr.mxu1 %v15090_v60 }
0x1754   :  { %6698 = vmatprep.subr.mxu0 %v14067_v41 }
0x1755   :  { %6699 = vmatpush1.msra.mxu0 %v14070_v21 }
0x1756   :  { %6700 = vmatprep.subr.mxu0 %v14073_v45 }
0x1757   :  { %6701 = vmatpush1.msra.mxu0 %v14076_v58 }
0x1758   :  { %6702 = vmatprep.subr.mxu0 %v14079_v22 }
0x1759   :  { %6703 = vmatpush1.msra.mxu0 %v14081_v29 }
0x175a   :  { %6704 = vmatprep.subr.mxu0 %v14083_v1 }
0x175b   :  { %6705 = vmatpush1.msra.mxu0 %v14086_v24 }
0x175c   :  { %6890 = vmatprep.subr.mxu0 %v13995_v0 }
0x17c9   :  { %v6197_v43 = vpop.f32.mrf.mxu0  ;;  %v6268_v5 = vpop.f32.mrf.mxu1 }
0x17ca   :  { %v6272_v37 = vadd.f32 %v6197_v43, %v4424_v11  ;;  %v6286_v29 = vadd.f32 %v13885_v28, %v6268_v5  ;;  %v4530_v11 = vadd.f32 %v15329_v62, %v13392_v36  ;;  %v15330_v36 = vld [vmem:[#allocation25_spill] sm:$0xff]  ;;  %v15331_v28 = vld [vmem:[#allocation16_spill] sm:$0xff] }
0x17cb   :  { %v10379_v6 = vpop.f32.mrf.mxu1  ;;  %v6199_v16 = vpop.f32.mrf.mxu0 }
0x17cc   :  { %v8697_v54 = vmul.f32 -1.442695, %v6272_v37  ;;  %v6279_v0 = vadd.f32 %v6199_v16, %v4426_v12 }
0x17ce   :  { %11032 = vpow2.f32 %v8697_v54  ;;  %v8698_v24 = vmul.f32 -1.442695, %v6279_v0 }
0x17d0   :  { %11034 = vpow2.f32 %v8698_v24  ;;  %v15334_v24 = vld [vmem:[#allocation17_spill] sm:$0xff] }
0x17db   :  { %v11033_v1 = vpop.eup %11032 }
0x17dc   :  { %v6276_v53 = vadd.f32 1.0, %v11033_v1 }
0x17dd   :  { %v11035_v57 = vpop.eup %11034 }
0x17de   :  { %11036 = vrcp.f32 %v6276_v53  ;;  %v6283_v6 = vadd.f32 1.0, %v11035_v57  ;;  %v15335_v53 = vld [vmem:[#allocation33_spill] sm:$0xff] }
0x17ea   :  { %v6436_v57 = vpop.f32.mrf.mxu0 }
0x17eb   :  { %v11037_v61 = vpop.eup %11036 }
0x17ec   :  { %v6287_v43 = vmul.f32 %v11037_v61, %v6286_v29  ;;  %v15333_v29 = vld [vmem:[#allocation29_spill] sm:$0xff]  ;;  %v6438_v5 = vpop.f32.mrf.mxu0 }
0x17ee   :  { %v6288_v37 = vadd.f32 %v6287_v43, %v4530_v11  ;;  %v14236_v2 = vpop.f32.mrf.mxu0 }
0x17ef   :  { %15336 = vst [vmem:[#allocation32_spill] sm:$0xff] %v14236_v2 }
0x17f0   :  { %11038 = vtanh.f32 %v6288_v37  ;;  %v14238_v12 = vpop.f32.mrf.mxu0  ;;  %v14248_v37 = vpop.f32.mrf.mxu1 }
0x17f1   :  { %11040 = vrcp.f32 %v6283_v6  ;;  %15337 = vst [vmem:[#allocation41_spill] sm:$0xff] %v14238_v12  ;;  %15342 = vst [vmem:[#allocation24_spill] sm:$0xff] %v14248_v37 }
0x17f2   :  { %v14240_v61 = vpop.f32.mrf.mxu0 }
0x17f3   :  { %15338 = vst [vmem:[#allocation45_spill] sm:$0xff] %v14240_v61 }
0x17f4   :  { %v14242_v62 = vpop.f32.mrf.mxu0 }
0x17f5   :  { %15339 = vst [vmem:[#allocation18_spill] sm:$0xff] %v14242_v62 }
0x17f6   :  { %v14244_v11 = vpop.f32.mrf.mxu0 }
0x17f7   :  { %15340 = vst [vmem:[#allocation39_spill] sm:$0xff] %v14244_v11 }
0x17f8   :  { %v14246_v43 = vpop.f32.mrf.mxu0 }
0x17f9   :  { %15341 = vst [vmem:[#allocation37_spill] sm:$0xff] %v14246_v43  ;;  %v8699_v43 = vld [vmem:[%s14924_s3 + $0x9] sm:$0x7] }
0x17fa   :  { %v14250_v6 = vpop.f32.mrf.mxu0 }
0x17fb   :  { %15343 = vst [vmem:[#allocation26_spill] sm:$0xff] %v14250_v6 }
0x17fd   :  { %v11039_v54 = vpop.eup %11038 }
0x17fe   :  { %v6290_v10 = vsub.f32 %v13968_v20, %v11039_v54  ;;  %v11041_v0 = vpop.eup %11040  ;;  %v15332_v20 = vld [vmem:[#allocation15_spill] sm:$0xff] }
0x1800   :  { %v6291_v16 = vmul.f32 %v11041_v0, %v6290_v10  ;;  %v14252_v10 = vpop.f32.mrf.mxu0 }
0x1801   :  { %15344 = vst [vmem:[#allocation36_spill] sm:$0xff] %v14252_v10  ;;  %v15353_v10 = vld [vmem:[#allocation19_spill] sm:$0xff] }
0x1802   :  { %v6292_v1 = vadd.f32 %v11039_v54, %v6291_v16  ;;  %v6549_v54 = vpop.f32.mrf.mxu1  ;;  %v14256_v16 = vpop.f32.mrf.mxu0 }
0x1803   :  { %15346 = vst [vmem:[#allocation23_spill] sm:$0xff] %v14256_v16 }
0x1804   :  { %6477 = vmatmul.mubr.f32.gmra.mxu0 %v6292_v1  ;;  %10422 = vmatmul.mubr.f32.gmra.mxu1 %v6292_v1  ;;  %v14254_v0 = vpop.f32.mrf.mxu1  ;;  %v14260_v61 = vpop.f32.mrf.mxu0 }
0x1805   :  { %6738 = vmatprep.mubr.f32.mxu0 %v15090_v60  ;;  %10456 = vmatprep.mubr.msk.f32.mxu1 %vm11221_vm0, %v15090_v60  ;;  %15345 = vst [vmem:[#allocation21_spill] sm:$0xff] %v14254_v0  ;;  %15348 = vst [vmem:[#allocation40_spill] sm:$0xff] %v14260_v61  ;;  %v14274_v0 = vrot.slane %v8699_v43, %v15353_v10 }
0x1806   :  { %v14258_v1 = vpop.f32.mrf.mxu1  ;;  %v14264_v11 = vpop.f32.mrf.mxu0 }
0x1807   :  { %15347 = vst [vmem:[#allocation20_spill] sm:$0xff] %v14258_v1  ;;  %15350 = vst [vmem:[#allocation46_spill] sm:$0xff] %v14264_v11  ;;  %v6437_v11 = vadd.f32 %v6436_v57, %v14274_v0  ;;  %v14292_v57 = vld [vmem:[%s14925_s4 + $0x3] ss:$0 sm:$0xff] }
0x1808   :  { %6739 = vmatmul.mubr.f32.vlgmr.msra.gmra.mxu0 %v15090_v60  ;;  %10457 = vmatmul.mubr.f32.vlgmr.msra.gmra.mxu1 %v15090_v60  ;;  %v14262_v62 = vpop.f32.mrf.mxu1  ;;  %v14271_v37 = vpop.f32.mrf.mxu0  ;;  %15354 = vst [vmem:[#allocation22_spill] sm:$0xff] %v14274_v0 }
0x1809   :  { %6891 = vmatpush1.msra.mxu0 %v13998_v55  ;;  %10460 = vmatpush3.msra.mxu1 %v14090_v32  ;;  %15349 = vst [vmem:[#allocation34_spill] sm:$0xff] %v14262_v62  ;;  %15352 = vst [vmem:[#allocation43_spill] sm:$0xff] %v14271_v37  ;;  %v15359_v37 = vld [vmem:[#allocation35_spill] sm:$0xff] }
0x180a   :  { %6892 = vmatprep.subr.mxu0 %v14001_v46  ;;  %10461 = vmatprep.subr.mxu1 %v15090_v60  ;;  %v14269_v6 = vpop.f32.mrf.mxu1 }
0x180b   :  { %6893 = vmatpush1.msra.mxu0 %v14004_v42  ;;  %10462 = vmatpush3.msra.mxu1 %v14092_v4  ;;  %15351 = vst [vmem:[#allocation44_spill] sm:$0xff] %v14269_v6 }
0x180c   :  { %6894 = vmatprep.subr.mxu0 %v14007_v47  ;;  %10463 = vmatprep.subr.mxu1 %v15090_v60 }
0x180d   :  { %6895 = vmatpush1.msra.mxu0 %v14010_v26  ;;  %10464 = vmatpush3.msra.mxu1 %v14097_v8 }
0x180e   :  { %6896 = vmatprep.subr.mxu0 %v14013_v44  ;;  %10465 = vmatprep.subr.mxu1 %v15090_v60 }
0x180f   :  { %6897 = vmatpush1.msra.mxu0 %v14016_v19  ;;  %10466 = vmatpush3.msra.mxu1 %v14102_v17 }
0x1810   :  { %6898 = vmatprep.subr.mxu0 %v14019_v49  ;;  %10467 = vmatprep.subr.mxu1 %v15090_v60 }
0x1811   :  { %6899 = vmatpush1.msra.mxu0 %v14022_v51  ;;  %10468 = vmatpush3.msra.mxu1 %v14106_v18 }
0x1812   :  { %6900 = vmatprep.subr.mxu0 %v14025_v25  ;;  %10469 = vmatprep.subr.mxu1 %v15090_v60 }
0x1813   :  { %6901 = vmatpush1.msra.mxu0 %v14028_v50  ;;  %10470 = vmatpush3.msra.mxu1 %v14110_v7 }
0x1814   :  { %6902 = vmatprep.subr.mxu0 %v14031_v15  ;;  %10471 = vmatprep.subr.mxu1 %v15090_v60 }
0x1815   :  { %6903 = vmatpush1.msra.mxu0 %v14034_v33  ;;  %10472 = vmatpush3.msra.mxu1 %v14114_v35 }
0x1816   :  { %6904 = vmatprep.subr.mxu0 %v14037_v9  ;;  %10473 = vmatprep.subr.mxu1 %v15090_v60 }
0x1817   :  { %6905 = vmatpush1.msra.mxu0 %v14040_v59  ;;  %10474 = vmatpush3.msra.mxu1 %v14118_v34 }
0x1818   :  { %6906 = vmatprep.subr.mxu0 %v14043_v30  ;;  %10475 = vmatprep.subr.mxu1 %v15090_v60 }
0x1819   :  { %6907 = vmatpush1.msra.mxu0 %v14046_v31  ;;  %10476 = vmatpush3.msra.mxu1 %v14122_v38 }
0x181a   :  { %6908 = vmatprep.subr.mxu0 %v14049_v14  ;;  %10477 = vmatprep.subr.mxu1 %v15090_v60 }
0x181b   :  { %6909 = vmatpush1.msra.mxu0 %v14052_v56  ;;  %10478 = vmatpush3.msra.mxu1 %v14126_v48 }
0x181c   :  { %6910 = vmatprep.subr.mxu0 %v14055_v27  ;;  %10479 = vmatprep.subr.mxu1 %v15090_v60 }
0x181d   :  { %6911 = vmatpush1.msra.mxu0 %v14058_v40  ;;  %10480 = vmatpush3.msra.mxu1 %v14130_v23 }
0x181e   :  { %6912 = vmatprep.subr.mxu0 %v14061_v52  ;;  %10481 = vmatprep.subr.mxu1 %v15090_v60 }
0x181f   :  { %6913 = vmatpush1.msra.mxu0 %v14064_v63  ;;  %10482 = vmatpush3.msra.mxu1 %v14134_v3 }
0x1820   :  { %6914 = vmatprep.subr.mxu0 %v14067_v41  ;;  %10483 = vmatprep.subr.mxu1 %v15090_v60 }
0x1821   :  { %6915 = vmatpush1.msra.mxu0 %v14070_v21  ;;  %10484 = vmatpush3.msra.mxu1 %v14138_v39 }
0x1822   :  { %6916 = vmatprep.subr.mxu0 %v14073_v45  ;;  %10485 = vmatprep.subr.mxu1 %v15090_v60 }
0x1823   :  { %6917 = vmatpush1.msra.mxu0 %v14076_v58  ;;  %10486 = vmatpush3.msra.mxu1 %v14142_v13 }
0x1824   :  { %6918 = vmatprep.subr.mxu0 %v14079_v22  ;;  %10487 = vmatprep.subr.mxu1 %v15090_v60 }
0x1825   :  { %6919 = vmatpush1.msra.mxu0 %v15330_v36  ;;  %10488 = vmatpush3.msra.mxu1 %v15331_v28 }
0x1826   :  { %6920 = vmatprep.subr.mxu0 %v15332_v20  ;;  %10489 = vmatprep.subr.mxu1 %v15090_v60 }
0x1827   :  { %6921 = vmatpush1.msra.mxu0 %v15333_v29  ;;  %6954 = vmatprep.mubr.f32.mxu0 %v15090_v60  ;;  %v14286_v29 = vrot.slane %v8699_v43, %v15359_v37 }
0x1828   :  { %10490 = vmatpush3.msra.mxu1 %v15334_v24  ;;  %10491 = vmatprep.mubr.msk.f32.mxu1 %vm11221_vm0, %v15090_v60 }
0x1829   :  { %7106 = vmatprep.subr.mxu0 %v15335_v53  ;;  %10494 = vmatprep.subr.mxu1 %v15090_v60 }
0x18c4   :  { %v14276_v16 = vpop.f32.mrf.mxu0  ;;  %v14278_v1 = vpop.f32.mrf.mxu1 }
0x18c5   :  { %15355 = vst [vmem:[#allocation30_spill] sm:$0xff] %v14276_v16  ;;  %15356 = vst [vmem:[#allocation31_spill] sm:$0xff] %v14278_v1  ;;  %v6439_v16 = vadd.f32 %v6438_v5, %v14286_v29 }
0x18c6   :  { %v14280_v61 = vpop.f32.mrf.mxu0  ;;  %v14282_v62 = vpop.f32.mrf.mxu1 }
0x18c7   :  { %15357 = vst [vmem:[#allocation38_spill] sm:$0xff] %v14280_v61  ;;  %15358 = vst [vmem:[#allocation42_spill] sm:$0xff] %v14282_v62 }
0x18c8   :  { %v6740_v12 = vpop.f32.mrf.mxu0  ;;  %v6811_v2 = vpop.f32.mrf.mxu1 }
0x18c9   :  { %v6815_v53 = vadd.f32 %v6740_v12, %v6437_v11  ;;  %v15360_v12 = vld [vmem:[#allocation28_spill] sm:$0xff] }
0x18ca   :  { %v10458_v24 = vpop.f32.mrf.mxu1  ;;  %v6742_v10 = vpop.f32.mrf.mxu0  ;;  %v14296_v11 = vrot.slane %v8699_v43, %v15360_v12  ;;  %v15363_v43 = vld [vmem:[#allocation15_spill] sm:$0xff]  ;;  %v15367_v12 = vld [vmem:[#allocation32_spill] sm:$0xff] }
0x18cb   :  { %v8702_v6 = vmul.f32 -1.442695, %v6815_v53  ;;  %v6822_v20 = vadd.f32 %v6742_v10, %v6439_v16  ;;  %v6829_v24 = vadd.f32 %v14292_v57, %v6811_v2  ;;  %v15362_v2 = vld [vmem:[#allocation16_spill] sm:$0xff] }
0x18cc   :  { %v6550_v5 = vadd.f32 %v6549_v54, %v14296_v11  ;;  %v15364_v54 = vld [vmem:[#allocation29_spill] sm:$0xff] }
0x18cd   :  { %11042 = vpow2.f32 %v8702_v6  ;;  %v8703_v1 = vmul.f32 -1.442695, %v6822_v20 }
0x18cf   :  { %11044 = vpow2.f32 %v8703_v1 }
0x18da   :  { %v11043_v28 = vpop.eup %11042 }
0x18db   :  { %v6819_v61 = vadd.f32 1.0, %v11043_v28 }
0x18dc   :  { %v11045_v53 = vpop.eup %11044 }
0x18dd   :  { %11046 = vrcp.f32 %v6819_v61  ;;  %v6826_v20 = vadd.f32 1.0, %v11045_v53  ;;  %v15366_v53 = vld [vmem:[#allocation33_spill] sm:$0xff] }
0x18ea   :  { %v11047_v37 = vpop.eup %11046 }
0x18eb   :  { %v6830_v6 = vmul.f32 %v11047_v37, %v6829_v24  ;;  %v15365_v24 = vld [vmem:[#allocation17_spill] sm:$0xff]  ;;  %v6443_v37 = vadd.f32 %v15367_v12, %v14274_v0  ;;  %v15369_v0 = vld [vmem:[#allocation24_spill] sm:$0xff] }
0x18ed   :  { %v6831_v16 = vadd.f32 %v6830_v6, %v6550_v5 }
0x18ef   :  { %11048 = vtanh.f32 %v6831_v16 }
0x18f0   :  { %11050 = vrcp.f32 %v6826_v20 }
0x18fc   :  { %v11049_v28 = vpop.eup %11048 }
0x18fd   :  { %v6833_v61 = vsub.f32 0.0, %v11049_v28  ;;  %v11051_v1 = vpop.eup %11050 }
0x18ff   :  { %v6834_v10 = vmul.f32 %v11051_v1, %v6833_v61  ;;  %v15368_v1 = vld [vmem:[#allocation41_spill] sm:$0xff] }
0x1901   :  { %v14299_v62 = vadd.f32 %v11049_v28, %v6834_v10  ;;  %v6445_v10 = vadd.f32 %v15368_v1, %v14286_v29 }
0x1903   :  { %15361 = vst [vmem:[#allocation27_spill] sm:$0xff] %v14299_v62  ;;  %6955 = vmatmul.mubr.f32.vlgmr.msra.gmra.mxu0 %v14299_v62  ;;  %10492 = vmatmul.mubr.f32.vlgmr.msra.gmra.mxu1 %v14299_v62 }
0x1904   :  { %7107 = vmatpush1.msra.mxu0 %v13998_v55  ;;  %10495 = vmatpush3.msra.mxu1 %v14090_v32 }
0x1905   :  { %7108 = vmatprep.subr.mxu0 %v14001_v46  ;;  %10496 = vmatprep.subr.mxu1 %v15090_v60 }
0x1906   :  { %7109 = vmatpush1.msra.mxu0 %v14004_v42  ;;  %10497 = vmatpush3.msra.mxu1 %v14092_v4 }
0x1907   :  { %7110 = vmatprep.subr.mxu0 %v14007_v47  ;;  %10498 = vmatprep.subr.mxu1 %v15090_v60 }
0x1908   :  { %7111 = vmatpush1.msra.mxu0 %v14010_v26  ;;  %10499 = vmatpush3.msra.mxu1 %v14097_v8 }
0x1909   :  { %7112 = vmatprep.subr.mxu0 %v14013_v44  ;;  %10500 = vmatprep.subr.mxu1 %v15090_v60 }
0x190a   :  { %7113 = vmatpush1.msra.mxu0 %v14016_v19  ;;  %10501 = vmatpush3.msra.mxu1 %v14102_v17 }
0x190b   :  { %7114 = vmatprep.subr.mxu0 %v14019_v49  ;;  %10502 = vmatprep.subr.mxu1 %v15090_v60 }
0x190c   :  { %7115 = vmatpush1.msra.mxu0 %v14022_v51  ;;  %10503 = vmatpush3.msra.mxu1 %v14106_v18 }
0x190d   :  { %7116 = vmatprep.subr.mxu0 %v14025_v25  ;;  %10504 = vmatprep.subr.mxu1 %v15090_v60 }
0x190e   :  { %7117 = vmatpush1.msra.mxu0 %v14028_v50  ;;  %10505 = vmatpush3.msra.mxu1 %v14110_v7 }
0x190f   :  { %7118 = vmatprep.subr.mxu0 %v14031_v15  ;;  %10506 = vmatprep.subr.mxu1 %v15090_v60 }
0x1910   :  { %7119 = vmatpush1.msra.mxu0 %v14034_v33  ;;  %10507 = vmatpush3.msra.mxu1 %v14114_v35 }
0x1911   :  { %7120 = vmatprep.subr.mxu0 %v14037_v9  ;;  %10508 = vmatprep.subr.mxu1 %v15090_v60 }
0x1912   :  { %7121 = vmatpush1.msra.mxu0 %v14040_v59  ;;  %10509 = vmatpush3.msra.mxu1 %v14118_v34 }
0x1913   :  { %7122 = vmatprep.subr.mxu0 %v14043_v30  ;;  %10510 = vmatprep.subr.mxu1 %v15090_v60 }
0x1914   :  { %7123 = vmatpush1.msra.mxu0 %v14046_v31  ;;  %10511 = vmatpush3.msra.mxu1 %v14122_v38 }
0x1915   :  { %7124 = vmatprep.subr.mxu0 %v14049_v14  ;;  %10512 = vmatprep.subr.mxu1 %v15090_v60 }
0x1916   :  { %7125 = vmatpush1.msra.mxu0 %v14052_v56  ;;  %10513 = vmatpush3.msra.mxu1 %v14126_v48 }
0x1917   :  { %7126 = vmatprep.subr.mxu0 %v14055_v27  ;;  %10514 = vmatprep.subr.mxu1 %v15090_v60 }
0x1918   :  { %7127 = vmatpush1.msra.mxu0 %v14058_v40  ;;  %10515 = vmatpush3.msra.mxu1 %v14130_v23 }
0x1919   :  { %7128 = vmatprep.subr.mxu0 %v14061_v52  ;;  %10516 = vmatprep.subr.mxu1 %v15090_v60 }
0x191a   :  { %7129 = vmatpush1.msra.mxu0 %v14064_v63  ;;  %10517 = vmatpush3.msra.mxu1 %v14134_v3 }
0x191b   :  { %7130 = vmatprep.subr.mxu0 %v14067_v41  ;;  %10518 = vmatprep.subr.mxu1 %v15090_v60 }
0x191c   :  { %7131 = vmatpush1.msra.mxu0 %v14070_v21  ;;  %10519 = vmatpush3.msra.mxu1 %v14138_v39 }
0x191d   :  { %7132 = vmatprep.subr.mxu0 %v14073_v45  ;;  %10520 = vmatprep.subr.mxu1 %v15090_v60 }
0x191e   :  { %7133 = vmatpush1.msra.mxu0 %v14076_v58  ;;  %10521 = vmatpush3.msra.mxu1 %v14142_v13 }
0x191f   :  { %7134 = vmatprep.subr.mxu0 %v14079_v22  ;;  %10522 = vmatprep.subr.mxu1 %v15090_v60 }
0x1920   :  { %7135 = vmatpush1.msra.mxu0 %v15330_v36  ;;  %10523 = vmatpush3.msra.mxu1 %v15362_v2 }
0x1921   :  { %7136 = vmatprep.subr.mxu0 %v15363_v43  ;;  %10524 = vmatprep.subr.mxu1 %v15090_v60 }
0x1922   :  { %7137 = vmatpush1.msra.mxu0 %v15364_v54  ;;  %7170 = vmatprep.mubr.f32.mxu0 %v15090_v60 }
0x1923   :  { %10525 = vmatpush3.msra.mxu1 %v15365_v24  ;;  %10526 = vmatprep.mubr.msk.f32.mxu1 %vm11221_vm0, %v15090_v60 }
0x1924   :  { %7322 = vmatprep.subr.mxu0 %v15366_v53  ;;  %10529 = vmatprep.subr.mxu1 %v15090_v60 }
0x19c3   :  { %v6956_v5 = vpop.f32.mrf.mxu0  ;;  %v7027_v6 = vpop.f32.mrf.mxu1 }
0x19c4   :  { %v7031_v20 = vadd.f32 %v6956_v5, %v6443_v37  ;;  %v7045_v36 = vadd.f32 %v14292_v57, %v7027_v6  ;;  %v6555_v37 = vadd.f32 %v15369_v0, %v14296_v11  ;;  %v14505_v0 = vld [vmem:[#allocation7 + $0x578] sm:$0xff] }
0x19c5   :  { %v10493_v16 = vpop.f32.mrf.mxu1  ;;  %v6958_v61 = vpop.f32.mrf.mxu0  ;;  %v14512_v6 = vld [vmem:[#allocation7 + $0x558] sm:$0xff] }
0x19c6   :  { %v8704_v28 = vmul.f32 -1.442695, %v7031_v20  ;;  %v7038_v24 = vadd.f32 %v6958_v61, %v6445_v10  ;;  %v14515_v10 = vld [vmem:[#allocation7 + $0x568] sm:$0xff] }
0x19c8   :  { %11052 = vpow2.f32 %v8704_v28  ;;  %v8705_v54 = vmul.f32 -1.442695, %v7038_v24 }
0x19ca   :  { %11054 = vpow2.f32 %v8705_v54  ;;  %v14510_v54 = vld [vmem:[#allocation7 + $0x560] sm:$0xff] }
0x19d5   :  { %v11053_v43 = vpop.eup %11052 }
0x19d6   :  { %v7035_v2 = vadd.f32 1.0, %v11053_v43 }
0x19d7   :  { %v11055_v53 = vpop.eup %11054 }
0x19d8   :  { %11056 = vrcp.f32 %v7035_v2  ;;  %v7042_v16 = vadd.f32 1.0, %v11055_v53  ;;  %v14508_v2 = vld [vmem:[#allocation7 + $0x570] sm:$0xff]  ;;  %v14517_v53 = vld [vmem:[#allocation7 + $0x548] sm:$0xff] }
0x19e5   :  { %v11057_v12 = vpop.eup %11056 }
0x19e6   :  { %v7046_v5 = vmul.f32 %v11057_v12, %v7045_v36  ;;  %v14502_v36 = vld [vmem:[#allocation7 + $0x588] sm:$0xff]  ;;  %v14521_v12 = vld [vmem:[#allocation7 + $0x540] sm:$0xff] }
0x19e8   :  { %v7047_v20 = vadd.f32 %v7046_v5, %v6555_v37  ;;  %v14523_v37 = vld [vmem:[#allocation7 + $0x550] sm:$0xff] }
0x19e9   :  { %v14527_v5 = vld [vmem:[#allocation7 + $0x530] sm:$0xff] }
0x19ea   :  { %11058 = vtanh.f32 %v7047_v20  ;;  %v14529_v20 = vld [vmem:[#allocation7 + $0x538] sm:$0xff] }
0x19eb   :  { %11060 = vrcp.f32 %v7042_v16  ;;  %v14533_v16 = vld [vmem:[#allocation7 + $0x528] sm:$0xff] }
0x19f7   :  { %v11059_v28 = vpop.eup %11058 }
0x19f8   :  { %v7049_v61 = vsub.f32 %v14299_v62, %v11059_v28  ;;  %v11061_v24 = vpop.eup %11060 }
0x19fa   :  { %v7050_v1 = vmul.f32 %v11061_v24, %v7049_v61  ;;  %v14539_v61 = vld [vmem:[#allocation7 + $0x520] sm:$0xff]  ;;  %v14543_v24 = vld [vmem:[#allocation7 + $0x510] sm:$0xff] }
0x19fc   :  { %v14378_v43 = vadd.f32 %v11059_v28, %v7050_v1  ;;  %v14537_v28 = vld [vmem:[#allocation7 + $0x518] sm:$0xff]  ;;  %v14547_v1 = vld [vmem:[#allocation7 + $0x500] sm:$0xff] }
0x19fe   :  { %15370 = vst [vmem:[#allocation19_spill] sm:$0xff] %v14378_v43  ;;  %7171 = vmatmul.mubr.f32.vlgmr.msra.gmra.mxu0 %v14378_v43  ;;  %10527 = vmatmul.mubr.f32.vlgmr.msra.gmra.mxu1 %v14378_v43 }
0x19ff   :  { %7323 = vmatpush1.msra.mxu0 %v13998_v55  ;;  %10530 = vmatpush3.msra.mxu1 %v14090_v32  ;;  %v15371_v55 = vld [vmem:[#allocation25_spill] sm:$0xff] }
0x1a00   :  { %7324 = vmatprep.subr.mxu0 %v14001_v46  ;;  %10531 = vmatprep.subr.mxu1 %v15090_v60  ;;  %v15372_v46 = vld [vmem:[#allocation16_spill] sm:$0xff] }
0x1a01   :  { %7325 = vmatpush1.msra.mxu0 %v14004_v42  ;;  %10532 = vmatpush3.msra.mxu1 %v14092_v4  ;;  %v15373_v42 = vld [vmem:[#allocation15_spill] sm:$0xff] }
0x1a02   :  { %7326 = vmatprep.subr.mxu0 %v14007_v47  ;;  %10533 = vmatprep.subr.mxu1 %v15090_v60  ;;  %v15374_v47 = vld [vmem:[#allocation29_spill] sm:$0xff] }
0x1a03   :  { %7327 = vmatpush1.msra.mxu0 %v14010_v26  ;;  %10534 = vmatpush3.msra.mxu1 %v14097_v8  ;;  %v15375_v26 = vld [vmem:[#allocation17_spill] sm:$0xff] }
0x1a04   :  { %7328 = vmatprep.subr.mxu0 %v14013_v44  ;;  %10535 = vmatprep.subr.mxu1 %v15090_v60  ;;  %v15376_v44 = vld [vmem:[#allocation22_spill] sm:$0xff] }
0x1a05   :  { %7329 = vmatpush1.msra.mxu0 %v14016_v19  ;;  %10536 = vmatpush3.msra.mxu1 %v14102_v17  ;;  %v15377_v19 = vld [vmem:[#allocation45_spill] sm:$0xff] }
0x1a06   :  { %7330 = vmatprep.subr.mxu0 %v14019_v49  ;;  %10537 = vmatprep.subr.mxu1 %v15090_v60  ;;  %v6449_v49 = vadd.f32 %v15377_v19, %v15376_v44  ;;  %v14567_v19 = vld [vmem:[#allocation7 + $0x4d0] sm:$0xff] }
0x1a07   :  { %7331 = vmatpush1.msra.mxu0 %v14022_v51  ;;  %10538 = vmatpush3.msra.mxu1 %v14106_v18 }
0x1a08   :  { %7332 = vmatprep.subr.mxu0 %v14025_v25  ;;  %10539 = vmatprep.subr.mxu1 %v15090_v60 }
0x1a09   :  { %7333 = vmatpush1.msra.mxu0 %v14028_v50  ;;  %10540 = vmatpush3.msra.mxu1 %v14110_v7 }
0x1a0a   :  { %7334 = vmatprep.subr.mxu0 %v14031_v15  ;;  %10541 = vmatprep.subr.mxu1 %v15090_v60 }
0x1a0b   :  { %7335 = vmatpush1.msra.mxu0 %v14034_v33  ;;  %10542 = vmatpush3.msra.mxu1 %v14114_v35 }
0x1a0c   :  { %7336 = vmatprep.subr.mxu0 %v14037_v9  ;;  %10543 = vmatprep.subr.mxu1 %v15090_v60 }
0x1a0d   :  { %7337 = vmatpush1.msra.mxu0 %v14040_v59  ;;  %10544 = vmatpush3.msra.mxu1 %v14118_v34  ;;  %v15378_v59 = vld [vmem:[#allocation18_spill] sm:$0xff] }
0x1a0e   :  { %7338 = vmatprep.subr.mxu0 %v14043_v30  ;;  %10545 = vmatprep.subr.mxu1 %v15090_v60  ;;  %v6451_v30 = vadd.f32 %v15378_v59, %v14286_v29  ;;  %v14593_v59 = vld [vmem:[#allocation7 + $0x498] sm:$0xff] }
0x1a0f   :  { %7339 = vmatpush1.msra.mxu0 %v14046_v31  ;;  %10546 = vmatpush3.msra.mxu1 %v14122_v38  ;;  %15383 = vst [vmem:[#allocation32_spill] sm:$0xff] %v14593_v59 }
0x1a10   :  { %7340 = vmatprep.subr.mxu0 %v14049_v14  ;;  %10547 = vmatprep.subr.mxu1 %v15090_v60 }
0x1a11   :  { %7341 = vmatpush1.msra.mxu0 %v14052_v56  ;;  %10548 = vmatpush3.msra.mxu1 %v14126_v48 }
0x1a12   :  { %7342 = vmatprep.subr.mxu0 %v14055_v27  ;;  %10549 = vmatprep.subr.mxu1 %v15090_v60 }
0x1a13   :  { %7343 = vmatpush1.msra.mxu0 %v14058_v40  ;;  %10550 = vmatpush3.msra.mxu1 %v14130_v23 }
0x1a14   :  { %7344 = vmatprep.subr.mxu0 %v14061_v52  ;;  %10551 = vmatprep.subr.mxu1 %v15090_v60 }
0x1a15   :  { %7345 = vmatpush1.msra.mxu0 %v14064_v63  ;;  %10552 = vmatpush3.msra.mxu1 %v14134_v3  ;;  %v14493_v3 = vld [vmem:[#allocation7 + $0x5a8] sm:$0xff] }
0x1a16   :  { %7346 = vmatprep.subr.mxu0 %v14067_v41  ;;  %10553 = vmatprep.subr.mxu1 %v15090_v60  ;;  %v15379_v41 = vld [vmem:[#allocation20_spill] sm:$0xff] }
0x1a17   :  { %7347 = vmatpush1.msra.mxu0 %v14070_v21  ;;  %10554 = vmatpush3.msra.mxu1 %v14138_v39  ;;  %v6560_v21 = vadd.f32 %v15379_v41, %v14296_v11  ;;  %v14496_v39 = vld [vmem:[#allocation7 + $0x5a0] sm:$0xff] }
0x1a18   :  { %7348 = vmatprep.subr.mxu0 %v14073_v45  ;;  %10555 = vmatprep.subr.mxu1 %v15090_v60 }
0x1a19   :  { %7349 = vmatpush1.msra.mxu0 %v14076_v58  ;;  %10556 = vmatpush3.msra.mxu1 %v14142_v13  ;;  %v14499_v13 = vld [vmem:[#allocation7 + $0x590] sm:$0xff] }
0x1a1a   :  { %7350 = vmatprep.subr.mxu0 %v14079_v22  ;;  %10557 = vmatprep.subr.mxu1 %v15090_v60 }
0x1a1b   :  { %7351 = vmatpush1.msra.mxu0 %v15371_v55  ;;  %10558 = vmatpush3.msra.mxu1 %v15372_v46  ;;  %v14549_v55 = vld [vmem:[#allocation7 + $0x508] sm:$0xff]  ;;  %v14553_v46 = vld [vmem:[#allocation7 + $0x4f8] sm:$0xff] }
0x1a1c   :  { %7352 = vmatprep.subr.mxu0 %v15373_v42  ;;  %10559 = vmatprep.subr.mxu1 %v15090_v60  ;;  %v14557_v42 = vld [vmem:[#allocation7 + $0x4e8] sm:$0xff] }
0x1a1d   :  { %7353 = vmatpush1.msra.mxu0 %v15374_v47  ;;  %7386 = vmatprep.mubr.f32.mxu0 %v15090_v60  ;;  %v14559_v47 = vld [vmem:[#allocation7 + $0x4f0] sm:$0xff] }
0x1a1e   :  { %10560 = vmatpush3.msra.mxu1 %v15375_v26  ;;  %10561 = vmatprep.mubr.msk.f32.mxu1 %vm11221_vm0, %v15090_v60  ;;  %v14563_v26 = vld [vmem:[#allocation7 + $0x4e0] sm:$0xff] }
0x1a1f   :  { %10564 = vmatprep.subr.mxu1 %v15090_v60 }
0x1abe   :  { %v7172_v51 = vpop.f32.mrf.mxu0  ;;  %v7243_v25 = vpop.f32.mrf.mxu1 }
0x1abf   :  { %v7247_v50 = vadd.f32 %v7172_v51, %v6449_v49  ;;  %v7261_v52 = vadd.f32 %v14292_v57, %v7243_v25  ;;  %v14569_v49 = vld [vmem:[#allocation7 + $0x4d8] sm:$0xff]  ;;  %v14573_v51 = vld [vmem:[#allocation7 + $0x4c8] sm:$0xff] }
0x1ac0   :  { %v10528_v15 = vpop.f32.mrf.mxu1  ;;  %v7174_v9 = vpop.f32.mrf.mxu0  ;;  %v14577_v25 = vld [vmem:[#allocation7 + $0x4b8] sm:$0xff] }
0x1ac1   :  { %v8706_v33 = vmul.f32 -1.442695, %v7247_v50  ;;  %v7254_v31 = vadd.f32 %v7174_v9, %v6451_v30  ;;  %v14579_v50 = vld [vmem:[#allocation7 + $0x4c0] sm:$0xff]  ;;  %v14583_v15 = vld [vmem:[#allocation7 + $0x4b0] sm:$0xff]  ;;  %v14589_v9 = vld [vmem:[#allocation7 + $0x4a8] sm:$0xff] }
0x1ac2   :  { %15382 = vst [vmem:[#allocation33_spill] sm:$0xff] %v14589_v9  ;;  %v14597_v30 = vld [vmem:[#allocation7 + $0x488] sm:$0xff] }
0x1ac3   :  { %11062 = vpow2.f32 %v8706_v33  ;;  %v8707_v14 = vmul.f32 -1.442695, %v7254_v31  ;;  %v14587_v33 = vld [vmem:[#allocation7 + $0x4a0] sm:$0xff]  ;;  %15384 = vst [vmem:[#allocation41_spill] sm:$0xff] %v14597_v30  ;;  %v14599_v31 = vld [vmem:[#allocation7 + $0x490] sm:$0xff] }
0x1ac4   :  { %15385 = vst [vmem:[#allocation24_spill] sm:$0xff] %v14599_v31 }
0x1ac5   :  { %11064 = vpow2.f32 %v8707_v14  ;;  %v14603_v14 = vld [vmem:[#allocation7 + $0x480] sm:$0xff] }
0x1ac6   :  { %15386 = vst [vmem:[#allocation25_spill] sm:$0xff] %v14603_v14 }
0x1ad0   :  { %v11063_v56 = vpop.eup %11062 }
0x1ad1   :  { %v7251_v27 = vadd.f32 1.0, %v11063_v56  ;;  %v15387_v56 = vld [vmem:[#allocation39_spill] sm:$0xff] }
0x1ad2   :  { %v11065_v40 = vpop.eup %11064 }
0x1ad3   :  { %11066 = vrcp.f32 %v7251_v27  ;;  %v7258_v22 = vadd.f32 1.0, %v11065_v40  ;;  %v6455_v27 = vadd.f32 %v15387_v56, %v15376_v44  ;;  %v15389_v44 = vld [vmem:[#allocation21_spill] sm:$0xff] }
0x1ae0   :  { %v11067_v63 = vpop.eup %11066 }
0x1ae1   :  { %v7262_v45 = vmul.f32 %v11067_v63, %v7261_v52 }
0x1ae3   :  { %v7263_v58 = vadd.f32 %v7262_v45, %v6560_v21 }
0x1ae5   :  { %11068 = vtanh.f32 %v7263_v58  ;;  %v15388_v58 = vld [vmem:[#allocation37_spill] sm:$0xff] }
0x1ae6   :  { %11070 = vrcp.f32 %v7258_v22  ;;  %v6457_v22 = vadd.f32 %v15388_v58, %v14286_v29 }
0x1af2   :  { %v11069_v35 = vpop.eup %11068 }
0x1af3   :  { %v7265_v34 = vsub.f32 %v14378_v43, %v11069_v35  ;;  %v11071_v38 = vpop.eup %11070 }
0x1af5   :  { %v7266_v48 = vmul.f32 %v11071_v38, %v7265_v34 }
0x1af7   :  { %v14456_v23 = vadd.f32 %v11069_v35, %v7266_v48 }
0x1af9   :  { %15380 = vst [vmem:[#allocation35_spill] sm:$0xff] %v14456_v23  ;;  %7387 = vmatmul.mubr.f32.vlgmr.msra.gmra.mxu0 %v14456_v23  ;;  %10562 = vmatmul.mubr.f32.vlgmr.msra.gmra.mxu1 %v14456_v23 }
0x1afa   :  { %10565 = vmatpush3.msra.mxu1 %v14090_v32  ;;  %7602 = vmatprep.mubr.f32.mxu0 %v15090_v60  ;;  %v14475_v32 = vld [vmem:[#allocation7 + $0x5f0] sm:$0xff] }
0x1afb   :  { %10566 = vmatprep.subr.mxu1 %v15090_v60  ;;  %10596 = vmatprep.mubr.msk.f32.mxu1 %vm11221_vm0, %v15090_v60  ;;  %15381 = vst [vmem:[#allocation28_spill] sm:$0xff] %v14475_v32 }
0x1afc   :  { %10567 = vmatpush3.msra.mxu1 %v14092_v4  ;;  %7538 = vmatprep.subr.mxu0 %v14475_v32  ;;  %v14478_v4 = vld [vmem:[#allocation7 + $0x5e8] sm:$0xff] }
0x1afd   :  { %10568 = vmatprep.subr.mxu1 %v15090_v60  ;;  %7539 = vmatpush1.msra.mxu0 %v14478_v4 }
0x1afe   :  { %10569 = vmatpush3.msra.mxu1 %v14097_v8  ;;  %v14481_v8 = vld [vmem:[#allocation7 + $0x5d8] sm:$0xff] }
0x1aff   :  { %10570 = vmatprep.subr.mxu1 %v15090_v60  ;;  %7540 = vmatprep.subr.mxu0 %v14481_v8 }
0x1b00   :  { %10571 = vmatpush3.msra.mxu1 %v14102_v17  ;;  %v14484_v17 = vld [vmem:[#allocation7 + $0x5d0] sm:$0xff] }
0x1b01   :  { %10572 = vmatprep.subr.mxu1 %v15090_v60  ;;  %7541 = vmatpush1.msra.mxu0 %v14484_v17 }
0x1b02   :  { %10573 = vmatpush3.msra.mxu1 %v14106_v18  ;;  %v14487_v18 = vld [vmem:[#allocation7 + $0x5c0] sm:$0xff] }
0x1b03   :  { %10574 = vmatprep.subr.mxu1 %v15090_v60  ;;  %7542 = vmatprep.subr.mxu0 %v14487_v18 }
0x1b04   :  { %10575 = vmatpush3.msra.mxu1 %v14110_v7  ;;  %v14490_v7 = vld [vmem:[#allocation7 + $0x5b8] sm:$0xff] }
0x1b05   :  { %10576 = vmatprep.subr.mxu1 %v15090_v60  ;;  %7543 = vmatpush1.msra.mxu0 %v14490_v7 }
0x1b06   :  { %7544 = vmatprep.subr.mxu0 %v14493_v3  ;;  %10577 = vmatpush3.msra.mxu1 %v14515_v10 }
0x1b07   :  { %7545 = vmatpush1.msra.mxu0 %v14496_v39  ;;  %10578 = vmatprep.subr.mxu1 %v15090_v60 }
0x1b08   :  { %7546 = vmatprep.subr.mxu0 %v14499_v13  ;;  %10579 = vmatpush3.msra.mxu1 %v14523_v37 }
0x1b09   :  { %7547 = vmatpush1.msra.mxu0 %v14502_v36  ;;  %10580 = vmatprep.subr.mxu1 %v15090_v60 }
0x1b0a   :  { %7548 = vmatprep.subr.mxu0 %v14505_v0  ;;  %10581 = vmatpush3.msra.mxu1 %v14529_v20 }
0x1b0b   :  { %7549 = vmatpush1.msra.mxu0 %v14508_v2  ;;  %10582 = vmatprep.subr.mxu1 %v15090_v60 }
0x1b0c   :  { %7550 = vmatprep.subr.mxu0 %v14510_v54  ;;  %10583 = vmatpush3.msra.mxu1 %v14539_v61 }
0x1b0d   :  { %7551 = vmatpush1.msra.mxu0 %v14512_v6  ;;  %10584 = vmatprep.subr.mxu1 %v15090_v60 }
0x1b0e   :  { %7552 = vmatprep.subr.mxu0 %v14517_v53  ;;  %10585 = vmatpush3.msra.mxu1 %v14549_v55 }
0x1b0f   :  { %7553 = vmatpush1.msra.mxu0 %v14521_v12  ;;  %10586 = vmatprep.subr.mxu1 %v15090_v60 }
0x1b10   :  { %7554 = vmatprep.subr.mxu0 %v14527_v5  ;;  %10587 = vmatpush3.msra.mxu1 %v14559_v47 }
0x1b11   :  { %7555 = vmatpush1.msra.mxu0 %v14533_v16  ;;  %10588 = vmatprep.subr.mxu1 %v15090_v60 }
0x1b12   :  { %7556 = vmatprep.subr.mxu0 %v14537_v28  ;;  %10589 = vmatpush3.msra.mxu1 %v14569_v49 }
0x1b13   :  { %7557 = vmatpush1.msra.mxu0 %v14543_v24  ;;  %10590 = vmatprep.subr.mxu1 %v15090_v60 }
0x1b14   :  { %7558 = vmatprep.subr.mxu0 %v14547_v1  ;;  %10591 = vmatpush3.msra.mxu1 %v14579_v50 }
0x1b15   :  { %7559 = vmatpush1.msra.mxu0 %v14553_v46  ;;  %10592 = vmatprep.subr.mxu1 %v15090_v60 }
0x1b16   :  { %7560 = vmatprep.subr.mxu0 %v14557_v42  ;;  %10593 = vmatpush3.msra.mxu1 %v14589_v9 }
0x1b17   :  { %7561 = vmatpush1.msra.mxu0 %v14563_v26  ;;  %10594 = vmatprep.subr.mxu1 %v15090_v60 }
0x1b18   :  { %7562 = vmatprep.subr.mxu0 %v14567_v19  ;;  %10595 = vmatpush3.msra.mxu1 %v14599_v31 }
0x1b19   :  { %7563 = vmatpush1.msra.mxu0 %v14573_v51  ;;  %10599 = vmatprep.subr.mxu1 %v15090_v60 }
0x1b1a   :  { %7564 = vmatprep.subr.mxu0 %v14577_v25 }
0x1b1b   :  { %7565 = vmatpush1.msra.mxu0 %v14583_v15 }
0x1b1c   :  { %7566 = vmatprep.subr.mxu0 %v14587_v33 }
0x1b1d   :  { %7567 = vmatpush1.msra.mxu0 %v14593_v59 }
0x1b1e   :  { %7568 = vmatprep.subr.mxu0 %v14597_v30 }
0x1b1f   :  { %7569 = vmatpush1.msra.mxu0 %v14603_v14 }
0x1b20   :  { %7754 = vmatprep.subr.mxu0 %v14475_v32 }
0x1bb9   :  { %v7388_v40 = vpop.f32.mrf.mxu0  ;;  %v7459_v52 = vpop.f32.mrf.mxu1 }
0x1bba   :  { %v7463_v63 = vadd.f32 %v7388_v40, %v6455_v27  ;;  %v7477_v62 = vadd.f32 %v14292_v57, %v7459_v52  ;;  %v6565_v27 = vadd.f32 %v15389_v44, %v14296_v11  ;;  %v14667_v44 = vld [vmem:[#allocation7 + $0x5c8] sm:$0xff]  ;;  %v14671_v52 = vld [vmem:[#allocation7 + $0x5b0] sm:$0xff] }
0x1bbb   :  { %v10563_v41 = vpop.f32.mrf.mxu1  ;;  %v7390_v45 = vpop.f32.mrf.mxu0 }
0x1bbc   :  { %v8708_v21 = vmul.f32 -1.442695, %v7463_v63  ;;  %v7470_v35 = vadd.f32 %v7390_v45, %v6457_v22 }
0x1bbe   :  { %11072 = vpow2.f32 %v8708_v21  ;;  %v8709_v34 = vmul.f32 -1.442695, %v7470_v35 }
0x1bc0   :  { %11074 = vpow2.f32 %v8709_v34  ;;  %v14675_v34 = vld [vmem:[#allocation7 + $0x598] sm:$0xff] }
0x1bcb   :  { %v11073_v38 = vpop.eup %11072 }
0x1bcc   :  { %v7467_v48 = vadd.f32 1.0, %v11073_v38  ;;  %v14679_v38 = vld [vmem:[#allocation7 + $0x580] sm:$0xff] }
0x1bcd   :  { %v11075_v43 = vpop.eup %11074 }
0x1bce   :  { %11076 = vrcp.f32 %v7467_v48  ;;  %v7474_v41 = vadd.f32 1.0, %v11075_v43  ;;  %v14663_v43 = vld [vmem:[#allocation7 + $0x5e0] sm:$0xff]  ;;  %v15391_v48 = vld [vmem:[#allocation22_spill] sm:$0xff] }
0x1bdb   :  { %v11077_v56 = vpop.eup %11076 }
0x1bdc   :  { %v7478_v40 = vmul.f32 %v11077_v56, %v7477_v62  ;;  %v14659_v62 = vld [vmem:[#allocation7 + $0x5f8] sm:$0xff] }
0x1bdd   :  { %v15392_v56 = vld [vmem:[#allocation26_spill] sm:$0xff] }
0x1bde   :  { %v7479_v63 = vadd.f32 %v7478_v40, %v6565_v27  ;;  %v6461_v27 = vadd.f32 %v15392_v56, %v15391_v48  ;;  %v15394_v48 = vld [vmem:[#allocation44_spill] sm:$0xff] }
0x1be0   :  { %11078 = vtanh.f32 %v7479_v63 }
0x1be1   :  { %11080 = vrcp.f32 %v7474_v41 }
0x1bed   :  { %v11079_v21 = vpop.eup %11078 }
0x1bee   :  { %v7481_v45 = vsub.f32 %v14456_v23, %v11079_v21  ;;  %v11081_v58 = vpop.eup %11080 }
0x1bf0   :  { %v7482_v22 = vmul.f32 %v11081_v58, %v7481_v45 }
0x1bf2   :  { %v14620_v35 = vadd.f32 %v11079_v21, %v7482_v22  ;;  %v15393_v22 = vld [vmem:[#allocation36_spill] sm:$0xff] }
0x1bf3   :  { %v6463_v23 = vadd.f32 %v15393_v22, %v14286_v29  ;;  %v15402_v22 = vld [vmem:[#allocation23_spill] sm:$0xff] }
0x1bf4   :  { %15390 = vst [vmem:[#allocation16_spill] sm:$0xff] %v14620_v35  ;;  %7603 = vmatmul.mubr.f32.vlgmr.msra.gmra.mxu0 %v14620_v35  ;;  %10597 = vmatmul.mubr.f32.vlgmr.msra.gmra.mxu1 %v14620_v35 }
0x1bf5   :  { %7755 = vmatpush1.msra.mxu0 %v14478_v4  ;;  %7818 = vmatprep.mubr.f32.mxu0 %v15090_v60 }
0x1bf6   :  { %7756 = vmatprep.subr.mxu0 %v14481_v8  ;;  %10631 = vmatprep.mubr.msk.f32.mxu1 %vm11221_vm0, %v15090_v60 }
0x1bf7   :  { %7757 = vmatpush1.msra.mxu0 %v14484_v17  ;;  %10600 = vmatpush3.msra.mxu1 %v14659_v62 }
0x1bf8   :  { %7758 = vmatprep.subr.mxu0 %v14487_v18  ;;  %10601 = vmatprep.subr.mxu1 %v15090_v60 }
0x1bf9   :  { %7759 = vmatpush1.msra.mxu0 %v14490_v7  ;;  %10602 = vmatpush3.msra.mxu1 %v14663_v43 }
0x1bfa   :  { %7760 = vmatprep.subr.mxu0 %v14493_v3  ;;  %10603 = vmatprep.subr.mxu1 %v15090_v60 }
0x1bfb   :  { %7761 = vmatpush1.msra.mxu0 %v14496_v39  ;;  %10604 = vmatpush3.msra.mxu1 %v14667_v44 }
0x1bfc   :  { %7762 = vmatprep.subr.mxu0 %v14499_v13  ;;  %10605 = vmatprep.subr.mxu1 %v15090_v60 }
0x1bfd   :  { %7763 = vmatpush1.msra.mxu0 %v14502_v36  ;;  %10606 = vmatpush3.msra.mxu1 %v14671_v52 }
0x1bfe   :  { %7764 = vmatprep.subr.mxu0 %v14505_v0  ;;  %10607 = vmatprep.subr.mxu1 %v15090_v60 }
0x1bff   :  { %7765 = vmatpush1.msra.mxu0 %v14508_v2  ;;  %10608 = vmatpush3.msra.mxu1 %v14675_v34 }
0x1c00   :  { %7766 = vmatprep.subr.mxu0 %v14510_v54  ;;  %10609 = vmatprep.subr.mxu1 %v15090_v60 }
0x1c01   :  { %7767 = vmatpush1.msra.mxu0 %v14512_v6  ;;  %10610 = vmatpush3.msra.mxu1 %v14679_v38 }
0x1c02   :  { %7768 = vmatprep.subr.mxu0 %v14517_v53  ;;  %10611 = vmatprep.subr.mxu1 %v15090_v60 }
0x1c03   :  { %7769 = vmatpush1.msra.mxu0 %v14521_v12  ;;  %10612 = vmatpush3.msra.mxu1 %v14515_v10 }
0x1c04   :  { %7770 = vmatprep.subr.mxu0 %v14527_v5  ;;  %10613 = vmatprep.subr.mxu1 %v15090_v60 }
0x1c05   :  { %7771 = vmatpush1.msra.mxu0 %v14533_v16  ;;  %10614 = vmatpush3.msra.mxu1 %v14523_v37 }
0x1c06   :  { %7772 = vmatprep.subr.mxu0 %v14537_v28  ;;  %10615 = vmatprep.subr.mxu1 %v15090_v60 }
0x1c07   :  { %7773 = vmatpush1.msra.mxu0 %v14543_v24  ;;  %10616 = vmatpush3.msra.mxu1 %v14529_v20 }
0x1c08   :  { %7774 = vmatprep.subr.mxu0 %v14547_v1  ;;  %10617 = vmatprep.subr.mxu1 %v15090_v60 }
0x1c09   :  { %7775 = vmatpush1.msra.mxu0 %v14553_v46  ;;  %10618 = vmatpush3.msra.mxu1 %v14539_v61 }
0x1c0a   :  { %7776 = vmatprep.subr.mxu0 %v14557_v42  ;;  %10619 = vmatprep.subr.mxu1 %v15090_v60 }
0x1c0b   :  { %7777 = vmatpush1.msra.mxu0 %v14563_v26  ;;  %10620 = vmatpush3.msra.mxu1 %v14549_v55 }
0x1c0c   :  { %7778 = vmatprep.subr.mxu0 %v14567_v19  ;;  %10621 = vmatprep.subr.mxu1 %v15090_v60 }
0x1c0d   :  { %7779 = vmatpush1.msra.mxu0 %v14573_v51  ;;  %10622 = vmatpush3.msra.mxu1 %v14559_v47 }
0x1c0e   :  { %7780 = vmatprep.subr.mxu0 %v14577_v25  ;;  %10623 = vmatprep.subr.mxu1 %v15090_v60 }
0x1c0f   :  { %7781 = vmatpush1.msra.mxu0 %v14583_v15  ;;  %10624 = vmatpush3.msra.mxu1 %v14569_v49 }
0x1c10   :  { %7782 = vmatprep.subr.mxu0 %v14587_v33  ;;  %10625 = vmatprep.subr.mxu1 %v15090_v60 }
0x1c11   :  { %7783 = vmatpush1.msra.mxu0 %v14593_v59  ;;  %10626 = vmatpush3.msra.mxu1 %v14579_v50 }
0x1c12   :  { %7784 = vmatprep.subr.mxu0 %v14597_v30  ;;  %10627 = vmatprep.subr.mxu1 %v15090_v60 }
0x1c13   :  { %7785 = vmatpush1.msra.mxu0 %v14603_v14  ;;  %10628 = vmatpush3.msra.mxu1 %v14589_v9 }
0x1c14   :  { %7970 = vmatprep.subr.mxu0 %v14475_v32  ;;  %10629 = vmatprep.subr.mxu1 %v15090_v60 }
0x1c15   :  { %10630 = vmatpush3.msra.mxu1 %v14599_v31 }
0x1c16   :  { %10634 = vmatprep.subr.mxu1 %v15090_v60 }
0x1cb4   :  { %v7604_v40 = vpop.f32.mrf.mxu0  ;;  %v7675_v63 = vpop.f32.mrf.mxu1 }
0x1cb5   :  { %v7679_v41 = vadd.f32 %v7604_v40, %v6461_v27  ;;  %v7693_v59 = vadd.f32 %v14292_v57, %v7675_v63  ;;  %v6570_v27 = vadd.f32 %v15394_v48, %v14296_v11  ;;  %v15395_v57 = vld [vmem:[#allocation32_spill] sm:$0xff]  ;;  %v15401_v63 = vld [vmem:[#allocation22_spill] sm:$0xff] }
0x1cb6   :  { %v10598_v21 = vpop.f32.mrf.mxu1  ;;  %v7606_v58 = vpop.f32.mrf.mxu0  ;;  %v15400_v48 = vld [vmem:[#allocation28_spill] sm:$0xff] }
0x1cb7   :  { %v8710_v45 = vmul.f32 -1.442695, %v7679_v41  ;;  %v7686_v32 = vadd.f32 %v7606_v58, %v6463_v23 }
0x1cb9   :  { %11082 = vpow2.f32 %v8710_v45  ;;  %v8711_v14 = vmul.f32 -1.442695, %v7686_v32 }
0x1cbb   :  { %11084 = vpow2.f32 %v8711_v14  ;;  %v15399_v14 = vld [vmem:[#allocation24_spill] sm:$0xff] }
0x1cc6   :  { %v11083_v30 = vpop.eup %11082 }
0x1cc7   :  { %v7683_v9 = vadd.f32 1.0, %v11083_v30 }
0x1cc8   :  { %v11085_v31 = vpop.eup %11084 }
0x1cc9   :  { %11086 = vrcp.f32 %v7683_v9  ;;  %v7690_v21 = vadd.f32 1.0, %v11085_v31  ;;  %v15396_v9 = vld [vmem:[#allocation33_spill] sm:$0xff] }
0x1cca   :  { %v15398_v31 = vld [vmem:[#allocation25_spill] sm:$0xff] }
0x1cd6   :  { %v11087_v56 = vpop.eup %11086 }
0x1cd7   :  { %v7694_v40 = vmul.f32 %v11087_v56, %v7693_v59  ;;  %v15397_v59 = vld [vmem:[#allocation41_spill] sm:$0xff]  ;;  %v6467_v56 = vadd.f32 %v15402_v22, %v15401_v63  ;;  %v14789_v22 = vld [vmem:[%s14925_s4 + $0x3] ss:$0 sm:$0xff] }
0x1cd9   :  { %v7695_v41 = vadd.f32 %v7694_v40, %v6570_v27 }
0x1cdb   :  { %11088 = vtanh.f32 %v7695_v41 }
0x1cdc   :  { %11090 = vrcp.f32 %v7690_v21 }
0x1ce8   :  { %v11089_v45 = vpop.eup %11088 }
0x1ce9   :  { %v7697_v23 = vsub.f32 %v14620_v35, %v11089_v45  ;;  %v11091_v32 = vpop.eup %11090 }
0x1ceb   :  { %v7698_v58 = vmul.f32 %v11091_v32, %v7697_v23  ;;  %v15403_v32 = vld [vmem:[#allocation40_spill] sm:$0xff] }
0x1ced   :  { %v14711_v30 = vadd.f32 %v11089_v45, %v7698_v58  ;;  %v6469_v58 = vadd.f32 %v15403_v32, %v14286_v29 }
0x1cef   :  { %7819 = vmatmul.mubr.f32.vlgmr.msra.gmra.mxu0 %v14711_v30  ;;  %10632 = vmatmul.mubr.f32.vlgmr.msra.gmra.mxu1 %v14711_v30 }
0x1cf0   :  { %7971 = vmatpush1.msra.mxu0 %v14478_v4  ;;  %10635 = vmatpush3.msra.mxu1 %v14659_v62 }
0x1cf1   :  { %7972 = vmatprep.subr.mxu0 %v14481_v8  ;;  %10636 = vmatprep.subr.mxu1 %v15090_v60 }
0x1cf2   :  { %7973 = vmatpush1.msra.mxu0 %v14484_v17  ;;  %10637 = vmatpush3.msra.mxu1 %v14663_v43 }
0x1cf3   :  { %7974 = vmatprep.subr.mxu0 %v14487_v18  ;;  %10638 = vmatprep.subr.mxu1 %v15090_v60 }
0x1cf4   :  { %7975 = vmatpush1.msra.mxu0 %v14490_v7  ;;  %10639 = vmatpush3.msra.mxu1 %v14667_v44 }
0x1cf5   :  { %7976 = vmatprep.subr.mxu0 %v14493_v3  ;;  %10640 = vmatprep.subr.mxu1 %v15090_v60 }
0x1cf6   :  { %7977 = vmatpush1.msra.mxu0 %v14496_v39  ;;  %10641 = vmatpush3.msra.mxu1 %v14671_v52 }
0x1cf7   :  { %7978 = vmatprep.subr.mxu0 %v14499_v13  ;;  %10642 = vmatprep.subr.mxu1 %v15090_v60 }
0x1cf8   :  { %7979 = vmatpush1.msra.mxu0 %v14502_v36  ;;  %10643 = vmatpush3.msra.mxu1 %v14675_v34 }
0x1cf9   :  { %7980 = vmatprep.subr.mxu0 %v14505_v0  ;;  %10644 = vmatprep.subr.mxu1 %v15090_v60 }
0x1cfa   :  { %7981 = vmatpush1.msra.mxu0 %v14508_v2  ;;  %10645 = vmatpush3.msra.mxu1 %v14679_v38 }
0x1cfb   :  { %7982 = vmatprep.subr.mxu0 %v14510_v54  ;;  %10646 = vmatprep.subr.mxu1 %v15090_v60 }
0x1cfc   :  { %7983 = vmatpush1.msra.mxu0 %v14512_v6  ;;  %10647 = vmatpush3.msra.mxu1 %v14515_v10 }
0x1cfd   :  { %7984 = vmatprep.subr.mxu0 %v14517_v53  ;;  %10648 = vmatprep.subr.mxu1 %v15090_v60 }
0x1cfe   :  { %7985 = vmatpush1.msra.mxu0 %v14521_v12  ;;  %10649 = vmatpush3.msra.mxu1 %v14523_v37 }
0x1cff   :  { %7986 = vmatprep.subr.mxu0 %v14527_v5  ;;  %10650 = vmatprep.subr.mxu1 %v15090_v60 }
0x1d00   :  { %7987 = vmatpush1.msra.mxu0 %v14533_v16  ;;  %10651 = vmatpush3.msra.mxu1 %v14529_v20 }
0x1d01   :  { %7988 = vmatprep.subr.mxu0 %v14537_v28  ;;  %10652 = vmatprep.subr.mxu1 %v15090_v60 }
0x1d02   :  { %7989 = vmatpush1.msra.mxu0 %v14543_v24  ;;  %10653 = vmatpush3.msra.mxu1 %v14539_v61 }
0x1d03   :  { %7990 = vmatprep.subr.mxu0 %v14547_v1  ;;  %10654 = vmatprep.subr.mxu1 %v15090_v60 }
0x1d04   :  { %7991 = vmatpush1.msra.mxu0 %v14553_v46  ;;  %10655 = vmatpush3.msra.mxu1 %v14549_v55 }
0x1d05   :  { %7992 = vmatprep.subr.mxu0 %v14557_v42  ;;  %10656 = vmatprep.subr.mxu1 %v15090_v60 }
0x1d06   :  { %7993 = vmatpush1.msra.mxu0 %v14563_v26  ;;  %10657 = vmatpush3.msra.mxu1 %v14559_v47 }
0x1d07   :  { %7994 = vmatprep.subr.mxu0 %v14567_v19  ;;  %10658 = vmatprep.subr.mxu1 %v15090_v60 }
0x1d08   :  { %7995 = vmatpush1.msra.mxu0 %v14573_v51  ;;  %10659 = vmatpush3.msra.mxu1 %v14569_v49 }
0x1d09   :  { %7996 = vmatprep.subr.mxu0 %v14577_v25  ;;  %10660 = vmatprep.subr.mxu1 %v15090_v60 }
0x1d0a   :  { %7997 = vmatpush1.msra.mxu0 %v14583_v15  ;;  %10661 = vmatpush3.msra.mxu1 %v14579_v50 }
0x1d0b   :  { %7998 = vmatprep.subr.mxu0 %v14587_v33  ;;  %10662 = vmatprep.subr.mxu1 %v15090_v60 }
0x1d0c   :  { %7999 = vmatpush1.msra.mxu0 %v15395_v57  ;;  %10663 = vmatpush3.msra.mxu1 %v15396_v9 }
0x1d0d   :  { %8000 = vmatprep.subr.mxu0 %v15397_v59  ;;  %10664 = vmatprep.subr.mxu1 %v15090_v60 }
0x1d0e   :  { %8001 = vmatpush1.msra.mxu0 %v15398_v31  ;;  %8034 = vmatprep.mubr.f32.mxu0 %v15090_v60 }
0x1d0f   :  { %10665 = vmatpush3.msra.mxu1 %v15399_v14  ;;  %10666 = vmatprep.mubr.msk.f32.mxu1 %vm11221_vm0, %v15090_v60 }
0x1d10   :  { %8186 = vmatprep.subr.mxu0 %v15400_v48  ;;  %10669 = vmatprep.subr.mxu1 %v15090_v60 }
0x1daf   :  { %v7820_v27 = vpop.f32.mrf.mxu0  ;;  %v7891_v40 = vpop.f32.mrf.mxu1 }
0x1db0   :  { %v7895_v41 = vadd.f32 %v7820_v27, %v6467_v56  ;;  %v7909_v56 = vadd.f32 %v14789_v22, %v7891_v40  ;;  %v8359_v40 = vld [vmem:[#allocation9 + $0x8] sm:$0xff] }
0x1db1   :  { %v10633_v21 = vpop.f32.mrf.mxu1  ;;  %v7822_v23 = vpop.f32.mrf.mxu0 }
0x1db2   :  { %v8712_v45 = vmul.f32 -1.442695, %v7895_v41  ;;  %v7902_v35 = vadd.f32 %v7822_v23, %v6469_v58  ;;  %v15404_v41 = vld [vmem:[#allocation34_spill] sm:$0xff] }
0x1db3   :  { %v6575_v21 = vadd.f32 %v15404_v41, %v14296_v11  ;;  %v15414_v41 = vld [vmem:[#allocation16_spill] sm:$0xff] }
0x1db4   :  { %11092 = vpow2.f32 %v8712_v45  ;;  %v8713_v14 = vmul.f32 -1.442695, %v7902_v35 }
0x1db6   :  { %11094 = vpow2.f32 %v8713_v14 }
0x1dc1   :  { %v11093_v31 = vpop.eup %11092 }
0x1dc2   :  { %v7899_v59 = vadd.f32 1.0, %v11093_v31 }
0x1dc3   :  { %v11095_v48 = vpop.eup %11094 }
0x1dc4   :  { %11096 = vrcp.f32 %v7899_v59  ;;  %v7906_v23 = vadd.f32 1.0, %v11095_v48  ;;  %v8358_v48 = vld [vmem:[#allocation9] sm:$0xff] }
0x1dd1   :  { %v11097_v27 = vpop.eup %11096 }
0x1dd2   :  { %v7910_v45 = vmul.f32 %v11097_v27, %v7909_v56  ;;  %v15412_v56 = vld [vmem:[#allocation19_spill] sm:$0xff] }
0x1dd3   :  { %v15413_v27 = vld [vmem:[#allocation35_spill] sm:$0xff] }
0x1dd4   :  { %v7911_v32 = vadd.f32 %v7910_v45, %v6575_v21  ;;  %v8509_v21 = vld [vmem:[#allocation10 + $0x78] sm:$0xff]  ;;  %v8508_v45 = vld [vmem:[#allocation10 + $0x70] sm:$0xff] }
0x1dd6   :  { %11098 = vtanh.f32 %v7911_v32  ;;  %v8507_v32 = vld [vmem:[#allocation10 + $0x68] sm:$0xff] }
0x1dd7   :  { %11100 = vrcp.f32 %v7906_v23  ;;  %v8506_v23 = vld [vmem:[#allocation10 + $0x60] sm:$0xff] }
0x1de3   :  { %v11099_v35 = vpop.eup %11098 }
0x1de4   :  { %v7913_v59 = vsub.f32 %v14711_v30, %v11099_v35  ;;  %v11101_v31 = vpop.eup %11100 }
0x1de6   :  { %v7914_v14 = vmul.f32 %v11101_v31, %v7913_v59  ;;  %v8503_v59 = vld [vmem:[#allocation10 + $0x48] sm:$0xff]  ;;  %v8502_v31 = vld [vmem:[#allocation10 + $0x40] sm:$0xff] }
0x1de8   :  { %v14795_v58 = vadd.f32 %v11099_v35, %v7914_v14  ;;  %v8505_v35 = vld [vmem:[#allocation10 + $0x58] sm:$0xff] }
0x1de9   :  { %v8501_v14 = vld [vmem:[#allocation10 + $0x38] sm:$0xff] }
0x1dea   :  { %8035 = vmatmul.mubr.f32.vlgmr.msra.gmra.mxu0 %v14795_v58  ;;  %10667 = vmatmul.mubr.f32.vlgmr.msra.gmra.mxu1 %v14795_v58 }
0x1deb   :  { %8187 = vmatpush1.msra.mxu0 %v14478_v4  ;;  %10670 = vmatpush3.msra.mxu1 %v14659_v62  ;;  %v15405_v4 = vld [vmem:[#allocation41_spill] sm:$0xff]  ;;  %v8367_v62 = vld [vmem:[#allocation9 + $0x48] sm:$0xff] }
0x1dec   :  { %8188 = vmatprep.subr.mxu0 %v14481_v8  ;;  %10671 = vmatprep.subr.mxu1 %v15090_v60  ;;  %v15406_v8 = vld [vmem:[#allocation25_spill] sm:$0xff] }
0x1ded   :  { %8189 = vmatpush1.msra.mxu0 %v14484_v17  ;;  %10672 = vmatpush3.msra.mxu1 %v14663_v43  ;;  %v15407_v17 = vld [vmem:[#allocation24_spill] sm:$0xff]  ;;  %v8366_v43 = vld [vmem:[#allocation9 + $0x40] sm:$0xff] }
0x1dee   :  { %8190 = vmatprep.subr.mxu0 %v14487_v18  ;;  %10673 = vmatprep.subr.mxu1 %v15090_v60  ;;  %v8373_v18 = vld [vmem:[#allocation9 + $0x78] sm:$0xff] }
0x1def   :  { %8191 = vmatpush1.msra.mxu0 %v14490_v7  ;;  %10674 = vmatpush3.msra.mxu1 %v14667_v44  ;;  %v15408_v7 = vld [vmem:[#allocation46_spill] sm:$0xff] }
0x1df0   :  { %8192 = vmatprep.subr.mxu0 %v14493_v3  ;;  %10675 = vmatprep.subr.mxu1 %v15090_v60  ;;  %v6473_v3 = vadd.f32 %v15408_v7, %v15401_v63  ;;  %v8365_v44 = vld [vmem:[#allocation9 + $0x38] sm:$0xff]  ;;  %v8495_v7 = vld [vmem:[#allocation10 + $0x8] sm:$0xff] }
0x1df1   :  { %8193 = vmatpush1.msra.mxu0 %v14496_v39  ;;  %10676 = vmatpush3.msra.mxu1 %v14671_v52  ;;  %v8364_v52 = vld [vmem:[#allocation9 + $0x30] sm:$0xff] }
0x1df2   :  { %8194 = vmatprep.subr.mxu0 %v14499_v13  ;;  %10677 = vmatprep.subr.mxu1 %v15090_v60 }
0x1df3   :  { %8195 = vmatpush1.msra.mxu0 %v14502_v36  ;;  %10678 = vmatpush3.msra.mxu1 %v14675_v34  ;;  %v8363_v34 = vld [vmem:[#allocation9 + $0x28] sm:$0xff] }
0x1df4   :  { %8196 = vmatprep.subr.mxu0 %v14505_v0  ;;  %10679 = vmatprep.subr.mxu1 %v15090_v60 }
0x1df5   :  { %8197 = vmatpush1.msra.mxu0 %v14508_v2  ;;  %10680 = vmatpush3.msra.mxu1 %v14679_v38  ;;  %v8362_v38 = vld [vmem:[#allocation9 + $0x20] sm:$0xff] }
0x1df6   :  { %8198 = vmatprep.subr.mxu0 %v14510_v54  ;;  %10681 = vmatprep.subr.mxu1 %v15090_v60 }
0x1df7   :  { %8199 = vmatpush1.msra.mxu0 %v14512_v6  ;;  %10682 = vmatpush3.msra.mxu1 %v14515_v10  ;;  %v15409_v6 = vld [vmem:[#allocation43_spill] sm:$0xff] }
0x1df8   :  { %8200 = vmatprep.subr.mxu0 %v14517_v53  ;;  %10683 = vmatprep.subr.mxu1 %v15090_v60  ;;  %v6475_v10 = vadd.f32 %v15409_v6, %v14286_v29 }
0x1df9   :  { %8201 = vmatpush1.msra.mxu0 %v14521_v12  ;;  %10684 = vmatpush3.msra.mxu1 %v14523_v37 }
0x1dfa   :  { %8202 = vmatprep.subr.mxu0 %v14527_v5  ;;  %10685 = vmatprep.subr.mxu1 %v15090_v60 }
0x1dfb   :  { %8203 = vmatpush1.msra.mxu0 %v14533_v16  ;;  %10686 = vmatpush3.msra.mxu1 %v14529_v20 }
0x1dfc   :  { %8204 = vmatprep.subr.mxu0 %v14537_v28  ;;  %10687 = vmatprep.subr.mxu1 %v15090_v60  ;;  %v15410_v28 = vld [vmem:[#allocation42_spill] sm:$0xff] }
0x1dfd   :  { %8205 = vmatpush1.msra.mxu0 %v14543_v24  ;;  %10688 = vmatpush3.msra.mxu1 %v14539_v61  ;;  %v6580_v61 = vadd.f32 %v15410_v28, %v14296_v11 }
0x1dfe   :  { %8206 = vmatprep.subr.mxu0 %v14547_v1  ;;  %10689 = vmatprep.subr.mxu1 %v15090_v60 }
0x1dff   :  { %8207 = vmatpush1.msra.mxu0 %v14553_v46  ;;  %10690 = vmatpush3.msra.mxu1 %v14549_v55 }
0x1e00   :  { %8208 = vmatprep.subr.mxu0 %v14557_v42  ;;  %10691 = vmatprep.subr.mxu1 %v15090_v60 }
0x1e01   :  { %8209 = vmatpush1.msra.mxu0 %v14563_v26  ;;  %10692 = vmatpush3.msra.mxu1 %v14559_v47 }
0x1e02   :  { %8210 = vmatprep.subr.mxu0 %v14567_v19  ;;  %10693 = vmatprep.subr.mxu1 %v15090_v60 }
0x1e03   :  { %8211 = vmatpush1.msra.mxu0 %v14573_v51  ;;  %10694 = vmatpush3.msra.mxu1 %v14569_v49  ;;  %v8372_v49 = vld [vmem:[#allocation9 + $0x70] sm:$0xff]  ;;  %v15411_v51 = vld [vmem:[#allocation27_spill] sm:$0xff] }
0x1e04   :  { %8212 = vmatprep.subr.mxu0 %v14577_v25  ;;  %10695 = vmatprep.subr.mxu1 %v15090_v60  ;;  %v8371_v25 = vld [vmem:[#allocation9 + $0x68] sm:$0xff] }
0x1e05   :  { %8213 = vmatpush1.msra.mxu0 %v14583_v15  ;;  %10696 = vmatpush3.msra.mxu1 %v14579_v50  ;;  %v8370_v50 = vld [vmem:[#allocation9 + $0x60] sm:$0xff]  ;;  %v8369_v15 = vld [vmem:[#allocation9 + $0x58] sm:$0xff] }
0x1e06   :  { %8214 = vmatprep.subr.mxu0 %v14587_v33  ;;  %10697 = vmatprep.subr.mxu1 %v15090_v60  ;;  %v8368_v33 = vld [vmem:[#allocation9 + $0x50] sm:$0xff] }
0x1e07   :  { %8215 = vmatpush1.msra.mxu0 %v15395_v57  ;;  %10698 = vmatpush3.msra.mxu1 %v15396_v9  ;;  %v8361_v57 = vld [vmem:[#allocation9 + $0x18] sm:$0xff]  ;;  %v8360_v9 = vld [vmem:[#allocation9 + $0x10] sm:$0xff] }
0x1e08   :  { %8216 = vmatprep.subr.mxu0 %v15405_v4  ;;  %10699 = vmatprep.subr.mxu1 %v15090_v60  ;;  %v8499_v4 = vld [vmem:[#allocation10 + $0x28] sm:$0xff] }
0x1e09   :  { %8217 = vmatpush1.msra.mxu0 %v15406_v8  ;;  %8250 = vmatprep.mubr.f32.mxu0 %v15090_v60  ;;  %v8498_v8 = vld [vmem:[#allocation10 + $0x20] sm:$0xff] }
0x1e0a   :  { %10700 = vmatpush3.msra.mxu1 %v15407_v17  ;;  %10701 = vmatprep.mubr.msk.f32.mxu1 %vm11221_vm0, %v15090_v60  ;;  %v8497_v17 = vld [vmem:[#allocation10 + $0x18] sm:$0xff] }
0x1e0b   :  { %10704 = vmatprep.subr.mxu0 %v8373_v18  ;;  %10748 = vmatprep.subr.mxu1 %v8509_v21 }
0x1eaa   :  { %v8036_v39 = vpop.f32.mrf.mxu0  ;;  %v8107_v13 = vpop.f32.mrf.mxu1 }
0x1eab   :  { %v8111_v36 = vadd.f32 %v8036_v39, %v6473_v3  ;;  %v8125_v20 = vadd.f32 %v14789_v22, %v8107_v13  ;;  %v8494_v3 = vld [vmem:[#allocation10] sm:$0xff]  ;;  %v15415_v39 = vld [vmem:[#allocation30_spill] sm:$0xff] }
0x1eac   :  { %v10668_v0 = vpop.f32.mrf.mxu1  ;;  %v8038_v54 = vpop.f32.mrf.mxu0  ;;  %v6479_v13 = vadd.f32 %v15415_v39, %v15401_v63  ;;  %v8718_v63 = vld [vmem:[%s14927_s6] ss:$0 sm:$0xff] }
0x1ead   :  { %v8714_v2 = vmul.f32 -1.442695, %v8111_v36  ;;  %v8118_v53 = vadd.f32 %v8038_v54, %v6475_v10 }
0x1eaf   :  { %11102 = vpow2.f32 %v8714_v2  ;;  %v8715_v12 = vmul.f32 -1.442695, %v8118_v53  ;;  %v15416_v53 = vld [vmem:[#allocation38_spill] sm:$0xff] }
0x1eb1   :  { %11104 = vpow2.f32 %v8715_v12  ;;  %v6481_v12 = vadd.f32 %v15416_v53, %v14286_v29 }
0x1ebc   :  { %v11103_v37 = vpop.eup %11102 }
0x1ebd   :  { %v8115_v5 = vadd.f32 1.0, %v11103_v37 }
0x1ebe   :  { %v11105_v60 = vpop.eup %11104 }
0x1ebf   :  { %11106 = vrcp.f32 %v8115_v5  ;;  %v8122_v55 = vadd.f32 1.0, %v11105_v60 }
0x1ecc   :  { %v11107_v16 = vpop.eup %11106 }
0x1ecd   :  { %v8126_v24 = vmul.f32 %v11107_v16, %v8125_v20 }
0x1ecf   :  { %v8127_v1 = vadd.f32 %v8126_v24, %v6580_v61 }
0x1ed1   :  { %11108 = vtanh.f32 %v8127_v1 }
0x1ed2   :  { %11110 = vrcp.f32 %v8122_v55 }
0x1ede   :  { %v11109_v46 = vpop.eup %11108 }
0x1edf   :  { %v8129_v42 = vsub.f32 %v14795_v58, %v11109_v46  ;;  %v11111_v47 = vpop.eup %11110 }
0x1ee1   :  { %v8130_v26 = vmul.f32 %v11111_v47, %v8129_v42 }
0x1ee3   :  { %v14872_v19 = vadd.f32 %v11109_v46, %v8130_v26  ;;  %v15417_v46 = vld [vmem:[#allocation31_spill] sm:$0xff] }
0x1ee4   :  { %v6585_v29 = vadd.f32 %v15417_v46, %v14296_v11 }
0x1ee5   :  { %8251 = vmatmul.mubr.f32.vlgmr.msra.gmra.mxu0 %v14872_v19  ;;  %10702 = vmatmul.mubr.f32.vlgmr.msra.gmra.mxu1 %v14872_v19 }
0x1ee6   :  { %10705 = vmatpush3.msra.mxu0 %v8373_v18  ;;  %10736 = vmatprep.mubr.f32.mxu0 %v15411_v51  ;;  %v8496_v18 = vld [vmem:[#allocation10 + $0x10] sm:$0xff] }
0x1ee7   :  { %10706 = vmatprep.subr.mxu0 %v8372_v49  ;;  %10749 = vmatpush3.msra.mxu1 %v8509_v21 }
0x1ee8   :  { %10707 = vmatpush3.msra.mxu0 %v8372_v49  ;;  %10750 = vmatprep.subr.mxu1 %v8508_v45 }
0x1ee9   :  { %10708 = vmatprep.subr.mxu0 %v8371_v25  ;;  %10751 = vmatpush3.msra.mxu1 %v8508_v45 }
0x1eea   :  { %10709 = vmatpush3.msra.mxu0 %v8371_v25  ;;  %10752 = vmatprep.subr.mxu1 %v8507_v32 }
0x1eeb   :  { %10710 = vmatprep.subr.mxu0 %v8370_v50  ;;  %10753 = vmatpush3.msra.mxu1 %v8507_v32 }
0x1eec   :  { %10711 = vmatpush3.msra.mxu0 %v8370_v50  ;;  %10754 = vmatprep.subr.mxu1 %v8506_v23 }
0x1eed   :  { %10712 = vmatprep.subr.mxu0 %v8369_v15  ;;  %10755 = vmatpush3.msra.mxu1 %v8506_v23 }
0x1eee   :  { %10713 = vmatpush3.msra.mxu0 %v8369_v15  ;;  %10756 = vmatprep.subr.mxu1 %v8505_v35 }
0x1eef   :  { %10714 = vmatprep.subr.mxu0 %v8368_v33  ;;  %10757 = vmatpush3.msra.mxu1 %v8505_v35 }
0x1ef0   :  { %10715 = vmatpush3.msra.mxu0 %v8368_v33 }
0x1ef1   :  { %10716 = vmatprep.subr.mxu0 %v8367_v62 }
0x1ef2   :  { %10717 = vmatpush3.msra.mxu0 %v8367_v62 }
0x1ef3   :  { %10718 = vmatprep.subr.mxu0 %v8366_v43 }
0x1ef4   :  { %10719 = vmatpush3.msra.mxu0 %v8366_v43 }
0x1ef5   :  { %10720 = vmatprep.subr.mxu0 %v8365_v44 }
0x1ef6   :  { %10721 = vmatpush3.msra.mxu0 %v8365_v44 }
0x1ef7   :  { %10722 = vmatprep.subr.mxu0 %v8364_v52 }
0x1ef8   :  { %10723 = vmatpush3.msra.mxu0 %v8364_v52 }
0x1ef9   :  { %10724 = vmatprep.subr.mxu0 %v8363_v34 }
0x1efa   :  { %10725 = vmatpush3.msra.mxu0 %v8363_v34 }
0x1efb   :  { %10726 = vmatprep.subr.mxu0 %v8362_v38 }
0x1efc   :  { %10727 = vmatpush3.msra.mxu0 %v8362_v38 }
0x1efd   :  { %10728 = vmatprep.subr.mxu0 %v8361_v57 }
0x1efe   :  { %10729 = vmatpush3.msra.mxu0 %v8361_v57 }
0x1eff   :  { %10730 = vmatprep.subr.mxu0 %v8360_v9 }
0x1f00   :  { %10731 = vmatpush3.msra.mxu0 %v8360_v9 }
0x1f01   :  { %10732 = vmatprep.subr.mxu0 %v8359_v40 }
0x1f02   :  { %10733 = vmatpush3.msra.mxu0 %v8359_v40 }
0x1f03   :  { %10734 = vmatprep.subr.mxu0 %v8358_v48 }
0x1f04   :  { %10735 = vmatpush3.msra.mxu0 %v8358_v48 }
0x1f05   :  { %10737 = vmatmul.mubr.f32.vlgmr.msra.gmra.mxu0 %v15412_v56 }
0x1f06   :  { %10739 = vmatprep.mubr.f32.mxu0 %v15413_v27 }
0x1f09   :  { %10740 = vmatmul.mubr.f32.gmra.mxu0 %v15414_v41  ;;  %v8719_v41 = vld [vmem:[%s14929_s8] ss:$0 sm:$0xff] }
0x1f0a   :  { %10742 = vmatprep.mubr.f32.mxu0 %v14711_v30  ;;  %v8504_v30 = vld [vmem:[#allocation10 + $0x50] sm:$0xff] }
0x1f0b   :  { %10758 = vmatprep.subr.mxu1 %v8504_v30 }
0x1f0c   :  { %10759 = vmatpush3.msra.mxu1 %v8504_v30 }
0x1f0d   :  { %10743 = vmatmul.mubr.f32.gmra.mxu0 %v14795_v58  ;;  %10760 = vmatprep.subr.mxu1 %v8503_v59  ;;  %v8500_v58 = vld [vmem:[#allocation10 + $0x30] sm:$0xff] }
0x1f0e   :  { %10745 = vmatprep.mubr.f32.mxu0 %v14872_v19  ;;  %10761 = vmatpush3.msra.mxu1 %v8503_v59 }
0x1f0f   :  { %10762 = vmatprep.subr.mxu1 %v8502_v31 }
0x1f10   :  { %10763 = vmatpush3.msra.mxu1 %v8502_v31 }
0x1f11   :  { %10764 = vmatprep.subr.mxu1 %v8501_v14 }
0x1f12   :  { %10765 = vmatpush3.msra.mxu1 %v8501_v14 }
0x1f13   :  { %10766 = vmatprep.subr.mxu1 %v8500_v58 }
0x1f14   :  { %10767 = vmatpush3.msra.mxu1 %v8500_v58 }
0x1f15   :  { %10768 = vmatprep.subr.mxu1 %v8499_v4 }
0x1f16   :  { %10769 = vmatpush3.msra.mxu1 %v8499_v4 }
0x1f17   :  { %10770 = vmatprep.subr.mxu1 %v8498_v8 }
0x1f18   :  { %10771 = vmatpush3.msra.mxu1 %v8498_v8 }
0x1f19   :  { %10772 = vmatprep.subr.mxu1 %v8497_v17 }
0x1f1a   :  { %10773 = vmatpush3.msra.mxu1 %v8497_v17 }
0x1f1b   :  { %10774 = vmatprep.subr.mxu1 %v8496_v18 }
0x1f1c   :  { %10775 = vmatpush3.msra.mxu1 %v8496_v18 }
0x1f1d   :  { %10776 = vmatprep.subr.mxu1 %v8495_v7 }
0x1f1e   :  { %10777 = vmatpush3.msra.mxu1 %v8495_v7 }
0x1f1f   :  { %10778 = vmatprep.subr.mxu1 %v8494_v3 }
0x1f20   :  { %10779 = vmatpush3.msra.mxu1 %v8494_v3 }
0x1fa5   :  { %v8252_v36 = vpop.f32.mrf.mxu0  ;;  %v8323_v0 = vpop.f32.mrf.mxu1 }
0x1fa6   :  { %v8327_v2 = vadd.f32 %v8252_v36, %v6479_v13  ;;  %v8341_v61 = vadd.f32 %v14789_v22, %v8323_v0 }
0x1fa7   :  { %v10703_v54 = vpop.f32.mrf.mxu1  ;;  %v8254_v10 = vpop.f32.mrf.mxu0 }
0x1fa8   :  { %v8716_v6 = vmul.f32 -1.442695, %v8327_v2  ;;  %v8334_v37 = vadd.f32 %v8254_v10, %v6481_v12 }
0x1faa   :  { %11112 = vpow2.f32 %v8716_v6  ;;  %v8717_v5 = vmul.f32 -1.442695, %v8334_v37 }
0x1fac   :  { %11114 = vpow2.f32 %v8717_v5 }
0x1fb7   :  { %v11113_v60 = vpop.eup %11112 }
0x1fb8   :  { %v8331_v20 = vadd.f32 1.0, %v11113_v60 }
0x1fb9   :  { %v11115_v28 = vpop.eup %11114 }
0x1fba   :  { %11116 = vrcp.f32 %v8331_v20  ;;  %v8338_v51 = vadd.f32 1.0, %v11115_v28 }
0x1fc5   :  { %v10738_v16 = vpop.f32.mrf.mxu0 }
0x1fc6   :  { %v8453_v1 = vadd.f32 %v10738_v16, %v8718_v63 }
0x1fc7   :  { %v11117_v24 = vpop.eup %11116  ;;  %v8447_v55 = vpop.f32.mrf.mxu0 }
0x1fc8   :  { %v8342_v42 = vmul.f32 %v11117_v24, %v8341_v61  ;;  %v8448_v47 = vadd.f32 %v8718_v63, %v8447_v55  ;;  %v8487_v50 = vmax.f32 %v8453_v1, 0.0 }
0x1fc9   :  { %v10741_v26 = vpop.f32.mrf.mxu0 }
0x1fca   :  { %v8343_v49 = vadd.f32 %v8342_v42, %v6585_v29  ;;  %v8486_v25 = vmax.f32 %v8448_v47, 0.0  ;;  %v8463_v15 = vadd.f32 %v10741_v26, %v8718_v63 }
0x1fcb   :  { %v8457_v33 = vpop.f32.mrf.mxu0 }
0x1fcc   :  { %11118 = vtanh.f32 %v8343_v49  ;;  %v8458_v62 = vadd.f32 %v8718_v63, %v8457_v33  ;;  %10780 = vmatprep.mubr.f32.mxu1 %v8486_v25  ;;  %v8489_v44 = vmax.f32 %v8463_v15, 0.0 }
0x1fcd   :  { %v10744_v43 = vpop.f32.mrf.mxu0  ;;  %10781 = vmatmul.mubr.f32.vlgmr.msra.gmra.mxu1 %v8487_v50  ;;  %11120 = vrcp.f32 %v8338_v51 }
0x1fce   :  { %v8488_v22 = vmax.f32 %v8458_v62, 0.0  ;;  %v8473_v52 = vadd.f32 %v10744_v43, %v8718_v63 }
0x1fcf   :  { %v8467_v34 = vpop.f32.mrf.mxu0 }
0x1fd0   :  { %v8468_v11 = vadd.f32 %v8718_v63, %v8467_v34  ;;  %10783 = vmatprep.mubr.f32.mxu1 %v8488_v22  ;;  %v8491_v57 = vmax.f32 %v8473_v52, 0.0 }
0x1fd1   :  { %10784 = vmatmul.mubr.f32.gmra.mxu1 %v8489_v44 }
0x1fd2   :  { %v8490_v38 = vmax.f32 %v8468_v11, 0.0 }
0x1fd4   :  { %10786 = vmatprep.mubr.f32.mxu1 %v8490_v38 }
0x1fd5   :  { %10787 = vmatmul.mubr.f32.gmra.mxu1 %v8491_v57 }
0x1fd9   :  { %v11119_v9 = vpop.eup %11118 }
0x1fda   :  { %v8345_v40 = vsub.f32 %v14872_v19, %v11119_v9  ;;  %v11121_v48 = vpop.eup %11120 }
0x1fdc   :  { %v8346_v56 = vmul.f32 %v11121_v48, %v8345_v40 }
0x1fde   :  { %v8347_v27 = vadd.f32 %v11119_v9, %v8346_v56 }
0x1fe0   :  { %10746 = vmatmul.mubr.f32.gmra.mxu0 %v8347_v27 }
0x208d   :  { %v10782_v21 = vpop.f32.mrf.mxu1 }
0x208e   :  { %v8589_v45 = vadd.f32 %v10782_v21, %v8719_v41 }
0x208f   :  { %v8583_v32 = vpop.f32.mrf.mxu1 }
0x2090   :  { %8623 = vst [vmem:[%s14930_s9 + $0x8] sm:$0xff] %v8589_v45  ;;  %v8584_v23 = vadd.f32 %v8719_v41, %v8583_v32 }
0x2091   :  { %v10785_v35 = vpop.f32.mrf.mxu1 }
0x2092   :  { %8622 = vst [vmem:[%s14930_s9] sm:$0xff] %v8584_v23  ;;  %v8599_v19 = vadd.f32 %v10785_v35, %v8719_v41 }
0x2093   :  { %v8593_v30 = vpop.f32.mrf.mxu1 }
0x2094   :  { %8625 = vst [vmem:[%s14930_s9 + $0x18] sm:$0xff] %v8599_v19  ;;  %v8594_v59 = vadd.f32 %v8719_v41, %v8593_v30 }
0x2095   :  { %v10788_v31 = vpop.f32.mrf.mxu1 }
0x2096   :  { %8624 = vst [vmem:[%s14930_s9 + $0x10] sm:$0xff] %v8594_v59  ;;  %v8609_v14 = vadd.f32 %v10788_v31, %v8719_v41 }
0x2097   :  { %v8603_v58 = vpop.f32.mrf.mxu1 }
0x2098   :  { %8627 = vst [vmem:[%s14930_s9 + $0x28] sm:$0xff] %v8609_v14  ;;  %v8604_v4 = vadd.f32 %v8719_v41, %v8603_v58 }
0x209a   :  { %8626 = vst [vmem:[%s14930_s9 + $0x20] sm:$0xff] %v8604_v4 }
0x20a0   :  { %v10747_v8 = vpop.f32.mrf.mxu0 }
0x20a1   :  { %v8483_v17 = vadd.f32 %v10747_v8, %v8718_v63 }
0x20a2   :  { %v8477_v18 = vpop.f32.mrf.mxu0 }
0x20a3   :  { %v8478_v7 = vadd.f32 %v8718_v63, %v8477_v18  ;;  %v8493_v39 = vmax.f32 %v8483_v17, 0.0 }
0x20a5   :  { %v8492_v3 = vmax.f32 %v8478_v7, 0.0 }
0x20a7   :  { %10789 = vmatprep.mubr.f32.mxu1 %v8492_v3 }
0x20a8   :  { %10790 = vmatmul.mubr.f32.gmra.mxu1 %v8493_v39 }
0x2168   :  { %v10791_v13 = vpop.f32.mrf.mxu1 }
0x2169   :  { %v8619_v36 = vadd.f32 %v10791_v13, %v8719_v41 }
0x216a   :  { %v8613_v0 = vpop.f32.mrf.mxu1 }
0x216b   :  { %8629 = vst [vmem:[%s14930_s9 + $0x38] sm:$0xff] %v8619_v36  ;;  %v8614_v2 = vadd.f32 %v8719_v41, %v8613_v0 }
0x216d   :  { %8628 = vst [vmem:[%s14930_s9 + $0x30] sm:$0xff] %v8614_v2 }
0x216e   :  { %8634 = vsyncpa [#allocation6], 1 }
0x216f   :  { %8635 = vsyncpa [#allocation8], 1 }
0x2170   :  { %8636 = vsyncpa [#allocation11], 1 }

</bundles_post_ra>
